<compile_context>
chip_gen: v7x
topology: tpu7x:2x2x1
jax: 0.10.0
libtpu: 0.0.40
codegen_flags: <defaults>
</compile_context>

<pallas_src>
import jax
import jax.numpy as jnp
from jax import lax
from jax.experimental import pallas as pl
from jax.experimental.pallas import tpu as pltpu

FEAT_DIM = 2048
NUM_CLASSES_S1 = 4
NUM_CLASSES_S2 = 7
LANE = 128
D_COMB = 2 * FEAT_DIM + NUM_CLASSES_S1          # 4100
D_COMB_PAD = 2 * FEAT_DIM + LANE                # 4224 (33 * 128, lane aligned)

# -----------------------------------------------------------------------------
# ResNet-50 backbone (plain JAX glue), NHWC end-to-end, bf16 conv / f32 accum.
# TODO(synk): the ResNet-50 conv/BN/maxpool stack stays in XLA (lax.conv); only
#             the dual-stage classifier head is a Pallas kernel.
# TODO(synk): torchvision pretrained-weight loading has no in-script equivalent;
#             weights are He-initialized, BatchNorm is eval-mode (running stats).
# -----------------------------------------------------------------------------
def conv2d(x, w, stride, padding):
    # bf16 operands + f32 accumulation: MXU bf16 rate on v5e/v6e/v7x.
    return lax.conv_general_dilated(
        x.astype(jnp.bfloat16), w.astype(jnp.bfloat16),
        window_strides=(stride, stride),
        padding=[(padding, padding), (padding, padding)],
        dimension_numbers=("NHWC", "HWIO", "NHWC"),
        preferred_element_type=jnp.float32)


def batchnorm(x, p):
    gamma, beta, mean, var = p
    inv = gamma * lax.rsqrt(var + 1e-5)
    return x * inv + (beta - mean * inv)           # broadcasts over last (C) dim


def maxpool3x3s2(x):
    init = jnp.array(-jnp.inf, dtype=x.dtype)
    return lax.reduce_window(
        x, init, lax.max,
        window_dimensions=(1, 3, 3, 1),
        window_strides=(1, 2, 2, 1),
        padding=[(0, 0), (1, 1), (1, 1), (0, 0)])


def _conv_init(key, kh, kw, in_ch, out_ch):
    fan_in = in_ch * kh * kw
    return jax.random.normal(key, (kh, kw, in_ch, out_ch), jnp.float32) * jnp.sqrt(2.0 / fan_in)


def _bn_init(ch):
    # eval-mode BN params: gamma, beta, running_mean, running_var
    return (jnp.ones(ch, jnp.float32), jnp.zeros(ch, jnp.float32),
            jnp.zeros(ch, jnp.float32), jnp.ones(ch, jnp.float32))


_LAYERS_CFG = [(64, 3, 1), (128, 4, 2), (256, 6, 2), (512, 3, 2)]


def make_resnet50_params(key):
    keys = iter(jax.random.split(key, 64))
    params = {
        "stem_conv": _conv_init(next(keys), 7, 7, 3, 64),
        "stem_bn": _bn_init(64),
        "layers": [],
    }
    in_ch = 64
    for width, blocks, stride in _LAYERS_CFG:
        blocks_p = []
        for b in range(blocks):
            s = stride if b == 0 else 1
            bp = {
                "conv1": _conv_init(next(keys), 1, 1, in_ch, width), "bn1": _bn_init(width),
                "conv2": _conv_init(next(keys), 3, 3, width, width), "bn2": _bn_init(width),
                "conv3": _conv_init(next(keys), 1, 1, width, width * 4), "bn3": _bn_init(width * 4),
            }
            if s != 1 or in_ch != width * 4:
                bp["down_conv"] = _conv_init(next(keys), 1, 1, in_ch, width * 4)
                bp["down_bn"] = _bn_init(width * 4)
            in_ch = width * 4
            blocks_p.append(bp)
        params["layers"].append(blocks_p)
    return params


def resnet50_feature_map(params, x):
    """x: [B, H, W, 3] NHWC -> pre-pool feature map [B, h, w, 2048] (f32)."""
    x = conv2d(x, params["stem_conv"], 2, 3)
    x = jax.nn.relu(batchnorm(x, params["stem_bn"]))
    x = maxpool3x3s2(x)
    for li, (width, blocks, stride) in enumerate(_LAYERS_CFG):
        for b in range(blocks):
            bp = params["layers"][li][b]
            s = stride if b == 0 else 1
            identity = x
            out = jax.nn.relu(batchnorm(conv2d(x, bp["conv1"], 1, 0), bp["bn1"]))
            out = jax.nn.relu(batchnorm(conv2d(out, bp["conv2"], s, 1), bp["bn2"]))
            out = batchnorm(conv2d(out, bp["conv3"], 1, 0), bp["bn3"])
            if "down_conv" in bp:
                identity = batchnorm(conv2d(x, bp["down_conv"], s, 0), bp["down_bn"])
            x = jax.nn.relu(out + identity)
    return x  # [B, h, w, 2048]


# -----------------------------------------------------------------------------
# Pallas head kernel: stage1 linear + concat-free combined write + stage2 linear.
# Per batch tile: f1 / f2 blocks are pooled [TB, 2048] f32 features; all
# classifier weights/biases stay resident across batch tiles.
# -----------------------------------------------------------------------------
def head_kernel(f1_ref, f2_ref, w1_ref, b1_ref, w2_ref, b2_ref,
                combined_ref, logits2_ref):
    f1 = f1_ref[...]                                                       # [TB, 2048] f32
    f2 = f2_ref[...]                                                       # [TB, 2048] f32
    # Stage-1 classifier (lane-padded to 128 classes; extra cols are exactly 0).
    logits1 = jnp.dot(f1, w1_ref[...],
                      preferred_element_type=jnp.float32) + b1_ref[...]    # [TB, 128]
    # combined = cat([features2, features1, logits1], dim=1), written as three
    # lane-aligned slice stores (offsets 0 / 2048 / 4096) — no concat value.
    combined_ref[:, 0:FEAT_DIM] = f2
    combined_ref[:, FEAT_DIM:2 * FEAT_DIM] = f1
    combined_ref[:, 2 * FEAT_DIM:] = logits1
    # Stage-2 classifier as a split dot over row-slices of w2 — mathematically
    # identical to dotting the materialized concat (padding rows/cols are zero).
    logits2_ref[...] = (
        jnp.dot(f2, w2_ref[0:FEAT_DIM, :], preferred_element_type=jnp.float32)
        + jnp.dot(f1, w2_ref[FEAT_DIM:2 * FEAT_DIM, :], preferred_element_type=jnp.float32)
        + jnp.dot(logits1, w2_ref[2 * FEAT_DIM:, :], preferred_element_type=jnp.float32)
        + b2_ref[...])


def head_forward(f1, f2, w1, b1, w2, b2):
    """f1/f2: pooled [B, 2048] f32 features.
    Returns (combined [B,4100], logits1 [B,4], logits2 [B,7])."""
    B, C = f1.shape
    assert C == FEAT_DIM
    f1 = f1.astype(jnp.float32)
    f2 = f2.astype(jnp.float32)

    # Batch tiling: pad B to a sublane multiple of 8; tile at TB<=128 (each block
    # then holds ~2 MiB of pooled features + ~2 MiB of combined output — large
    # enough for HBM roofline, small enough for v7x's 64 MiB VMEM with margin).
    TB_MAX = 128
    B_pad = ((B + 7) // 8) * 8
    if B_pad <= TB_MAX:
        TB = B_pad
    else:
        TB = TB_MAX
        B_pad = ((B_pad + TB - 1) // TB) * TB
    if B_pad != B:
        pad = ((0, B_pad - B), (0, 0))
        f1 = jnp.pad(f1, pad)
        f2 = jnp.pad(f2, pad)

    # Zero-pad classifier weights/biases so all kernel shapes are lane-aligned.
    # Kept f32: with pooled inputs the head is far from any VMEM limit, and f32
    # weights keep the head bit-exact w.r.t. the f32 reference math.
    w1p = jnp.zeros((C, LANE), jnp.float32).at[:, :NUM_CLASSES_S1].set(w1.T)
    b1p = jnp.zeros((1, LANE), jnp.float32).at[0, :NUM_CLASSES_S1].set(b1)
    w2p = jnp.zeros((D_COMB_PAD, LANE), jnp.float32).at[:D_COMB, :NUM_CLASSES_S2].set(w2.T)
    b2p = jnp.zeros((1, LANE), jnp.float32).at[0, :NUM_CLASSES_S2].set(b2)

    grid = (B_pad // TB,)
    combined_p, logits2_p = pl.pallas_call(
        head_kernel,
        grid=grid,
        in_specs=[
            pl.BlockSpec((TB, C), lambda i: (i, 0)),               # pooled f1 tile
            pl.BlockSpec((TB, C), lambda i: (i, 0)),               # pooled f2 tile
            pl.BlockSpec((C, LANE), lambda i: (0, 0)),             # w1p (resident)
            pl.BlockSpec((1, LANE), lambda i: (0, 0)),             # b1p (resident)
            pl.BlockSpec((D_COMB_PAD, LANE), lambda i: (0, 0)),    # w2p (resident)
            pl.BlockSpec((1, LANE), lambda i: (0, 0)),             # b2p (resident)
        ],
        out_specs=(
            pl.BlockSpec((TB, D_COMB_PAD), lambda i: (i, 0)),
            pl.BlockSpec((TB, LANE), lambda i: (i, 0)),
        ),
        out_shape=(
            jax.ShapeDtypeStruct((B_pad, D_COMB_PAD), jnp.float32),
            jax.ShapeDtypeStruct((B_pad, LANE), jnp.float32),
        ),
        compiler_params=pltpu.CompilerParams(
            dimension_semantics=("parallel",),          # v7x: 2 TCs split batch tiles
            vmem_limit_bytes=32 * 1024 * 1024,          # > v5e's 16 MiB default, fits v7x
        ),
    )(f1, f2, w1p, b1p, w2p, b2p)

    combined = combined_p[:B, :D_COMB]
    # logits_stage1 is byte-identical to the lane-aligned slice it was stored to
    # inside `combined` — no separate kernel output needed.
    logits1 = combined_p[:B, 2 * FEAT_DIM:2 * FEAT_DIM + NUM_CLASSES_S1]
    logits2 = logits2_p[:B, :NUM_CLASSES_S2]
    return combined, logits1, logits2


def head_reference(f1, f2, w1, b1, w2, b2):
    """Pure-JAX f32 reference of the head."""
    logits1 = f1 @ w1.T + b1
    combined = jnp.concatenate([f2, f1, logits1], axis=1)
    logits2 = combined @ w2.T + b2
    return combined, logits1, logits2


# -----------------------------------------------------------------------------
# Full forward (== DualStageExtractFeatureModel.forward).
# -----------------------------------------------------------------------------
@jax.jit
def dual_stage_forward(params, x):
    # x: [B, 3, H, W] NCHW (PyTorch layout). One cheap transpose of the tiny
    # input; the backbones run NHWC end-to-end (no feature-map transpose).
    x = jnp.transpose(x, (0, 2, 3, 1))                       # [B, H, W, 3]
    fmap1 = resnet50_feature_map(params["resnet1"], x)       # [B, h, w, 2048]
    fmap2 = resnet50_feature_map(params["resnet2"], x)
    # Global average pool (adaptive_avg_pool2d(1,1)) done here so XLA fuses the
    # reduce into the backbone epilogue; the Pallas head only reads [B, 2048].
    f1 = jnp.mean(fmap1, axis=(1, 2))                        # [B, 2048] f32
    f2 = jnp.mean(fmap2, axis=(1, 2))                        # [B, 2048] f32

    combined, logits1, logits2 = head_forward(
        f1, f2,
        params["stage1_w"], params["stage1_b"],
        params["stage2_w"], params["stage2_b"])

    stage2_weights = params["stage2_w"]                      # [7, 4100]
    return combined, stage2_weights, logits1, logits2


def init_params(key):
    k1, k2, k3, k4, k5, k6 = jax.random.split(key, 6)
    return {
        "resnet1": make_resnet50_params(k1),
        "resnet2": make_resnet50_params(k2),
        "stage1_w": jax.random.normal(k3, (NUM_CLASSES_S1, FEAT_DIM), jnp.float32) * 0.02,
        "stage1_b": jax.random.normal(k4, (NUM_CLASSES_S1,), jnp.float32) * 0.02,
        "stage2_w": jax.random.normal(k5, (NUM_CLASSES_S2, D_COMB), jnp.float32) * 0.02,
        "stage2_b": jax.random.normal(k6, (NUM_CLASSES_S2,), jnp.float32) * 0.02,
    }


if __name__ == "__main__":
    key = jax.random.PRNGKey(0)
    pkey, xkey, fkey = jax.random.split(key, 3)
    params = init_params(pkey)
    # NCHW input, like the PyTorch module (3-channel image).
    x = jax.random.normal(xkey, (2, 3, 64, 64), jnp.float32)

    outs = jax.block_until_ready(dual_stage_forward(params, x))
    combined, w2, logits1, logits2 = outs

    assert combined.shape == (2, D_COMB)
    assert w2.shape == (NUM_CLASSES_S2, D_COMB)
    assert logits1.shape == (2, NUM_CLASSES_S1)
    assert logits2.shape == (2, NUM_CLASSES_S2)
    for o in (combined, logits1, logits2):
        assert bool(jnp.all(jnp.isfinite(o)))

    # Standalone correctness check of the Pallas head vs pure-JAX f32 reference.
    kf1, kf2 = jax.random.split(fkey)
    f1t = jax.random.normal(kf1, (2, FEAT_DIM), jnp.float32)
    f2t = jax.random.normal(kf2, (2, FEAT_DIM), jnp.float32)
    got = jax.block_until_ready(head_forward(
        f1t, f2t, params["stage1_w"], params["stage1_b"],
        params["stage2_w"], params["stage2_b"]))
    ref = head_reference(
        f1t, f2t, params["stage1_w"], params["stage1_b"],
        params["stage2_w"], params["stage2_b"])
    for g, r in zip(got, ref):
        assert bool(jnp.allclose(g, r, atol=1e-2, rtol=1e-2)), "head mismatch vs reference"

    print("KERNEL_OK")
</pallas_src>

<mosaic_0001>
module attributes {stable_mosaic.version = 11 : i64} {
  func.func @head_kernel(%arg0: i32, %arg1: memref<8x2048xf32, #tpu.memory_space<vmem>>, %arg2: memref<8x2048xf32, #tpu.memory_space<vmem>>, %arg3: memref<2048x128xf32, #tpu.memory_space<vmem>>, %arg4: memref<1x128xf32, #tpu.memory_space<vmem>>, %arg5: memref<4224x128xf32, #tpu.memory_space<vmem>>, %arg6: memref<1x128xf32, #tpu.memory_space<vmem>>, %arg7: memref<8x4224xf32, #tpu.memory_space<vmem>>, %arg8: memref<8x128xf32, #tpu.memory_space<vmem>>) attributes {dimension_semantics = [#tpu.dimension_semantics<parallel>], iteration_bounds = array<i64: 1>, scalar_prefetch = 0 : i64, scratch_operands = 0 : i64, tpu.core_type = #tpu.core_type<tc>, window_params = [{transform_indices = @transform_0, window_bounds = array<i64: 8, 2048>}, {transform_indices = @transform_1, window_bounds = array<i64: 8, 2048>}, {pipeline_mode = #tpu.pipeline_mode<synchronous>, transform_indices = @transform_2, window_bounds = array<i64: 2048, 128>}, {pipeline_mode = #tpu.pipeline_mode<synchronous>, transform_indices = @transform_3, window_bounds = array<i64: 1, 128>}, {pipeline_mode = #tpu.pipeline_mode<synchronous>, transform_indices = @transform_4, window_bounds = array<i64: 4224, 128>}, {pipeline_mode = #tpu.pipeline_mode<synchronous>, transform_indices = @transform_5, window_bounds = array<i64: 1, 128>}, {transform_indices = @transform_6, window_bounds = array<i64: 8, 4224>}, {transform_indices = @transform_7, window_bounds = array<i64: 8, 128>}]} {
    %c0 = arith.constant 0 : index
    %c0_0 = arith.constant 0 : index
    %0 = vector.load %arg1[%c0, %c0_0] : memref<8x2048xf32, #tpu.memory_space<vmem>>, vector<8x2048xf32>
    %c0_1 = arith.constant 0 : index
    %c0_2 = arith.constant 0 : index
    %1 = vector.load %arg2[%c0_1, %c0_2] : memref<8x2048xf32, #tpu.memory_space<vmem>>, vector<8x2048xf32>
    %c0_3 = arith.constant 0 : index
    %c0_4 = arith.constant 0 : index
    %2 = vector.load %arg3[%c0_3, %c0_4] : memref<2048x128xf32, #tpu.memory_space<vmem>>, vector<2048x128xf32>
    %cst = arith.constant dense<0.000000e+00> : vector<8x128xf32>
    %3 = tpu.matmul %0, %2, %cst {dimension_numbers = #tpu.dot_dimension_numbers<[1], [0], [0], [1], [0, 0, 1, 1], [], []>} : vector<8x2048xf32>, vector<2048x128xf32>, vector<8x128xf32> -> vector<8x128xf32>
    %c0_5 = arith.constant 0 : index
    %c0_6 = arith.constant 0 : index
    %4 = vector.load %arg4[%c0_5, %c0_6] : memref<1x128xf32, #tpu.memory_space<vmem>>, vector<1x128xf32>
    %5 = vector.broadcast %4 : vector<1x128xf32> to vector<8x128xf32>
    %6 = arith.addf %3, %5 : vector<8x128xf32>
    %c0_7 = arith.constant 0 : index
    %c0_8 = arith.constant 0 : index
    %7 = vector.load %arg7[%c0_7, %c0_8] : memref<8x4224xf32, #tpu.memory_space<vmem>>, vector<8x2048xf32>
    tpu.vector_store %arg7[%c0_7, %c0_8], %1 {strides = array<i32>} : memref<8x4224xf32, #tpu.memory_space<vmem>>, vector<8x2048xf32>,
    %c0_9 = arith.constant 0 : index
    %c2048 = arith.constant 2048 : index
    %8 = vector.load %arg7[%c0_9, %c2048] : memref<8x4224xf32, #tpu.memory_space<vmem>>, vector<8x2048xf32>
    tpu.vector_store %arg7[%c0_9, %c2048], %0 {strides = array<i32>} : memref<8x4224xf32, #tpu.memory_space<vmem>>, vector<8x2048xf32>,
    %c0_10 = arith.constant 0 : index
    %c4096 = arith.constant 4096 : index
    %9 = vector.load %arg7[%c0_10, %c4096] : memref<8x4224xf32, #tpu.memory_space<vmem>>, vector<8x128xf32>
    tpu.vector_store %arg7[%c0_10, %c4096], %6 {strides = array<i32>} : memref<8x4224xf32, #tpu.memory_space<vmem>>, vector<8x128xf32>,
    %c0_11 = arith.constant 0 : index
    %c0_12 = arith.constant 0 : index
    %10 = vector.load %arg5[%c0_11, %c0_12] : memref<4224x128xf32, #tpu.memory_space<vmem>>, vector<2048x128xf32>
    %cst_13 = arith.constant dense<0.000000e+00> : vector<8x128xf32>
    %11 = tpu.matmul %1, %10, %cst_13 {dimension_numbers = #tpu.dot_dimension_numbers<[1], [0], [0], [1], [0, 0, 1, 1], [], []>} : vector<8x2048xf32>, vector<2048x128xf32>, vector<8x128xf32> -> vector<8x128xf32>
    %c2048_14 = arith.constant 2048 : index
    %c0_15 = arith.constant 0 : index
    %12 = vector.load %arg5[%c2048_14, %c0_15] : memref<4224x128xf32, #tpu.memory_space<vmem>>, vector<2048x128xf32>
    %cst_16 = arith.constant dense<0.000000e+00> : vector<8x128xf32>
    %13 = tpu.matmul %0, %12, %cst_16 {dimension_numbers = #tpu.dot_dimension_numbers<[1], [0], [0], [1], [0, 0, 1, 1], [], []>} : vector<8x2048xf32>, vector<2048x128xf32>, vector<8x128xf32> -> vector<8x128xf32>
    %14 = arith.addf %11, %13 : vector<8x128xf32>
    %c4096_17 = arith.constant 4096 : index
    %c0_18 = arith.constant 0 : index
    %15 = vector.load %arg5[%c4096_17, %c0_18] : memref<4224x128xf32, #tpu.memory_space<vmem>>, vector<128x128xf32>
    %cst_19 = arith.constant dense<0.000000e+00> : vector<8x128xf32>
    %16 = tpu.matmul %6, %15, %cst_19 {dimension_numbers = #tpu.dot_dimension_numbers<[1], [0], [0], [1], [0, 0, 1, 1], [], []>} : vector<8x128xf32>, vector<128x128xf32>, vector<8x128xf32> -> vector<8x128xf32>
    %17 = arith.addf %14, %16 : vector<8x128xf32>
    %c0_20 = arith.constant 0 : index
    %c0_21 = arith.constant 0 : index
    %18 = vector.load %arg6[%c0_20, %c0_21] : memref<1x128xf32, #tpu.memory_space<vmem>>, vector<1x128xf32>
    %19 = vector.broadcast %18 : vector<1x128xf32> to vector<8x128xf32>
    %20 = arith.addf %17, %19 : vector<8x128xf32>
    %c0_22 = arith.constant 0 : index
    %c0_23 = arith.constant 0 : index
    %21 = vector.load %arg8[%c0_22, %c0_23] : memref<8x128xf32, #tpu.memory_space<vmem>>, vector<8x128xf32>
    tpu.vector_store %arg8[%c0_22, %c0_23], %20 {strides = array<i32>} : memref<8x128xf32, #tpu.memory_space<vmem>>, vector<8x128xf32>,
    return
  }
  func.func @transform_0(%arg0: i32) -> (i32, i32) {
    %c0_i32 = arith.constant 0 : i32
    %c0_i32_0 = arith.constant 0 : i32
    return %arg0, %c0_i32 : i32, i32
  }
  func.func @transform_1(%arg0: i32) -> (i32, i32) {
    %c0_i32 = arith.constant 0 : i32
    %c0_i32_0 = arith.constant 0 : i32
    return %arg0, %c0_i32 : i32, i32
  }
  func.func @transform_2(%arg0: i32) -> (i32, i32) {
    %c0_i32 = arith.constant 0 : i32
    %c0_i32_0 = arith.constant 0 : i32
    %c0_i32_1 = arith.constant 0 : i32
    return %c0_i32, %c0_i32_0 : i32, i32
  }
  func.func @transform_3(%arg0: i32) -> (i32, i32) {
    %c0_i32 = arith.constant 0 : i32
    %c0_i32_0 = arith.constant 0 : i32
    %c0_i32_1 = arith.constant 0 : i32
    return %c0_i32, %c0_i32_0 : i32, i32
  }
  func.func @transform_4(%arg0: i32) -> (i32, i32) {
    %c0_i32 = arith.constant 0 : i32
    %c0_i32_0 = arith.constant 0 : i32
    %c0_i32_1 = arith.constant 0 : i32
    return %c0_i32, %c0_i32_0 : i32, i32
  }
  func.func @transform_5(%arg0: i32) -> (i32, i32) {
    %c0_i32 = arith.constant 0 : i32
    %c0_i32_0 = arith.constant 0 : i32
    %c0_i32_1 = arith.constant 0 : i32
    return %c0_i32, %c0_i32_0 : i32, i32
  }
  func.func @transform_6(%arg0: i32) -> (i32, i32) {
    %c0_i32 = arith.constant 0 : i32
    %c0_i32_0 = arith.constant 0 : i32
    return %arg0, %c0_i32 : i32, i32
  }
  func.func @transform_7(%arg0: i32) -> (i32, i32) {
    %c0_i32 = arith.constant 0 : i32
    %c0_i32_0 = arith.constant 0 : i32
    return %arg0, %c0_i32 : i32, i32
  }
}

</mosaic_0001>

<bundles_post_ra>
// kernel: reverse
= control target key start
LH: loop header
LB: loop body
LE: loop exit
PB: predicated region body
PF: predicated region fallthrough
CT: control target
= control target key end

     0   :  { %s33417_s0 = inlined_call_operand.vmem [shape: bf16[3,3,512,512], index: 0, kind: input, shape index: {}]   ;;  %s33418_s1 = inlined_call_operand.vmem [shape: bf16[3,3,512,512], index: 1, kind: output, shape index: {}]  }
   0x1   :  { %v25343_v0 = vld [vmem:[%s33417_s0 + $0x2000] sm:$0xff]   ;;  %v25352_v9 = vld [vmem:[%s33417_s0 + $0x2010] sm:$0xff]  }
   0x2   :  { %v25344_v1 = vld [vmem:[%s33417_s0 + $0x1400] sm:$0xff]   ;;  %20162 = vst [vmem:[%s33418_s1] sm:$0xff] %v25343_v0  ;;  %v25353_v10 = vld [vmem:[%s33417_s0 + $0x1410] sm:$0xff]   ;;  %20198 = vst [vmem:[%s33418_s1 + $0x10] sm:$0xff] %v25352_v9 }
   0x3   :  { %v25345_v2 = vld [vmem:[%s33417_s0 + $0x800] sm:$0xff]   ;;  %20166 = vst [vmem:[%s33418_s1 + $0xc00] sm:$0xff] %v25344_v1  ;;  %v25354_v11 = vld [vmem:[%s33417_s0 + $0x810] sm:$0xff]   ;;  %20202 = vst [vmem:[%s33418_s1 + $0xc10] sm:$0xff] %v25353_v10 }
   0x4   :  { %v25346_v3 = vld [vmem:[%s33417_s0 + $0x1c00] sm:$0xff]   ;;  %20170 = vst [vmem:[%s33418_s1 + $0x1800] sm:$0xff] %v25345_v2  ;;  %v25355_v12 = vld [vmem:[%s33417_s0 + $0x1c10] sm:$0xff]   ;;  %20206 = vst [vmem:[%s33418_s1 + $0x1810] sm:$0xff] %v25354_v11 }
   0x5   :  { %v25347_v4 = vld [vmem:[%s33417_s0 + $0x1000] sm:$0xff]   ;;  %20174 = vst [vmem:[%s33418_s1 + $0x400] sm:$0xff] %v25346_v3  ;;  %v25356_v13 = vld [vmem:[%s33417_s0 + $0x1010] sm:$0xff]   ;;  %20210 = vst [vmem:[%s33418_s1 + $0x410] sm:$0xff] %v25355_v12 }
   0x6   :  { %v25348_v5 = vld [vmem:[%s33417_s0 + $0x400] sm:$0xff]   ;;  %20178 = vst [vmem:[%s33418_s1 + $0x1000] sm:$0xff] %v25347_v4  ;;  %v25357_v14 = vld [vmem:[%s33417_s0 + $0x410] sm:$0xff]   ;;  %20214 = vst [vmem:[%s33418_s1 + $0x1010] sm:$0xff] %v25356_v13 }
   0x7   :  { %v25349_v6 = vld [vmem:[%s33417_s0 + $0x1800] sm:$0xff]   ;;  %20182 = vst [vmem:[%s33418_s1 + $0x1c00] sm:$0xff] %v25348_v5  ;;  %v25358_v15 = vld [vmem:[%s33417_s0 + $0x1810] sm:$0xff]   ;;  %20218 = vst [vmem:[%s33418_s1 + $0x1c10] sm:$0xff] %v25357_v14 }
   0x8   :  { %v25350_v7 = vld [vmem:[%s33417_s0 + $0xc00] sm:$0xff]   ;;  %20186 = vst [vmem:[%s33418_s1 + $0x800] sm:$0xff] %v25349_v6  ;;  %v25359_v16 = vld [vmem:[%s33417_s0 + $0xc10] sm:$0xff]   ;;  %20222 = vst [vmem:[%s33418_s1 + $0x810] sm:$0xff] %v25358_v15 }
   0x9   :  { %v25351_v8 = vld [vmem:[%s33417_s0] sm:$0xff]   ;;  %20190 = vst [vmem:[%s33418_s1 + $0x1400] sm:$0xff] %v25350_v7  ;;  %v25360_v17 = vld [vmem:[%s33417_s0 + $0x10] sm:$0xff]   ;;  %20226 = vst [vmem:[%s33418_s1 + $0x1410] sm:$0xff] %v25359_v16 }
   0xa   :  { %20194 = vst [vmem:[%s33418_s1 + $0x2000] sm:$0xff] %v25351_v8  ;;  %v25361_v18 = vld [vmem:[%s33417_s0 + $0x2020] sm:$0xff]   ;;  %20230 = vst [vmem:[%s33418_s1 + $0x2010] sm:$0xff] %v25360_v17  ;;  %v25370_v27 = vld [vmem:[%s33417_s0 + $0x2030] sm:$0xff]  }
   0xb   :  { %v25362_v19 = vld [vmem:[%s33417_s0 + $0x1420] sm:$0xff]   ;;  %20234 = vst [vmem:[%s33418_s1 + $0x20] sm:$0xff] %v25361_v18  ;;  %v25371_v28 = vld [vmem:[%s33417_s0 + $0x1430] sm:$0xff]   ;;  %20270 = vst [vmem:[%s33418_s1 + $0x30] sm:$0xff] %v25370_v27 }
   0xc   :  { %v25363_v20 = vld [vmem:[%s33417_s0 + $0x820] sm:$0xff]   ;;  %20238 = vst [vmem:[%s33418_s1 + $0xc20] sm:$0xff] %v25362_v19  ;;  %v25372_v29 = vld [vmem:[%s33417_s0 + $0x830] sm:$0xff]   ;;  %20274 = vst [vmem:[%s33418_s1 + $0xc30] sm:$0xff] %v25371_v28 }
   0xd   :  { %v25364_v21 = vld [vmem:[%s33417_s0 + $0x1c20] sm:$0xff]   ;;  %20242 = vst [vmem:[%s33418_s1 + $0x1820] sm:$0xff] %v25363_v20  ;;  %v25373_v30 = vld [vmem:[%s33417_s0 + $0x1c30] sm:$0xff]   ;;  %20278 = vst [vmem:[%s33418_s1 + $0x1830] sm:$0xff] %v25372_v29 }
   0xe   :  { %v25365_v22 = vld [vmem:[%s33417_s0 + $0x1020] sm:$0xff]   ;;  %20246 = vst [vmem:[%s33418_s1 + $0x420] sm:$0xff] %v25364_v21  ;;  %v25374_v31 = vld [vmem:[%s33417_s0 + $0x1030] sm:$0xff]   ;;  %20282 = vst [vmem:[%s33418_s1 + $0x430] sm:$0xff] %v25373_v30 }
   0xf   :  { %v25366_v23 = vld [vmem:[%s33417_s0 + $0x420] sm:$0xff]   ;;  %20250 = vst [vmem:[%s33418_s1 + $0x1020] sm:$0xff] %v25365_v22  ;;  %v25375_v32 = vld [vmem:[%s33417_s0 + $0x430] sm:$0xff]   ;;  %20286 = vst [vmem:[%s33418_s1 + $0x1030] sm:$0xff] %v25374_v31 }
  0x10   :  { %v25367_v24 = vld [vmem:[%s33417_s0 + $0x1820] sm:$0xff]   ;;  %20254 = vst [vmem:[%s33418_s1 + $0x1c20] sm:$0xff] %v25366_v23  ;;  %v25376_v33 = vld [vmem:[%s33417_s0 + $0x1830] sm:$0xff]   ;;  %20290 = vst [vmem:[%s33418_s1 + $0x1c30] sm:$0xff] %v25375_v32 }
  0x11   :  { %v25368_v25 = vld [vmem:[%s33417_s0 + $0xc20] sm:$0xff]   ;;  %20258 = vst [vmem:[%s33418_s1 + $0x820] sm:$0xff] %v25367_v24  ;;  %v25377_v34 = vld [vmem:[%s33417_s0 + $0xc30] sm:$0xff]   ;;  %20294 = vst [vmem:[%s33418_s1 + $0x830] sm:$0xff] %v25376_v33 }
  0x12   :  { %v25369_v26 = vld [vmem:[%s33417_s0 + $0x20] sm:$0xff]   ;;  %20262 = vst [vmem:[%s33418_s1 + $0x1420] sm:$0xff] %v25368_v25  ;;  %v25378_v35 = vld [vmem:[%s33417_s0 + $0x30] sm:$0xff]   ;;  %20298 = vst [vmem:[%s33418_s1 + $0x1430] sm:$0xff] %v25377_v34 }
  0x13   :  { %20266 = vst [vmem:[%s33418_s1 + $0x2020] sm:$0xff] %v25369_v26  ;;  %v25379_v36 = vld [vmem:[%s33417_s0 + $0x2040] sm:$0xff]   ;;  %20302 = vst [vmem:[%s33418_s1 + $0x2030] sm:$0xff] %v25378_v35  ;;  %v25388_v45 = vld [vmem:[%s33417_s0 + $0x2050] sm:$0xff]  }
  0x14   :  { %v25380_v37 = vld [vmem:[%s33417_s0 + $0x1440] sm:$0xff]   ;;  %20306 = vst [vmem:[%s33418_s1 + $0x40] sm:$0xff] %v25379_v36  ;;  %v25389_v46 = vld [vmem:[%s33417_s0 + $0x1450] sm:$0xff]   ;;  %20342 = vst [vmem:[%s33418_s1 + $0x50] sm:$0xff] %v25388_v45 }
  0x15   :  { %v25381_v38 = vld [vmem:[%s33417_s0 + $0x840] sm:$0xff]   ;;  %20310 = vst [vmem:[%s33418_s1 + $0xc40] sm:$0xff] %v25380_v37  ;;  %v25390_v47 = vld [vmem:[%s33417_s0 + $0x850] sm:$0xff]   ;;  %20346 = vst [vmem:[%s33418_s1 + $0xc50] sm:$0xff] %v25389_v46 }
  0x16   :  { %v25382_v39 = vld [vmem:[%s33417_s0 + $0x1c40] sm:$0xff]   ;;  %20314 = vst [vmem:[%s33418_s1 + $0x1840] sm:$0xff] %v25381_v38  ;;  %v25391_v48 = vld [vmem:[%s33417_s0 + $0x1c50] sm:$0xff]   ;;  %20350 = vst [vmem:[%s33418_s1 + $0x1850] sm:$0xff] %v25390_v47 }
  0x17   :  { %v25383_v40 = vld [vmem:[%s33417_s0 + $0x1040] sm:$0xff]   ;;  %20318 = vst [vmem:[%s33418_s1 + $0x440] sm:$0xff] %v25382_v39  ;;  %v25392_v49 = vld [vmem:[%s33417_s0 + $0x1050] sm:$0xff]   ;;  %20354 = vst [vmem:[%s33418_s1 + $0x450] sm:$0xff] %v25391_v48 }
  0x18   :  { %v25384_v41 = vld [vmem:[%s33417_s0 + $0x440] sm:$0xff]   ;;  %20322 = vst [vmem:[%s33418_s1 + $0x1040] sm:$0xff] %v25383_v40  ;;  %v25393_v50 = vld [vmem:[%s33417_s0 + $0x450] sm:$0xff]   ;;  %20358 = vst [vmem:[%s33418_s1 + $0x1050] sm:$0xff] %v25392_v49 }
  0x19   :  { %v25385_v42 = vld [vmem:[%s33417_s0 + $0x1840] sm:$0xff]   ;;  %20326 = vst [vmem:[%s33418_s1 + $0x1c40] sm:$0xff] %v25384_v41  ;;  %v25394_v51 = vld [vmem:[%s33417_s0 + $0x1850] sm:$0xff]   ;;  %20362 = vst [vmem:[%s33418_s1 + $0x1c50] sm:$0xff] %v25393_v50 }
  0x1a   :  { %v25386_v43 = vld [vmem:[%s33417_s0 + $0xc40] sm:$0xff]   ;;  %20330 = vst [vmem:[%s33418_s1 + $0x840] sm:$0xff] %v25385_v42  ;;  %v25395_v52 = vld [vmem:[%s33417_s0 + $0xc50] sm:$0xff]   ;;  %20366 = vst [vmem:[%s33418_s1 + $0x850] sm:$0xff] %v25394_v51 }
  0x1b   :  { %v25387_v44 = vld [vmem:[%s33417_s0 + $0x40] sm:$0xff]   ;;  %20334 = vst [vmem:[%s33418_s1 + $0x1440] sm:$0xff] %v25386_v43  ;;  %v25396_v53 = vld [vmem:[%s33417_s0 + $0x50] sm:$0xff]   ;;  %20370 = vst [vmem:[%s33418_s1 + $0x1450] sm:$0xff] %v25395_v52 }
  0x1c   :  { %20338 = vst [vmem:[%s33418_s1 + $0x2040] sm:$0xff] %v25387_v44  ;;  %v25397_v54 = vld [vmem:[%s33417_s0 + $0x2060] sm:$0xff]   ;;  %20374 = vst [vmem:[%s33418_s1 + $0x2050] sm:$0xff] %v25396_v53  ;;  %v25406_v63 = vld [vmem:[%s33417_s0 + $0x2070] sm:$0xff]  }
  0x1d   :  { %v25398_v55 = vld [vmem:[%s33417_s0 + $0x1460] sm:$0xff]   ;;  %20378 = vst [vmem:[%s33418_s1 + $0x60] sm:$0xff] %v25397_v54  ;;  %v25407_v0 = vld [vmem:[%s33417_s0 + $0x1470] sm:$0xff]   ;;  %20414 = vst [vmem:[%s33418_s1 + $0x70] sm:$0xff] %v25406_v63 }
  0x1e   :  { %v25399_v56 = vld [vmem:[%s33417_s0 + $0x860] sm:$0xff]   ;;  %20382 = vst [vmem:[%s33418_s1 + $0xc60] sm:$0xff] %v25398_v55  ;;  %v25408_v1 = vld [vmem:[%s33417_s0 + $0x870] sm:$0xff]   ;;  %20418 = vst [vmem:[%s33418_s1 + $0xc70] sm:$0xff] %v25407_v0 }
  0x1f   :  { %v25400_v57 = vld [vmem:[%s33417_s0 + $0x1c60] sm:$0xff]   ;;  %20386 = vst [vmem:[%s33418_s1 + $0x1860] sm:$0xff] %v25399_v56  ;;  %v25409_v2 = vld [vmem:[%s33417_s0 + $0x1c70] sm:$0xff]   ;;  %20422 = vst [vmem:[%s33418_s1 + $0x1870] sm:$0xff] %v25408_v1 }
  0x20   :  { %v25401_v58 = vld [vmem:[%s33417_s0 + $0x1060] sm:$0xff]   ;;  %20390 = vst [vmem:[%s33418_s1 + $0x460] sm:$0xff] %v25400_v57  ;;  %v25410_v3 = vld [vmem:[%s33417_s0 + $0x1070] sm:$0xff]   ;;  %20426 = vst [vmem:[%s33418_s1 + $0x470] sm:$0xff] %v25409_v2 }
  0x21   :  { %v25402_v59 = vld [vmem:[%s33417_s0 + $0x460] sm:$0xff]   ;;  %20394 = vst [vmem:[%s33418_s1 + $0x1060] sm:$0xff] %v25401_v58  ;;  %v25411_v4 = vld [vmem:[%s33417_s0 + $0x470] sm:$0xff]   ;;  %20430 = vst [vmem:[%s33418_s1 + $0x1070] sm:$0xff] %v25410_v3 }
  0x22   :  { %v25403_v60 = vld [vmem:[%s33417_s0 + $0x1860] sm:$0xff]   ;;  %20398 = vst [vmem:[%s33418_s1 + $0x1c60] sm:$0xff] %v25402_v59  ;;  %v25412_v5 = vld [vmem:[%s33417_s0 + $0x1870] sm:$0xff]   ;;  %20434 = vst [vmem:[%s33418_s1 + $0x1c70] sm:$0xff] %v25411_v4 }
  0x23   :  { %v25404_v61 = vld [vmem:[%s33417_s0 + $0xc60] sm:$0xff]   ;;  %20402 = vst [vmem:[%s33418_s1 + $0x860] sm:$0xff] %v25403_v60  ;;  %v25413_v6 = vld [vmem:[%s33417_s0 + $0xc70] sm:$0xff]   ;;  %20438 = vst [vmem:[%s33418_s1 + $0x870] sm:$0xff] %v25412_v5 }
  0x24   :  { %v25405_v62 = vld [vmem:[%s33417_s0 + $0x60] sm:$0xff]   ;;  %20406 = vst [vmem:[%s33418_s1 + $0x1460] sm:$0xff] %v25404_v61  ;;  %v25414_v7 = vld [vmem:[%s33417_s0 + $0x70] sm:$0xff]   ;;  %20442 = vst [vmem:[%s33418_s1 + $0x1470] sm:$0xff] %v25413_v6 }
  0x25   :  { %20410 = vst [vmem:[%s33418_s1 + $0x2060] sm:$0xff] %v25405_v62  ;;  %v25415_v8 = vld [vmem:[%s33417_s0 + $0x2080] sm:$0xff]   ;;  %20446 = vst [vmem:[%s33418_s1 + $0x2070] sm:$0xff] %v25414_v7  ;;  %v25424_v17 = vld [vmem:[%s33417_s0 + $0x2090] sm:$0xff]  }
  0x26   :  { %v25416_v9 = vld [vmem:[%s33417_s0 + $0x1480] sm:$0xff]   ;;  %20450 = vst [vmem:[%s33418_s1 + $0x80] sm:$0xff] %v25415_v8  ;;  %v25425_v18 = vld [vmem:[%s33417_s0 + $0x1490] sm:$0xff]   ;;  %20486 = vst [vmem:[%s33418_s1 + $0x90] sm:$0xff] %v25424_v17 }
  0x27   :  { %v25417_v10 = vld [vmem:[%s33417_s0 + $0x880] sm:$0xff]   ;;  %20454 = vst [vmem:[%s33418_s1 + $0xc80] sm:$0xff] %v25416_v9  ;;  %v25426_v19 = vld [vmem:[%s33417_s0 + $0x890] sm:$0xff]   ;;  %20490 = vst [vmem:[%s33418_s1 + $0xc90] sm:$0xff] %v25425_v18 }
  0x28   :  { %v25418_v11 = vld [vmem:[%s33417_s0 + $0x1c80] sm:$0xff]   ;;  %20458 = vst [vmem:[%s33418_s1 + $0x1880] sm:$0xff] %v25417_v10  ;;  %v25427_v20 = vld [vmem:[%s33417_s0 + $0x1c90] sm:$0xff]   ;;  %20494 = vst [vmem:[%s33418_s1 + $0x1890] sm:$0xff] %v25426_v19 }
  0x29   :  { %v25419_v12 = vld [vmem:[%s33417_s0 + $0x1080] sm:$0xff]   ;;  %20462 = vst [vmem:[%s33418_s1 + $0x480] sm:$0xff] %v25418_v11  ;;  %v25428_v21 = vld [vmem:[%s33417_s0 + $0x1090] sm:$0xff]   ;;  %20498 = vst [vmem:[%s33418_s1 + $0x490] sm:$0xff] %v25427_v20 }
  0x2a   :  { %v25420_v13 = vld [vmem:[%s33417_s0 + $0x480] sm:$0xff]   ;;  %20466 = vst [vmem:[%s33418_s1 + $0x1080] sm:$0xff] %v25419_v12  ;;  %v25429_v22 = vld [vmem:[%s33417_s0 + $0x490] sm:$0xff]   ;;  %20502 = vst [vmem:[%s33418_s1 + $0x1090] sm:$0xff] %v25428_v21 }
  0x2b   :  { %v25421_v14 = vld [vmem:[%s33417_s0 + $0x1880] sm:$0xff]   ;;  %20470 = vst [vmem:[%s33418_s1 + $0x1c80] sm:$0xff] %v25420_v13  ;;  %v25430_v23 = vld [vmem:[%s33417_s0 + $0x1890] sm:$0xff]   ;;  %20506 = vst [vmem:[%s33418_s1 + $0x1c90] sm:$0xff] %v25429_v22 }
  0x2c   :  { %v25422_v15 = vld [vmem:[%s33417_s0 + $0xc80] sm:$0xff]   ;;  %20474 = vst [vmem:[%s33418_s1 + $0x880] sm:$0xff] %v25421_v14  ;;  %v25431_v24 = vld [vmem:[%s33417_s0 + $0xc90] sm:$0xff]   ;;  %20510 = vst [vmem:[%s33418_s1 + $0x890] sm:$0xff] %v25430_v23 }
  0x2d   :  { %v25423_v16 = vld [vmem:[%s33417_s0 + $0x80] sm:$0xff]   ;;  %20478 = vst [vmem:[%s33418_s1 + $0x1480] sm:$0xff] %v25422_v15  ;;  %v25432_v25 = vld [vmem:[%s33417_s0 + $0x90] sm:$0xff]   ;;  %20514 = vst [vmem:[%s33418_s1 + $0x1490] sm:$0xff] %v25431_v24 }
  0x2e   :  { %20482 = vst [vmem:[%s33418_s1 + $0x2080] sm:$0xff] %v25423_v16  ;;  %v25433_v26 = vld [vmem:[%s33417_s0 + $0x20a0] sm:$0xff]   ;;  %20518 = vst [vmem:[%s33418_s1 + $0x2090] sm:$0xff] %v25432_v25  ;;  %v25442_v35 = vld [vmem:[%s33417_s0 + $0x20b0] sm:$0xff]  }
  0x2f   :  { %v25434_v27 = vld [vmem:[%s33417_s0 + $0x14a0] sm:$0xff]   ;;  %20522 = vst [vmem:[%s33418_s1 + $0xa0] sm:$0xff] %v25433_v26  ;;  %v25443_v36 = vld [vmem:[%s33417_s0 + $0x14b0] sm:$0xff]   ;;  %20558 = vst [vmem:[%s33418_s1 + $0xb0] sm:$0xff] %v25442_v35 }
  0x30   :  { %v25435_v28 = vld [vmem:[%s33417_s0 + $0x8a0] sm:$0xff]   ;;  %20526 = vst [vmem:[%s33418_s1 + $0xca0] sm:$0xff] %v25434_v27  ;;  %v25444_v37 = vld [vmem:[%s33417_s0 + $0x8b0] sm:$0xff]   ;;  %20562 = vst [vmem:[%s33418_s1 + $0xcb0] sm:$0xff] %v25443_v36 }
  0x31   :  { %v25436_v29 = vld [vmem:[%s33417_s0 + $0x1ca0] sm:$0xff]   ;;  %20530 = vst [vmem:[%s33418_s1 + $0x18a0] sm:$0xff] %v25435_v28  ;;  %v25445_v38 = vld [vmem:[%s33417_s0 + $0x1cb0] sm:$0xff]   ;;  %20566 = vst [vmem:[%s33418_s1 + $0x18b0] sm:$0xff] %v25444_v37 }
  0x32   :  { %v25437_v30 = vld [vmem:[%s33417_s0 + $0x10a0] sm:$0xff]   ;;  %20534 = vst [vmem:[%s33418_s1 + $0x4a0] sm:$0xff] %v25436_v29  ;;  %v25446_v39 = vld [vmem:[%s33417_s0 + $0x10b0] sm:$0xff]   ;;  %20570 = vst [vmem:[%s33418_s1 + $0x4b0] sm:$0xff] %v25445_v38 }
  0x33   :  { %v25438_v31 = vld [vmem:[%s33417_s0 + $0x4a0] sm:$0xff]   ;;  %20538 = vst [vmem:[%s33418_s1 + $0x10a0] sm:$0xff] %v25437_v30  ;;  %v25447_v40 = vld [vmem:[%s33417_s0 + $0x4b0] sm:$0xff]   ;;  %20574 = vst [vmem:[%s33418_s1 + $0x10b0] sm:$0xff] %v25446_v39 }
  0x34   :  { %v25439_v32 = vld [vmem:[%s33417_s0 + $0x18a0] sm:$0xff]   ;;  %20542 = vst [vmem:[%s33418_s1 + $0x1ca0] sm:$0xff] %v25438_v31  ;;  %v25448_v41 = vld [vmem:[%s33417_s0 + $0x18b0] sm:$0xff]   ;;  %20578 = vst [vmem:[%s33418_s1 + $0x1cb0] sm:$0xff] %v25447_v40 }
  0x35   :  { %v25440_v33 = vld [vmem:[%s33417_s0 + $0xca0] sm:$0xff]   ;;  %20546 = vst [vmem:[%s33418_s1 + $0x8a0] sm:$0xff] %v25439_v32  ;;  %v25449_v42 = vld [vmem:[%s33417_s0 + $0xcb0] sm:$0xff]   ;;  %20582 = vst [vmem:[%s33418_s1 + $0x8b0] sm:$0xff] %v25448_v41 }
  0x36   :  { %v25441_v34 = vld [vmem:[%s33417_s0 + $0xa0] sm:$0xff]   ;;  %20550 = vst [vmem:[%s33418_s1 + $0x14a0] sm:$0xff] %v25440_v33  ;;  %v25450_v43 = vld [vmem:[%s33417_s0 + $0xb0] sm:$0xff]   ;;  %20586 = vst [vmem:[%s33418_s1 + $0x14b0] sm:$0xff] %v25449_v42 }
  0x37   :  { %20554 = vst [vmem:[%s33418_s1 + $0x20a0] sm:$0xff] %v25441_v34  ;;  %v25451_v44 = vld [vmem:[%s33417_s0 + $0x20c0] sm:$0xff]   ;;  %20590 = vst [vmem:[%s33418_s1 + $0x20b0] sm:$0xff] %v25450_v43  ;;  %v25460_v53 = vld [vmem:[%s33417_s0 + $0x20d0] sm:$0xff]  }
  0x38   :  { %v25452_v45 = vld [vmem:[%s33417_s0 + $0x14c0] sm:$0xff]   ;;  %20594 = vst [vmem:[%s33418_s1 + $0xc0] sm:$0xff] %v25451_v44  ;;  %v25461_v54 = vld [vmem:[%s33417_s0 + $0x14d0] sm:$0xff]   ;;  %20630 = vst [vmem:[%s33418_s1 + $0xd0] sm:$0xff] %v25460_v53 }
  0x39   :  { %v25453_v46 = vld [vmem:[%s33417_s0 + $0x8c0] sm:$0xff]   ;;  %20598 = vst [vmem:[%s33418_s1 + $0xcc0] sm:$0xff] %v25452_v45  ;;  %v25462_v55 = vld [vmem:[%s33417_s0 + $0x8d0] sm:$0xff]   ;;  %20634 = vst [vmem:[%s33418_s1 + $0xcd0] sm:$0xff] %v25461_v54 }
  0x3a   :  { %v25454_v47 = vld [vmem:[%s33417_s0 + $0x1cc0] sm:$0xff]   ;;  %20602 = vst [vmem:[%s33418_s1 + $0x18c0] sm:$0xff] %v25453_v46  ;;  %v25463_v56 = vld [vmem:[%s33417_s0 + $0x1cd0] sm:$0xff]   ;;  %20638 = vst [vmem:[%s33418_s1 + $0x18d0] sm:$0xff] %v25462_v55 }
  0x3b   :  { %v25455_v48 = vld [vmem:[%s33417_s0 + $0x10c0] sm:$0xff]   ;;  %20606 = vst [vmem:[%s33418_s1 + $0x4c0] sm:$0xff] %v25454_v47  ;;  %v25464_v57 = vld [vmem:[%s33417_s0 + $0x10d0] sm:$0xff]   ;;  %20642 = vst [vmem:[%s33418_s1 + $0x4d0] sm:$0xff] %v25463_v56 }
  0x3c   :  { %v25456_v49 = vld [vmem:[%s33417_s0 + $0x4c0] sm:$0xff]   ;;  %20610 = vst [vmem:[%s33418_s1 + $0x10c0] sm:$0xff] %v25455_v48  ;;  %v25465_v58 = vld [vmem:[%s33417_s0 + $0x4d0] sm:$0xff]   ;;  %20646 = vst [vmem:[%s33418_s1 + $0x10d0] sm:$0xff] %v25464_v57 }
  0x3d   :  { %v25457_v50 = vld [vmem:[%s33417_s0 + $0x18c0] sm:$0xff]   ;;  %20614 = vst [vmem:[%s33418_s1 + $0x1cc0] sm:$0xff] %v25456_v49  ;;  %v25466_v59 = vld [vmem:[%s33417_s0 + $0x18d0] sm:$0xff]   ;;  %20650 = vst [vmem:[%s33418_s1 + $0x1cd0] sm:$0xff] %v25465_v58 }
  0x3e   :  { %v25458_v51 = vld [vmem:[%s33417_s0 + $0xcc0] sm:$0xff]   ;;  %20618 = vst [vmem:[%s33418_s1 + $0x8c0] sm:$0xff] %v25457_v50  ;;  %v25467_v60 = vld [vmem:[%s33417_s0 + $0xcd0] sm:$0xff]   ;;  %20654 = vst [vmem:[%s33418_s1 + $0x8d0] sm:$0xff] %v25466_v59 }
  0x3f   :  { %v25459_v52 = vld [vmem:[%s33417_s0 + $0xc0] sm:$0xff]   ;;  %20622 = vst [vmem:[%s33418_s1 + $0x14c0] sm:$0xff] %v25458_v51  ;;  %v25468_v61 = vld [vmem:[%s33417_s0 + $0xd0] sm:$0xff]   ;;  %20658 = vst [vmem:[%s33418_s1 + $0x14d0] sm:$0xff] %v25467_v60 }
  0x40   :  { %20626 = vst [vmem:[%s33418_s1 + $0x20c0] sm:$0xff] %v25459_v52  ;;  %v25469_v62 = vld [vmem:[%s33417_s0 + $0x20e0] sm:$0xff]   ;;  %20662 = vst [vmem:[%s33418_s1 + $0x20d0] sm:$0xff] %v25468_v61  ;;  %v25478_v7 = vld [vmem:[%s33417_s0 + $0x20f0] sm:$0xff]  }
  0x41   :  { %v25470_v63 = vld [vmem:[%s33417_s0 + $0x14e0] sm:$0xff]   ;;  %20666 = vst [vmem:[%s33418_s1 + $0xe0] sm:$0xff] %v25469_v62  ;;  %v25479_v8 = vld [vmem:[%s33417_s0 + $0x14f0] sm:$0xff]   ;;  %20702 = vst [vmem:[%s33418_s1 + $0xf0] sm:$0xff] %v25478_v7 }
  0x42   :  { %v25471_v0 = vld [vmem:[%s33417_s0 + $0x8e0] sm:$0xff]   ;;  %20670 = vst [vmem:[%s33418_s1 + $0xce0] sm:$0xff] %v25470_v63  ;;  %v25480_v9 = vld [vmem:[%s33417_s0 + $0x8f0] sm:$0xff]   ;;  %20706 = vst [vmem:[%s33418_s1 + $0xcf0] sm:$0xff] %v25479_v8 }
  0x43   :  { %v25472_v1 = vld [vmem:[%s33417_s0 + $0x1ce0] sm:$0xff]   ;;  %20674 = vst [vmem:[%s33418_s1 + $0x18e0] sm:$0xff] %v25471_v0  ;;  %v25481_v10 = vld [vmem:[%s33417_s0 + $0x1cf0] sm:$0xff]   ;;  %20710 = vst [vmem:[%s33418_s1 + $0x18f0] sm:$0xff] %v25480_v9 }
  0x44   :  { %v25473_v2 = vld [vmem:[%s33417_s0 + $0x10e0] sm:$0xff]   ;;  %20678 = vst [vmem:[%s33418_s1 + $0x4e0] sm:$0xff] %v25472_v1  ;;  %v25482_v11 = vld [vmem:[%s33417_s0 + $0x10f0] sm:$0xff]   ;;  %20714 = vst [vmem:[%s33418_s1 + $0x4f0] sm:$0xff] %v25481_v10 }
  0x45   :  { %v25474_v3 = vld [vmem:[%s33417_s0 + $0x4e0] sm:$0xff]   ;;  %20682 = vst [vmem:[%s33418_s1 + $0x10e0] sm:$0xff] %v25473_v2  ;;  %v25483_v12 = vld [vmem:[%s33417_s0 + $0x4f0] sm:$0xff]   ;;  %20718 = vst [vmem:[%s33418_s1 + $0x10f0] sm:$0xff] %v25482_v11 }
  0x46   :  { %v25475_v4 = vld [vmem:[%s33417_s0 + $0x18e0] sm:$0xff]   ;;  %20686 = vst [vmem:[%s33418_s1 + $0x1ce0] sm:$0xff] %v25474_v3  ;;  %v25484_v13 = vld [vmem:[%s33417_s0 + $0x18f0] sm:$0xff]   ;;  %20722 = vst [vmem:[%s33418_s1 + $0x1cf0] sm:$0xff] %v25483_v12 }
  0x47   :  { %v25476_v5 = vld [vmem:[%s33417_s0 + $0xce0] sm:$0xff]   ;;  %20690 = vst [vmem:[%s33418_s1 + $0x8e0] sm:$0xff] %v25475_v4  ;;  %v25485_v14 = vld [vmem:[%s33417_s0 + $0xcf0] sm:$0xff]   ;;  %20726 = vst [vmem:[%s33418_s1 + $0x8f0] sm:$0xff] %v25484_v13 }
  0x48   :  { %v25477_v6 = vld [vmem:[%s33417_s0 + $0xe0] sm:$0xff]   ;;  %20694 = vst [vmem:[%s33418_s1 + $0x14e0] sm:$0xff] %v25476_v5  ;;  %v25486_v15 = vld [vmem:[%s33417_s0 + $0xf0] sm:$0xff]   ;;  %20730 = vst [vmem:[%s33418_s1 + $0x14f0] sm:$0xff] %v25485_v14 }
  0x49   :  { %20698 = vst [vmem:[%s33418_s1 + $0x20e0] sm:$0xff] %v25477_v6  ;;  %v25487_v16 = vld [vmem:[%s33417_s0 + $0x2100] sm:$0xff]   ;;  %20734 = vst [vmem:[%s33418_s1 + $0x20f0] sm:$0xff] %v25486_v15  ;;  %v25496_v25 = vld [vmem:[%s33417_s0 + $0x2110] sm:$0xff]  }
  0x4a   :  { %v25488_v17 = vld [vmem:[%s33417_s0 + $0x1500] sm:$0xff]   ;;  %20738 = vst [vmem:[%s33418_s1 + $0x100] sm:$0xff] %v25487_v16  ;;  %v25497_v26 = vld [vmem:[%s33417_s0 + $0x1510] sm:$0xff]   ;;  %20774 = vst [vmem:[%s33418_s1 + $0x110] sm:$0xff] %v25496_v25 }
  0x4b   :  { %v25489_v18 = vld [vmem:[%s33417_s0 + $0x900] sm:$0xff]   ;;  %20742 = vst [vmem:[%s33418_s1 + $0xd00] sm:$0xff] %v25488_v17  ;;  %v25498_v27 = vld [vmem:[%s33417_s0 + $0x910] sm:$0xff]   ;;  %20778 = vst [vmem:[%s33418_s1 + $0xd10] sm:$0xff] %v25497_v26 }
  0x4c   :  { %v25490_v19 = vld [vmem:[%s33417_s0 + $0x1d00] sm:$0xff]   ;;  %20746 = vst [vmem:[%s33418_s1 + $0x1900] sm:$0xff] %v25489_v18  ;;  %v25499_v28 = vld [vmem:[%s33417_s0 + $0x1d10] sm:$0xff]   ;;  %20782 = vst [vmem:[%s33418_s1 + $0x1910] sm:$0xff] %v25498_v27 }
  0x4d   :  { %v25491_v20 = vld [vmem:[%s33417_s0 + $0x1100] sm:$0xff]   ;;  %20750 = vst [vmem:[%s33418_s1 + $0x500] sm:$0xff] %v25490_v19  ;;  %v25500_v29 = vld [vmem:[%s33417_s0 + $0x1110] sm:$0xff]   ;;  %20786 = vst [vmem:[%s33418_s1 + $0x510] sm:$0xff] %v25499_v28 }
  0x4e   :  { %v25492_v21 = vld [vmem:[%s33417_s0 + $0x500] sm:$0xff]   ;;  %20754 = vst [vmem:[%s33418_s1 + $0x1100] sm:$0xff] %v25491_v20  ;;  %v25501_v30 = vld [vmem:[%s33417_s0 + $0x510] sm:$0xff]   ;;  %20790 = vst [vmem:[%s33418_s1 + $0x1110] sm:$0xff] %v25500_v29 }
  0x4f   :  { %v25493_v22 = vld [vmem:[%s33417_s0 + $0x1900] sm:$0xff]   ;;  %20758 = vst [vmem:[%s33418_s1 + $0x1d00] sm:$0xff] %v25492_v21  ;;  %v25502_v31 = vld [vmem:[%s33417_s0 + $0x1910] sm:$0xff]   ;;  %20794 = vst [vmem:[%s33418_s1 + $0x1d10] sm:$0xff] %v25501_v30 }
  0x50   :  { %v25494_v23 = vld [vmem:[%s33417_s0 + $0xd00] sm:$0xff]   ;;  %20762 = vst [vmem:[%s33418_s1 + $0x900] sm:$0xff] %v25493_v22  ;;  %v25503_v32 = vld [vmem:[%s33417_s0 + $0xd10] sm:$0xff]   ;;  %20798 = vst [vmem:[%s33418_s1 + $0x910] sm:$0xff] %v25502_v31 }
  0x51   :  { %v25495_v24 = vld [vmem:[%s33417_s0 + $0x100] sm:$0xff]   ;;  %20766 = vst [vmem:[%s33418_s1 + $0x1500] sm:$0xff] %v25494_v23  ;;  %v25504_v33 = vld [vmem:[%s33417_s0 + $0x110] sm:$0xff]   ;;  %20802 = vst [vmem:[%s33418_s1 + $0x1510] sm:$0xff] %v25503_v32 }
  0x52   :  { %20770 = vst [vmem:[%s33418_s1 + $0x2100] sm:$0xff] %v25495_v24  ;;  %v25505_v34 = vld [vmem:[%s33417_s0 + $0x2120] sm:$0xff]   ;;  %20806 = vst [vmem:[%s33418_s1 + $0x2110] sm:$0xff] %v25504_v33  ;;  %v25514_v43 = vld [vmem:[%s33417_s0 + $0x2130] sm:$0xff]  }
  0x53   :  { %v25506_v35 = vld [vmem:[%s33417_s0 + $0x1520] sm:$0xff]   ;;  %20810 = vst [vmem:[%s33418_s1 + $0x120] sm:$0xff] %v25505_v34  ;;  %v25515_v44 = vld [vmem:[%s33417_s0 + $0x1530] sm:$0xff]   ;;  %20846 = vst [vmem:[%s33418_s1 + $0x130] sm:$0xff] %v25514_v43 }
  0x54   :  { %v25507_v36 = vld [vmem:[%s33417_s0 + $0x920] sm:$0xff]   ;;  %20814 = vst [vmem:[%s33418_s1 + $0xd20] sm:$0xff] %v25506_v35  ;;  %v25516_v45 = vld [vmem:[%s33417_s0 + $0x930] sm:$0xff]   ;;  %20850 = vst [vmem:[%s33418_s1 + $0xd30] sm:$0xff] %v25515_v44 }
  0x55   :  { %v25508_v37 = vld [vmem:[%s33417_s0 + $0x1d20] sm:$0xff]   ;;  %20818 = vst [vmem:[%s33418_s1 + $0x1920] sm:$0xff] %v25507_v36  ;;  %v25517_v46 = vld [vmem:[%s33417_s0 + $0x1d30] sm:$0xff]   ;;  %20854 = vst [vmem:[%s33418_s1 + $0x1930] sm:$0xff] %v25516_v45 }
  0x56   :  { %v25509_v38 = vld [vmem:[%s33417_s0 + $0x1120] sm:$0xff]   ;;  %20822 = vst [vmem:[%s33418_s1 + $0x520] sm:$0xff] %v25508_v37  ;;  %v25518_v47 = vld [vmem:[%s33417_s0 + $0x1130] sm:$0xff]   ;;  %20858 = vst [vmem:[%s33418_s1 + $0x530] sm:$0xff] %v25517_v46 }
  0x57   :  { %v25510_v39 = vld [vmem:[%s33417_s0 + $0x520] sm:$0xff]   ;;  %20826 = vst [vmem:[%s33418_s1 + $0x1120] sm:$0xff] %v25509_v38  ;;  %v25519_v48 = vld [vmem:[%s33417_s0 + $0x530] sm:$0xff]   ;;  %20862 = vst [vmem:[%s33418_s1 + $0x1130] sm:$0xff] %v25518_v47 }
  0x58   :  { %v25511_v40 = vld [vmem:[%s33417_s0 + $0x1920] sm:$0xff]   ;;  %20830 = vst [vmem:[%s33418_s1 + $0x1d20] sm:$0xff] %v25510_v39  ;;  %v25520_v49 = vld [vmem:[%s33417_s0 + $0x1930] sm:$0xff]   ;;  %20866 = vst [vmem:[%s33418_s1 + $0x1d30] sm:$0xff] %v25519_v48 }
  0x59   :  { %v25512_v41 = vld [vmem:[%s33417_s0 + $0xd20] sm:$0xff]   ;;  %20834 = vst [vmem:[%s33418_s1 + $0x920] sm:$0xff] %v25511_v40  ;;  %v25521_v50 = vld [vmem:[%s33417_s0 + $0xd30] sm:$0xff]   ;;  %20870 = vst [vmem:[%s33418_s1 + $0x930] sm:$0xff] %v25520_v49 }
  0x5a   :  { %v25513_v42 = vld [vmem:[%s33417_s0 + $0x120] sm:$0xff]   ;;  %20838 = vst [vmem:[%s33418_s1 + $0x1520] sm:$0xff] %v25512_v41  ;;  %v25522_v51 = vld [vmem:[%s33417_s0 + $0x130] sm:$0xff]   ;;  %20874 = vst [vmem:[%s33418_s1 + $0x1530] sm:$0xff] %v25521_v50 }
  0x5b   :  { %20842 = vst [vmem:[%s33418_s1 + $0x2120] sm:$0xff] %v25513_v42  ;;  %v25523_v52 = vld [vmem:[%s33417_s0 + $0x2140] sm:$0xff]   ;;  %20878 = vst [vmem:[%s33418_s1 + $0x2130] sm:$0xff] %v25522_v51  ;;  %v25532_v61 = vld [vmem:[%s33417_s0 + $0x2150] sm:$0xff]  }
  0x5c   :  { %v25524_v53 = vld [vmem:[%s33417_s0 + $0x1540] sm:$0xff]   ;;  %20882 = vst [vmem:[%s33418_s1 + $0x140] sm:$0xff] %v25523_v52  ;;  %v25533_v62 = vld [vmem:[%s33417_s0 + $0x1550] sm:$0xff]   ;;  %20918 = vst [vmem:[%s33418_s1 + $0x150] sm:$0xff] %v25532_v61 }
  0x5d   :  { %v25525_v54 = vld [vmem:[%s33417_s0 + $0x940] sm:$0xff]   ;;  %20886 = vst [vmem:[%s33418_s1 + $0xd40] sm:$0xff] %v25524_v53  ;;  %v25534_v63 = vld [vmem:[%s33417_s0 + $0x950] sm:$0xff]   ;;  %20922 = vst [vmem:[%s33418_s1 + $0xd50] sm:$0xff] %v25533_v62 }
  0x5e   :  { %v25526_v55 = vld [vmem:[%s33417_s0 + $0x1d40] sm:$0xff]   ;;  %20890 = vst [vmem:[%s33418_s1 + $0x1940] sm:$0xff] %v25525_v54  ;;  %v25535_v0 = vld [vmem:[%s33417_s0 + $0x1d50] sm:$0xff]   ;;  %20926 = vst [vmem:[%s33418_s1 + $0x1950] sm:$0xff] %v25534_v63 }
  0x5f   :  { %v25527_v56 = vld [vmem:[%s33417_s0 + $0x1140] sm:$0xff]   ;;  %20894 = vst [vmem:[%s33418_s1 + $0x540] sm:$0xff] %v25526_v55  ;;  %v25536_v1 = vld [vmem:[%s33417_s0 + $0x1150] sm:$0xff]   ;;  %20930 = vst [vmem:[%s33418_s1 + $0x550] sm:$0xff] %v25535_v0 }
  0x60   :  { %v25528_v57 = vld [vmem:[%s33417_s0 + $0x540] sm:$0xff]   ;;  %20898 = vst [vmem:[%s33418_s1 + $0x1140] sm:$0xff] %v25527_v56  ;;  %v25537_v2 = vld [vmem:[%s33417_s0 + $0x550] sm:$0xff]   ;;  %20934 = vst [vmem:[%s33418_s1 + $0x1150] sm:$0xff] %v25536_v1 }
  0x61   :  { %v25529_v58 = vld [vmem:[%s33417_s0 + $0x1940] sm:$0xff]   ;;  %20902 = vst [vmem:[%s33418_s1 + $0x1d40] sm:$0xff] %v25528_v57  ;;  %v25538_v3 = vld [vmem:[%s33417_s0 + $0x1950] sm:$0xff]   ;;  %20938 = vst [vmem:[%s33418_s1 + $0x1d50] sm:$0xff] %v25537_v2 }
  0x62   :  { %v25530_v59 = vld [vmem:[%s33417_s0 + $0xd40] sm:$0xff]   ;;  %20906 = vst [vmem:[%s33418_s1 + $0x940] sm:$0xff] %v25529_v58  ;;  %v25539_v4 = vld [vmem:[%s33417_s0 + $0xd50] sm:$0xff]   ;;  %20942 = vst [vmem:[%s33418_s1 + $0x950] sm:$0xff] %v25538_v3 }
  0x63   :  { %v25531_v60 = vld [vmem:[%s33417_s0 + $0x140] sm:$0xff]   ;;  %20910 = vst [vmem:[%s33418_s1 + $0x1540] sm:$0xff] %v25530_v59  ;;  %v25540_v5 = vld [vmem:[%s33417_s0 + $0x150] sm:$0xff]   ;;  %20946 = vst [vmem:[%s33418_s1 + $0x1550] sm:$0xff] %v25539_v4 }
  0x64   :  { %20914 = vst [vmem:[%s33418_s1 + $0x2140] sm:$0xff] %v25531_v60  ;;  %v25541_v6 = vld [vmem:[%s33417_s0 + $0x2160] sm:$0xff]   ;;  %20950 = vst [vmem:[%s33418_s1 + $0x2150] sm:$0xff] %v25540_v5  ;;  %v25550_v15 = vld [vmem:[%s33417_s0 + $0x2170] sm:$0xff]  }
  0x65   :  { %v25542_v7 = vld [vmem:[%s33417_s0 + $0x1560] sm:$0xff]   ;;  %20954 = vst [vmem:[%s33418_s1 + $0x160] sm:$0xff] %v25541_v6  ;;  %v25551_v16 = vld [vmem:[%s33417_s0 + $0x1570] sm:$0xff]   ;;  %20990 = vst [vmem:[%s33418_s1 + $0x170] sm:$0xff] %v25550_v15 }
  0x66   :  { %v25543_v8 = vld [vmem:[%s33417_s0 + $0x960] sm:$0xff]   ;;  %20958 = vst [vmem:[%s33418_s1 + $0xd60] sm:$0xff] %v25542_v7  ;;  %v25552_v17 = vld [vmem:[%s33417_s0 + $0x970] sm:$0xff]   ;;  %20994 = vst [vmem:[%s33418_s1 + $0xd70] sm:$0xff] %v25551_v16 }
  0x67   :  { %v25544_v9 = vld [vmem:[%s33417_s0 + $0x1d60] sm:$0xff]   ;;  %20962 = vst [vmem:[%s33418_s1 + $0x1960] sm:$0xff] %v25543_v8  ;;  %v25553_v18 = vld [vmem:[%s33417_s0 + $0x1d70] sm:$0xff]   ;;  %20998 = vst [vmem:[%s33418_s1 + $0x1970] sm:$0xff] %v25552_v17 }
  0x68   :  { %v25545_v10 = vld [vmem:[%s33417_s0 + $0x1160] sm:$0xff]   ;;  %20966 = vst [vmem:[%s33418_s1 + $0x560] sm:$0xff] %v25544_v9  ;;  %v25554_v19 = vld [vmem:[%s33417_s0 + $0x1170] sm:$0xff]   ;;  %21002 = vst [vmem:[%s33418_s1 + $0x570] sm:$0xff] %v25553_v18 }
  0x69   :  { %v25546_v11 = vld [vmem:[%s33417_s0 + $0x560] sm:$0xff]   ;;  %20970 = vst [vmem:[%s33418_s1 + $0x1160] sm:$0xff] %v25545_v10  ;;  %v25555_v20 = vld [vmem:[%s33417_s0 + $0x570] sm:$0xff]   ;;  %21006 = vst [vmem:[%s33418_s1 + $0x1170] sm:$0xff] %v25554_v19 }
  0x6a   :  { %v25547_v12 = vld [vmem:[%s33417_s0 + $0x1960] sm:$0xff]   ;;  %20974 = vst [vmem:[%s33418_s1 + $0x1d60] sm:$0xff] %v25546_v11  ;;  %v25556_v21 = vld [vmem:[%s33417_s0 + $0x1970] sm:$0xff]   ;;  %21010 = vst [vmem:[%s33418_s1 + $0x1d70] sm:$0xff] %v25555_v20 }
  0x6b   :  { %v25548_v13 = vld [vmem:[%s33417_s0 + $0xd60] sm:$0xff]   ;;  %20978 = vst [vmem:[%s33418_s1 + $0x960] sm:$0xff] %v25547_v12  ;;  %v25557_v22 = vld [vmem:[%s33417_s0 + $0xd70] sm:$0xff]   ;;  %21014 = vst [vmem:[%s33418_s1 + $0x970] sm:$0xff] %v25556_v21 }
  0x6c   :  { %v25549_v14 = vld [vmem:[%s33417_s0 + $0x160] sm:$0xff]   ;;  %20982 = vst [vmem:[%s33418_s1 + $0x1560] sm:$0xff] %v25548_v13  ;;  %v25558_v23 = vld [vmem:[%s33417_s0 + $0x170] sm:$0xff]   ;;  %21018 = vst [vmem:[%s33418_s1 + $0x1570] sm:$0xff] %v25557_v22 }
  0x6d   :  { %20986 = vst [vmem:[%s33418_s1 + $0x2160] sm:$0xff] %v25549_v14  ;;  %v25559_v24 = vld [vmem:[%s33417_s0 + $0x2180] sm:$0xff]   ;;  %21022 = vst [vmem:[%s33418_s1 + $0x2170] sm:$0xff] %v25558_v23  ;;  %v25568_v33 = vld [vmem:[%s33417_s0 + $0x2190] sm:$0xff]  }
  0x6e   :  { %v25560_v25 = vld [vmem:[%s33417_s0 + $0x1580] sm:$0xff]   ;;  %21026 = vst [vmem:[%s33418_s1 + $0x180] sm:$0xff] %v25559_v24  ;;  %v25569_v34 = vld [vmem:[%s33417_s0 + $0x1590] sm:$0xff]   ;;  %21062 = vst [vmem:[%s33418_s1 + $0x190] sm:$0xff] %v25568_v33 }
  0x6f   :  { %v25561_v26 = vld [vmem:[%s33417_s0 + $0x980] sm:$0xff]   ;;  %21030 = vst [vmem:[%s33418_s1 + $0xd80] sm:$0xff] %v25560_v25  ;;  %v25570_v35 = vld [vmem:[%s33417_s0 + $0x990] sm:$0xff]   ;;  %21066 = vst [vmem:[%s33418_s1 + $0xd90] sm:$0xff] %v25569_v34 }
  0x70   :  { %v25562_v27 = vld [vmem:[%s33417_s0 + $0x1d80] sm:$0xff]   ;;  %21034 = vst [vmem:[%s33418_s1 + $0x1980] sm:$0xff] %v25561_v26  ;;  %v25571_v36 = vld [vmem:[%s33417_s0 + $0x1d90] sm:$0xff]   ;;  %21070 = vst [vmem:[%s33418_s1 + $0x1990] sm:$0xff] %v25570_v35 }
  0x71   :  { %v25563_v28 = vld [vmem:[%s33417_s0 + $0x1180] sm:$0xff]   ;;  %21038 = vst [vmem:[%s33418_s1 + $0x580] sm:$0xff] %v25562_v27  ;;  %v25572_v37 = vld [vmem:[%s33417_s0 + $0x1190] sm:$0xff]   ;;  %21074 = vst [vmem:[%s33418_s1 + $0x590] sm:$0xff] %v25571_v36 }
  0x72   :  { %v25564_v29 = vld [vmem:[%s33417_s0 + $0x580] sm:$0xff]   ;;  %21042 = vst [vmem:[%s33418_s1 + $0x1180] sm:$0xff] %v25563_v28  ;;  %v25573_v38 = vld [vmem:[%s33417_s0 + $0x590] sm:$0xff]   ;;  %21078 = vst [vmem:[%s33418_s1 + $0x1190] sm:$0xff] %v25572_v37 }
  0x73   :  { %v25565_v30 = vld [vmem:[%s33417_s0 + $0x1980] sm:$0xff]   ;;  %21046 = vst [vmem:[%s33418_s1 + $0x1d80] sm:$0xff] %v25564_v29  ;;  %v25574_v39 = vld [vmem:[%s33417_s0 + $0x1990] sm:$0xff]   ;;  %21082 = vst [vmem:[%s33418_s1 + $0x1d90] sm:$0xff] %v25573_v38 }
  0x74   :  { %v25566_v31 = vld [vmem:[%s33417_s0 + $0xd80] sm:$0xff]   ;;  %21050 = vst [vmem:[%s33418_s1 + $0x980] sm:$0xff] %v25565_v30  ;;  %v25575_v40 = vld [vmem:[%s33417_s0 + $0xd90] sm:$0xff]   ;;  %21086 = vst [vmem:[%s33418_s1 + $0x990] sm:$0xff] %v25574_v39 }
  0x75   :  { %v25567_v32 = vld [vmem:[%s33417_s0 + $0x180] sm:$0xff]   ;;  %21054 = vst [vmem:[%s33418_s1 + $0x1580] sm:$0xff] %v25566_v31  ;;  %v25576_v41 = vld [vmem:[%s33417_s0 + $0x190] sm:$0xff]   ;;  %21090 = vst [vmem:[%s33418_s1 + $0x1590] sm:$0xff] %v25575_v40 }
  0x76   :  { %21058 = vst [vmem:[%s33418_s1 + $0x2180] sm:$0xff] %v25567_v32  ;;  %v25577_v42 = vld [vmem:[%s33417_s0 + $0x21a0] sm:$0xff]   ;;  %21094 = vst [vmem:[%s33418_s1 + $0x2190] sm:$0xff] %v25576_v41  ;;  %v25586_v51 = vld [vmem:[%s33417_s0 + $0x21b0] sm:$0xff]  }
  0x77   :  { %v25578_v43 = vld [vmem:[%s33417_s0 + $0x15a0] sm:$0xff]   ;;  %21098 = vst [vmem:[%s33418_s1 + $0x1a0] sm:$0xff] %v25577_v42  ;;  %v25587_v52 = vld [vmem:[%s33417_s0 + $0x15b0] sm:$0xff]   ;;  %21134 = vst [vmem:[%s33418_s1 + $0x1b0] sm:$0xff] %v25586_v51 }
  0x78   :  { %v25579_v44 = vld [vmem:[%s33417_s0 + $0x9a0] sm:$0xff]   ;;  %21102 = vst [vmem:[%s33418_s1 + $0xda0] sm:$0xff] %v25578_v43  ;;  %v25588_v53 = vld [vmem:[%s33417_s0 + $0x9b0] sm:$0xff]   ;;  %21138 = vst [vmem:[%s33418_s1 + $0xdb0] sm:$0xff] %v25587_v52 }
  0x79   :  { %v25580_v45 = vld [vmem:[%s33417_s0 + $0x1da0] sm:$0xff]   ;;  %21106 = vst [vmem:[%s33418_s1 + $0x19a0] sm:$0xff] %v25579_v44  ;;  %v25589_v54 = vld [vmem:[%s33417_s0 + $0x1db0] sm:$0xff]   ;;  %21142 = vst [vmem:[%s33418_s1 + $0x19b0] sm:$0xff] %v25588_v53 }
  0x7a   :  { %v25581_v46 = vld [vmem:[%s33417_s0 + $0x11a0] sm:$0xff]   ;;  %21110 = vst [vmem:[%s33418_s1 + $0x5a0] sm:$0xff] %v25580_v45  ;;  %v25590_v55 = vld [vmem:[%s33417_s0 + $0x11b0] sm:$0xff]   ;;  %21146 = vst [vmem:[%s33418_s1 + $0x5b0] sm:$0xff] %v25589_v54 }
  0x7b   :  { %v25582_v47 = vld [vmem:[%s33417_s0 + $0x5a0] sm:$0xff]   ;;  %21114 = vst [vmem:[%s33418_s1 + $0x11a0] sm:$0xff] %v25581_v46  ;;  %v25591_v56 = vld [vmem:[%s33417_s0 + $0x5b0] sm:$0xff]   ;;  %21150 = vst [vmem:[%s33418_s1 + $0x11b0] sm:$0xff] %v25590_v55 }
  0x7c   :  { %v25583_v48 = vld [vmem:[%s33417_s0 + $0x19a0] sm:$0xff]   ;;  %21118 = vst [vmem:[%s33418_s1 + $0x1da0] sm:$0xff] %v25582_v47  ;;  %v25592_v57 = vld [vmem:[%s33417_s0 + $0x19b0] sm:$0xff]   ;;  %21154 = vst [vmem:[%s33418_s1 + $0x1db0] sm:$0xff] %v25591_v56 }
  0x7d   :  { %v25584_v49 = vld [vmem:[%s33417_s0 + $0xda0] sm:$0xff]   ;;  %21122 = vst [vmem:[%s33418_s1 + $0x9a0] sm:$0xff] %v25583_v48  ;;  %v25593_v58 = vld [vmem:[%s33417_s0 + $0xdb0] sm:$0xff]   ;;  %21158 = vst [vmem:[%s33418_s1 + $0x9b0] sm:$0xff] %v25592_v57 }
  0x7e   :  { %v25585_v50 = vld [vmem:[%s33417_s0 + $0x1a0] sm:$0xff]   ;;  %21126 = vst [vmem:[%s33418_s1 + $0x15a0] sm:$0xff] %v25584_v49  ;;  %v25594_v59 = vld [vmem:[%s33417_s0 + $0x1b0] sm:$0xff]   ;;  %21162 = vst [vmem:[%s33418_s1 + $0x15b0] sm:$0xff] %v25593_v58 }
  0x7f   :  { %21130 = vst [vmem:[%s33418_s1 + $0x21a0] sm:$0xff] %v25585_v50  ;;  %v25595_v60 = vld [vmem:[%s33417_s0 + $0x21c0] sm:$0xff]   ;;  %21166 = vst [vmem:[%s33418_s1 + $0x21b0] sm:$0xff] %v25594_v59  ;;  %v25604_v5 = vld [vmem:[%s33417_s0 + $0x21d0] sm:$0xff]  }
  0x80   :  { %v25596_v61 = vld [vmem:[%s33417_s0 + $0x15c0] sm:$0xff]   ;;  %21170 = vst [vmem:[%s33418_s1 + $0x1c0] sm:$0xff] %v25595_v60  ;;  %v25605_v6 = vld [vmem:[%s33417_s0 + $0x15d0] sm:$0xff]   ;;  %21206 = vst [vmem:[%s33418_s1 + $0x1d0] sm:$0xff] %v25604_v5 }
  0x81   :  { %v25597_v62 = vld [vmem:[%s33417_s0 + $0x9c0] sm:$0xff]   ;;  %21174 = vst [vmem:[%s33418_s1 + $0xdc0] sm:$0xff] %v25596_v61  ;;  %v25606_v7 = vld [vmem:[%s33417_s0 + $0x9d0] sm:$0xff]   ;;  %21210 = vst [vmem:[%s33418_s1 + $0xdd0] sm:$0xff] %v25605_v6 }
  0x82   :  { %v25598_v63 = vld [vmem:[%s33417_s0 + $0x1dc0] sm:$0xff]   ;;  %21178 = vst [vmem:[%s33418_s1 + $0x19c0] sm:$0xff] %v25597_v62  ;;  %v25607_v8 = vld [vmem:[%s33417_s0 + $0x1dd0] sm:$0xff]   ;;  %21214 = vst [vmem:[%s33418_s1 + $0x19d0] sm:$0xff] %v25606_v7 }
  0x83   :  { %v25599_v0 = vld [vmem:[%s33417_s0 + $0x11c0] sm:$0xff]   ;;  %21182 = vst [vmem:[%s33418_s1 + $0x5c0] sm:$0xff] %v25598_v63  ;;  %v25608_v9 = vld [vmem:[%s33417_s0 + $0x11d0] sm:$0xff]   ;;  %21218 = vst [vmem:[%s33418_s1 + $0x5d0] sm:$0xff] %v25607_v8 }
  0x84   :  { %v25600_v1 = vld [vmem:[%s33417_s0 + $0x5c0] sm:$0xff]   ;;  %21186 = vst [vmem:[%s33418_s1 + $0x11c0] sm:$0xff] %v25599_v0  ;;  %v25609_v10 = vld [vmem:[%s33417_s0 + $0x5d0] sm:$0xff]   ;;  %21222 = vst [vmem:[%s33418_s1 + $0x11d0] sm:$0xff] %v25608_v9 }
  0x85   :  { %v25601_v2 = vld [vmem:[%s33417_s0 + $0x19c0] sm:$0xff]   ;;  %21190 = vst [vmem:[%s33418_s1 + $0x1dc0] sm:$0xff] %v25600_v1  ;;  %v25610_v11 = vld [vmem:[%s33417_s0 + $0x19d0] sm:$0xff]   ;;  %21226 = vst [vmem:[%s33418_s1 + $0x1dd0] sm:$0xff] %v25609_v10 }
  0x86   :  { %v25602_v3 = vld [vmem:[%s33417_s0 + $0xdc0] sm:$0xff]   ;;  %21194 = vst [vmem:[%s33418_s1 + $0x9c0] sm:$0xff] %v25601_v2  ;;  %v25611_v12 = vld [vmem:[%s33417_s0 + $0xdd0] sm:$0xff]   ;;  %21230 = vst [vmem:[%s33418_s1 + $0x9d0] sm:$0xff] %v25610_v11 }
  0x87   :  { %v25603_v4 = vld [vmem:[%s33417_s0 + $0x1c0] sm:$0xff]   ;;  %21198 = vst [vmem:[%s33418_s1 + $0x15c0] sm:$0xff] %v25602_v3  ;;  %v25612_v13 = vld [vmem:[%s33417_s0 + $0x1d0] sm:$0xff]   ;;  %21234 = vst [vmem:[%s33418_s1 + $0x15d0] sm:$0xff] %v25611_v12 }
  0x88   :  { %21202 = vst [vmem:[%s33418_s1 + $0x21c0] sm:$0xff] %v25603_v4  ;;  %v25613_v14 = vld [vmem:[%s33417_s0 + $0x21e0] sm:$0xff]   ;;  %21238 = vst [vmem:[%s33418_s1 + $0x21d0] sm:$0xff] %v25612_v13  ;;  %v25622_v23 = vld [vmem:[%s33417_s0 + $0x21f0] sm:$0xff]  }
  0x89   :  { %v25614_v15 = vld [vmem:[%s33417_s0 + $0x15e0] sm:$0xff]   ;;  %21242 = vst [vmem:[%s33418_s1 + $0x1e0] sm:$0xff] %v25613_v14  ;;  %v25623_v24 = vld [vmem:[%s33417_s0 + $0x15f0] sm:$0xff]   ;;  %21278 = vst [vmem:[%s33418_s1 + $0x1f0] sm:$0xff] %v25622_v23 }
  0x8a   :  { %v25615_v16 = vld [vmem:[%s33417_s0 + $0x9e0] sm:$0xff]   ;;  %21246 = vst [vmem:[%s33418_s1 + $0xde0] sm:$0xff] %v25614_v15  ;;  %v25624_v25 = vld [vmem:[%s33417_s0 + $0x9f0] sm:$0xff]   ;;  %21282 = vst [vmem:[%s33418_s1 + $0xdf0] sm:$0xff] %v25623_v24 }
  0x8b   :  { %v25616_v17 = vld [vmem:[%s33417_s0 + $0x1de0] sm:$0xff]   ;;  %21250 = vst [vmem:[%s33418_s1 + $0x19e0] sm:$0xff] %v25615_v16  ;;  %v25625_v26 = vld [vmem:[%s33417_s0 + $0x1df0] sm:$0xff]   ;;  %21286 = vst [vmem:[%s33418_s1 + $0x19f0] sm:$0xff] %v25624_v25 }
  0x8c   :  { %v25617_v18 = vld [vmem:[%s33417_s0 + $0x11e0] sm:$0xff]   ;;  %21254 = vst [vmem:[%s33418_s1 + $0x5e0] sm:$0xff] %v25616_v17  ;;  %v25626_v27 = vld [vmem:[%s33417_s0 + $0x11f0] sm:$0xff]   ;;  %21290 = vst [vmem:[%s33418_s1 + $0x5f0] sm:$0xff] %v25625_v26 }
  0x8d   :  { %v25618_v19 = vld [vmem:[%s33417_s0 + $0x5e0] sm:$0xff]   ;;  %21258 = vst [vmem:[%s33418_s1 + $0x11e0] sm:$0xff] %v25617_v18  ;;  %v25627_v28 = vld [vmem:[%s33417_s0 + $0x5f0] sm:$0xff]   ;;  %21294 = vst [vmem:[%s33418_s1 + $0x11f0] sm:$0xff] %v25626_v27 }
  0x8e   :  { %v25619_v20 = vld [vmem:[%s33417_s0 + $0x19e0] sm:$0xff]   ;;  %21262 = vst [vmem:[%s33418_s1 + $0x1de0] sm:$0xff] %v25618_v19  ;;  %v25628_v29 = vld [vmem:[%s33417_s0 + $0x19f0] sm:$0xff]   ;;  %21298 = vst [vmem:[%s33418_s1 + $0x1df0] sm:$0xff] %v25627_v28 }
  0x8f   :  { %v25620_v21 = vld [vmem:[%s33417_s0 + $0xde0] sm:$0xff]   ;;  %21266 = vst [vmem:[%s33418_s1 + $0x9e0] sm:$0xff] %v25619_v20  ;;  %v25629_v30 = vld [vmem:[%s33417_s0 + $0xdf0] sm:$0xff]   ;;  %21302 = vst [vmem:[%s33418_s1 + $0x9f0] sm:$0xff] %v25628_v29 }
  0x90   :  { %v25621_v22 = vld [vmem:[%s33417_s0 + $0x1e0] sm:$0xff]   ;;  %21270 = vst [vmem:[%s33418_s1 + $0x15e0] sm:$0xff] %v25620_v21  ;;  %v25630_v31 = vld [vmem:[%s33417_s0 + $0x1f0] sm:$0xff]   ;;  %21306 = vst [vmem:[%s33418_s1 + $0x15f0] sm:$0xff] %v25629_v30 }
  0x91   :  { %21274 = vst [vmem:[%s33418_s1 + $0x21e0] sm:$0xff] %v25621_v22  ;;  %v25631_v32 = vld [vmem:[%s33417_s0 + $0x2200] sm:$0xff]   ;;  %21310 = vst [vmem:[%s33418_s1 + $0x21f0] sm:$0xff] %v25630_v31  ;;  %v25640_v41 = vld [vmem:[%s33417_s0 + $0x2210] sm:$0xff]  }
  0x92   :  { %v25632_v33 = vld [vmem:[%s33417_s0 + $0x1600] sm:$0xff]   ;;  %21314 = vst [vmem:[%s33418_s1 + $0x200] sm:$0xff] %v25631_v32  ;;  %v25641_v42 = vld [vmem:[%s33417_s0 + $0x1610] sm:$0xff]   ;;  %21350 = vst [vmem:[%s33418_s1 + $0x210] sm:$0xff] %v25640_v41 }
  0x93   :  { %v25633_v34 = vld [vmem:[%s33417_s0 + $0xa00] sm:$0xff]   ;;  %21318 = vst [vmem:[%s33418_s1 + $0xe00] sm:$0xff] %v25632_v33  ;;  %v25642_v43 = vld [vmem:[%s33417_s0 + $0xa10] sm:$0xff]   ;;  %21354 = vst [vmem:[%s33418_s1 + $0xe10] sm:$0xff] %v25641_v42 }
  0x94   :  { %v25634_v35 = vld [vmem:[%s33417_s0 + $0x1e00] sm:$0xff]   ;;  %21322 = vst [vmem:[%s33418_s1 + $0x1a00] sm:$0xff] %v25633_v34  ;;  %v25643_v44 = vld [vmem:[%s33417_s0 + $0x1e10] sm:$0xff]   ;;  %21358 = vst [vmem:[%s33418_s1 + $0x1a10] sm:$0xff] %v25642_v43 }
  0x95   :  { %v25635_v36 = vld [vmem:[%s33417_s0 + $0x1200] sm:$0xff]   ;;  %21326 = vst [vmem:[%s33418_s1 + $0x600] sm:$0xff] %v25634_v35  ;;  %v25644_v45 = vld [vmem:[%s33417_s0 + $0x1210] sm:$0xff]   ;;  %21362 = vst [vmem:[%s33418_s1 + $0x610] sm:$0xff] %v25643_v44 }
  0x96   :  { %v25636_v37 = vld [vmem:[%s33417_s0 + $0x600] sm:$0xff]   ;;  %21330 = vst [vmem:[%s33418_s1 + $0x1200] sm:$0xff] %v25635_v36  ;;  %v25645_v46 = vld [vmem:[%s33417_s0 + $0x610] sm:$0xff]   ;;  %21366 = vst [vmem:[%s33418_s1 + $0x1210] sm:$0xff] %v25644_v45 }
  0x97   :  { %v25637_v38 = vld [vmem:[%s33417_s0 + $0x1a00] sm:$0xff]   ;;  %21334 = vst [vmem:[%s33418_s1 + $0x1e00] sm:$0xff] %v25636_v37  ;;  %v25646_v47 = vld [vmem:[%s33417_s0 + $0x1a10] sm:$0xff]   ;;  %21370 = vst [vmem:[%s33418_s1 + $0x1e10] sm:$0xff] %v25645_v46 }
  0x98   :  { %v25638_v39 = vld [vmem:[%s33417_s0 + $0xe00] sm:$0xff]   ;;  %21338 = vst [vmem:[%s33418_s1 + $0xa00] sm:$0xff] %v25637_v38  ;;  %v25647_v48 = vld [vmem:[%s33417_s0 + $0xe10] sm:$0xff]   ;;  %21374 = vst [vmem:[%s33418_s1 + $0xa10] sm:$0xff] %v25646_v47 }
  0x99   :  { %v25639_v40 = vld [vmem:[%s33417_s0 + $0x200] sm:$0xff]   ;;  %21342 = vst [vmem:[%s33418_s1 + $0x1600] sm:$0xff] %v25638_v39  ;;  %v25648_v49 = vld [vmem:[%s33417_s0 + $0x210] sm:$0xff]   ;;  %21378 = vst [vmem:[%s33418_s1 + $0x1610] sm:$0xff] %v25647_v48 }
  0x9a   :  { %21346 = vst [vmem:[%s33418_s1 + $0x2200] sm:$0xff] %v25639_v40  ;;  %v25649_v50 = vld [vmem:[%s33417_s0 + $0x2220] sm:$0xff]   ;;  %21382 = vst [vmem:[%s33418_s1 + $0x2210] sm:$0xff] %v25648_v49  ;;  %v25658_v59 = vld [vmem:[%s33417_s0 + $0x2230] sm:$0xff]  }
  0x9b   :  { %v25650_v51 = vld [vmem:[%s33417_s0 + $0x1620] sm:$0xff]   ;;  %21386 = vst [vmem:[%s33418_s1 + $0x220] sm:$0xff] %v25649_v50  ;;  %v25659_v60 = vld [vmem:[%s33417_s0 + $0x1630] sm:$0xff]   ;;  %21422 = vst [vmem:[%s33418_s1 + $0x230] sm:$0xff] %v25658_v59 }
  0x9c   :  { %v25651_v52 = vld [vmem:[%s33417_s0 + $0xa20] sm:$0xff]   ;;  %21390 = vst [vmem:[%s33418_s1 + $0xe20] sm:$0xff] %v25650_v51  ;;  %v25660_v61 = vld [vmem:[%s33417_s0 + $0xa30] sm:$0xff]   ;;  %21426 = vst [vmem:[%s33418_s1 + $0xe30] sm:$0xff] %v25659_v60 }
  0x9d   :  { %v25652_v53 = vld [vmem:[%s33417_s0 + $0x1e20] sm:$0xff]   ;;  %21394 = vst [vmem:[%s33418_s1 + $0x1a20] sm:$0xff] %v25651_v52  ;;  %v25661_v62 = vld [vmem:[%s33417_s0 + $0x1e30] sm:$0xff]   ;;  %21430 = vst [vmem:[%s33418_s1 + $0x1a30] sm:$0xff] %v25660_v61 }
  0x9e   :  { %v25653_v54 = vld [vmem:[%s33417_s0 + $0x1220] sm:$0xff]   ;;  %21398 = vst [vmem:[%s33418_s1 + $0x620] sm:$0xff] %v25652_v53  ;;  %v25662_v63 = vld [vmem:[%s33417_s0 + $0x1230] sm:$0xff]   ;;  %21434 = vst [vmem:[%s33418_s1 + $0x630] sm:$0xff] %v25661_v62 }
  0x9f   :  { %v25654_v55 = vld [vmem:[%s33417_s0 + $0x620] sm:$0xff]   ;;  %21402 = vst [vmem:[%s33418_s1 + $0x1220] sm:$0xff] %v25653_v54  ;;  %v25663_v0 = vld [vmem:[%s33417_s0 + $0x630] sm:$0xff]   ;;  %21438 = vst [vmem:[%s33418_s1 + $0x1230] sm:$0xff] %v25662_v63 }
  0xa0   :  { %v25655_v56 = vld [vmem:[%s33417_s0 + $0x1a20] sm:$0xff]   ;;  %21406 = vst [vmem:[%s33418_s1 + $0x1e20] sm:$0xff] %v25654_v55  ;;  %v25664_v1 = vld [vmem:[%s33417_s0 + $0x1a30] sm:$0xff]   ;;  %21442 = vst [vmem:[%s33418_s1 + $0x1e30] sm:$0xff] %v25663_v0 }
  0xa1   :  { %v25656_v57 = vld [vmem:[%s33417_s0 + $0xe20] sm:$0xff]   ;;  %21410 = vst [vmem:[%s33418_s1 + $0xa20] sm:$0xff] %v25655_v56  ;;  %v25665_v2 = vld [vmem:[%s33417_s0 + $0xe30] sm:$0xff]   ;;  %21446 = vst [vmem:[%s33418_s1 + $0xa30] sm:$0xff] %v25664_v1 }
  0xa2   :  { %v25657_v58 = vld [vmem:[%s33417_s0 + $0x220] sm:$0xff]   ;;  %21414 = vst [vmem:[%s33418_s1 + $0x1620] sm:$0xff] %v25656_v57  ;;  %v25666_v3 = vld [vmem:[%s33417_s0 + $0x230] sm:$0xff]   ;;  %21450 = vst [vmem:[%s33418_s1 + $0x1630] sm:$0xff] %v25665_v2 }
  0xa3   :  { %21418 = vst [vmem:[%s33418_s1 + $0x2220] sm:$0xff] %v25657_v58  ;;  %v25667_v4 = vld [vmem:[%s33417_s0 + $0x2240] sm:$0xff]   ;;  %21454 = vst [vmem:[%s33418_s1 + $0x2230] sm:$0xff] %v25666_v3  ;;  %v25676_v13 = vld [vmem:[%s33417_s0 + $0x2250] sm:$0xff]  }
  0xa4   :  { %v25668_v5 = vld [vmem:[%s33417_s0 + $0x1640] sm:$0xff]   ;;  %21458 = vst [vmem:[%s33418_s1 + $0x240] sm:$0xff] %v25667_v4  ;;  %v25677_v14 = vld [vmem:[%s33417_s0 + $0x1650] sm:$0xff]   ;;  %21494 = vst [vmem:[%s33418_s1 + $0x250] sm:$0xff] %v25676_v13 }
  0xa5   :  { %v25669_v6 = vld [vmem:[%s33417_s0 + $0xa40] sm:$0xff]   ;;  %21462 = vst [vmem:[%s33418_s1 + $0xe40] sm:$0xff] %v25668_v5  ;;  %v25678_v15 = vld [vmem:[%s33417_s0 + $0xa50] sm:$0xff]   ;;  %21498 = vst [vmem:[%s33418_s1 + $0xe50] sm:$0xff] %v25677_v14 }
  0xa6   :  { %v25670_v7 = vld [vmem:[%s33417_s0 + $0x1e40] sm:$0xff]   ;;  %21466 = vst [vmem:[%s33418_s1 + $0x1a40] sm:$0xff] %v25669_v6  ;;  %v25679_v16 = vld [vmem:[%s33417_s0 + $0x1e50] sm:$0xff]   ;;  %21502 = vst [vmem:[%s33418_s1 + $0x1a50] sm:$0xff] %v25678_v15 }
  0xa7   :  { %v25671_v8 = vld [vmem:[%s33417_s0 + $0x1240] sm:$0xff]   ;;  %21470 = vst [vmem:[%s33418_s1 + $0x640] sm:$0xff] %v25670_v7  ;;  %v25680_v17 = vld [vmem:[%s33417_s0 + $0x1250] sm:$0xff]   ;;  %21506 = vst [vmem:[%s33418_s1 + $0x650] sm:$0xff] %v25679_v16 }
  0xa8   :  { %v25672_v9 = vld [vmem:[%s33417_s0 + $0x640] sm:$0xff]   ;;  %21474 = vst [vmem:[%s33418_s1 + $0x1240] sm:$0xff] %v25671_v8  ;;  %v25681_v18 = vld [vmem:[%s33417_s0 + $0x650] sm:$0xff]   ;;  %21510 = vst [vmem:[%s33418_s1 + $0x1250] sm:$0xff] %v25680_v17 }
  0xa9   :  { %v25673_v10 = vld [vmem:[%s33417_s0 + $0x1a40] sm:$0xff]   ;;  %21478 = vst [vmem:[%s33418_s1 + $0x1e40] sm:$0xff] %v25672_v9  ;;  %v25682_v19 = vld [vmem:[%s33417_s0 + $0x1a50] sm:$0xff]   ;;  %21514 = vst [vmem:[%s33418_s1 + $0x1e50] sm:$0xff] %v25681_v18 }
  0xaa   :  { %v25674_v11 = vld [vmem:[%s33417_s0 + $0xe40] sm:$0xff]   ;;  %21482 = vst [vmem:[%s33418_s1 + $0xa40] sm:$0xff] %v25673_v10  ;;  %v25683_v20 = vld [vmem:[%s33417_s0 + $0xe50] sm:$0xff]   ;;  %21518 = vst [vmem:[%s33418_s1 + $0xa50] sm:$0xff] %v25682_v19 }
  0xab   :  { %v25675_v12 = vld [vmem:[%s33417_s0 + $0x240] sm:$0xff]   ;;  %21486 = vst [vmem:[%s33418_s1 + $0x1640] sm:$0xff] %v25674_v11  ;;  %v25684_v21 = vld [vmem:[%s33417_s0 + $0x250] sm:$0xff]   ;;  %21522 = vst [vmem:[%s33418_s1 + $0x1650] sm:$0xff] %v25683_v20 }
  0xac   :  { %21490 = vst [vmem:[%s33418_s1 + $0x2240] sm:$0xff] %v25675_v12  ;;  %v25685_v22 = vld [vmem:[%s33417_s0 + $0x2260] sm:$0xff]   ;;  %21526 = vst [vmem:[%s33418_s1 + $0x2250] sm:$0xff] %v25684_v21  ;;  %v25694_v31 = vld [vmem:[%s33417_s0 + $0x2270] sm:$0xff]  }
  0xad   :  { %v25686_v23 = vld [vmem:[%s33417_s0 + $0x1660] sm:$0xff]   ;;  %21530 = vst [vmem:[%s33418_s1 + $0x260] sm:$0xff] %v25685_v22  ;;  %v25695_v32 = vld [vmem:[%s33417_s0 + $0x1670] sm:$0xff]   ;;  %21566 = vst [vmem:[%s33418_s1 + $0x270] sm:$0xff] %v25694_v31 }
  0xae   :  { %v25687_v24 = vld [vmem:[%s33417_s0 + $0xa60] sm:$0xff]   ;;  %21534 = vst [vmem:[%s33418_s1 + $0xe60] sm:$0xff] %v25686_v23  ;;  %v25696_v33 = vld [vmem:[%s33417_s0 + $0xa70] sm:$0xff]   ;;  %21570 = vst [vmem:[%s33418_s1 + $0xe70] sm:$0xff] %v25695_v32 }
  0xaf   :  { %v25688_v25 = vld [vmem:[%s33417_s0 + $0x1e60] sm:$0xff]   ;;  %21538 = vst [vmem:[%s33418_s1 + $0x1a60] sm:$0xff] %v25687_v24  ;;  %v25697_v34 = vld [vmem:[%s33417_s0 + $0x1e70] sm:$0xff]   ;;  %21574 = vst [vmem:[%s33418_s1 + $0x1a70] sm:$0xff] %v25696_v33 }
  0xb0   :  { %v25689_v26 = vld [vmem:[%s33417_s0 + $0x1260] sm:$0xff]   ;;  %21542 = vst [vmem:[%s33418_s1 + $0x660] sm:$0xff] %v25688_v25  ;;  %v25698_v35 = vld [vmem:[%s33417_s0 + $0x1270] sm:$0xff]   ;;  %21578 = vst [vmem:[%s33418_s1 + $0x670] sm:$0xff] %v25697_v34 }
  0xb1   :  { %v25690_v27 = vld [vmem:[%s33417_s0 + $0x660] sm:$0xff]   ;;  %21546 = vst [vmem:[%s33418_s1 + $0x1260] sm:$0xff] %v25689_v26  ;;  %v25699_v36 = vld [vmem:[%s33417_s0 + $0x670] sm:$0xff]   ;;  %21582 = vst [vmem:[%s33418_s1 + $0x1270] sm:$0xff] %v25698_v35 }
  0xb2   :  { %v25691_v28 = vld [vmem:[%s33417_s0 + $0x1a60] sm:$0xff]   ;;  %21550 = vst [vmem:[%s33418_s1 + $0x1e60] sm:$0xff] %v25690_v27  ;;  %v25700_v37 = vld [vmem:[%s33417_s0 + $0x1a70] sm:$0xff]   ;;  %21586 = vst [vmem:[%s33418_s1 + $0x1e70] sm:$0xff] %v25699_v36 }
  0xb3   :  { %v25692_v29 = vld [vmem:[%s33417_s0 + $0xe60] sm:$0xff]   ;;  %21554 = vst [vmem:[%s33418_s1 + $0xa60] sm:$0xff] %v25691_v28  ;;  %v25701_v38 = vld [vmem:[%s33417_s0 + $0xe70] sm:$0xff]   ;;  %21590 = vst [vmem:[%s33418_s1 + $0xa70] sm:$0xff] %v25700_v37 }
  0xb4   :  { %v25693_v30 = vld [vmem:[%s33417_s0 + $0x260] sm:$0xff]   ;;  %21558 = vst [vmem:[%s33418_s1 + $0x1660] sm:$0xff] %v25692_v29  ;;  %v25702_v39 = vld [vmem:[%s33417_s0 + $0x270] sm:$0xff]   ;;  %21594 = vst [vmem:[%s33418_s1 + $0x1670] sm:$0xff] %v25701_v38 }
  0xb5   :  { %21562 = vst [vmem:[%s33418_s1 + $0x2260] sm:$0xff] %v25693_v30  ;;  %v25703_v40 = vld [vmem:[%s33417_s0 + $0x2280] sm:$0xff]   ;;  %21598 = vst [vmem:[%s33418_s1 + $0x2270] sm:$0xff] %v25702_v39  ;;  %v25712_v49 = vld [vmem:[%s33417_s0 + $0x2290] sm:$0xff]  }
  0xb6   :  { %v25704_v41 = vld [vmem:[%s33417_s0 + $0x1680] sm:$0xff]   ;;  %21602 = vst [vmem:[%s33418_s1 + $0x280] sm:$0xff] %v25703_v40  ;;  %v25713_v50 = vld [vmem:[%s33417_s0 + $0x1690] sm:$0xff]   ;;  %21638 = vst [vmem:[%s33418_s1 + $0x290] sm:$0xff] %v25712_v49 }
  0xb7   :  { %v25705_v42 = vld [vmem:[%s33417_s0 + $0xa80] sm:$0xff]   ;;  %21606 = vst [vmem:[%s33418_s1 + $0xe80] sm:$0xff] %v25704_v41  ;;  %v25714_v51 = vld [vmem:[%s33417_s0 + $0xa90] sm:$0xff]   ;;  %21642 = vst [vmem:[%s33418_s1 + $0xe90] sm:$0xff] %v25713_v50 }
  0xb8   :  { %v25706_v43 = vld [vmem:[%s33417_s0 + $0x1e80] sm:$0xff]   ;;  %21610 = vst [vmem:[%s33418_s1 + $0x1a80] sm:$0xff] %v25705_v42  ;;  %v25715_v52 = vld [vmem:[%s33417_s0 + $0x1e90] sm:$0xff]   ;;  %21646 = vst [vmem:[%s33418_s1 + $0x1a90] sm:$0xff] %v25714_v51 }
  0xb9   :  { %v25707_v44 = vld [vmem:[%s33417_s0 + $0x1280] sm:$0xff]   ;;  %21614 = vst [vmem:[%s33418_s1 + $0x680] sm:$0xff] %v25706_v43  ;;  %v25716_v53 = vld [vmem:[%s33417_s0 + $0x1290] sm:$0xff]   ;;  %21650 = vst [vmem:[%s33418_s1 + $0x690] sm:$0xff] %v25715_v52 }
  0xba   :  { %v25708_v45 = vld [vmem:[%s33417_s0 + $0x680] sm:$0xff]   ;;  %21618 = vst [vmem:[%s33418_s1 + $0x1280] sm:$0xff] %v25707_v44  ;;  %v25717_v54 = vld [vmem:[%s33417_s0 + $0x690] sm:$0xff]   ;;  %21654 = vst [vmem:[%s33418_s1 + $0x1290] sm:$0xff] %v25716_v53 }
  0xbb   :  { %v25709_v46 = vld [vmem:[%s33417_s0 + $0x1a80] sm:$0xff]   ;;  %21622 = vst [vmem:[%s33418_s1 + $0x1e80] sm:$0xff] %v25708_v45  ;;  %v25718_v55 = vld [vmem:[%s33417_s0 + $0x1a90] sm:$0xff]   ;;  %21658 = vst [vmem:[%s33418_s1 + $0x1e90] sm:$0xff] %v25717_v54 }
  0xbc   :  { %v25710_v47 = vld [vmem:[%s33417_s0 + $0xe80] sm:$0xff]   ;;  %21626 = vst [vmem:[%s33418_s1 + $0xa80] sm:$0xff] %v25709_v46  ;;  %v25719_v56 = vld [vmem:[%s33417_s0 + $0xe90] sm:$0xff]   ;;  %21662 = vst [vmem:[%s33418_s1 + $0xa90] sm:$0xff] %v25718_v55 }
  0xbd   :  { %v25711_v48 = vld [vmem:[%s33417_s0 + $0x280] sm:$0xff]   ;;  %21630 = vst [vmem:[%s33418_s1 + $0x1680] sm:$0xff] %v25710_v47  ;;  %v25720_v57 = vld [vmem:[%s33417_s0 + $0x290] sm:$0xff]   ;;  %21666 = vst [vmem:[%s33418_s1 + $0x1690] sm:$0xff] %v25719_v56 }
  0xbe   :  { %21634 = vst [vmem:[%s33418_s1 + $0x2280] sm:$0xff] %v25711_v48  ;;  %v25721_v58 = vld [vmem:[%s33417_s0 + $0x22a0] sm:$0xff]   ;;  %21670 = vst [vmem:[%s33418_s1 + $0x2290] sm:$0xff] %v25720_v57  ;;  %v25730_v3 = vld [vmem:[%s33417_s0 + $0x22b0] sm:$0xff]  }
  0xbf   :  { %v25722_v59 = vld [vmem:[%s33417_s0 + $0x16a0] sm:$0xff]   ;;  %21674 = vst [vmem:[%s33418_s1 + $0x2a0] sm:$0xff] %v25721_v58  ;;  %v25731_v4 = vld [vmem:[%s33417_s0 + $0x16b0] sm:$0xff]   ;;  %21710 = vst [vmem:[%s33418_s1 + $0x2b0] sm:$0xff] %v25730_v3 }
  0xc0   :  { %v25723_v60 = vld [vmem:[%s33417_s0 + $0xaa0] sm:$0xff]   ;;  %21678 = vst [vmem:[%s33418_s1 + $0xea0] sm:$0xff] %v25722_v59  ;;  %v25732_v5 = vld [vmem:[%s33417_s0 + $0xab0] sm:$0xff]   ;;  %21714 = vst [vmem:[%s33418_s1 + $0xeb0] sm:$0xff] %v25731_v4 }
  0xc1   :  { %v25724_v61 = vld [vmem:[%s33417_s0 + $0x1ea0] sm:$0xff]   ;;  %21682 = vst [vmem:[%s33418_s1 + $0x1aa0] sm:$0xff] %v25723_v60  ;;  %v25733_v6 = vld [vmem:[%s33417_s0 + $0x1eb0] sm:$0xff]   ;;  %21718 = vst [vmem:[%s33418_s1 + $0x1ab0] sm:$0xff] %v25732_v5 }
  0xc2   :  { %v25725_v62 = vld [vmem:[%s33417_s0 + $0x12a0] sm:$0xff]   ;;  %21686 = vst [vmem:[%s33418_s1 + $0x6a0] sm:$0xff] %v25724_v61  ;;  %v25734_v7 = vld [vmem:[%s33417_s0 + $0x12b0] sm:$0xff]   ;;  %21722 = vst [vmem:[%s33418_s1 + $0x6b0] sm:$0xff] %v25733_v6 }
  0xc3   :  { %v25726_v63 = vld [vmem:[%s33417_s0 + $0x6a0] sm:$0xff]   ;;  %21690 = vst [vmem:[%s33418_s1 + $0x12a0] sm:$0xff] %v25725_v62  ;;  %v25735_v8 = vld [vmem:[%s33417_s0 + $0x6b0] sm:$0xff]   ;;  %21726 = vst [vmem:[%s33418_s1 + $0x12b0] sm:$0xff] %v25734_v7 }
  0xc4   :  { %v25727_v0 = vld [vmem:[%s33417_s0 + $0x1aa0] sm:$0xff]   ;;  %21694 = vst [vmem:[%s33418_s1 + $0x1ea0] sm:$0xff] %v25726_v63  ;;  %v25736_v9 = vld [vmem:[%s33417_s0 + $0x1ab0] sm:$0xff]   ;;  %21730 = vst [vmem:[%s33418_s1 + $0x1eb0] sm:$0xff] %v25735_v8 }
  0xc5   :  { %v25728_v1 = vld [vmem:[%s33417_s0 + $0xea0] sm:$0xff]   ;;  %21698 = vst [vmem:[%s33418_s1 + $0xaa0] sm:$0xff] %v25727_v0  ;;  %v25737_v10 = vld [vmem:[%s33417_s0 + $0xeb0] sm:$0xff]   ;;  %21734 = vst [vmem:[%s33418_s1 + $0xab0] sm:$0xff] %v25736_v9 }
  0xc6   :  { %v25729_v2 = vld [vmem:[%s33417_s0 + $0x2a0] sm:$0xff]   ;;  %21702 = vst [vmem:[%s33418_s1 + $0x16a0] sm:$0xff] %v25728_v1  ;;  %v25738_v11 = vld [vmem:[%s33417_s0 + $0x2b0] sm:$0xff]   ;;  %21738 = vst [vmem:[%s33418_s1 + $0x16b0] sm:$0xff] %v25737_v10 }
  0xc7   :  { %21706 = vst [vmem:[%s33418_s1 + $0x22a0] sm:$0xff] %v25729_v2  ;;  %v25739_v12 = vld [vmem:[%s33417_s0 + $0x22c0] sm:$0xff]   ;;  %21742 = vst [vmem:[%s33418_s1 + $0x22b0] sm:$0xff] %v25738_v11  ;;  %v25748_v21 = vld [vmem:[%s33417_s0 + $0x22d0] sm:$0xff]  }
  0xc8   :  { %v25740_v13 = vld [vmem:[%s33417_s0 + $0x16c0] sm:$0xff]   ;;  %21746 = vst [vmem:[%s33418_s1 + $0x2c0] sm:$0xff] %v25739_v12  ;;  %v25749_v22 = vld [vmem:[%s33417_s0 + $0x16d0] sm:$0xff]   ;;  %21782 = vst [vmem:[%s33418_s1 + $0x2d0] sm:$0xff] %v25748_v21 }
  0xc9   :  { %v25741_v14 = vld [vmem:[%s33417_s0 + $0xac0] sm:$0xff]   ;;  %21750 = vst [vmem:[%s33418_s1 + $0xec0] sm:$0xff] %v25740_v13  ;;  %v25750_v23 = vld [vmem:[%s33417_s0 + $0xad0] sm:$0xff]   ;;  %21786 = vst [vmem:[%s33418_s1 + $0xed0] sm:$0xff] %v25749_v22 }
  0xca   :  { %v25742_v15 = vld [vmem:[%s33417_s0 + $0x1ec0] sm:$0xff]   ;;  %21754 = vst [vmem:[%s33418_s1 + $0x1ac0] sm:$0xff] %v25741_v14  ;;  %v25751_v24 = vld [vmem:[%s33417_s0 + $0x1ed0] sm:$0xff]   ;;  %21790 = vst [vmem:[%s33418_s1 + $0x1ad0] sm:$0xff] %v25750_v23 }
  0xcb   :  { %v25743_v16 = vld [vmem:[%s33417_s0 + $0x12c0] sm:$0xff]   ;;  %21758 = vst [vmem:[%s33418_s1 + $0x6c0] sm:$0xff] %v25742_v15  ;;  %v25752_v25 = vld [vmem:[%s33417_s0 + $0x12d0] sm:$0xff]   ;;  %21794 = vst [vmem:[%s33418_s1 + $0x6d0] sm:$0xff] %v25751_v24 }
  0xcc   :  { %v25744_v17 = vld [vmem:[%s33417_s0 + $0x6c0] sm:$0xff]   ;;  %21762 = vst [vmem:[%s33418_s1 + $0x12c0] sm:$0xff] %v25743_v16  ;;  %v25753_v26 = vld [vmem:[%s33417_s0 + $0x6d0] sm:$0xff]   ;;  %21798 = vst [vmem:[%s33418_s1 + $0x12d0] sm:$0xff] %v25752_v25 }
  0xcd   :  { %v25745_v18 = vld [vmem:[%s33417_s0 + $0x1ac0] sm:$0xff]   ;;  %21766 = vst [vmem:[%s33418_s1 + $0x1ec0] sm:$0xff] %v25744_v17  ;;  %v25754_v27 = vld [vmem:[%s33417_s0 + $0x1ad0] sm:$0xff]   ;;  %21802 = vst [vmem:[%s33418_s1 + $0x1ed0] sm:$0xff] %v25753_v26 }
  0xce   :  { %v25746_v19 = vld [vmem:[%s33417_s0 + $0xec0] sm:$0xff]   ;;  %21770 = vst [vmem:[%s33418_s1 + $0xac0] sm:$0xff] %v25745_v18  ;;  %v25755_v28 = vld [vmem:[%s33417_s0 + $0xed0] sm:$0xff]   ;;  %21806 = vst [vmem:[%s33418_s1 + $0xad0] sm:$0xff] %v25754_v27 }
  0xcf   :  { %v25747_v20 = vld [vmem:[%s33417_s0 + $0x2c0] sm:$0xff]   ;;  %21774 = vst [vmem:[%s33418_s1 + $0x16c0] sm:$0xff] %v25746_v19  ;;  %v25756_v29 = vld [vmem:[%s33417_s0 + $0x2d0] sm:$0xff]   ;;  %21810 = vst [vmem:[%s33418_s1 + $0x16d0] sm:$0xff] %v25755_v28 }
  0xd0   :  { %21778 = vst [vmem:[%s33418_s1 + $0x22c0] sm:$0xff] %v25747_v20  ;;  %v25757_v30 = vld [vmem:[%s33417_s0 + $0x22e0] sm:$0xff]   ;;  %21814 = vst [vmem:[%s33418_s1 + $0x22d0] sm:$0xff] %v25756_v29  ;;  %v25766_v39 = vld [vmem:[%s33417_s0 + $0x22f0] sm:$0xff]  }
  0xd1   :  { %v25758_v31 = vld [vmem:[%s33417_s0 + $0x16e0] sm:$0xff]   ;;  %21818 = vst [vmem:[%s33418_s1 + $0x2e0] sm:$0xff] %v25757_v30  ;;  %v25767_v40 = vld [vmem:[%s33417_s0 + $0x16f0] sm:$0xff]   ;;  %21854 = vst [vmem:[%s33418_s1 + $0x2f0] sm:$0xff] %v25766_v39 }
  0xd2   :  { %v25759_v32 = vld [vmem:[%s33417_s0 + $0xae0] sm:$0xff]   ;;  %21822 = vst [vmem:[%s33418_s1 + $0xee0] sm:$0xff] %v25758_v31  ;;  %v25768_v41 = vld [vmem:[%s33417_s0 + $0xaf0] sm:$0xff]   ;;  %21858 = vst [vmem:[%s33418_s1 + $0xef0] sm:$0xff] %v25767_v40 }
  0xd3   :  { %v25760_v33 = vld [vmem:[%s33417_s0 + $0x1ee0] sm:$0xff]   ;;  %21826 = vst [vmem:[%s33418_s1 + $0x1ae0] sm:$0xff] %v25759_v32  ;;  %v25769_v42 = vld [vmem:[%s33417_s0 + $0x1ef0] sm:$0xff]   ;;  %21862 = vst [vmem:[%s33418_s1 + $0x1af0] sm:$0xff] %v25768_v41 }
  0xd4   :  { %v25761_v34 = vld [vmem:[%s33417_s0 + $0x12e0] sm:$0xff]   ;;  %21830 = vst [vmem:[%s33418_s1 + $0x6e0] sm:$0xff] %v25760_v33  ;;  %v25770_v43 = vld [vmem:[%s33417_s0 + $0x12f0] sm:$0xff]   ;;  %21866 = vst [vmem:[%s33418_s1 + $0x6f0] sm:$0xff] %v25769_v42 }
  0xd5   :  { %v25762_v35 = vld [vmem:[%s33417_s0 + $0x6e0] sm:$0xff]   ;;  %21834 = vst [vmem:[%s33418_s1 + $0x12e0] sm:$0xff] %v25761_v34  ;;  %v25771_v44 = vld [vmem:[%s33417_s0 + $0x6f0] sm:$0xff]   ;;  %21870 = vst [vmem:[%s33418_s1 + $0x12f0] sm:$0xff] %v25770_v43 }
  0xd6   :  { %v25763_v36 = vld [vmem:[%s33417_s0 + $0x1ae0] sm:$0xff]   ;;  %21838 = vst [vmem:[%s33418_s1 + $0x1ee0] sm:$0xff] %v25762_v35  ;;  %v25772_v45 = vld [vmem:[%s33417_s0 + $0x1af0] sm:$0xff]   ;;  %21874 = vst [vmem:[%s33418_s1 + $0x1ef0] sm:$0xff] %v25771_v44 }
  0xd7   :  { %v25764_v37 = vld [vmem:[%s33417_s0 + $0xee0] sm:$0xff]   ;;  %21842 = vst [vmem:[%s33418_s1 + $0xae0] sm:$0xff] %v25763_v36  ;;  %v25773_v46 = vld [vmem:[%s33417_s0 + $0xef0] sm:$0xff]   ;;  %21878 = vst [vmem:[%s33418_s1 + $0xaf0] sm:$0xff] %v25772_v45 }
  0xd8   :  { %v25765_v38 = vld [vmem:[%s33417_s0 + $0x2e0] sm:$0xff]   ;;  %21846 = vst [vmem:[%s33418_s1 + $0x16e0] sm:$0xff] %v25764_v37  ;;  %v25774_v47 = vld [vmem:[%s33417_s0 + $0x2f0] sm:$0xff]   ;;  %21882 = vst [vmem:[%s33418_s1 + $0x16f0] sm:$0xff] %v25773_v46 }
  0xd9   :  { %21850 = vst [vmem:[%s33418_s1 + $0x22e0] sm:$0xff] %v25765_v38  ;;  %v25775_v48 = vld [vmem:[%s33417_s0 + $0x2300] sm:$0xff]   ;;  %21886 = vst [vmem:[%s33418_s1 + $0x22f0] sm:$0xff] %v25774_v47  ;;  %v25784_v57 = vld [vmem:[%s33417_s0 + $0x2310] sm:$0xff]  }
  0xda   :  { %v25776_v49 = vld [vmem:[%s33417_s0 + $0x1700] sm:$0xff]   ;;  %21890 = vst [vmem:[%s33418_s1 + $0x300] sm:$0xff] %v25775_v48  ;;  %v25785_v58 = vld [vmem:[%s33417_s0 + $0x1710] sm:$0xff]   ;;  %21926 = vst [vmem:[%s33418_s1 + $0x310] sm:$0xff] %v25784_v57 }
  0xdb   :  { %v25777_v50 = vld [vmem:[%s33417_s0 + $0xb00] sm:$0xff]   ;;  %21894 = vst [vmem:[%s33418_s1 + $0xf00] sm:$0xff] %v25776_v49  ;;  %v25786_v59 = vld [vmem:[%s33417_s0 + $0xb10] sm:$0xff]   ;;  %21930 = vst [vmem:[%s33418_s1 + $0xf10] sm:$0xff] %v25785_v58 }
  0xdc   :  { %v25778_v51 = vld [vmem:[%s33417_s0 + $0x1f00] sm:$0xff]   ;;  %21898 = vst [vmem:[%s33418_s1 + $0x1b00] sm:$0xff] %v25777_v50  ;;  %v25787_v60 = vld [vmem:[%s33417_s0 + $0x1f10] sm:$0xff]   ;;  %21934 = vst [vmem:[%s33418_s1 + $0x1b10] sm:$0xff] %v25786_v59 }
  0xdd   :  { %v25779_v52 = vld [vmem:[%s33417_s0 + $0x1300] sm:$0xff]   ;;  %21902 = vst [vmem:[%s33418_s1 + $0x700] sm:$0xff] %v25778_v51  ;;  %v25788_v61 = vld [vmem:[%s33417_s0 + $0x1310] sm:$0xff]   ;;  %21938 = vst [vmem:[%s33418_s1 + $0x710] sm:$0xff] %v25787_v60 }
  0xde   :  { %v25780_v53 = vld [vmem:[%s33417_s0 + $0x700] sm:$0xff]   ;;  %21906 = vst [vmem:[%s33418_s1 + $0x1300] sm:$0xff] %v25779_v52  ;;  %v25789_v62 = vld [vmem:[%s33417_s0 + $0x710] sm:$0xff]   ;;  %21942 = vst [vmem:[%s33418_s1 + $0x1310] sm:$0xff] %v25788_v61 }
  0xdf   :  { %v25781_v54 = vld [vmem:[%s33417_s0 + $0x1b00] sm:$0xff]   ;;  %21910 = vst [vmem:[%s33418_s1 + $0x1f00] sm:$0xff] %v25780_v53  ;;  %v25790_v63 = vld [vmem:[%s33417_s0 + $0x1b10] sm:$0xff]   ;;  %21946 = vst [vmem:[%s33418_s1 + $0x1f10] sm:$0xff] %v25789_v62 }
  0xe0   :  { %v25782_v55 = vld [vmem:[%s33417_s0 + $0xf00] sm:$0xff]   ;;  %21914 = vst [vmem:[%s33418_s1 + $0xb00] sm:$0xff] %v25781_v54  ;;  %v25791_v0 = vld [vmem:[%s33417_s0 + $0xf10] sm:$0xff]   ;;  %21950 = vst [vmem:[%s33418_s1 + $0xb10] sm:$0xff] %v25790_v63 }
  0xe1   :  { %v25783_v56 = vld [vmem:[%s33417_s0 + $0x300] sm:$0xff]   ;;  %21918 = vst [vmem:[%s33418_s1 + $0x1700] sm:$0xff] %v25782_v55  ;;  %v25792_v1 = vld [vmem:[%s33417_s0 + $0x310] sm:$0xff]   ;;  %21954 = vst [vmem:[%s33418_s1 + $0x1710] sm:$0xff] %v25791_v0 }
  0xe2   :  { %21922 = vst [vmem:[%s33418_s1 + $0x2300] sm:$0xff] %v25783_v56  ;;  %v25793_v2 = vld [vmem:[%s33417_s0 + $0x2320] sm:$0xff]   ;;  %21958 = vst [vmem:[%s33418_s1 + $0x2310] sm:$0xff] %v25792_v1  ;;  %v25802_v11 = vld [vmem:[%s33417_s0 + $0x2330] sm:$0xff]  }
  0xe3   :  { %v25794_v3 = vld [vmem:[%s33417_s0 + $0x1720] sm:$0xff]   ;;  %21962 = vst [vmem:[%s33418_s1 + $0x320] sm:$0xff] %v25793_v2  ;;  %v25803_v12 = vld [vmem:[%s33417_s0 + $0x1730] sm:$0xff]   ;;  %21998 = vst [vmem:[%s33418_s1 + $0x330] sm:$0xff] %v25802_v11 }
  0xe4   :  { %v25795_v4 = vld [vmem:[%s33417_s0 + $0xb20] sm:$0xff]   ;;  %21966 = vst [vmem:[%s33418_s1 + $0xf20] sm:$0xff] %v25794_v3  ;;  %v25804_v13 = vld [vmem:[%s33417_s0 + $0xb30] sm:$0xff]   ;;  %22002 = vst [vmem:[%s33418_s1 + $0xf30] sm:$0xff] %v25803_v12 }
  0xe5   :  { %v25796_v5 = vld [vmem:[%s33417_s0 + $0x1f20] sm:$0xff]   ;;  %21970 = vst [vmem:[%s33418_s1 + $0x1b20] sm:$0xff] %v25795_v4  ;;  %v25805_v14 = vld [vmem:[%s33417_s0 + $0x1f30] sm:$0xff]   ;;  %22006 = vst [vmem:[%s33418_s1 + $0x1b30] sm:$0xff] %v25804_v13 }
  0xe6   :  { %v25797_v6 = vld [vmem:[%s33417_s0 + $0x1320] sm:$0xff]   ;;  %21974 = vst [vmem:[%s33418_s1 + $0x720] sm:$0xff] %v25796_v5  ;;  %v25806_v15 = vld [vmem:[%s33417_s0 + $0x1330] sm:$0xff]   ;;  %22010 = vst [vmem:[%s33418_s1 + $0x730] sm:$0xff] %v25805_v14 }
  0xe7   :  { %v25798_v7 = vld [vmem:[%s33417_s0 + $0x720] sm:$0xff]   ;;  %21978 = vst [vmem:[%s33418_s1 + $0x1320] sm:$0xff] %v25797_v6  ;;  %v25807_v16 = vld [vmem:[%s33417_s0 + $0x730] sm:$0xff]   ;;  %22014 = vst [vmem:[%s33418_s1 + $0x1330] sm:$0xff] %v25806_v15 }
  0xe8   :  { %v25799_v8 = vld [vmem:[%s33417_s0 + $0x1b20] sm:$0xff]   ;;  %21982 = vst [vmem:[%s33418_s1 + $0x1f20] sm:$0xff] %v25798_v7  ;;  %v25808_v17 = vld [vmem:[%s33417_s0 + $0x1b30] sm:$0xff]   ;;  %22018 = vst [vmem:[%s33418_s1 + $0x1f30] sm:$0xff] %v25807_v16 }
  0xe9   :  { %v25800_v9 = vld [vmem:[%s33417_s0 + $0xf20] sm:$0xff]   ;;  %21986 = vst [vmem:[%s33418_s1 + $0xb20] sm:$0xff] %v25799_v8  ;;  %v25809_v18 = vld [vmem:[%s33417_s0 + $0xf30] sm:$0xff]   ;;  %22022 = vst [vmem:[%s33418_s1 + $0xb30] sm:$0xff] %v25808_v17 }
  0xea   :  { %v25801_v10 = vld [vmem:[%s33417_s0 + $0x320] sm:$0xff]   ;;  %21990 = vst [vmem:[%s33418_s1 + $0x1720] sm:$0xff] %v25800_v9  ;;  %v25810_v19 = vld [vmem:[%s33417_s0 + $0x330] sm:$0xff]   ;;  %22026 = vst [vmem:[%s33418_s1 + $0x1730] sm:$0xff] %v25809_v18 }
  0xeb   :  { %21994 = vst [vmem:[%s33418_s1 + $0x2320] sm:$0xff] %v25801_v10  ;;  %v25811_v20 = vld [vmem:[%s33417_s0 + $0x2340] sm:$0xff]   ;;  %22030 = vst [vmem:[%s33418_s1 + $0x2330] sm:$0xff] %v25810_v19  ;;  %v25820_v29 = vld [vmem:[%s33417_s0 + $0x2350] sm:$0xff]  }
  0xec   :  { %v25812_v21 = vld [vmem:[%s33417_s0 + $0x1740] sm:$0xff]   ;;  %22034 = vst [vmem:[%s33418_s1 + $0x340] sm:$0xff] %v25811_v20  ;;  %v25821_v30 = vld [vmem:[%s33417_s0 + $0x1750] sm:$0xff]   ;;  %22070 = vst [vmem:[%s33418_s1 + $0x350] sm:$0xff] %v25820_v29 }
  0xed   :  { %v25813_v22 = vld [vmem:[%s33417_s0 + $0xb40] sm:$0xff]   ;;  %22038 = vst [vmem:[%s33418_s1 + $0xf40] sm:$0xff] %v25812_v21  ;;  %v25822_v31 = vld [vmem:[%s33417_s0 + $0xb50] sm:$0xff]   ;;  %22074 = vst [vmem:[%s33418_s1 + $0xf50] sm:$0xff] %v25821_v30 }
  0xee   :  { %v25814_v23 = vld [vmem:[%s33417_s0 + $0x1f40] sm:$0xff]   ;;  %22042 = vst [vmem:[%s33418_s1 + $0x1b40] sm:$0xff] %v25813_v22  ;;  %v25823_v32 = vld [vmem:[%s33417_s0 + $0x1f50] sm:$0xff]   ;;  %22078 = vst [vmem:[%s33418_s1 + $0x1b50] sm:$0xff] %v25822_v31 }
  0xef   :  { %v25815_v24 = vld [vmem:[%s33417_s0 + $0x1340] sm:$0xff]   ;;  %22046 = vst [vmem:[%s33418_s1 + $0x740] sm:$0xff] %v25814_v23  ;;  %v25824_v33 = vld [vmem:[%s33417_s0 + $0x1350] sm:$0xff]   ;;  %22082 = vst [vmem:[%s33418_s1 + $0x750] sm:$0xff] %v25823_v32 }
  0xf0   :  { %v25816_v25 = vld [vmem:[%s33417_s0 + $0x740] sm:$0xff]   ;;  %22050 = vst [vmem:[%s33418_s1 + $0x1340] sm:$0xff] %v25815_v24  ;;  %v25825_v34 = vld [vmem:[%s33417_s0 + $0x750] sm:$0xff]   ;;  %22086 = vst [vmem:[%s33418_s1 + $0x1350] sm:$0xff] %v25824_v33 }
  0xf1   :  { %v25817_v26 = vld [vmem:[%s33417_s0 + $0x1b40] sm:$0xff]   ;;  %22054 = vst [vmem:[%s33418_s1 + $0x1f40] sm:$0xff] %v25816_v25  ;;  %v25826_v35 = vld [vmem:[%s33417_s0 + $0x1b50] sm:$0xff]   ;;  %22090 = vst [vmem:[%s33418_s1 + $0x1f50] sm:$0xff] %v25825_v34 }
  0xf2   :  { %v25818_v27 = vld [vmem:[%s33417_s0 + $0xf40] sm:$0xff]   ;;  %22058 = vst [vmem:[%s33418_s1 + $0xb40] sm:$0xff] %v25817_v26  ;;  %v25827_v36 = vld [vmem:[%s33417_s0 + $0xf50] sm:$0xff]   ;;  %22094 = vst [vmem:[%s33418_s1 + $0xb50] sm:$0xff] %v25826_v35 }
  0xf3   :  { %v25819_v28 = vld [vmem:[%s33417_s0 + $0x340] sm:$0xff]   ;;  %22062 = vst [vmem:[%s33418_s1 + $0x1740] sm:$0xff] %v25818_v27  ;;  %v25828_v37 = vld [vmem:[%s33417_s0 + $0x350] sm:$0xff]   ;;  %22098 = vst [vmem:[%s33418_s1 + $0x1750] sm:$0xff] %v25827_v36 }
  0xf4   :  { %22066 = vst [vmem:[%s33418_s1 + $0x2340] sm:$0xff] %v25819_v28  ;;  %v25829_v38 = vld [vmem:[%s33417_s0 + $0x2360] sm:$0xff]   ;;  %22102 = vst [vmem:[%s33418_s1 + $0x2350] sm:$0xff] %v25828_v37  ;;  %v25838_v47 = vld [vmem:[%s33417_s0 + $0x2370] sm:$0xff]  }
  0xf5   :  { %v25830_v39 = vld [vmem:[%s33417_s0 + $0x1760] sm:$0xff]   ;;  %22106 = vst [vmem:[%s33418_s1 + $0x360] sm:$0xff] %v25829_v38  ;;  %v25839_v48 = vld [vmem:[%s33417_s0 + $0x1770] sm:$0xff]   ;;  %22142 = vst [vmem:[%s33418_s1 + $0x370] sm:$0xff] %v25838_v47 }
  0xf6   :  { %v25831_v40 = vld [vmem:[%s33417_s0 + $0xb60] sm:$0xff]   ;;  %22110 = vst [vmem:[%s33418_s1 + $0xf60] sm:$0xff] %v25830_v39  ;;  %v25840_v49 = vld [vmem:[%s33417_s0 + $0xb70] sm:$0xff]   ;;  %22146 = vst [vmem:[%s33418_s1 + $0xf70] sm:$0xff] %v25839_v48 }
  0xf7   :  { %v25832_v41 = vld [vmem:[%s33417_s0 + $0x1f60] sm:$0xff]   ;;  %22114 = vst [vmem:[%s33418_s1 + $0x1b60] sm:$0xff] %v25831_v40  ;;  %v25841_v50 = vld [vmem:[%s33417_s0 + $0x1f70] sm:$0xff]   ;;  %22150 = vst [vmem:[%s33418_s1 + $0x1b70] sm:$0xff] %v25840_v49 }
  0xf8   :  { %v25833_v42 = vld [vmem:[%s33417_s0 + $0x1360] sm:$0xff]   ;;  %22118 = vst [vmem:[%s33418_s1 + $0x760] sm:$0xff] %v25832_v41  ;;  %v25842_v51 = vld [vmem:[%s33417_s0 + $0x1370] sm:$0xff]   ;;  %22154 = vst [vmem:[%s33418_s1 + $0x770] sm:$0xff] %v25841_v50 }
  0xf9   :  { %v25834_v43 = vld [vmem:[%s33417_s0 + $0x760] sm:$0xff]   ;;  %22122 = vst [vmem:[%s33418_s1 + $0x1360] sm:$0xff] %v25833_v42  ;;  %v25843_v52 = vld [vmem:[%s33417_s0 + $0x770] sm:$0xff]   ;;  %22158 = vst [vmem:[%s33418_s1 + $0x1370] sm:$0xff] %v25842_v51 }
  0xfa   :  { %v25835_v44 = vld [vmem:[%s33417_s0 + $0x1b60] sm:$0xff]   ;;  %22126 = vst [vmem:[%s33418_s1 + $0x1f60] sm:$0xff] %v25834_v43  ;;  %v25844_v53 = vld [vmem:[%s33417_s0 + $0x1b70] sm:$0xff]   ;;  %22162 = vst [vmem:[%s33418_s1 + $0x1f70] sm:$0xff] %v25843_v52 }
  0xfb   :  { %v25836_v45 = vld [vmem:[%s33417_s0 + $0xf60] sm:$0xff]   ;;  %22130 = vst [vmem:[%s33418_s1 + $0xb60] sm:$0xff] %v25835_v44  ;;  %v25845_v54 = vld [vmem:[%s33417_s0 + $0xf70] sm:$0xff]   ;;  %22166 = vst [vmem:[%s33418_s1 + $0xb70] sm:$0xff] %v25844_v53 }
  0xfc   :  { %v25837_v46 = vld [vmem:[%s33417_s0 + $0x360] sm:$0xff]   ;;  %22134 = vst [vmem:[%s33418_s1 + $0x1760] sm:$0xff] %v25836_v45  ;;  %v25846_v55 = vld [vmem:[%s33417_s0 + $0x370] sm:$0xff]   ;;  %22170 = vst [vmem:[%s33418_s1 + $0x1770] sm:$0xff] %v25845_v54 }
  0xfd   :  { %22138 = vst [vmem:[%s33418_s1 + $0x2360] sm:$0xff] %v25837_v46  ;;  %v25847_v56 = vld [vmem:[%s33417_s0 + $0x2380] sm:$0xff]   ;;  %22174 = vst [vmem:[%s33418_s1 + $0x2370] sm:$0xff] %v25846_v55  ;;  %v25856_v1 = vld [vmem:[%s33417_s0 + $0x2390] sm:$0xff]  }
  0xfe   :  { %v25848_v57 = vld [vmem:[%s33417_s0 + $0x1780] sm:$0xff]   ;;  %22178 = vst [vmem:[%s33418_s1 + $0x380] sm:$0xff] %v25847_v56  ;;  %v25857_v2 = vld [vmem:[%s33417_s0 + $0x1790] sm:$0xff]   ;;  %22214 = vst [vmem:[%s33418_s1 + $0x390] sm:$0xff] %v25856_v1 }
  0xff   :  { %v25849_v58 = vld [vmem:[%s33417_s0 + $0xb80] sm:$0xff]   ;;  %22182 = vst [vmem:[%s33418_s1 + $0xf80] sm:$0xff] %v25848_v57  ;;  %v25858_v3 = vld [vmem:[%s33417_s0 + $0xb90] sm:$0xff]   ;;  %22218 = vst [vmem:[%s33418_s1 + $0xf90] sm:$0xff] %v25857_v2 }
 0x100   :  { %v25850_v59 = vld [vmem:[%s33417_s0 + $0x1f80] sm:$0xff]   ;;  %22186 = vst [vmem:[%s33418_s1 + $0x1b80] sm:$0xff] %v25849_v58  ;;  %v25859_v4 = vld [vmem:[%s33417_s0 + $0x1f90] sm:$0xff]   ;;  %22222 = vst [vmem:[%s33418_s1 + $0x1b90] sm:$0xff] %v25858_v3 }
 0x101   :  { %v25851_v60 = vld [vmem:[%s33417_s0 + $0x1380] sm:$0xff]   ;;  %22190 = vst [vmem:[%s33418_s1 + $0x780] sm:$0xff] %v25850_v59  ;;  %v25860_v5 = vld [vmem:[%s33417_s0 + $0x1390] sm:$0xff]   ;;  %22226 = vst [vmem:[%s33418_s1 + $0x790] sm:$0xff] %v25859_v4 }
 0x102   :  { %v25852_v61 = vld [vmem:[%s33417_s0 + $0x780] sm:$0xff]   ;;  %22194 = vst [vmem:[%s33418_s1 + $0x1380] sm:$0xff] %v25851_v60  ;;  %v25861_v6 = vld [vmem:[%s33417_s0 + $0x790] sm:$0xff]   ;;  %22230 = vst [vmem:[%s33418_s1 + $0x1390] sm:$0xff] %v25860_v5 }
 0x103   :  { %v25853_v62 = vld [vmem:[%s33417_s0 + $0x1b80] sm:$0xff]   ;;  %22198 = vst [vmem:[%s33418_s1 + $0x1f80] sm:$0xff] %v25852_v61  ;;  %v25862_v7 = vld [vmem:[%s33417_s0 + $0x1b90] sm:$0xff]   ;;  %22234 = vst [vmem:[%s33418_s1 + $0x1f90] sm:$0xff] %v25861_v6 }
 0x104   :  { %v25854_v63 = vld [vmem:[%s33417_s0 + $0xf80] sm:$0xff]   ;;  %22202 = vst [vmem:[%s33418_s1 + $0xb80] sm:$0xff] %v25853_v62  ;;  %v25863_v8 = vld [vmem:[%s33417_s0 + $0xf90] sm:$0xff]   ;;  %22238 = vst [vmem:[%s33418_s1 + $0xb90] sm:$0xff] %v25862_v7 }
 0x105   :  { %v25855_v0 = vld [vmem:[%s33417_s0 + $0x380] sm:$0xff]   ;;  %22206 = vst [vmem:[%s33418_s1 + $0x1780] sm:$0xff] %v25854_v63  ;;  %v25864_v9 = vld [vmem:[%s33417_s0 + $0x390] sm:$0xff]   ;;  %22242 = vst [vmem:[%s33418_s1 + $0x1790] sm:$0xff] %v25863_v8 }
 0x106   :  { %22210 = vst [vmem:[%s33418_s1 + $0x2380] sm:$0xff] %v25855_v0  ;;  %v25865_v10 = vld [vmem:[%s33417_s0 + $0x23a0] sm:$0xff]   ;;  %22246 = vst [vmem:[%s33418_s1 + $0x2390] sm:$0xff] %v25864_v9  ;;  %v25874_v19 = vld [vmem:[%s33417_s0 + $0x23b0] sm:$0xff]  }
 0x107   :  { %v25866_v11 = vld [vmem:[%s33417_s0 + $0x17a0] sm:$0xff]   ;;  %22250 = vst [vmem:[%s33418_s1 + $0x3a0] sm:$0xff] %v25865_v10  ;;  %v25875_v20 = vld [vmem:[%s33417_s0 + $0x17b0] sm:$0xff]   ;;  %22286 = vst [vmem:[%s33418_s1 + $0x3b0] sm:$0xff] %v25874_v19 }
 0x108   :  { %v25867_v12 = vld [vmem:[%s33417_s0 + $0xba0] sm:$0xff]   ;;  %22254 = vst [vmem:[%s33418_s1 + $0xfa0] sm:$0xff] %v25866_v11  ;;  %v25876_v21 = vld [vmem:[%s33417_s0 + $0xbb0] sm:$0xff]   ;;  %22290 = vst [vmem:[%s33418_s1 + $0xfb0] sm:$0xff] %v25875_v20 }
 0x109   :  { %v25868_v13 = vld [vmem:[%s33417_s0 + $0x1fa0] sm:$0xff]   ;;  %22258 = vst [vmem:[%s33418_s1 + $0x1ba0] sm:$0xff] %v25867_v12  ;;  %v25877_v22 = vld [vmem:[%s33417_s0 + $0x1fb0] sm:$0xff]   ;;  %22294 = vst [vmem:[%s33418_s1 + $0x1bb0] sm:$0xff] %v25876_v21 }
 0x10a   :  { %v25869_v14 = vld [vmem:[%s33417_s0 + $0x13a0] sm:$0xff]   ;;  %22262 = vst [vmem:[%s33418_s1 + $0x7a0] sm:$0xff] %v25868_v13  ;;  %v25878_v23 = vld [vmem:[%s33417_s0 + $0x13b0] sm:$0xff]   ;;  %22298 = vst [vmem:[%s33418_s1 + $0x7b0] sm:$0xff] %v25877_v22 }
 0x10b   :  { %v25870_v15 = vld [vmem:[%s33417_s0 + $0x7a0] sm:$0xff]   ;;  %22266 = vst [vmem:[%s33418_s1 + $0x13a0] sm:$0xff] %v25869_v14  ;;  %v25879_v24 = vld [vmem:[%s33417_s0 + $0x7b0] sm:$0xff]   ;;  %22302 = vst [vmem:[%s33418_s1 + $0x13b0] sm:$0xff] %v25878_v23 }
 0x10c   :  { %v25871_v16 = vld [vmem:[%s33417_s0 + $0x1ba0] sm:$0xff]   ;;  %22270 = vst [vmem:[%s33418_s1 + $0x1fa0] sm:$0xff] %v25870_v15  ;;  %v25880_v25 = vld [vmem:[%s33417_s0 + $0x1bb0] sm:$0xff]   ;;  %22306 = vst [vmem:[%s33418_s1 + $0x1fb0] sm:$0xff] %v25879_v24 }
 0x10d   :  { %v25872_v17 = vld [vmem:[%s33417_s0 + $0xfa0] sm:$0xff]   ;;  %22274 = vst [vmem:[%s33418_s1 + $0xba0] sm:$0xff] %v25871_v16  ;;  %v25881_v26 = vld [vmem:[%s33417_s0 + $0xfb0] sm:$0xff]   ;;  %22310 = vst [vmem:[%s33418_s1 + $0xbb0] sm:$0xff] %v25880_v25 }
 0x10e   :  { %v25873_v18 = vld [vmem:[%s33417_s0 + $0x3a0] sm:$0xff]   ;;  %22278 = vst [vmem:[%s33418_s1 + $0x17a0] sm:$0xff] %v25872_v17  ;;  %v25882_v27 = vld [vmem:[%s33417_s0 + $0x3b0] sm:$0xff]   ;;  %22314 = vst [vmem:[%s33418_s1 + $0x17b0] sm:$0xff] %v25881_v26 }
 0x10f   :  { %22282 = vst [vmem:[%s33418_s1 + $0x23a0] sm:$0xff] %v25873_v18  ;;  %v25883_v28 = vld [vmem:[%s33417_s0 + $0x23c0] sm:$0xff]   ;;  %22318 = vst [vmem:[%s33418_s1 + $0x23b0] sm:$0xff] %v25882_v27  ;;  %v25892_v37 = vld [vmem:[%s33417_s0 + $0x23d0] sm:$0xff]  }
 0x110   :  { %v25884_v29 = vld [vmem:[%s33417_s0 + $0x17c0] sm:$0xff]   ;;  %22322 = vst [vmem:[%s33418_s1 + $0x3c0] sm:$0xff] %v25883_v28  ;;  %v25893_v38 = vld [vmem:[%s33417_s0 + $0x17d0] sm:$0xff]   ;;  %22358 = vst [vmem:[%s33418_s1 + $0x3d0] sm:$0xff] %v25892_v37 }
 0x111   :  { %v25885_v30 = vld [vmem:[%s33417_s0 + $0xbc0] sm:$0xff]   ;;  %22326 = vst [vmem:[%s33418_s1 + $0xfc0] sm:$0xff] %v25884_v29  ;;  %v25894_v39 = vld [vmem:[%s33417_s0 + $0xbd0] sm:$0xff]   ;;  %22362 = vst [vmem:[%s33418_s1 + $0xfd0] sm:$0xff] %v25893_v38 }
 0x112   :  { %v25886_v31 = vld [vmem:[%s33417_s0 + $0x1fc0] sm:$0xff]   ;;  %22330 = vst [vmem:[%s33418_s1 + $0x1bc0] sm:$0xff] %v25885_v30  ;;  %v25895_v40 = vld [vmem:[%s33417_s0 + $0x1fd0] sm:$0xff]   ;;  %22366 = vst [vmem:[%s33418_s1 + $0x1bd0] sm:$0xff] %v25894_v39 }
 0x113   :  { %v25887_v32 = vld [vmem:[%s33417_s0 + $0x13c0] sm:$0xff]   ;;  %22334 = vst [vmem:[%s33418_s1 + $0x7c0] sm:$0xff] %v25886_v31  ;;  %v25896_v41 = vld [vmem:[%s33417_s0 + $0x13d0] sm:$0xff]   ;;  %22370 = vst [vmem:[%s33418_s1 + $0x7d0] sm:$0xff] %v25895_v40 }
 0x114   :  { %v25888_v33 = vld [vmem:[%s33417_s0 + $0x7c0] sm:$0xff]   ;;  %22338 = vst [vmem:[%s33418_s1 + $0x13c0] sm:$0xff] %v25887_v32  ;;  %v25897_v42 = vld [vmem:[%s33417_s0 + $0x7d0] sm:$0xff]   ;;  %22374 = vst [vmem:[%s33418_s1 + $0x13d0] sm:$0xff] %v25896_v41 }
 0x115   :  { %v25889_v34 = vld [vmem:[%s33417_s0 + $0x1bc0] sm:$0xff]   ;;  %22342 = vst [vmem:[%s33418_s1 + $0x1fc0] sm:$0xff] %v25888_v33  ;;  %v25898_v43 = vld [vmem:[%s33417_s0 + $0x1bd0] sm:$0xff]   ;;  %22378 = vst [vmem:[%s33418_s1 + $0x1fd0] sm:$0xff] %v25897_v42 }
 0x116   :  { %v25890_v35 = vld [vmem:[%s33417_s0 + $0xfc0] sm:$0xff]   ;;  %22346 = vst [vmem:[%s33418_s1 + $0xbc0] sm:$0xff] %v25889_v34  ;;  %v25899_v44 = vld [vmem:[%s33417_s0 + $0xfd0] sm:$0xff]   ;;  %22382 = vst [vmem:[%s33418_s1 + $0xbd0] sm:$0xff] %v25898_v43 }
 0x117   :  { %v25891_v36 = vld [vmem:[%s33417_s0 + $0x3c0] sm:$0xff]   ;;  %22350 = vst [vmem:[%s33418_s1 + $0x17c0] sm:$0xff] %v25890_v35  ;;  %v25900_v45 = vld [vmem:[%s33417_s0 + $0x3d0] sm:$0xff]   ;;  %22386 = vst [vmem:[%s33418_s1 + $0x17d0] sm:$0xff] %v25899_v44 }
 0x118   :  { %22354 = vst [vmem:[%s33418_s1 + $0x23c0] sm:$0xff] %v25891_v36  ;;  %v25901_v46 = vld [vmem:[%s33417_s0 + $0x23e0] sm:$0xff]   ;;  %22390 = vst [vmem:[%s33418_s1 + $0x23d0] sm:$0xff] %v25900_v45  ;;  %v25910_v55 = vld [vmem:[%s33417_s0 + $0x23f0] sm:$0xff]  }
 0x119   :  { %v25902_v47 = vld [vmem:[%s33417_s0 + $0x17e0] sm:$0xff]   ;;  %22394 = vst [vmem:[%s33418_s1 + $0x3e0] sm:$0xff] %v25901_v46  ;;  %v25911_v56 = vld [vmem:[%s33417_s0 + $0x17f0] sm:$0xff]   ;;  %22430 = vst [vmem:[%s33418_s1 + $0x3f0] sm:$0xff] %v25910_v55 }
 0x11a   :  { %v25903_v48 = vld [vmem:[%s33417_s0 + $0xbe0] sm:$0xff]   ;;  %22398 = vst [vmem:[%s33418_s1 + $0xfe0] sm:$0xff] %v25902_v47  ;;  %v25912_v57 = vld [vmem:[%s33417_s0 + $0xbf0] sm:$0xff]   ;;  %22434 = vst [vmem:[%s33418_s1 + $0xff0] sm:$0xff] %v25911_v56 }
 0x11b   :  { %v25904_v49 = vld [vmem:[%s33417_s0 + $0x1fe0] sm:$0xff]   ;;  %22402 = vst [vmem:[%s33418_s1 + $0x1be0] sm:$0xff] %v25903_v48  ;;  %v25913_v58 = vld [vmem:[%s33417_s0 + $0x1ff0] sm:$0xff]   ;;  %22438 = vst [vmem:[%s33418_s1 + $0x1bf0] sm:$0xff] %v25912_v57 }
 0x11c   :  { %v25905_v50 = vld [vmem:[%s33417_s0 + $0x13e0] sm:$0xff]   ;;  %22406 = vst [vmem:[%s33418_s1 + $0x7e0] sm:$0xff] %v25904_v49  ;;  %v25914_v59 = vld [vmem:[%s33417_s0 + $0x13f0] sm:$0xff]   ;;  %22442 = vst [vmem:[%s33418_s1 + $0x7f0] sm:$0xff] %v25913_v58 }
 0x11d   :  { %v25906_v51 = vld [vmem:[%s33417_s0 + $0x7e0] sm:$0xff]   ;;  %22410 = vst [vmem:[%s33418_s1 + $0x13e0] sm:$0xff] %v25905_v50  ;;  %v25915_v60 = vld [vmem:[%s33417_s0 + $0x7f0] sm:$0xff]   ;;  %22446 = vst [vmem:[%s33418_s1 + $0x13f0] sm:$0xff] %v25914_v59 }
 0x11e   :  { %v25907_v52 = vld [vmem:[%s33417_s0 + $0x1be0] sm:$0xff]   ;;  %22414 = vst [vmem:[%s33418_s1 + $0x1fe0] sm:$0xff] %v25906_v51  ;;  %v25916_v61 = vld [vmem:[%s33417_s0 + $0x1bf0] sm:$0xff]   ;;  %22450 = vst [vmem:[%s33418_s1 + $0x1ff0] sm:$0xff] %v25915_v60 }
 0x11f   :  { %v25908_v53 = vld [vmem:[%s33417_s0 + $0xfe0] sm:$0xff]   ;;  %22418 = vst [vmem:[%s33418_s1 + $0xbe0] sm:$0xff] %v25907_v52  ;;  %v25917_v62 = vld [vmem:[%s33417_s0 + $0xff0] sm:$0xff]   ;;  %22454 = vst [vmem:[%s33418_s1 + $0xbf0] sm:$0xff] %v25916_v61 }
 0x120   :  { %v25909_v54 = vld [vmem:[%s33417_s0 + $0x3e0] sm:$0xff]   ;;  %22422 = vst [vmem:[%s33418_s1 + $0x17e0] sm:$0xff] %v25908_v53  ;;  %v25918_v63 = vld [vmem:[%s33417_s0 + $0x3f0] sm:$0xff]   ;;  %22458 = vst [vmem:[%s33418_s1 + $0x17f0] sm:$0xff] %v25917_v62 }
 0x121   :  { %22426 = vst [vmem:[%s33418_s1 + $0x23e0] sm:$0xff] %v25909_v54  ;;  %22462 = vst [vmem:[%s33418_s1 + $0x23f0] sm:$0xff] %v25918_v63  ;;  %v25919_v0 = vld [vmem:[%s33417_s0 + $0x2008] sm:$0xff]   ;;  %v25928_v9 = vld [vmem:[%s33417_s0 + $0x2018] sm:$0xff]  }
 0x122   :  { %v25920_v1 = vld [vmem:[%s33417_s0 + $0x1408] sm:$0xff]   ;;  %23042 = vst [vmem:[%s33418_s1 + $0x8] sm:$0xff] %v25919_v0  ;;  %v25929_v10 = vld [vmem:[%s33417_s0 + $0x1418] sm:$0xff]   ;;  %23078 = vst [vmem:[%s33418_s1 + $0x18] sm:$0xff] %v25928_v9 }
 0x123   :  { %v25921_v2 = vld [vmem:[%s33417_s0 + $0x808] sm:$0xff]   ;;  %23046 = vst [vmem:[%s33418_s1 + $0xc08] sm:$0xff] %v25920_v1  ;;  %v25930_v11 = vld [vmem:[%s33417_s0 + $0x818] sm:$0xff]   ;;  %23082 = vst [vmem:[%s33418_s1 + $0xc18] sm:$0xff] %v25929_v10 }
 0x124   :  { %v25922_v3 = vld [vmem:[%s33417_s0 + $0x1c08] sm:$0xff]   ;;  %23050 = vst [vmem:[%s33418_s1 + $0x1808] sm:$0xff] %v25921_v2  ;;  %v25931_v12 = vld [vmem:[%s33417_s0 + $0x1c18] sm:$0xff]   ;;  %23086 = vst [vmem:[%s33418_s1 + $0x1818] sm:$0xff] %v25930_v11 }
 0x125   :  { %v25923_v4 = vld [vmem:[%s33417_s0 + $0x1008] sm:$0xff]   ;;  %23054 = vst [vmem:[%s33418_s1 + $0x408] sm:$0xff] %v25922_v3  ;;  %v25932_v13 = vld [vmem:[%s33417_s0 + $0x1018] sm:$0xff]   ;;  %23090 = vst [vmem:[%s33418_s1 + $0x418] sm:$0xff] %v25931_v12 }
 0x126   :  { %v25924_v5 = vld [vmem:[%s33417_s0 + $0x408] sm:$0xff]   ;;  %23058 = vst [vmem:[%s33418_s1 + $0x1008] sm:$0xff] %v25923_v4  ;;  %v25933_v14 = vld [vmem:[%s33417_s0 + $0x418] sm:$0xff]   ;;  %23094 = vst [vmem:[%s33418_s1 + $0x1018] sm:$0xff] %v25932_v13 }
 0x127   :  { %v25925_v6 = vld [vmem:[%s33417_s0 + $0x1808] sm:$0xff]   ;;  %23062 = vst [vmem:[%s33418_s1 + $0x1c08] sm:$0xff] %v25924_v5  ;;  %v25934_v15 = vld [vmem:[%s33417_s0 + $0x1818] sm:$0xff]   ;;  %23098 = vst [vmem:[%s33418_s1 + $0x1c18] sm:$0xff] %v25933_v14 }
 0x128   :  { %v25926_v7 = vld [vmem:[%s33417_s0 + $0xc08] sm:$0xff]   ;;  %23066 = vst [vmem:[%s33418_s1 + $0x808] sm:$0xff] %v25925_v6  ;;  %v25935_v16 = vld [vmem:[%s33417_s0 + $0xc18] sm:$0xff]   ;;  %23102 = vst [vmem:[%s33418_s1 + $0x818] sm:$0xff] %v25934_v15 }
 0x129   :  { %v25927_v8 = vld [vmem:[%s33417_s0 + $0x8] sm:$0xff]   ;;  %23070 = vst [vmem:[%s33418_s1 + $0x1408] sm:$0xff] %v25926_v7  ;;  %v25936_v17 = vld [vmem:[%s33417_s0 + $0x18] sm:$0xff]   ;;  %23106 = vst [vmem:[%s33418_s1 + $0x1418] sm:$0xff] %v25935_v16 }
 0x12a   :  { %23074 = vst [vmem:[%s33418_s1 + $0x2008] sm:$0xff] %v25927_v8  ;;  %v25937_v18 = vld [vmem:[%s33417_s0 + $0x2028] sm:$0xff]   ;;  %23110 = vst [vmem:[%s33418_s1 + $0x2018] sm:$0xff] %v25936_v17  ;;  %v25946_v27 = vld [vmem:[%s33417_s0 + $0x2038] sm:$0xff]  }
 0x12b   :  { %v25938_v19 = vld [vmem:[%s33417_s0 + $0x1428] sm:$0xff]   ;;  %23114 = vst [vmem:[%s33418_s1 + $0x28] sm:$0xff] %v25937_v18  ;;  %v25947_v28 = vld [vmem:[%s33417_s0 + $0x1438] sm:$0xff]   ;;  %23150 = vst [vmem:[%s33418_s1 + $0x38] sm:$0xff] %v25946_v27 }
 0x12c   :  { %v25939_v20 = vld [vmem:[%s33417_s0 + $0x828] sm:$0xff]   ;;  %23118 = vst [vmem:[%s33418_s1 + $0xc28] sm:$0xff] %v25938_v19  ;;  %v25948_v29 = vld [vmem:[%s33417_s0 + $0x838] sm:$0xff]   ;;  %23154 = vst [vmem:[%s33418_s1 + $0xc38] sm:$0xff] %v25947_v28 }
 0x12d   :  { %v25940_v21 = vld [vmem:[%s33417_s0 + $0x1c28] sm:$0xff]   ;;  %23122 = vst [vmem:[%s33418_s1 + $0x1828] sm:$0xff] %v25939_v20  ;;  %v25949_v30 = vld [vmem:[%s33417_s0 + $0x1c38] sm:$0xff]   ;;  %23158 = vst [vmem:[%s33418_s1 + $0x1838] sm:$0xff] %v25948_v29 }
 0x12e   :  { %v25941_v22 = vld [vmem:[%s33417_s0 + $0x1028] sm:$0xff]   ;;  %23126 = vst [vmem:[%s33418_s1 + $0x428] sm:$0xff] %v25940_v21  ;;  %v25950_v31 = vld [vmem:[%s33417_s0 + $0x1038] sm:$0xff]   ;;  %23162 = vst [vmem:[%s33418_s1 + $0x438] sm:$0xff] %v25949_v30 }
 0x12f   :  { %v25942_v23 = vld [vmem:[%s33417_s0 + $0x428] sm:$0xff]   ;;  %23130 = vst [vmem:[%s33418_s1 + $0x1028] sm:$0xff] %v25941_v22  ;;  %v25951_v32 = vld [vmem:[%s33417_s0 + $0x438] sm:$0xff]   ;;  %23166 = vst [vmem:[%s33418_s1 + $0x1038] sm:$0xff] %v25950_v31 }
 0x130   :  { %v25943_v24 = vld [vmem:[%s33417_s0 + $0x1828] sm:$0xff]   ;;  %23134 = vst [vmem:[%s33418_s1 + $0x1c28] sm:$0xff] %v25942_v23  ;;  %v25952_v33 = vld [vmem:[%s33417_s0 + $0x1838] sm:$0xff]   ;;  %23170 = vst [vmem:[%s33418_s1 + $0x1c38] sm:$0xff] %v25951_v32 }
 0x131   :  { %v25944_v25 = vld [vmem:[%s33417_s0 + $0xc28] sm:$0xff]   ;;  %23138 = vst [vmem:[%s33418_s1 + $0x828] sm:$0xff] %v25943_v24  ;;  %v25953_v34 = vld [vmem:[%s33417_s0 + $0xc38] sm:$0xff]   ;;  %23174 = vst [vmem:[%s33418_s1 + $0x838] sm:$0xff] %v25952_v33 }
 0x132   :  { %v25945_v26 = vld [vmem:[%s33417_s0 + $0x28] sm:$0xff]   ;;  %23142 = vst [vmem:[%s33418_s1 + $0x1428] sm:$0xff] %v25944_v25  ;;  %v25954_v35 = vld [vmem:[%s33417_s0 + $0x38] sm:$0xff]   ;;  %23178 = vst [vmem:[%s33418_s1 + $0x1438] sm:$0xff] %v25953_v34 }
 0x133   :  { %23146 = vst [vmem:[%s33418_s1 + $0x2028] sm:$0xff] %v25945_v26  ;;  %v25955_v36 = vld [vmem:[%s33417_s0 + $0x2048] sm:$0xff]   ;;  %23182 = vst [vmem:[%s33418_s1 + $0x2038] sm:$0xff] %v25954_v35  ;;  %v25964_v45 = vld [vmem:[%s33417_s0 + $0x2058] sm:$0xff]  }
 0x134   :  { %v25956_v37 = vld [vmem:[%s33417_s0 + $0x1448] sm:$0xff]   ;;  %23186 = vst [vmem:[%s33418_s1 + $0x48] sm:$0xff] %v25955_v36  ;;  %v25965_v46 = vld [vmem:[%s33417_s0 + $0x1458] sm:$0xff]   ;;  %23222 = vst [vmem:[%s33418_s1 + $0x58] sm:$0xff] %v25964_v45 }
 0x135   :  { %v25957_v38 = vld [vmem:[%s33417_s0 + $0x848] sm:$0xff]   ;;  %23190 = vst [vmem:[%s33418_s1 + $0xc48] sm:$0xff] %v25956_v37  ;;  %v25966_v47 = vld [vmem:[%s33417_s0 + $0x858] sm:$0xff]   ;;  %23226 = vst [vmem:[%s33418_s1 + $0xc58] sm:$0xff] %v25965_v46 }
 0x136   :  { %v25958_v39 = vld [vmem:[%s33417_s0 + $0x1c48] sm:$0xff]   ;;  %23194 = vst [vmem:[%s33418_s1 + $0x1848] sm:$0xff] %v25957_v38  ;;  %v25967_v48 = vld [vmem:[%s33417_s0 + $0x1c58] sm:$0xff]   ;;  %23230 = vst [vmem:[%s33418_s1 + $0x1858] sm:$0xff] %v25966_v47 }
 0x137   :  { %v25959_v40 = vld [vmem:[%s33417_s0 + $0x1048] sm:$0xff]   ;;  %23198 = vst [vmem:[%s33418_s1 + $0x448] sm:$0xff] %v25958_v39  ;;  %v25968_v49 = vld [vmem:[%s33417_s0 + $0x1058] sm:$0xff]   ;;  %23234 = vst [vmem:[%s33418_s1 + $0x458] sm:$0xff] %v25967_v48 }
 0x138   :  { %v25960_v41 = vld [vmem:[%s33417_s0 + $0x448] sm:$0xff]   ;;  %23202 = vst [vmem:[%s33418_s1 + $0x1048] sm:$0xff] %v25959_v40  ;;  %v25969_v50 = vld [vmem:[%s33417_s0 + $0x458] sm:$0xff]   ;;  %23238 = vst [vmem:[%s33418_s1 + $0x1058] sm:$0xff] %v25968_v49 }
 0x139   :  { %v25961_v42 = vld [vmem:[%s33417_s0 + $0x1848] sm:$0xff]   ;;  %23206 = vst [vmem:[%s33418_s1 + $0x1c48] sm:$0xff] %v25960_v41  ;;  %v25970_v51 = vld [vmem:[%s33417_s0 + $0x1858] sm:$0xff]   ;;  %23242 = vst [vmem:[%s33418_s1 + $0x1c58] sm:$0xff] %v25969_v50 }
 0x13a   :  { %v25962_v43 = vld [vmem:[%s33417_s0 + $0xc48] sm:$0xff]   ;;  %23210 = vst [vmem:[%s33418_s1 + $0x848] sm:$0xff] %v25961_v42  ;;  %v25971_v52 = vld [vmem:[%s33417_s0 + $0xc58] sm:$0xff]   ;;  %23246 = vst [vmem:[%s33418_s1 + $0x858] sm:$0xff] %v25970_v51 }
 0x13b   :  { %v25963_v44 = vld [vmem:[%s33417_s0 + $0x48] sm:$0xff]   ;;  %23214 = vst [vmem:[%s33418_s1 + $0x1448] sm:$0xff] %v25962_v43  ;;  %v25972_v53 = vld [vmem:[%s33417_s0 + $0x58] sm:$0xff]   ;;  %23250 = vst [vmem:[%s33418_s1 + $0x1458] sm:$0xff] %v25971_v52 }
 0x13c   :  { %23218 = vst [vmem:[%s33418_s1 + $0x2048] sm:$0xff] %v25963_v44  ;;  %v25973_v54 = vld [vmem:[%s33417_s0 + $0x2068] sm:$0xff]   ;;  %23254 = vst [vmem:[%s33418_s1 + $0x2058] sm:$0xff] %v25972_v53  ;;  %v25982_v63 = vld [vmem:[%s33417_s0 + $0x2078] sm:$0xff]  }
 0x13d   :  { %v25974_v55 = vld [vmem:[%s33417_s0 + $0x1468] sm:$0xff]   ;;  %23258 = vst [vmem:[%s33418_s1 + $0x68] sm:$0xff] %v25973_v54  ;;  %v25983_v0 = vld [vmem:[%s33417_s0 + $0x1478] sm:$0xff]   ;;  %23294 = vst [vmem:[%s33418_s1 + $0x78] sm:$0xff] %v25982_v63 }
 0x13e   :  { %v25975_v56 = vld [vmem:[%s33417_s0 + $0x868] sm:$0xff]   ;;  %23262 = vst [vmem:[%s33418_s1 + $0xc68] sm:$0xff] %v25974_v55  ;;  %v25984_v1 = vld [vmem:[%s33417_s0 + $0x878] sm:$0xff]   ;;  %23298 = vst [vmem:[%s33418_s1 + $0xc78] sm:$0xff] %v25983_v0 }
 0x13f   :  { %v25976_v57 = vld [vmem:[%s33417_s0 + $0x1c68] sm:$0xff]   ;;  %23266 = vst [vmem:[%s33418_s1 + $0x1868] sm:$0xff] %v25975_v56  ;;  %v25985_v2 = vld [vmem:[%s33417_s0 + $0x1c78] sm:$0xff]   ;;  %23302 = vst [vmem:[%s33418_s1 + $0x1878] sm:$0xff] %v25984_v1 }
 0x140   :  { %v25977_v58 = vld [vmem:[%s33417_s0 + $0x1068] sm:$0xff]   ;;  %23270 = vst [vmem:[%s33418_s1 + $0x468] sm:$0xff] %v25976_v57  ;;  %v25986_v3 = vld [vmem:[%s33417_s0 + $0x1078] sm:$0xff]   ;;  %23306 = vst [vmem:[%s33418_s1 + $0x478] sm:$0xff] %v25985_v2 }
 0x141   :  { %v25978_v59 = vld [vmem:[%s33417_s0 + $0x468] sm:$0xff]   ;;  %23274 = vst [vmem:[%s33418_s1 + $0x1068] sm:$0xff] %v25977_v58  ;;  %v25987_v4 = vld [vmem:[%s33417_s0 + $0x478] sm:$0xff]   ;;  %23310 = vst [vmem:[%s33418_s1 + $0x1078] sm:$0xff] %v25986_v3 }
 0x142   :  { %v25979_v60 = vld [vmem:[%s33417_s0 + $0x1868] sm:$0xff]   ;;  %23278 = vst [vmem:[%s33418_s1 + $0x1c68] sm:$0xff] %v25978_v59  ;;  %v25988_v5 = vld [vmem:[%s33417_s0 + $0x1878] sm:$0xff]   ;;  %23314 = vst [vmem:[%s33418_s1 + $0x1c78] sm:$0xff] %v25987_v4 }
 0x143   :  { %v25980_v61 = vld [vmem:[%s33417_s0 + $0xc68] sm:$0xff]   ;;  %23282 = vst [vmem:[%s33418_s1 + $0x868] sm:$0xff] %v25979_v60  ;;  %v25989_v6 = vld [vmem:[%s33417_s0 + $0xc78] sm:$0xff]   ;;  %23318 = vst [vmem:[%s33418_s1 + $0x878] sm:$0xff] %v25988_v5 }
 0x144   :  { %v25981_v62 = vld [vmem:[%s33417_s0 + $0x68] sm:$0xff]   ;;  %23286 = vst [vmem:[%s33418_s1 + $0x1468] sm:$0xff] %v25980_v61  ;;  %v25990_v7 = vld [vmem:[%s33417_s0 + $0x78] sm:$0xff]   ;;  %23322 = vst [vmem:[%s33418_s1 + $0x1478] sm:$0xff] %v25989_v6 }
 0x145   :  { %23290 = vst [vmem:[%s33418_s1 + $0x2068] sm:$0xff] %v25981_v62  ;;  %v25991_v8 = vld [vmem:[%s33417_s0 + $0x2088] sm:$0xff]   ;;  %23326 = vst [vmem:[%s33418_s1 + $0x2078] sm:$0xff] %v25990_v7  ;;  %v26000_v17 = vld [vmem:[%s33417_s0 + $0x2098] sm:$0xff]  }
 0x146   :  { %v25992_v9 = vld [vmem:[%s33417_s0 + $0x1488] sm:$0xff]   ;;  %23330 = vst [vmem:[%s33418_s1 + $0x88] sm:$0xff] %v25991_v8  ;;  %v26001_v18 = vld [vmem:[%s33417_s0 + $0x1498] sm:$0xff]   ;;  %23366 = vst [vmem:[%s33418_s1 + $0x98] sm:$0xff] %v26000_v17 }
 0x147   :  { %v25993_v10 = vld [vmem:[%s33417_s0 + $0x888] sm:$0xff]   ;;  %23334 = vst [vmem:[%s33418_s1 + $0xc88] sm:$0xff] %v25992_v9  ;;  %v26002_v19 = vld [vmem:[%s33417_s0 + $0x898] sm:$0xff]   ;;  %23370 = vst [vmem:[%s33418_s1 + $0xc98] sm:$0xff] %v26001_v18 }
 0x148   :  { %v25994_v11 = vld [vmem:[%s33417_s0 + $0x1c88] sm:$0xff]   ;;  %23338 = vst [vmem:[%s33418_s1 + $0x1888] sm:$0xff] %v25993_v10  ;;  %v26003_v20 = vld [vmem:[%s33417_s0 + $0x1c98] sm:$0xff]   ;;  %23374 = vst [vmem:[%s33418_s1 + $0x1898] sm:$0xff] %v26002_v19 }
 0x149   :  { %v25995_v12 = vld [vmem:[%s33417_s0 + $0x1088] sm:$0xff]   ;;  %23342 = vst [vmem:[%s33418_s1 + $0x488] sm:$0xff] %v25994_v11  ;;  %v26004_v21 = vld [vmem:[%s33417_s0 + $0x1098] sm:$0xff]   ;;  %23378 = vst [vmem:[%s33418_s1 + $0x498] sm:$0xff] %v26003_v20 }
 0x14a   :  { %v25996_v13 = vld [vmem:[%s33417_s0 + $0x488] sm:$0xff]   ;;  %23346 = vst [vmem:[%s33418_s1 + $0x1088] sm:$0xff] %v25995_v12  ;;  %v26005_v22 = vld [vmem:[%s33417_s0 + $0x498] sm:$0xff]   ;;  %23382 = vst [vmem:[%s33418_s1 + $0x1098] sm:$0xff] %v26004_v21 }
 0x14b   :  { %v25997_v14 = vld [vmem:[%s33417_s0 + $0x1888] sm:$0xff]   ;;  %23350 = vst [vmem:[%s33418_s1 + $0x1c88] sm:$0xff] %v25996_v13  ;;  %v26006_v23 = vld [vmem:[%s33417_s0 + $0x1898] sm:$0xff]   ;;  %23386 = vst [vmem:[%s33418_s1 + $0x1c98] sm:$0xff] %v26005_v22 }
 0x14c   :  { %v25998_v15 = vld [vmem:[%s33417_s0 + $0xc88] sm:$0xff]   ;;  %23354 = vst [vmem:[%s33418_s1 + $0x888] sm:$0xff] %v25997_v14  ;;  %v26007_v24 = vld [vmem:[%s33417_s0 + $0xc98] sm:$0xff]   ;;  %23390 = vst [vmem:[%s33418_s1 + $0x898] sm:$0xff] %v26006_v23 }
 0x14d   :  { %v25999_v16 = vld [vmem:[%s33417_s0 + $0x88] sm:$0xff]   ;;  %23358 = vst [vmem:[%s33418_s1 + $0x1488] sm:$0xff] %v25998_v15  ;;  %v26008_v25 = vld [vmem:[%s33417_s0 + $0x98] sm:$0xff]   ;;  %23394 = vst [vmem:[%s33418_s1 + $0x1498] sm:$0xff] %v26007_v24 }
 0x14e   :  { %23362 = vst [vmem:[%s33418_s1 + $0x2088] sm:$0xff] %v25999_v16  ;;  %v26009_v26 = vld [vmem:[%s33417_s0 + $0x20a8] sm:$0xff]   ;;  %23398 = vst [vmem:[%s33418_s1 + $0x2098] sm:$0xff] %v26008_v25  ;;  %v26018_v35 = vld [vmem:[%s33417_s0 + $0x20b8] sm:$0xff]  }
 0x14f   :  { %v26010_v27 = vld [vmem:[%s33417_s0 + $0x14a8] sm:$0xff]   ;;  %23402 = vst [vmem:[%s33418_s1 + $0xa8] sm:$0xff] %v26009_v26  ;;  %v26019_v36 = vld [vmem:[%s33417_s0 + $0x14b8] sm:$0xff]   ;;  %23438 = vst [vmem:[%s33418_s1 + $0xb8] sm:$0xff] %v26018_v35 }
 0x150   :  { %v26011_v28 = vld [vmem:[%s33417_s0 + $0x8a8] sm:$0xff]   ;;  %23406 = vst [vmem:[%s33418_s1 + $0xca8] sm:$0xff] %v26010_v27  ;;  %v26020_v37 = vld [vmem:[%s33417_s0 + $0x8b8] sm:$0xff]   ;;  %23442 = vst [vmem:[%s33418_s1 + $0xcb8] sm:$0xff] %v26019_v36 }
 0x151   :  { %v26012_v29 = vld [vmem:[%s33417_s0 + $0x1ca8] sm:$0xff]   ;;  %23410 = vst [vmem:[%s33418_s1 + $0x18a8] sm:$0xff] %v26011_v28  ;;  %v26021_v38 = vld [vmem:[%s33417_s0 + $0x1cb8] sm:$0xff]   ;;  %23446 = vst [vmem:[%s33418_s1 + $0x18b8] sm:$0xff] %v26020_v37 }
 0x152   :  { %v26013_v30 = vld [vmem:[%s33417_s0 + $0x10a8] sm:$0xff]   ;;  %23414 = vst [vmem:[%s33418_s1 + $0x4a8] sm:$0xff] %v26012_v29  ;;  %v26022_v39 = vld [vmem:[%s33417_s0 + $0x10b8] sm:$0xff]   ;;  %23450 = vst [vmem:[%s33418_s1 + $0x4b8] sm:$0xff] %v26021_v38 }
 0x153   :  { %v26014_v31 = vld [vmem:[%s33417_s0 + $0x4a8] sm:$0xff]   ;;  %23418 = vst [vmem:[%s33418_s1 + $0x10a8] sm:$0xff] %v26013_v30  ;;  %v26023_v40 = vld [vmem:[%s33417_s0 + $0x4b8] sm:$0xff]   ;;  %23454 = vst [vmem:[%s33418_s1 + $0x10b8] sm:$0xff] %v26022_v39 }
 0x154   :  { %v26015_v32 = vld [vmem:[%s33417_s0 + $0x18a8] sm:$0xff]   ;;  %23422 = vst [vmem:[%s33418_s1 + $0x1ca8] sm:$0xff] %v26014_v31  ;;  %v26024_v41 = vld [vmem:[%s33417_s0 + $0x18b8] sm:$0xff]   ;;  %23458 = vst [vmem:[%s33418_s1 + $0x1cb8] sm:$0xff] %v26023_v40 }
 0x155   :  { %v26016_v33 = vld [vmem:[%s33417_s0 + $0xca8] sm:$0xff]   ;;  %23426 = vst [vmem:[%s33418_s1 + $0x8a8] sm:$0xff] %v26015_v32  ;;  %v26025_v42 = vld [vmem:[%s33417_s0 + $0xcb8] sm:$0xff]   ;;  %23462 = vst [vmem:[%s33418_s1 + $0x8b8] sm:$0xff] %v26024_v41 }
 0x156   :  { %v26017_v34 = vld [vmem:[%s33417_s0 + $0xa8] sm:$0xff]   ;;  %23430 = vst [vmem:[%s33418_s1 + $0x14a8] sm:$0xff] %v26016_v33  ;;  %v26026_v43 = vld [vmem:[%s33417_s0 + $0xb8] sm:$0xff]   ;;  %23466 = vst [vmem:[%s33418_s1 + $0x14b8] sm:$0xff] %v26025_v42 }
 0x157   :  { %23434 = vst [vmem:[%s33418_s1 + $0x20a8] sm:$0xff] %v26017_v34  ;;  %v26027_v44 = vld [vmem:[%s33417_s0 + $0x20c8] sm:$0xff]   ;;  %23470 = vst [vmem:[%s33418_s1 + $0x20b8] sm:$0xff] %v26026_v43  ;;  %v26036_v53 = vld [vmem:[%s33417_s0 + $0x20d8] sm:$0xff]  }
 0x158   :  { %v26028_v45 = vld [vmem:[%s33417_s0 + $0x14c8] sm:$0xff]   ;;  %23474 = vst [vmem:[%s33418_s1 + $0xc8] sm:$0xff] %v26027_v44  ;;  %v26037_v54 = vld [vmem:[%s33417_s0 + $0x14d8] sm:$0xff]   ;;  %23510 = vst [vmem:[%s33418_s1 + $0xd8] sm:$0xff] %v26036_v53 }
 0x159   :  { %v26029_v46 = vld [vmem:[%s33417_s0 + $0x8c8] sm:$0xff]   ;;  %23478 = vst [vmem:[%s33418_s1 + $0xcc8] sm:$0xff] %v26028_v45  ;;  %v26038_v55 = vld [vmem:[%s33417_s0 + $0x8d8] sm:$0xff]   ;;  %23514 = vst [vmem:[%s33418_s1 + $0xcd8] sm:$0xff] %v26037_v54 }
 0x15a   :  { %v26030_v47 = vld [vmem:[%s33417_s0 + $0x1cc8] sm:$0xff]   ;;  %23482 = vst [vmem:[%s33418_s1 + $0x18c8] sm:$0xff] %v26029_v46  ;;  %v26039_v56 = vld [vmem:[%s33417_s0 + $0x1cd8] sm:$0xff]   ;;  %23518 = vst [vmem:[%s33418_s1 + $0x18d8] sm:$0xff] %v26038_v55 }
 0x15b   :  { %v26031_v48 = vld [vmem:[%s33417_s0 + $0x10c8] sm:$0xff]   ;;  %23486 = vst [vmem:[%s33418_s1 + $0x4c8] sm:$0xff] %v26030_v47  ;;  %v26040_v57 = vld [vmem:[%s33417_s0 + $0x10d8] sm:$0xff]   ;;  %23522 = vst [vmem:[%s33418_s1 + $0x4d8] sm:$0xff] %v26039_v56 }
 0x15c   :  { %v26032_v49 = vld [vmem:[%s33417_s0 + $0x4c8] sm:$0xff]   ;;  %23490 = vst [vmem:[%s33418_s1 + $0x10c8] sm:$0xff] %v26031_v48  ;;  %v26041_v58 = vld [vmem:[%s33417_s0 + $0x4d8] sm:$0xff]   ;;  %23526 = vst [vmem:[%s33418_s1 + $0x10d8] sm:$0xff] %v26040_v57 }
 0x15d   :  { %v26033_v50 = vld [vmem:[%s33417_s0 + $0x18c8] sm:$0xff]   ;;  %23494 = vst [vmem:[%s33418_s1 + $0x1cc8] sm:$0xff] %v26032_v49  ;;  %v26042_v59 = vld [vmem:[%s33417_s0 + $0x18d8] sm:$0xff]   ;;  %23530 = vst [vmem:[%s33418_s1 + $0x1cd8] sm:$0xff] %v26041_v58 }
 0x15e   :  { %v26034_v51 = vld [vmem:[%s33417_s0 + $0xcc8] sm:$0xff]   ;;  %23498 = vst [vmem:[%s33418_s1 + $0x8c8] sm:$0xff] %v26033_v50  ;;  %v26043_v60 = vld [vmem:[%s33417_s0 + $0xcd8] sm:$0xff]   ;;  %23534 = vst [vmem:[%s33418_s1 + $0x8d8] sm:$0xff] %v26042_v59 }
 0x15f   :  { %v26035_v52 = vld [vmem:[%s33417_s0 + $0xc8] sm:$0xff]   ;;  %23502 = vst [vmem:[%s33418_s1 + $0x14c8] sm:$0xff] %v26034_v51  ;;  %v26044_v61 = vld [vmem:[%s33417_s0 + $0xd8] sm:$0xff]   ;;  %23538 = vst [vmem:[%s33418_s1 + $0x14d8] sm:$0xff] %v26043_v60 }
 0x160   :  { %23506 = vst [vmem:[%s33418_s1 + $0x20c8] sm:$0xff] %v26035_v52  ;;  %v26045_v62 = vld [vmem:[%s33417_s0 + $0x20e8] sm:$0xff]   ;;  %23542 = vst [vmem:[%s33418_s1 + $0x20d8] sm:$0xff] %v26044_v61  ;;  %v26054_v7 = vld [vmem:[%s33417_s0 + $0x20f8] sm:$0xff]  }
 0x161   :  { %v26046_v63 = vld [vmem:[%s33417_s0 + $0x14e8] sm:$0xff]   ;;  %23546 = vst [vmem:[%s33418_s1 + $0xe8] sm:$0xff] %v26045_v62  ;;  %v26055_v8 = vld [vmem:[%s33417_s0 + $0x14f8] sm:$0xff]   ;;  %23582 = vst [vmem:[%s33418_s1 + $0xf8] sm:$0xff] %v26054_v7 }
 0x162   :  { %v26047_v0 = vld [vmem:[%s33417_s0 + $0x8e8] sm:$0xff]   ;;  %23550 = vst [vmem:[%s33418_s1 + $0xce8] sm:$0xff] %v26046_v63  ;;  %v26056_v9 = vld [vmem:[%s33417_s0 + $0x8f8] sm:$0xff]   ;;  %23586 = vst [vmem:[%s33418_s1 + $0xcf8] sm:$0xff] %v26055_v8 }
 0x163   :  { %v26048_v1 = vld [vmem:[%s33417_s0 + $0x1ce8] sm:$0xff]   ;;  %23554 = vst [vmem:[%s33418_s1 + $0x18e8] sm:$0xff] %v26047_v0  ;;  %v26057_v10 = vld [vmem:[%s33417_s0 + $0x1cf8] sm:$0xff]   ;;  %23590 = vst [vmem:[%s33418_s1 + $0x18f8] sm:$0xff] %v26056_v9 }
 0x164   :  { %v26049_v2 = vld [vmem:[%s33417_s0 + $0x10e8] sm:$0xff]   ;;  %23558 = vst [vmem:[%s33418_s1 + $0x4e8] sm:$0xff] %v26048_v1  ;;  %v26058_v11 = vld [vmem:[%s33417_s0 + $0x10f8] sm:$0xff]   ;;  %23594 = vst [vmem:[%s33418_s1 + $0x4f8] sm:$0xff] %v26057_v10 }
 0x165   :  { %v26050_v3 = vld [vmem:[%s33417_s0 + $0x4e8] sm:$0xff]   ;;  %23562 = vst [vmem:[%s33418_s1 + $0x10e8] sm:$0xff] %v26049_v2  ;;  %v26059_v12 = vld [vmem:[%s33417_s0 + $0x4f8] sm:$0xff]   ;;  %23598 = vst [vmem:[%s33418_s1 + $0x10f8] sm:$0xff] %v26058_v11 }
 0x166   :  { %v26051_v4 = vld [vmem:[%s33417_s0 + $0x18e8] sm:$0xff]   ;;  %23566 = vst [vmem:[%s33418_s1 + $0x1ce8] sm:$0xff] %v26050_v3  ;;  %v26060_v13 = vld [vmem:[%s33417_s0 + $0x18f8] sm:$0xff]   ;;  %23602 = vst [vmem:[%s33418_s1 + $0x1cf8] sm:$0xff] %v26059_v12 }
 0x167   :  { %v26052_v5 = vld [vmem:[%s33417_s0 + $0xce8] sm:$0xff]   ;;  %23570 = vst [vmem:[%s33418_s1 + $0x8e8] sm:$0xff] %v26051_v4  ;;  %v26061_v14 = vld [vmem:[%s33417_s0 + $0xcf8] sm:$0xff]   ;;  %23606 = vst [vmem:[%s33418_s1 + $0x8f8] sm:$0xff] %v26060_v13 }
 0x168   :  { %v26053_v6 = vld [vmem:[%s33417_s0 + $0xe8] sm:$0xff]   ;;  %23574 = vst [vmem:[%s33418_s1 + $0x14e8] sm:$0xff] %v26052_v5  ;;  %v26062_v15 = vld [vmem:[%s33417_s0 + $0xf8] sm:$0xff]   ;;  %23610 = vst [vmem:[%s33418_s1 + $0x14f8] sm:$0xff] %v26061_v14 }
 0x169   :  { %23578 = vst [vmem:[%s33418_s1 + $0x20e8] sm:$0xff] %v26053_v6  ;;  %v26063_v16 = vld [vmem:[%s33417_s0 + $0x2108] sm:$0xff]   ;;  %23614 = vst [vmem:[%s33418_s1 + $0x20f8] sm:$0xff] %v26062_v15  ;;  %v26072_v25 = vld [vmem:[%s33417_s0 + $0x2118] sm:$0xff]  }
 0x16a   :  { %v26064_v17 = vld [vmem:[%s33417_s0 + $0x1508] sm:$0xff]   ;;  %23618 = vst [vmem:[%s33418_s1 + $0x108] sm:$0xff] %v26063_v16  ;;  %v26073_v26 = vld [vmem:[%s33417_s0 + $0x1518] sm:$0xff]   ;;  %23654 = vst [vmem:[%s33418_s1 + $0x118] sm:$0xff] %v26072_v25 }
 0x16b   :  { %v26065_v18 = vld [vmem:[%s33417_s0 + $0x908] sm:$0xff]   ;;  %23622 = vst [vmem:[%s33418_s1 + $0xd08] sm:$0xff] %v26064_v17  ;;  %v26074_v27 = vld [vmem:[%s33417_s0 + $0x918] sm:$0xff]   ;;  %23658 = vst [vmem:[%s33418_s1 + $0xd18] sm:$0xff] %v26073_v26 }
 0x16c   :  { %v26066_v19 = vld [vmem:[%s33417_s0 + $0x1d08] sm:$0xff]   ;;  %23626 = vst [vmem:[%s33418_s1 + $0x1908] sm:$0xff] %v26065_v18  ;;  %v26075_v28 = vld [vmem:[%s33417_s0 + $0x1d18] sm:$0xff]   ;;  %23662 = vst [vmem:[%s33418_s1 + $0x1918] sm:$0xff] %v26074_v27 }
 0x16d   :  { %v26067_v20 = vld [vmem:[%s33417_s0 + $0x1108] sm:$0xff]   ;;  %23630 = vst [vmem:[%s33418_s1 + $0x508] sm:$0xff] %v26066_v19  ;;  %v26076_v29 = vld [vmem:[%s33417_s0 + $0x1118] sm:$0xff]   ;;  %23666 = vst [vmem:[%s33418_s1 + $0x518] sm:$0xff] %v26075_v28 }
 0x16e   :  { %v26068_v21 = vld [vmem:[%s33417_s0 + $0x508] sm:$0xff]   ;;  %23634 = vst [vmem:[%s33418_s1 + $0x1108] sm:$0xff] %v26067_v20  ;;  %v26077_v30 = vld [vmem:[%s33417_s0 + $0x518] sm:$0xff]   ;;  %23670 = vst [vmem:[%s33418_s1 + $0x1118] sm:$0xff] %v26076_v29 }
 0x16f   :  { %v26069_v22 = vld [vmem:[%s33417_s0 + $0x1908] sm:$0xff]   ;;  %23638 = vst [vmem:[%s33418_s1 + $0x1d08] sm:$0xff] %v26068_v21  ;;  %v26078_v31 = vld [vmem:[%s33417_s0 + $0x1918] sm:$0xff]   ;;  %23674 = vst [vmem:[%s33418_s1 + $0x1d18] sm:$0xff] %v26077_v30 }
 0x170   :  { %v26070_v23 = vld [vmem:[%s33417_s0 + $0xd08] sm:$0xff]   ;;  %23642 = vst [vmem:[%s33418_s1 + $0x908] sm:$0xff] %v26069_v22  ;;  %v26079_v32 = vld [vmem:[%s33417_s0 + $0xd18] sm:$0xff]   ;;  %23678 = vst [vmem:[%s33418_s1 + $0x918] sm:$0xff] %v26078_v31 }
 0x171   :  { %v26071_v24 = vld [vmem:[%s33417_s0 + $0x108] sm:$0xff]   ;;  %23646 = vst [vmem:[%s33418_s1 + $0x1508] sm:$0xff] %v26070_v23  ;;  %v26080_v33 = vld [vmem:[%s33417_s0 + $0x118] sm:$0xff]   ;;  %23682 = vst [vmem:[%s33418_s1 + $0x1518] sm:$0xff] %v26079_v32 }
 0x172   :  { %23650 = vst [vmem:[%s33418_s1 + $0x2108] sm:$0xff] %v26071_v24  ;;  %v26081_v34 = vld [vmem:[%s33417_s0 + $0x2128] sm:$0xff]   ;;  %23686 = vst [vmem:[%s33418_s1 + $0x2118] sm:$0xff] %v26080_v33  ;;  %v26090_v43 = vld [vmem:[%s33417_s0 + $0x2138] sm:$0xff]  }
 0x173   :  { %v26082_v35 = vld [vmem:[%s33417_s0 + $0x1528] sm:$0xff]   ;;  %23690 = vst [vmem:[%s33418_s1 + $0x128] sm:$0xff] %v26081_v34  ;;  %v26091_v44 = vld [vmem:[%s33417_s0 + $0x1538] sm:$0xff]   ;;  %23726 = vst [vmem:[%s33418_s1 + $0x138] sm:$0xff] %v26090_v43 }
 0x174   :  { %v26083_v36 = vld [vmem:[%s33417_s0 + $0x928] sm:$0xff]   ;;  %23694 = vst [vmem:[%s33418_s1 + $0xd28] sm:$0xff] %v26082_v35  ;;  %v26092_v45 = vld [vmem:[%s33417_s0 + $0x938] sm:$0xff]   ;;  %23730 = vst [vmem:[%s33418_s1 + $0xd38] sm:$0xff] %v26091_v44 }
 0x175   :  { %v26084_v37 = vld [vmem:[%s33417_s0 + $0x1d28] sm:$0xff]   ;;  %23698 = vst [vmem:[%s33418_s1 + $0x1928] sm:$0xff] %v26083_v36  ;;  %v26093_v46 = vld [vmem:[%s33417_s0 + $0x1d38] sm:$0xff]   ;;  %23734 = vst [vmem:[%s33418_s1 + $0x1938] sm:$0xff] %v26092_v45 }
 0x176   :  { %v26085_v38 = vld [vmem:[%s33417_s0 + $0x1128] sm:$0xff]   ;;  %23702 = vst [vmem:[%s33418_s1 + $0x528] sm:$0xff] %v26084_v37  ;;  %v26094_v47 = vld [vmem:[%s33417_s0 + $0x1138] sm:$0xff]   ;;  %23738 = vst [vmem:[%s33418_s1 + $0x538] sm:$0xff] %v26093_v46 }
 0x177   :  { %v26086_v39 = vld [vmem:[%s33417_s0 + $0x528] sm:$0xff]   ;;  %23706 = vst [vmem:[%s33418_s1 + $0x1128] sm:$0xff] %v26085_v38  ;;  %v26095_v48 = vld [vmem:[%s33417_s0 + $0x538] sm:$0xff]   ;;  %23742 = vst [vmem:[%s33418_s1 + $0x1138] sm:$0xff] %v26094_v47 }
 0x178   :  { %v26087_v40 = vld [vmem:[%s33417_s0 + $0x1928] sm:$0xff]   ;;  %23710 = vst [vmem:[%s33418_s1 + $0x1d28] sm:$0xff] %v26086_v39  ;;  %v26096_v49 = vld [vmem:[%s33417_s0 + $0x1938] sm:$0xff]   ;;  %23746 = vst [vmem:[%s33418_s1 + $0x1d38] sm:$0xff] %v26095_v48 }
 0x179   :  { %v26088_v41 = vld [vmem:[%s33417_s0 + $0xd28] sm:$0xff]   ;;  %23714 = vst [vmem:[%s33418_s1 + $0x928] sm:$0xff] %v26087_v40  ;;  %v26097_v50 = vld [vmem:[%s33417_s0 + $0xd38] sm:$0xff]   ;;  %23750 = vst [vmem:[%s33418_s1 + $0x938] sm:$0xff] %v26096_v49 }
 0x17a   :  { %v26089_v42 = vld [vmem:[%s33417_s0 + $0x128] sm:$0xff]   ;;  %23718 = vst [vmem:[%s33418_s1 + $0x1528] sm:$0xff] %v26088_v41  ;;  %v26098_v51 = vld [vmem:[%s33417_s0 + $0x138] sm:$0xff]   ;;  %23754 = vst [vmem:[%s33418_s1 + $0x1538] sm:$0xff] %v26097_v50 }
 0x17b   :  { %23722 = vst [vmem:[%s33418_s1 + $0x2128] sm:$0xff] %v26089_v42  ;;  %v26099_v52 = vld [vmem:[%s33417_s0 + $0x2148] sm:$0xff]   ;;  %23758 = vst [vmem:[%s33418_s1 + $0x2138] sm:$0xff] %v26098_v51  ;;  %v26108_v61 = vld [vmem:[%s33417_s0 + $0x2158] sm:$0xff]  }
 0x17c   :  { %v26100_v53 = vld [vmem:[%s33417_s0 + $0x1548] sm:$0xff]   ;;  %23762 = vst [vmem:[%s33418_s1 + $0x148] sm:$0xff] %v26099_v52  ;;  %v26109_v62 = vld [vmem:[%s33417_s0 + $0x1558] sm:$0xff]   ;;  %23798 = vst [vmem:[%s33418_s1 + $0x158] sm:$0xff] %v26108_v61 }
 0x17d   :  { %v26101_v54 = vld [vmem:[%s33417_s0 + $0x948] sm:$0xff]   ;;  %23766 = vst [vmem:[%s33418_s1 + $0xd48] sm:$0xff] %v26100_v53  ;;  %v26110_v63 = vld [vmem:[%s33417_s0 + $0x958] sm:$0xff]   ;;  %23802 = vst [vmem:[%s33418_s1 + $0xd58] sm:$0xff] %v26109_v62 }
 0x17e   :  { %v26102_v55 = vld [vmem:[%s33417_s0 + $0x1d48] sm:$0xff]   ;;  %23770 = vst [vmem:[%s33418_s1 + $0x1948] sm:$0xff] %v26101_v54  ;;  %v26111_v0 = vld [vmem:[%s33417_s0 + $0x1d58] sm:$0xff]   ;;  %23806 = vst [vmem:[%s33418_s1 + $0x1958] sm:$0xff] %v26110_v63 }
 0x17f   :  { %v26103_v56 = vld [vmem:[%s33417_s0 + $0x1148] sm:$0xff]   ;;  %23774 = vst [vmem:[%s33418_s1 + $0x548] sm:$0xff] %v26102_v55  ;;  %v26112_v1 = vld [vmem:[%s33417_s0 + $0x1158] sm:$0xff]   ;;  %23810 = vst [vmem:[%s33418_s1 + $0x558] sm:$0xff] %v26111_v0 }
 0x180   :  { %v26104_v57 = vld [vmem:[%s33417_s0 + $0x548] sm:$0xff]   ;;  %23778 = vst [vmem:[%s33418_s1 + $0x1148] sm:$0xff] %v26103_v56  ;;  %v26113_v2 = vld [vmem:[%s33417_s0 + $0x558] sm:$0xff]   ;;  %23814 = vst [vmem:[%s33418_s1 + $0x1158] sm:$0xff] %v26112_v1 }
 0x181   :  { %v26105_v58 = vld [vmem:[%s33417_s0 + $0x1948] sm:$0xff]   ;;  %23782 = vst [vmem:[%s33418_s1 + $0x1d48] sm:$0xff] %v26104_v57  ;;  %v26114_v3 = vld [vmem:[%s33417_s0 + $0x1958] sm:$0xff]   ;;  %23818 = vst [vmem:[%s33418_s1 + $0x1d58] sm:$0xff] %v26113_v2 }
 0x182   :  { %v26106_v59 = vld [vmem:[%s33417_s0 + $0xd48] sm:$0xff]   ;;  %23786 = vst [vmem:[%s33418_s1 + $0x948] sm:$0xff] %v26105_v58  ;;  %v26115_v4 = vld [vmem:[%s33417_s0 + $0xd58] sm:$0xff]   ;;  %23822 = vst [vmem:[%s33418_s1 + $0x958] sm:$0xff] %v26114_v3 }
 0x183   :  { %v26107_v60 = vld [vmem:[%s33417_s0 + $0x148] sm:$0xff]   ;;  %23790 = vst [vmem:[%s33418_s1 + $0x1548] sm:$0xff] %v26106_v59  ;;  %v26116_v5 = vld [vmem:[%s33417_s0 + $0x158] sm:$0xff]   ;;  %23826 = vst [vmem:[%s33418_s1 + $0x1558] sm:$0xff] %v26115_v4 }
 0x184   :  { %23794 = vst [vmem:[%s33418_s1 + $0x2148] sm:$0xff] %v26107_v60  ;;  %v26117_v6 = vld [vmem:[%s33417_s0 + $0x2168] sm:$0xff]   ;;  %23830 = vst [vmem:[%s33418_s1 + $0x2158] sm:$0xff] %v26116_v5  ;;  %v26126_v15 = vld [vmem:[%s33417_s0 + $0x2178] sm:$0xff]  }
 0x185   :  { %v26118_v7 = vld [vmem:[%s33417_s0 + $0x1568] sm:$0xff]   ;;  %23834 = vst [vmem:[%s33418_s1 + $0x168] sm:$0xff] %v26117_v6  ;;  %v26127_v16 = vld [vmem:[%s33417_s0 + $0x1578] sm:$0xff]   ;;  %23870 = vst [vmem:[%s33418_s1 + $0x178] sm:$0xff] %v26126_v15 }
 0x186   :  { %v26119_v8 = vld [vmem:[%s33417_s0 + $0x968] sm:$0xff]   ;;  %23838 = vst [vmem:[%s33418_s1 + $0xd68] sm:$0xff] %v26118_v7  ;;  %v26128_v17 = vld [vmem:[%s33417_s0 + $0x978] sm:$0xff]   ;;  %23874 = vst [vmem:[%s33418_s1 + $0xd78] sm:$0xff] %v26127_v16 }
 0x187   :  { %v26120_v9 = vld [vmem:[%s33417_s0 + $0x1d68] sm:$0xff]   ;;  %23842 = vst [vmem:[%s33418_s1 + $0x1968] sm:$0xff] %v26119_v8  ;;  %v26129_v18 = vld [vmem:[%s33417_s0 + $0x1d78] sm:$0xff]   ;;  %23878 = vst [vmem:[%s33418_s1 + $0x1978] sm:$0xff] %v26128_v17 }
 0x188   :  { %v26121_v10 = vld [vmem:[%s33417_s0 + $0x1168] sm:$0xff]   ;;  %23846 = vst [vmem:[%s33418_s1 + $0x568] sm:$0xff] %v26120_v9  ;;  %v26130_v19 = vld [vmem:[%s33417_s0 + $0x1178] sm:$0xff]   ;;  %23882 = vst [vmem:[%s33418_s1 + $0x578] sm:$0xff] %v26129_v18 }
 0x189   :  { %v26122_v11 = vld [vmem:[%s33417_s0 + $0x568] sm:$0xff]   ;;  %23850 = vst [vmem:[%s33418_s1 + $0x1168] sm:$0xff] %v26121_v10  ;;  %v26131_v20 = vld [vmem:[%s33417_s0 + $0x578] sm:$0xff]   ;;  %23886 = vst [vmem:[%s33418_s1 + $0x1178] sm:$0xff] %v26130_v19 }
 0x18a   :  { %v26123_v12 = vld [vmem:[%s33417_s0 + $0x1968] sm:$0xff]   ;;  %23854 = vst [vmem:[%s33418_s1 + $0x1d68] sm:$0xff] %v26122_v11  ;;  %v26132_v21 = vld [vmem:[%s33417_s0 + $0x1978] sm:$0xff]   ;;  %23890 = vst [vmem:[%s33418_s1 + $0x1d78] sm:$0xff] %v26131_v20 }
 0x18b   :  { %v26124_v13 = vld [vmem:[%s33417_s0 + $0xd68] sm:$0xff]   ;;  %23858 = vst [vmem:[%s33418_s1 + $0x968] sm:$0xff] %v26123_v12  ;;  %v26133_v22 = vld [vmem:[%s33417_s0 + $0xd78] sm:$0xff]   ;;  %23894 = vst [vmem:[%s33418_s1 + $0x978] sm:$0xff] %v26132_v21 }
 0x18c   :  { %v26125_v14 = vld [vmem:[%s33417_s0 + $0x168] sm:$0xff]   ;;  %23862 = vst [vmem:[%s33418_s1 + $0x1568] sm:$0xff] %v26124_v13  ;;  %v26134_v23 = vld [vmem:[%s33417_s0 + $0x178] sm:$0xff]   ;;  %23898 = vst [vmem:[%s33418_s1 + $0x1578] sm:$0xff] %v26133_v22 }
 0x18d   :  { %23866 = vst [vmem:[%s33418_s1 + $0x2168] sm:$0xff] %v26125_v14  ;;  %v26135_v24 = vld [vmem:[%s33417_s0 + $0x2188] sm:$0xff]   ;;  %23902 = vst [vmem:[%s33418_s1 + $0x2178] sm:$0xff] %v26134_v23  ;;  %v26144_v33 = vld [vmem:[%s33417_s0 + $0x2198] sm:$0xff]  }
 0x18e   :  { %v26136_v25 = vld [vmem:[%s33417_s0 + $0x1588] sm:$0xff]   ;;  %23906 = vst [vmem:[%s33418_s1 + $0x188] sm:$0xff] %v26135_v24  ;;  %v26145_v34 = vld [vmem:[%s33417_s0 + $0x1598] sm:$0xff]   ;;  %23942 = vst [vmem:[%s33418_s1 + $0x198] sm:$0xff] %v26144_v33 }
 0x18f   :  { %v26137_v26 = vld [vmem:[%s33417_s0 + $0x988] sm:$0xff]   ;;  %23910 = vst [vmem:[%s33418_s1 + $0xd88] sm:$0xff] %v26136_v25  ;;  %v26146_v35 = vld [vmem:[%s33417_s0 + $0x998] sm:$0xff]   ;;  %23946 = vst [vmem:[%s33418_s1 + $0xd98] sm:$0xff] %v26145_v34 }
 0x190   :  { %v26138_v27 = vld [vmem:[%s33417_s0 + $0x1d88] sm:$0xff]   ;;  %23914 = vst [vmem:[%s33418_s1 + $0x1988] sm:$0xff] %v26137_v26  ;;  %v26147_v36 = vld [vmem:[%s33417_s0 + $0x1d98] sm:$0xff]   ;;  %23950 = vst [vmem:[%s33418_s1 + $0x1998] sm:$0xff] %v26146_v35 }
 0x191   :  { %v26139_v28 = vld [vmem:[%s33417_s0 + $0x1188] sm:$0xff]   ;;  %23918 = vst [vmem:[%s33418_s1 + $0x588] sm:$0xff] %v26138_v27  ;;  %v26148_v37 = vld [vmem:[%s33417_s0 + $0x1198] sm:$0xff]   ;;  %23954 = vst [vmem:[%s33418_s1 + $0x598] sm:$0xff] %v26147_v36 }
 0x192   :  { %v26140_v29 = vld [vmem:[%s33417_s0 + $0x588] sm:$0xff]   ;;  %23922 = vst [vmem:[%s33418_s1 + $0x1188] sm:$0xff] %v26139_v28  ;;  %v26149_v38 = vld [vmem:[%s33417_s0 + $0x598] sm:$0xff]   ;;  %23958 = vst [vmem:[%s33418_s1 + $0x1198] sm:$0xff] %v26148_v37 }
 0x193   :  { %v26141_v30 = vld [vmem:[%s33417_s0 + $0x1988] sm:$0xff]   ;;  %23926 = vst [vmem:[%s33418_s1 + $0x1d88] sm:$0xff] %v26140_v29  ;;  %v26150_v39 = vld [vmem:[%s33417_s0 + $0x1998] sm:$0xff]   ;;  %23962 = vst [vmem:[%s33418_s1 + $0x1d98] sm:$0xff] %v26149_v38 }
 0x194   :  { %v26142_v31 = vld [vmem:[%s33417_s0 + $0xd88] sm:$0xff]   ;;  %23930 = vst [vmem:[%s33418_s1 + $0x988] sm:$0xff] %v26141_v30  ;;  %v26151_v40 = vld [vmem:[%s33417_s0 + $0xd98] sm:$0xff]   ;;  %23966 = vst [vmem:[%s33418_s1 + $0x998] sm:$0xff] %v26150_v39 }
 0x195   :  { %v26143_v32 = vld [vmem:[%s33417_s0 + $0x188] sm:$0xff]   ;;  %23934 = vst [vmem:[%s33418_s1 + $0x1588] sm:$0xff] %v26142_v31  ;;  %v26152_v41 = vld [vmem:[%s33417_s0 + $0x198] sm:$0xff]   ;;  %23970 = vst [vmem:[%s33418_s1 + $0x1598] sm:$0xff] %v26151_v40 }
 0x196   :  { %23938 = vst [vmem:[%s33418_s1 + $0x2188] sm:$0xff] %v26143_v32  ;;  %v26153_v42 = vld [vmem:[%s33417_s0 + $0x21a8] sm:$0xff]   ;;  %23974 = vst [vmem:[%s33418_s1 + $0x2198] sm:$0xff] %v26152_v41  ;;  %v26162_v51 = vld [vmem:[%s33417_s0 + $0x21b8] sm:$0xff]  }
 0x197   :  { %v26154_v43 = vld [vmem:[%s33417_s0 + $0x15a8] sm:$0xff]   ;;  %23978 = vst [vmem:[%s33418_s1 + $0x1a8] sm:$0xff] %v26153_v42  ;;  %v26163_v52 = vld [vmem:[%s33417_s0 + $0x15b8] sm:$0xff]   ;;  %24014 = vst [vmem:[%s33418_s1 + $0x1b8] sm:$0xff] %v26162_v51 }
 0x198   :  { %v26155_v44 = vld [vmem:[%s33417_s0 + $0x9a8] sm:$0xff]   ;;  %23982 = vst [vmem:[%s33418_s1 + $0xda8] sm:$0xff] %v26154_v43  ;;  %v26164_v53 = vld [vmem:[%s33417_s0 + $0x9b8] sm:$0xff]   ;;  %24018 = vst [vmem:[%s33418_s1 + $0xdb8] sm:$0xff] %v26163_v52 }
 0x199   :  { %v26156_v45 = vld [vmem:[%s33417_s0 + $0x1da8] sm:$0xff]   ;;  %23986 = vst [vmem:[%s33418_s1 + $0x19a8] sm:$0xff] %v26155_v44  ;;  %v26165_v54 = vld [vmem:[%s33417_s0 + $0x1db8] sm:$0xff]   ;;  %24022 = vst [vmem:[%s33418_s1 + $0x19b8] sm:$0xff] %v26164_v53 }
 0x19a   :  { %v26157_v46 = vld [vmem:[%s33417_s0 + $0x11a8] sm:$0xff]   ;;  %23990 = vst [vmem:[%s33418_s1 + $0x5a8] sm:$0xff] %v26156_v45  ;;  %v26166_v55 = vld [vmem:[%s33417_s0 + $0x11b8] sm:$0xff]   ;;  %24026 = vst [vmem:[%s33418_s1 + $0x5b8] sm:$0xff] %v26165_v54 }
 0x19b   :  { %v26158_v47 = vld [vmem:[%s33417_s0 + $0x5a8] sm:$0xff]   ;;  %23994 = vst [vmem:[%s33418_s1 + $0x11a8] sm:$0xff] %v26157_v46  ;;  %v26167_v56 = vld [vmem:[%s33417_s0 + $0x5b8] sm:$0xff]   ;;  %24030 = vst [vmem:[%s33418_s1 + $0x11b8] sm:$0xff] %v26166_v55 }
 0x19c   :  { %v26159_v48 = vld [vmem:[%s33417_s0 + $0x19a8] sm:$0xff]   ;;  %23998 = vst [vmem:[%s33418_s1 + $0x1da8] sm:$0xff] %v26158_v47  ;;  %v26168_v57 = vld [vmem:[%s33417_s0 + $0x19b8] sm:$0xff]   ;;  %24034 = vst [vmem:[%s33418_s1 + $0x1db8] sm:$0xff] %v26167_v56 }
 0x19d   :  { %v26160_v49 = vld [vmem:[%s33417_s0 + $0xda8] sm:$0xff]   ;;  %24002 = vst [vmem:[%s33418_s1 + $0x9a8] sm:$0xff] %v26159_v48  ;;  %v26169_v58 = vld [vmem:[%s33417_s0 + $0xdb8] sm:$0xff]   ;;  %24038 = vst [vmem:[%s33418_s1 + $0x9b8] sm:$0xff] %v26168_v57 }
 0x19e   :  { %v26161_v50 = vld [vmem:[%s33417_s0 + $0x1a8] sm:$0xff]   ;;  %24006 = vst [vmem:[%s33418_s1 + $0x15a8] sm:$0xff] %v26160_v49  ;;  %v26170_v59 = vld [vmem:[%s33417_s0 + $0x1b8] sm:$0xff]   ;;  %24042 = vst [vmem:[%s33418_s1 + $0x15b8] sm:$0xff] %v26169_v58 }
 0x19f   :  { %24010 = vst [vmem:[%s33418_s1 + $0x21a8] sm:$0xff] %v26161_v50  ;;  %v26171_v60 = vld [vmem:[%s33417_s0 + $0x21c8] sm:$0xff]   ;;  %24046 = vst [vmem:[%s33418_s1 + $0x21b8] sm:$0xff] %v26170_v59  ;;  %v26180_v5 = vld [vmem:[%s33417_s0 + $0x21d8] sm:$0xff]  }
 0x1a0   :  { %v26172_v61 = vld [vmem:[%s33417_s0 + $0x15c8] sm:$0xff]   ;;  %24050 = vst [vmem:[%s33418_s1 + $0x1c8] sm:$0xff] %v26171_v60  ;;  %v26181_v6 = vld [vmem:[%s33417_s0 + $0x15d8] sm:$0xff]   ;;  %24086 = vst [vmem:[%s33418_s1 + $0x1d8] sm:$0xff] %v26180_v5 }
 0x1a1   :  { %v26173_v62 = vld [vmem:[%s33417_s0 + $0x9c8] sm:$0xff]   ;;  %24054 = vst [vmem:[%s33418_s1 + $0xdc8] sm:$0xff] %v26172_v61  ;;  %v26182_v7 = vld [vmem:[%s33417_s0 + $0x9d8] sm:$0xff]   ;;  %24090 = vst [vmem:[%s33418_s1 + $0xdd8] sm:$0xff] %v26181_v6 }
 0x1a2   :  { %v26174_v63 = vld [vmem:[%s33417_s0 + $0x1dc8] sm:$0xff]   ;;  %24058 = vst [vmem:[%s33418_s1 + $0x19c8] sm:$0xff] %v26173_v62  ;;  %v26183_v8 = vld [vmem:[%s33417_s0 + $0x1dd8] sm:$0xff]   ;;  %24094 = vst [vmem:[%s33418_s1 + $0x19d8] sm:$0xff] %v26182_v7 }
 0x1a3   :  { %v26175_v0 = vld [vmem:[%s33417_s0 + $0x11c8] sm:$0xff]   ;;  %24062 = vst [vmem:[%s33418_s1 + $0x5c8] sm:$0xff] %v26174_v63  ;;  %v26184_v9 = vld [vmem:[%s33417_s0 + $0x11d8] sm:$0xff]   ;;  %24098 = vst [vmem:[%s33418_s1 + $0x5d8] sm:$0xff] %v26183_v8 }
 0x1a4   :  { %v26176_v1 = vld [vmem:[%s33417_s0 + $0x5c8] sm:$0xff]   ;;  %24066 = vst [vmem:[%s33418_s1 + $0x11c8] sm:$0xff] %v26175_v0  ;;  %v26185_v10 = vld [vmem:[%s33417_s0 + $0x5d8] sm:$0xff]   ;;  %24102 = vst [vmem:[%s33418_s1 + $0x11d8] sm:$0xff] %v26184_v9 }
 0x1a5   :  { %v26177_v2 = vld [vmem:[%s33417_s0 + $0x19c8] sm:$0xff]   ;;  %24070 = vst [vmem:[%s33418_s1 + $0x1dc8] sm:$0xff] %v26176_v1  ;;  %v26186_v11 = vld [vmem:[%s33417_s0 + $0x19d8] sm:$0xff]   ;;  %24106 = vst [vmem:[%s33418_s1 + $0x1dd8] sm:$0xff] %v26185_v10 }
 0x1a6   :  { %v26178_v3 = vld [vmem:[%s33417_s0 + $0xdc8] sm:$0xff]   ;;  %24074 = vst [vmem:[%s33418_s1 + $0x9c8] sm:$0xff] %v26177_v2  ;;  %v26187_v12 = vld [vmem:[%s33417_s0 + $0xdd8] sm:$0xff]   ;;  %24110 = vst [vmem:[%s33418_s1 + $0x9d8] sm:$0xff] %v26186_v11 }
 0x1a7   :  { %v26179_v4 = vld [vmem:[%s33417_s0 + $0x1c8] sm:$0xff]   ;;  %24078 = vst [vmem:[%s33418_s1 + $0x15c8] sm:$0xff] %v26178_v3  ;;  %v26188_v13 = vld [vmem:[%s33417_s0 + $0x1d8] sm:$0xff]   ;;  %24114 = vst [vmem:[%s33418_s1 + $0x15d8] sm:$0xff] %v26187_v12 }
 0x1a8   :  { %24082 = vst [vmem:[%s33418_s1 + $0x21c8] sm:$0xff] %v26179_v4  ;;  %v26189_v14 = vld [vmem:[%s33417_s0 + $0x21e8] sm:$0xff]   ;;  %24118 = vst [vmem:[%s33418_s1 + $0x21d8] sm:$0xff] %v26188_v13  ;;  %v26198_v23 = vld [vmem:[%s33417_s0 + $0x21f8] sm:$0xff]  }
 0x1a9   :  { %v26190_v15 = vld [vmem:[%s33417_s0 + $0x15e8] sm:$0xff]   ;;  %24122 = vst [vmem:[%s33418_s1 + $0x1e8] sm:$0xff] %v26189_v14  ;;  %v26199_v24 = vld [vmem:[%s33417_s0 + $0x15f8] sm:$0xff]   ;;  %24158 = vst [vmem:[%s33418_s1 + $0x1f8] sm:$0xff] %v26198_v23 }
 0x1aa   :  { %v26191_v16 = vld [vmem:[%s33417_s0 + $0x9e8] sm:$0xff]   ;;  %24126 = vst [vmem:[%s33418_s1 + $0xde8] sm:$0xff] %v26190_v15  ;;  %v26200_v25 = vld [vmem:[%s33417_s0 + $0x9f8] sm:$0xff]   ;;  %24162 = vst [vmem:[%s33418_s1 + $0xdf8] sm:$0xff] %v26199_v24 }
 0x1ab   :  { %v26192_v17 = vld [vmem:[%s33417_s0 + $0x1de8] sm:$0xff]   ;;  %24130 = vst [vmem:[%s33418_s1 + $0x19e8] sm:$0xff] %v26191_v16  ;;  %v26201_v26 = vld [vmem:[%s33417_s0 + $0x1df8] sm:$0xff]   ;;  %24166 = vst [vmem:[%s33418_s1 + $0x19f8] sm:$0xff] %v26200_v25 }
 0x1ac   :  { %v26193_v18 = vld [vmem:[%s33417_s0 + $0x11e8] sm:$0xff]   ;;  %24134 = vst [vmem:[%s33418_s1 + $0x5e8] sm:$0xff] %v26192_v17  ;;  %v26202_v27 = vld [vmem:[%s33417_s0 + $0x11f8] sm:$0xff]   ;;  %24170 = vst [vmem:[%s33418_s1 + $0x5f8] sm:$0xff] %v26201_v26 }
 0x1ad   :  { %v26194_v19 = vld [vmem:[%s33417_s0 + $0x5e8] sm:$0xff]   ;;  %24138 = vst [vmem:[%s33418_s1 + $0x11e8] sm:$0xff] %v26193_v18  ;;  %v26203_v28 = vld [vmem:[%s33417_s0 + $0x5f8] sm:$0xff]   ;;  %24174 = vst [vmem:[%s33418_s1 + $0x11f8] sm:$0xff] %v26202_v27 }
 0x1ae   :  { %v26195_v20 = vld [vmem:[%s33417_s0 + $0x19e8] sm:$0xff]   ;;  %24142 = vst [vmem:[%s33418_s1 + $0x1de8] sm:$0xff] %v26194_v19  ;;  %v26204_v29 = vld [vmem:[%s33417_s0 + $0x19f8] sm:$0xff]   ;;  %24178 = vst [vmem:[%s33418_s1 + $0x1df8] sm:$0xff] %v26203_v28 }
 0x1af   :  { %v26196_v21 = vld [vmem:[%s33417_s0 + $0xde8] sm:$0xff]   ;;  %24146 = vst [vmem:[%s33418_s1 + $0x9e8] sm:$0xff] %v26195_v20  ;;  %v26205_v30 = vld [vmem:[%s33417_s0 + $0xdf8] sm:$0xff]   ;;  %24182 = vst [vmem:[%s33418_s1 + $0x9f8] sm:$0xff] %v26204_v29 }
 0x1b0   :  { %v26197_v22 = vld [vmem:[%s33417_s0 + $0x1e8] sm:$0xff]   ;;  %24150 = vst [vmem:[%s33418_s1 + $0x15e8] sm:$0xff] %v26196_v21  ;;  %v26206_v31 = vld [vmem:[%s33417_s0 + $0x1f8] sm:$0xff]   ;;  %24186 = vst [vmem:[%s33418_s1 + $0x15f8] sm:$0xff] %v26205_v30 }
 0x1b1   :  { %24154 = vst [vmem:[%s33418_s1 + $0x21e8] sm:$0xff] %v26197_v22  ;;  %v26207_v32 = vld [vmem:[%s33417_s0 + $0x2208] sm:$0xff]   ;;  %24190 = vst [vmem:[%s33418_s1 + $0x21f8] sm:$0xff] %v26206_v31  ;;  %v26216_v41 = vld [vmem:[%s33417_s0 + $0x2218] sm:$0xff]  }
 0x1b2   :  { %v26208_v33 = vld [vmem:[%s33417_s0 + $0x1608] sm:$0xff]   ;;  %24194 = vst [vmem:[%s33418_s1 + $0x208] sm:$0xff] %v26207_v32  ;;  %v26217_v42 = vld [vmem:[%s33417_s0 + $0x1618] sm:$0xff]   ;;  %24230 = vst [vmem:[%s33418_s1 + $0x218] sm:$0xff] %v26216_v41 }
 0x1b3   :  { %v26209_v34 = vld [vmem:[%s33417_s0 + $0xa08] sm:$0xff]   ;;  %24198 = vst [vmem:[%s33418_s1 + $0xe08] sm:$0xff] %v26208_v33  ;;  %v26218_v43 = vld [vmem:[%s33417_s0 + $0xa18] sm:$0xff]   ;;  %24234 = vst [vmem:[%s33418_s1 + $0xe18] sm:$0xff] %v26217_v42 }
 0x1b4   :  { %v26210_v35 = vld [vmem:[%s33417_s0 + $0x1e08] sm:$0xff]   ;;  %24202 = vst [vmem:[%s33418_s1 + $0x1a08] sm:$0xff] %v26209_v34  ;;  %v26219_v44 = vld [vmem:[%s33417_s0 + $0x1e18] sm:$0xff]   ;;  %24238 = vst [vmem:[%s33418_s1 + $0x1a18] sm:$0xff] %v26218_v43 }
 0x1b5   :  { %v26211_v36 = vld [vmem:[%s33417_s0 + $0x1208] sm:$0xff]   ;;  %24206 = vst [vmem:[%s33418_s1 + $0x608] sm:$0xff] %v26210_v35  ;;  %v26220_v45 = vld [vmem:[%s33417_s0 + $0x1218] sm:$0xff]   ;;  %24242 = vst [vmem:[%s33418_s1 + $0x618] sm:$0xff] %v26219_v44 }
 0x1b6   :  { %v26212_v37 = vld [vmem:[%s33417_s0 + $0x608] sm:$0xff]   ;;  %24210 = vst [vmem:[%s33418_s1 + $0x1208] sm:$0xff] %v26211_v36  ;;  %v26221_v46 = vld [vmem:[%s33417_s0 + $0x618] sm:$0xff]   ;;  %24246 = vst [vmem:[%s33418_s1 + $0x1218] sm:$0xff] %v26220_v45 }
 0x1b7   :  { %v26213_v38 = vld [vmem:[%s33417_s0 + $0x1a08] sm:$0xff]   ;;  %24214 = vst [vmem:[%s33418_s1 + $0x1e08] sm:$0xff] %v26212_v37  ;;  %v26222_v47 = vld [vmem:[%s33417_s0 + $0x1a18] sm:$0xff]   ;;  %24250 = vst [vmem:[%s33418_s1 + $0x1e18] sm:$0xff] %v26221_v46 }
 0x1b8   :  { %v26214_v39 = vld [vmem:[%s33417_s0 + $0xe08] sm:$0xff]   ;;  %24218 = vst [vmem:[%s33418_s1 + $0xa08] sm:$0xff] %v26213_v38  ;;  %v26223_v48 = vld [vmem:[%s33417_s0 + $0xe18] sm:$0xff]   ;;  %24254 = vst [vmem:[%s33418_s1 + $0xa18] sm:$0xff] %v26222_v47 }
 0x1b9   :  { %v26215_v40 = vld [vmem:[%s33417_s0 + $0x208] sm:$0xff]   ;;  %24222 = vst [vmem:[%s33418_s1 + $0x1608] sm:$0xff] %v26214_v39  ;;  %v26224_v49 = vld [vmem:[%s33417_s0 + $0x218] sm:$0xff]   ;;  %24258 = vst [vmem:[%s33418_s1 + $0x1618] sm:$0xff] %v26223_v48 }
 0x1ba   :  { %24226 = vst [vmem:[%s33418_s1 + $0x2208] sm:$0xff] %v26215_v40  ;;  %v26225_v50 = vld [vmem:[%s33417_s0 + $0x2228] sm:$0xff]   ;;  %24262 = vst [vmem:[%s33418_s1 + $0x2218] sm:$0xff] %v26224_v49  ;;  %v26234_v59 = vld [vmem:[%s33417_s0 + $0x2238] sm:$0xff]  }
 0x1bb   :  { %v26226_v51 = vld [vmem:[%s33417_s0 + $0x1628] sm:$0xff]   ;;  %24266 = vst [vmem:[%s33418_s1 + $0x228] sm:$0xff] %v26225_v50  ;;  %v26235_v60 = vld [vmem:[%s33417_s0 + $0x1638] sm:$0xff]   ;;  %24302 = vst [vmem:[%s33418_s1 + $0x238] sm:$0xff] %v26234_v59 }
 0x1bc   :  { %v26227_v52 = vld [vmem:[%s33417_s0 + $0xa28] sm:$0xff]   ;;  %24270 = vst [vmem:[%s33418_s1 + $0xe28] sm:$0xff] %v26226_v51  ;;  %v26236_v61 = vld [vmem:[%s33417_s0 + $0xa38] sm:$0xff]   ;;  %24306 = vst [vmem:[%s33418_s1 + $0xe38] sm:$0xff] %v26235_v60 }
 0x1bd   :  { %v26228_v53 = vld [vmem:[%s33417_s0 + $0x1e28] sm:$0xff]   ;;  %24274 = vst [vmem:[%s33418_s1 + $0x1a28] sm:$0xff] %v26227_v52  ;;  %v26237_v62 = vld [vmem:[%s33417_s0 + $0x1e38] sm:$0xff]   ;;  %24310 = vst [vmem:[%s33418_s1 + $0x1a38] sm:$0xff] %v26236_v61 }
 0x1be   :  { %v26229_v54 = vld [vmem:[%s33417_s0 + $0x1228] sm:$0xff]   ;;  %24278 = vst [vmem:[%s33418_s1 + $0x628] sm:$0xff] %v26228_v53  ;;  %v26238_v63 = vld [vmem:[%s33417_s0 + $0x1238] sm:$0xff]   ;;  %24314 = vst [vmem:[%s33418_s1 + $0x638] sm:$0xff] %v26237_v62 }
 0x1bf   :  { %v26230_v55 = vld [vmem:[%s33417_s0 + $0x628] sm:$0xff]   ;;  %24282 = vst [vmem:[%s33418_s1 + $0x1228] sm:$0xff] %v26229_v54  ;;  %v26239_v0 = vld [vmem:[%s33417_s0 + $0x638] sm:$0xff]   ;;  %24318 = vst [vmem:[%s33418_s1 + $0x1238] sm:$0xff] %v26238_v63 }
 0x1c0   :  { %v26231_v56 = vld [vmem:[%s33417_s0 + $0x1a28] sm:$0xff]   ;;  %24286 = vst [vmem:[%s33418_s1 + $0x1e28] sm:$0xff] %v26230_v55  ;;  %v26240_v1 = vld [vmem:[%s33417_s0 + $0x1a38] sm:$0xff]   ;;  %24322 = vst [vmem:[%s33418_s1 + $0x1e38] sm:$0xff] %v26239_v0 }
 0x1c1   :  { %v26232_v57 = vld [vmem:[%s33417_s0 + $0xe28] sm:$0xff]   ;;  %24290 = vst [vmem:[%s33418_s1 + $0xa28] sm:$0xff] %v26231_v56  ;;  %v26241_v2 = vld [vmem:[%s33417_s0 + $0xe38] sm:$0xff]   ;;  %24326 = vst [vmem:[%s33418_s1 + $0xa38] sm:$0xff] %v26240_v1 }
 0x1c2   :  { %v26233_v58 = vld [vmem:[%s33417_s0 + $0x228] sm:$0xff]   ;;  %24294 = vst [vmem:[%s33418_s1 + $0x1628] sm:$0xff] %v26232_v57  ;;  %v26242_v3 = vld [vmem:[%s33417_s0 + $0x238] sm:$0xff]   ;;  %24330 = vst [vmem:[%s33418_s1 + $0x1638] sm:$0xff] %v26241_v2 }
 0x1c3   :  { %24298 = vst [vmem:[%s33418_s1 + $0x2228] sm:$0xff] %v26233_v58  ;;  %v26243_v4 = vld [vmem:[%s33417_s0 + $0x2248] sm:$0xff]   ;;  %24334 = vst [vmem:[%s33418_s1 + $0x2238] sm:$0xff] %v26242_v3  ;;  %v26252_v13 = vld [vmem:[%s33417_s0 + $0x2258] sm:$0xff]  }
 0x1c4   :  { %v26244_v5 = vld [vmem:[%s33417_s0 + $0x1648] sm:$0xff]   ;;  %24338 = vst [vmem:[%s33418_s1 + $0x248] sm:$0xff] %v26243_v4  ;;  %v26253_v14 = vld [vmem:[%s33417_s0 + $0x1658] sm:$0xff]   ;;  %24374 = vst [vmem:[%s33418_s1 + $0x258] sm:$0xff] %v26252_v13 }
 0x1c5   :  { %v26245_v6 = vld [vmem:[%s33417_s0 + $0xa48] sm:$0xff]   ;;  %24342 = vst [vmem:[%s33418_s1 + $0xe48] sm:$0xff] %v26244_v5  ;;  %v26254_v15 = vld [vmem:[%s33417_s0 + $0xa58] sm:$0xff]   ;;  %24378 = vst [vmem:[%s33418_s1 + $0xe58] sm:$0xff] %v26253_v14 }
 0x1c6   :  { %v26246_v7 = vld [vmem:[%s33417_s0 + $0x1e48] sm:$0xff]   ;;  %24346 = vst [vmem:[%s33418_s1 + $0x1a48] sm:$0xff] %v26245_v6  ;;  %v26255_v16 = vld [vmem:[%s33417_s0 + $0x1e58] sm:$0xff]   ;;  %24382 = vst [vmem:[%s33418_s1 + $0x1a58] sm:$0xff] %v26254_v15 }
 0x1c7   :  { %v26247_v8 = vld [vmem:[%s33417_s0 + $0x1248] sm:$0xff]   ;;  %24350 = vst [vmem:[%s33418_s1 + $0x648] sm:$0xff] %v26246_v7  ;;  %v26256_v17 = vld [vmem:[%s33417_s0 + $0x1258] sm:$0xff]   ;;  %24386 = vst [vmem:[%s33418_s1 + $0x658] sm:$0xff] %v26255_v16 }
 0x1c8   :  { %v26248_v9 = vld [vmem:[%s33417_s0 + $0x648] sm:$0xff]   ;;  %24354 = vst [vmem:[%s33418_s1 + $0x1248] sm:$0xff] %v26247_v8  ;;  %v26257_v18 = vld [vmem:[%s33417_s0 + $0x658] sm:$0xff]   ;;  %24390 = vst [vmem:[%s33418_s1 + $0x1258] sm:$0xff] %v26256_v17 }
 0x1c9   :  { %v26249_v10 = vld [vmem:[%s33417_s0 + $0x1a48] sm:$0xff]   ;;  %24358 = vst [vmem:[%s33418_s1 + $0x1e48] sm:$0xff] %v26248_v9  ;;  %v26258_v19 = vld [vmem:[%s33417_s0 + $0x1a58] sm:$0xff]   ;;  %24394 = vst [vmem:[%s33418_s1 + $0x1e58] sm:$0xff] %v26257_v18 }
 0x1ca   :  { %v26250_v11 = vld [vmem:[%s33417_s0 + $0xe48] sm:$0xff]   ;;  %24362 = vst [vmem:[%s33418_s1 + $0xa48] sm:$0xff] %v26249_v10  ;;  %v26259_v20 = vld [vmem:[%s33417_s0 + $0xe58] sm:$0xff]   ;;  %24398 = vst [vmem:[%s33418_s1 + $0xa58] sm:$0xff] %v26258_v19 }
 0x1cb   :  { %v26251_v12 = vld [vmem:[%s33417_s0 + $0x248] sm:$0xff]   ;;  %24366 = vst [vmem:[%s33418_s1 + $0x1648] sm:$0xff] %v26250_v11  ;;  %v26260_v21 = vld [vmem:[%s33417_s0 + $0x258] sm:$0xff]   ;;  %24402 = vst [vmem:[%s33418_s1 + $0x1658] sm:$0xff] %v26259_v20 }
 0x1cc   :  { %24370 = vst [vmem:[%s33418_s1 + $0x2248] sm:$0xff] %v26251_v12  ;;  %v26261_v22 = vld [vmem:[%s33417_s0 + $0x2268] sm:$0xff]   ;;  %24406 = vst [vmem:[%s33418_s1 + $0x2258] sm:$0xff] %v26260_v21  ;;  %v26270_v31 = vld [vmem:[%s33417_s0 + $0x2278] sm:$0xff]  }
 0x1cd   :  { %v26262_v23 = vld [vmem:[%s33417_s0 + $0x1668] sm:$0xff]   ;;  %24410 = vst [vmem:[%s33418_s1 + $0x268] sm:$0xff] %v26261_v22  ;;  %v26271_v32 = vld [vmem:[%s33417_s0 + $0x1678] sm:$0xff]   ;;  %24446 = vst [vmem:[%s33418_s1 + $0x278] sm:$0xff] %v26270_v31 }
 0x1ce   :  { %v26263_v24 = vld [vmem:[%s33417_s0 + $0xa68] sm:$0xff]   ;;  %24414 = vst [vmem:[%s33418_s1 + $0xe68] sm:$0xff] %v26262_v23  ;;  %v26272_v33 = vld [vmem:[%s33417_s0 + $0xa78] sm:$0xff]   ;;  %24450 = vst [vmem:[%s33418_s1 + $0xe78] sm:$0xff] %v26271_v32 }
 0x1cf   :  { %v26264_v25 = vld [vmem:[%s33417_s0 + $0x1e68] sm:$0xff]   ;;  %24418 = vst [vmem:[%s33418_s1 + $0x1a68] sm:$0xff] %v26263_v24  ;;  %v26273_v34 = vld [vmem:[%s33417_s0 + $0x1e78] sm:$0xff]   ;;  %24454 = vst [vmem:[%s33418_s1 + $0x1a78] sm:$0xff] %v26272_v33 }
 0x1d0   :  { %v26265_v26 = vld [vmem:[%s33417_s0 + $0x1268] sm:$0xff]   ;;  %24422 = vst [vmem:[%s33418_s1 + $0x668] sm:$0xff] %v26264_v25  ;;  %v26274_v35 = vld [vmem:[%s33417_s0 + $0x1278] sm:$0xff]   ;;  %24458 = vst [vmem:[%s33418_s1 + $0x678] sm:$0xff] %v26273_v34 }
 0x1d1   :  { %v26266_v27 = vld [vmem:[%s33417_s0 + $0x668] sm:$0xff]   ;;  %24426 = vst [vmem:[%s33418_s1 + $0x1268] sm:$0xff] %v26265_v26  ;;  %v26275_v36 = vld [vmem:[%s33417_s0 + $0x678] sm:$0xff]   ;;  %24462 = vst [vmem:[%s33418_s1 + $0x1278] sm:$0xff] %v26274_v35 }
 0x1d2   :  { %v26267_v28 = vld [vmem:[%s33417_s0 + $0x1a68] sm:$0xff]   ;;  %24430 = vst [vmem:[%s33418_s1 + $0x1e68] sm:$0xff] %v26266_v27  ;;  %v26276_v37 = vld [vmem:[%s33417_s0 + $0x1a78] sm:$0xff]   ;;  %24466 = vst [vmem:[%s33418_s1 + $0x1e78] sm:$0xff] %v26275_v36 }
 0x1d3   :  { %v26268_v29 = vld [vmem:[%s33417_s0 + $0xe68] sm:$0xff]   ;;  %24434 = vst [vmem:[%s33418_s1 + $0xa68] sm:$0xff] %v26267_v28  ;;  %v26277_v38 = vld [vmem:[%s33417_s0 + $0xe78] sm:$0xff]   ;;  %24470 = vst [vmem:[%s33418_s1 + $0xa78] sm:$0xff] %v26276_v37 }
 0x1d4   :  { %v26269_v30 = vld [vmem:[%s33417_s0 + $0x268] sm:$0xff]   ;;  %24438 = vst [vmem:[%s33418_s1 + $0x1668] sm:$0xff] %v26268_v29  ;;  %v26278_v39 = vld [vmem:[%s33417_s0 + $0x278] sm:$0xff]   ;;  %24474 = vst [vmem:[%s33418_s1 + $0x1678] sm:$0xff] %v26277_v38 }
 0x1d5   :  { %24442 = vst [vmem:[%s33418_s1 + $0x2268] sm:$0xff] %v26269_v30  ;;  %v26279_v40 = vld [vmem:[%s33417_s0 + $0x2288] sm:$0xff]   ;;  %24478 = vst [vmem:[%s33418_s1 + $0x2278] sm:$0xff] %v26278_v39  ;;  %v26288_v49 = vld [vmem:[%s33417_s0 + $0x2298] sm:$0xff]  }
 0x1d6   :  { %v26280_v41 = vld [vmem:[%s33417_s0 + $0x1688] sm:$0xff]   ;;  %24482 = vst [vmem:[%s33418_s1 + $0x288] sm:$0xff] %v26279_v40  ;;  %v26289_v50 = vld [vmem:[%s33417_s0 + $0x1698] sm:$0xff]   ;;  %24518 = vst [vmem:[%s33418_s1 + $0x298] sm:$0xff] %v26288_v49 }
 0x1d7   :  { %v26281_v42 = vld [vmem:[%s33417_s0 + $0xa88] sm:$0xff]   ;;  %24486 = vst [vmem:[%s33418_s1 + $0xe88] sm:$0xff] %v26280_v41  ;;  %v26290_v51 = vld [vmem:[%s33417_s0 + $0xa98] sm:$0xff]   ;;  %24522 = vst [vmem:[%s33418_s1 + $0xe98] sm:$0xff] %v26289_v50 }
 0x1d8   :  { %v26282_v43 = vld [vmem:[%s33417_s0 + $0x1e88] sm:$0xff]   ;;  %24490 = vst [vmem:[%s33418_s1 + $0x1a88] sm:$0xff] %v26281_v42  ;;  %v26291_v52 = vld [vmem:[%s33417_s0 + $0x1e98] sm:$0xff]   ;;  %24526 = vst [vmem:[%s33418_s1 + $0x1a98] sm:$0xff] %v26290_v51 }
 0x1d9   :  { %v26283_v44 = vld [vmem:[%s33417_s0 + $0x1288] sm:$0xff]   ;;  %24494 = vst [vmem:[%s33418_s1 + $0x688] sm:$0xff] %v26282_v43  ;;  %v26292_v53 = vld [vmem:[%s33417_s0 + $0x1298] sm:$0xff]   ;;  %24530 = vst [vmem:[%s33418_s1 + $0x698] sm:$0xff] %v26291_v52 }
 0x1da   :  { %v26284_v45 = vld [vmem:[%s33417_s0 + $0x688] sm:$0xff]   ;;  %24498 = vst [vmem:[%s33418_s1 + $0x1288] sm:$0xff] %v26283_v44  ;;  %v26293_v54 = vld [vmem:[%s33417_s0 + $0x698] sm:$0xff]   ;;  %24534 = vst [vmem:[%s33418_s1 + $0x1298] sm:$0xff] %v26292_v53 }
 0x1db   :  { %v26285_v46 = vld [vmem:[%s33417_s0 + $0x1a88] sm:$0xff]   ;;  %24502 = vst [vmem:[%s33418_s1 + $0x1e88] sm:$0xff] %v26284_v45  ;;  %v26294_v55 = vld [vmem:[%s33417_s0 + $0x1a98] sm:$0xff]   ;;  %24538 = vst [vmem:[%s33418_s1 + $0x1e98] sm:$0xff] %v26293_v54 }
 0x1dc   :  { %v26286_v47 = vld [vmem:[%s33417_s0 + $0xe88] sm:$0xff]   ;;  %24506 = vst [vmem:[%s33418_s1 + $0xa88] sm:$0xff] %v26285_v46  ;;  %v26295_v56 = vld [vmem:[%s33417_s0 + $0xe98] sm:$0xff]   ;;  %24542 = vst [vmem:[%s33418_s1 + $0xa98] sm:$0xff] %v26294_v55 }
 0x1dd   :  { %v26287_v48 = vld [vmem:[%s33417_s0 + $0x288] sm:$0xff]   ;;  %24510 = vst [vmem:[%s33418_s1 + $0x1688] sm:$0xff] %v26286_v47  ;;  %v26296_v57 = vld [vmem:[%s33417_s0 + $0x298] sm:$0xff]   ;;  %24546 = vst [vmem:[%s33418_s1 + $0x1698] sm:$0xff] %v26295_v56 }
 0x1de   :  { %24514 = vst [vmem:[%s33418_s1 + $0x2288] sm:$0xff] %v26287_v48  ;;  %v26297_v58 = vld [vmem:[%s33417_s0 + $0x22a8] sm:$0xff]   ;;  %24550 = vst [vmem:[%s33418_s1 + $0x2298] sm:$0xff] %v26296_v57  ;;  %v26306_v3 = vld [vmem:[%s33417_s0 + $0x22b8] sm:$0xff]  }
 0x1df   :  { %v26298_v59 = vld [vmem:[%s33417_s0 + $0x16a8] sm:$0xff]   ;;  %24554 = vst [vmem:[%s33418_s1 + $0x2a8] sm:$0xff] %v26297_v58  ;;  %v26307_v4 = vld [vmem:[%s33417_s0 + $0x16b8] sm:$0xff]   ;;  %24590 = vst [vmem:[%s33418_s1 + $0x2b8] sm:$0xff] %v26306_v3 }
 0x1e0   :  { %v26299_v60 = vld [vmem:[%s33417_s0 + $0xaa8] sm:$0xff]   ;;  %24558 = vst [vmem:[%s33418_s1 + $0xea8] sm:$0xff] %v26298_v59  ;;  %v26308_v5 = vld [vmem:[%s33417_s0 + $0xab8] sm:$0xff]   ;;  %24594 = vst [vmem:[%s33418_s1 + $0xeb8] sm:$0xff] %v26307_v4 }
 0x1e1   :  { %v26300_v61 = vld [vmem:[%s33417_s0 + $0x1ea8] sm:$0xff]   ;;  %24562 = vst [vmem:[%s33418_s1 + $0x1aa8] sm:$0xff] %v26299_v60  ;;  %v26309_v6 = vld [vmem:[%s33417_s0 + $0x1eb8] sm:$0xff]   ;;  %24598 = vst [vmem:[%s33418_s1 + $0x1ab8] sm:$0xff] %v26308_v5 }
 0x1e2   :  { %v26301_v62 = vld [vmem:[%s33417_s0 + $0x12a8] sm:$0xff]   ;;  %24566 = vst [vmem:[%s33418_s1 + $0x6a8] sm:$0xff] %v26300_v61  ;;  %v26310_v7 = vld [vmem:[%s33417_s0 + $0x12b8] sm:$0xff]   ;;  %24602 = vst [vmem:[%s33418_s1 + $0x6b8] sm:$0xff] %v26309_v6 }
 0x1e3   :  { %v26302_v63 = vld [vmem:[%s33417_s0 + $0x6a8] sm:$0xff]   ;;  %24570 = vst [vmem:[%s33418_s1 + $0x12a8] sm:$0xff] %v26301_v62  ;;  %v26311_v8 = vld [vmem:[%s33417_s0 + $0x6b8] sm:$0xff]   ;;  %24606 = vst [vmem:[%s33418_s1 + $0x12b8] sm:$0xff] %v26310_v7 }
 0x1e4   :  { %v26303_v0 = vld [vmem:[%s33417_s0 + $0x1aa8] sm:$0xff]   ;;  %24574 = vst [vmem:[%s33418_s1 + $0x1ea8] sm:$0xff] %v26302_v63  ;;  %v26312_v9 = vld [vmem:[%s33417_s0 + $0x1ab8] sm:$0xff]   ;;  %24610 = vst [vmem:[%s33418_s1 + $0x1eb8] sm:$0xff] %v26311_v8 }
 0x1e5   :  { %v26304_v1 = vld [vmem:[%s33417_s0 + $0xea8] sm:$0xff]   ;;  %24578 = vst [vmem:[%s33418_s1 + $0xaa8] sm:$0xff] %v26303_v0  ;;  %v26313_v10 = vld [vmem:[%s33417_s0 + $0xeb8] sm:$0xff]   ;;  %24614 = vst [vmem:[%s33418_s1 + $0xab8] sm:$0xff] %v26312_v9 }
 0x1e6   :  { %v26305_v2 = vld [vmem:[%s33417_s0 + $0x2a8] sm:$0xff]   ;;  %24582 = vst [vmem:[%s33418_s1 + $0x16a8] sm:$0xff] %v26304_v1  ;;  %v26314_v11 = vld [vmem:[%s33417_s0 + $0x2b8] sm:$0xff]   ;;  %24618 = vst [vmem:[%s33418_s1 + $0x16b8] sm:$0xff] %v26313_v10 }
 0x1e7   :  { %24586 = vst [vmem:[%s33418_s1 + $0x22a8] sm:$0xff] %v26305_v2  ;;  %v26315_v12 = vld [vmem:[%s33417_s0 + $0x22c8] sm:$0xff]   ;;  %24622 = vst [vmem:[%s33418_s1 + $0x22b8] sm:$0xff] %v26314_v11  ;;  %v26324_v21 = vld [vmem:[%s33417_s0 + $0x22d8] sm:$0xff]  }
 0x1e8   :  { %v26316_v13 = vld [vmem:[%s33417_s0 + $0x16c8] sm:$0xff]   ;;  %24626 = vst [vmem:[%s33418_s1 + $0x2c8] sm:$0xff] %v26315_v12  ;;  %v26325_v22 = vld [vmem:[%s33417_s0 + $0x16d8] sm:$0xff]   ;;  %24662 = vst [vmem:[%s33418_s1 + $0x2d8] sm:$0xff] %v26324_v21 }
 0x1e9   :  { %v26317_v14 = vld [vmem:[%s33417_s0 + $0xac8] sm:$0xff]   ;;  %24630 = vst [vmem:[%s33418_s1 + $0xec8] sm:$0xff] %v26316_v13  ;;  %v26326_v23 = vld [vmem:[%s33417_s0 + $0xad8] sm:$0xff]   ;;  %24666 = vst [vmem:[%s33418_s1 + $0xed8] sm:$0xff] %v26325_v22 }
 0x1ea   :  { %v26318_v15 = vld [vmem:[%s33417_s0 + $0x1ec8] sm:$0xff]   ;;  %24634 = vst [vmem:[%s33418_s1 + $0x1ac8] sm:$0xff] %v26317_v14  ;;  %v26327_v24 = vld [vmem:[%s33417_s0 + $0x1ed8] sm:$0xff]   ;;  %24670 = vst [vmem:[%s33418_s1 + $0x1ad8] sm:$0xff] %v26326_v23 }
 0x1eb   :  { %v26319_v16 = vld [vmem:[%s33417_s0 + $0x12c8] sm:$0xff]   ;;  %24638 = vst [vmem:[%s33418_s1 + $0x6c8] sm:$0xff] %v26318_v15  ;;  %v26328_v25 = vld [vmem:[%s33417_s0 + $0x12d8] sm:$0xff]   ;;  %24674 = vst [vmem:[%s33418_s1 + $0x6d8] sm:$0xff] %v26327_v24 }
 0x1ec   :  { %v26320_v17 = vld [vmem:[%s33417_s0 + $0x6c8] sm:$0xff]   ;;  %24642 = vst [vmem:[%s33418_s1 + $0x12c8] sm:$0xff] %v26319_v16  ;;  %v26329_v26 = vld [vmem:[%s33417_s0 + $0x6d8] sm:$0xff]   ;;  %24678 = vst [vmem:[%s33418_s1 + $0x12d8] sm:$0xff] %v26328_v25 }
 0x1ed   :  { %v26321_v18 = vld [vmem:[%s33417_s0 + $0x1ac8] sm:$0xff]   ;;  %24646 = vst [vmem:[%s33418_s1 + $0x1ec8] sm:$0xff] %v26320_v17  ;;  %v26330_v27 = vld [vmem:[%s33417_s0 + $0x1ad8] sm:$0xff]   ;;  %24682 = vst [vmem:[%s33418_s1 + $0x1ed8] sm:$0xff] %v26329_v26 }
 0x1ee   :  { %v26322_v19 = vld [vmem:[%s33417_s0 + $0xec8] sm:$0xff]   ;;  %24650 = vst [vmem:[%s33418_s1 + $0xac8] sm:$0xff] %v26321_v18  ;;  %v26331_v28 = vld [vmem:[%s33417_s0 + $0xed8] sm:$0xff]   ;;  %24686 = vst [vmem:[%s33418_s1 + $0xad8] sm:$0xff] %v26330_v27 }
 0x1ef   :  { %v26323_v20 = vld [vmem:[%s33417_s0 + $0x2c8] sm:$0xff]   ;;  %24654 = vst [vmem:[%s33418_s1 + $0x16c8] sm:$0xff] %v26322_v19  ;;  %v26332_v29 = vld [vmem:[%s33417_s0 + $0x2d8] sm:$0xff]   ;;  %24690 = vst [vmem:[%s33418_s1 + $0x16d8] sm:$0xff] %v26331_v28 }
 0x1f0   :  { %24658 = vst [vmem:[%s33418_s1 + $0x22c8] sm:$0xff] %v26323_v20  ;;  %v26333_v30 = vld [vmem:[%s33417_s0 + $0x22e8] sm:$0xff]   ;;  %24694 = vst [vmem:[%s33418_s1 + $0x22d8] sm:$0xff] %v26332_v29  ;;  %v26342_v39 = vld [vmem:[%s33417_s0 + $0x22f8] sm:$0xff]  }
 0x1f1   :  { %v26334_v31 = vld [vmem:[%s33417_s0 + $0x16e8] sm:$0xff]   ;;  %24698 = vst [vmem:[%s33418_s1 + $0x2e8] sm:$0xff] %v26333_v30  ;;  %v26343_v40 = vld [vmem:[%s33417_s0 + $0x16f8] sm:$0xff]   ;;  %24734 = vst [vmem:[%s33418_s1 + $0x2f8] sm:$0xff] %v26342_v39 }
 0x1f2   :  { %v26335_v32 = vld [vmem:[%s33417_s0 + $0xae8] sm:$0xff]   ;;  %24702 = vst [vmem:[%s33418_s1 + $0xee8] sm:$0xff] %v26334_v31  ;;  %v26344_v41 = vld [vmem:[%s33417_s0 + $0xaf8] sm:$0xff]   ;;  %24738 = vst [vmem:[%s33418_s1 + $0xef8] sm:$0xff] %v26343_v40 }
 0x1f3   :  { %v26336_v33 = vld [vmem:[%s33417_s0 + $0x1ee8] sm:$0xff]   ;;  %24706 = vst [vmem:[%s33418_s1 + $0x1ae8] sm:$0xff] %v26335_v32  ;;  %v26345_v42 = vld [vmem:[%s33417_s0 + $0x1ef8] sm:$0xff]   ;;  %24742 = vst [vmem:[%s33418_s1 + $0x1af8] sm:$0xff] %v26344_v41 }
 0x1f4   :  { %v26337_v34 = vld [vmem:[%s33417_s0 + $0x12e8] sm:$0xff]   ;;  %24710 = vst [vmem:[%s33418_s1 + $0x6e8] sm:$0xff] %v26336_v33  ;;  %v26346_v43 = vld [vmem:[%s33417_s0 + $0x12f8] sm:$0xff]   ;;  %24746 = vst [vmem:[%s33418_s1 + $0x6f8] sm:$0xff] %v26345_v42 }
 0x1f5   :  { %v26338_v35 = vld [vmem:[%s33417_s0 + $0x6e8] sm:$0xff]   ;;  %24714 = vst [vmem:[%s33418_s1 + $0x12e8] sm:$0xff] %v26337_v34  ;;  %v26347_v44 = vld [vmem:[%s33417_s0 + $0x6f8] sm:$0xff]   ;;  %24750 = vst [vmem:[%s33418_s1 + $0x12f8] sm:$0xff] %v26346_v43 }
 0x1f6   :  { %v26339_v36 = vld [vmem:[%s33417_s0 + $0x1ae8] sm:$0xff]   ;;  %24718 = vst [vmem:[%s33418_s1 + $0x1ee8] sm:$0xff] %v26338_v35  ;;  %v26348_v45 = vld [vmem:[%s33417_s0 + $0x1af8] sm:$0xff]   ;;  %24754 = vst [vmem:[%s33418_s1 + $0x1ef8] sm:$0xff] %v26347_v44 }
 0x1f7   :  { %v26340_v37 = vld [vmem:[%s33417_s0 + $0xee8] sm:$0xff]   ;;  %24722 = vst [vmem:[%s33418_s1 + $0xae8] sm:$0xff] %v26339_v36  ;;  %v26349_v46 = vld [vmem:[%s33417_s0 + $0xef8] sm:$0xff]   ;;  %24758 = vst [vmem:[%s33418_s1 + $0xaf8] sm:$0xff] %v26348_v45 }
 0x1f8   :  { %v26341_v38 = vld [vmem:[%s33417_s0 + $0x2e8] sm:$0xff]   ;;  %24726 = vst [vmem:[%s33418_s1 + $0x16e8] sm:$0xff] %v26340_v37  ;;  %v26350_v47 = vld [vmem:[%s33417_s0 + $0x2f8] sm:$0xff]   ;;  %24762 = vst [vmem:[%s33418_s1 + $0x16f8] sm:$0xff] %v26349_v46 }
 0x1f9   :  { %24730 = vst [vmem:[%s33418_s1 + $0x22e8] sm:$0xff] %v26341_v38  ;;  %v26351_v48 = vld [vmem:[%s33417_s0 + $0x2308] sm:$0xff]   ;;  %24766 = vst [vmem:[%s33418_s1 + $0x22f8] sm:$0xff] %v26350_v47  ;;  %v26360_v57 = vld [vmem:[%s33417_s0 + $0x2318] sm:$0xff]  }
 0x1fa   :  { %v26352_v49 = vld [vmem:[%s33417_s0 + $0x1708] sm:$0xff]   ;;  %24770 = vst [vmem:[%s33418_s1 + $0x308] sm:$0xff] %v26351_v48  ;;  %v26361_v58 = vld [vmem:[%s33417_s0 + $0x1718] sm:$0xff]   ;;  %24806 = vst [vmem:[%s33418_s1 + $0x318] sm:$0xff] %v26360_v57 }
 0x1fb   :  { %v26353_v50 = vld [vmem:[%s33417_s0 + $0xb08] sm:$0xff]   ;;  %24774 = vst [vmem:[%s33418_s1 + $0xf08] sm:$0xff] %v26352_v49  ;;  %v26362_v59 = vld [vmem:[%s33417_s0 + $0xb18] sm:$0xff]   ;;  %24810 = vst [vmem:[%s33418_s1 + $0xf18] sm:$0xff] %v26361_v58 }
 0x1fc   :  { %v26354_v51 = vld [vmem:[%s33417_s0 + $0x1f08] sm:$0xff]   ;;  %24778 = vst [vmem:[%s33418_s1 + $0x1b08] sm:$0xff] %v26353_v50  ;;  %v26363_v60 = vld [vmem:[%s33417_s0 + $0x1f18] sm:$0xff]   ;;  %24814 = vst [vmem:[%s33418_s1 + $0x1b18] sm:$0xff] %v26362_v59 }
 0x1fd   :  { %v26355_v52 = vld [vmem:[%s33417_s0 + $0x1308] sm:$0xff]   ;;  %24782 = vst [vmem:[%s33418_s1 + $0x708] sm:$0xff] %v26354_v51  ;;  %v26364_v61 = vld [vmem:[%s33417_s0 + $0x1318] sm:$0xff]   ;;  %24818 = vst [vmem:[%s33418_s1 + $0x718] sm:$0xff] %v26363_v60 }
 0x1fe   :  { %v26356_v53 = vld [vmem:[%s33417_s0 + $0x708] sm:$0xff]   ;;  %24786 = vst [vmem:[%s33418_s1 + $0x1308] sm:$0xff] %v26355_v52  ;;  %v26365_v62 = vld [vmem:[%s33417_s0 + $0x718] sm:$0xff]   ;;  %24822 = vst [vmem:[%s33418_s1 + $0x1318] sm:$0xff] %v26364_v61 }
 0x1ff   :  { %v26357_v54 = vld [vmem:[%s33417_s0 + $0x1b08] sm:$0xff]   ;;  %24790 = vst [vmem:[%s33418_s1 + $0x1f08] sm:$0xff] %v26356_v53  ;;  %v26366_v63 = vld [vmem:[%s33417_s0 + $0x1b18] sm:$0xff]   ;;  %24826 = vst [vmem:[%s33418_s1 + $0x1f18] sm:$0xff] %v26365_v62 }
 0x200   :  { %v26358_v55 = vld [vmem:[%s33417_s0 + $0xf08] sm:$0xff]   ;;  %24794 = vst [vmem:[%s33418_s1 + $0xb08] sm:$0xff] %v26357_v54  ;;  %v26367_v0 = vld [vmem:[%s33417_s0 + $0xf18] sm:$0xff]   ;;  %24830 = vst [vmem:[%s33418_s1 + $0xb18] sm:$0xff] %v26366_v63 }
 0x201   :  { %v26359_v56 = vld [vmem:[%s33417_s0 + $0x308] sm:$0xff]   ;;  %24798 = vst [vmem:[%s33418_s1 + $0x1708] sm:$0xff] %v26358_v55  ;;  %v26368_v1 = vld [vmem:[%s33417_s0 + $0x318] sm:$0xff]   ;;  %24834 = vst [vmem:[%s33418_s1 + $0x1718] sm:$0xff] %v26367_v0 }
 0x202   :  { %24802 = vst [vmem:[%s33418_s1 + $0x2308] sm:$0xff] %v26359_v56  ;;  %v26369_v2 = vld [vmem:[%s33417_s0 + $0x2328] sm:$0xff]   ;;  %24838 = vst [vmem:[%s33418_s1 + $0x2318] sm:$0xff] %v26368_v1  ;;  %v26378_v11 = vld [vmem:[%s33417_s0 + $0x2338] sm:$0xff]  }
 0x203   :  { %v26370_v3 = vld [vmem:[%s33417_s0 + $0x1728] sm:$0xff]   ;;  %24842 = vst [vmem:[%s33418_s1 + $0x328] sm:$0xff] %v26369_v2  ;;  %v26379_v12 = vld [vmem:[%s33417_s0 + $0x1738] sm:$0xff]   ;;  %24878 = vst [vmem:[%s33418_s1 + $0x338] sm:$0xff] %v26378_v11 }
 0x204   :  { %v26371_v4 = vld [vmem:[%s33417_s0 + $0xb28] sm:$0xff]   ;;  %24846 = vst [vmem:[%s33418_s1 + $0xf28] sm:$0xff] %v26370_v3  ;;  %v26380_v13 = vld [vmem:[%s33417_s0 + $0xb38] sm:$0xff]   ;;  %24882 = vst [vmem:[%s33418_s1 + $0xf38] sm:$0xff] %v26379_v12 }
 0x205   :  { %v26372_v5 = vld [vmem:[%s33417_s0 + $0x1f28] sm:$0xff]   ;;  %24850 = vst [vmem:[%s33418_s1 + $0x1b28] sm:$0xff] %v26371_v4  ;;  %v26381_v14 = vld [vmem:[%s33417_s0 + $0x1f38] sm:$0xff]   ;;  %24886 = vst [vmem:[%s33418_s1 + $0x1b38] sm:$0xff] %v26380_v13 }
 0x206   :  { %v26373_v6 = vld [vmem:[%s33417_s0 + $0x1328] sm:$0xff]   ;;  %24854 = vst [vmem:[%s33418_s1 + $0x728] sm:$0xff] %v26372_v5  ;;  %v26382_v15 = vld [vmem:[%s33417_s0 + $0x1338] sm:$0xff]   ;;  %24890 = vst [vmem:[%s33418_s1 + $0x738] sm:$0xff] %v26381_v14 }
 0x207   :  { %v26374_v7 = vld [vmem:[%s33417_s0 + $0x728] sm:$0xff]   ;;  %24858 = vst [vmem:[%s33418_s1 + $0x1328] sm:$0xff] %v26373_v6  ;;  %v26383_v16 = vld [vmem:[%s33417_s0 + $0x738] sm:$0xff]   ;;  %24894 = vst [vmem:[%s33418_s1 + $0x1338] sm:$0xff] %v26382_v15 }
 0x208   :  { %v26375_v8 = vld [vmem:[%s33417_s0 + $0x1b28] sm:$0xff]   ;;  %24862 = vst [vmem:[%s33418_s1 + $0x1f28] sm:$0xff] %v26374_v7  ;;  %v26384_v17 = vld [vmem:[%s33417_s0 + $0x1b38] sm:$0xff]   ;;  %24898 = vst [vmem:[%s33418_s1 + $0x1f38] sm:$0xff] %v26383_v16 }
 0x209   :  { %v26376_v9 = vld [vmem:[%s33417_s0 + $0xf28] sm:$0xff]   ;;  %24866 = vst [vmem:[%s33418_s1 + $0xb28] sm:$0xff] %v26375_v8  ;;  %v26385_v18 = vld [vmem:[%s33417_s0 + $0xf38] sm:$0xff]   ;;  %24902 = vst [vmem:[%s33418_s1 + $0xb38] sm:$0xff] %v26384_v17 }
 0x20a   :  { %v26377_v10 = vld [vmem:[%s33417_s0 + $0x328] sm:$0xff]   ;;  %24870 = vst [vmem:[%s33418_s1 + $0x1728] sm:$0xff] %v26376_v9  ;;  %v26386_v19 = vld [vmem:[%s33417_s0 + $0x338] sm:$0xff]   ;;  %24906 = vst [vmem:[%s33418_s1 + $0x1738] sm:$0xff] %v26385_v18 }
 0x20b   :  { %24874 = vst [vmem:[%s33418_s1 + $0x2328] sm:$0xff] %v26377_v10  ;;  %v26387_v20 = vld [vmem:[%s33417_s0 + $0x2348] sm:$0xff]   ;;  %24910 = vst [vmem:[%s33418_s1 + $0x2338] sm:$0xff] %v26386_v19  ;;  %v26396_v29 = vld [vmem:[%s33417_s0 + $0x2358] sm:$0xff]  }
 0x20c   :  { %v26388_v21 = vld [vmem:[%s33417_s0 + $0x1748] sm:$0xff]   ;;  %24914 = vst [vmem:[%s33418_s1 + $0x348] sm:$0xff] %v26387_v20  ;;  %v26397_v30 = vld [vmem:[%s33417_s0 + $0x1758] sm:$0xff]   ;;  %24950 = vst [vmem:[%s33418_s1 + $0x358] sm:$0xff] %v26396_v29 }
 0x20d   :  { %v26389_v22 = vld [vmem:[%s33417_s0 + $0xb48] sm:$0xff]   ;;  %24918 = vst [vmem:[%s33418_s1 + $0xf48] sm:$0xff] %v26388_v21  ;;  %v26398_v31 = vld [vmem:[%s33417_s0 + $0xb58] sm:$0xff]   ;;  %24954 = vst [vmem:[%s33418_s1 + $0xf58] sm:$0xff] %v26397_v30 }
 0x20e   :  { %v26390_v23 = vld [vmem:[%s33417_s0 + $0x1f48] sm:$0xff]   ;;  %24922 = vst [vmem:[%s33418_s1 + $0x1b48] sm:$0xff] %v26389_v22  ;;  %v26399_v32 = vld [vmem:[%s33417_s0 + $0x1f58] sm:$0xff]   ;;  %24958 = vst [vmem:[%s33418_s1 + $0x1b58] sm:$0xff] %v26398_v31 }
 0x20f   :  { %v26391_v24 = vld [vmem:[%s33417_s0 + $0x1348] sm:$0xff]   ;;  %24926 = vst [vmem:[%s33418_s1 + $0x748] sm:$0xff] %v26390_v23  ;;  %v26400_v33 = vld [vmem:[%s33417_s0 + $0x1358] sm:$0xff]   ;;  %24962 = vst [vmem:[%s33418_s1 + $0x758] sm:$0xff] %v26399_v32 }
 0x210   :  { %v26392_v25 = vld [vmem:[%s33417_s0 + $0x748] sm:$0xff]   ;;  %24930 = vst [vmem:[%s33418_s1 + $0x1348] sm:$0xff] %v26391_v24  ;;  %v26401_v34 = vld [vmem:[%s33417_s0 + $0x758] sm:$0xff]   ;;  %24966 = vst [vmem:[%s33418_s1 + $0x1358] sm:$0xff] %v26400_v33 }
 0x211   :  { %v26393_v26 = vld [vmem:[%s33417_s0 + $0x1b48] sm:$0xff]   ;;  %24934 = vst [vmem:[%s33418_s1 + $0x1f48] sm:$0xff] %v26392_v25  ;;  %v26402_v35 = vld [vmem:[%s33417_s0 + $0x1b58] sm:$0xff]   ;;  %24970 = vst [vmem:[%s33418_s1 + $0x1f58] sm:$0xff] %v26401_v34 }
 0x212   :  { %v26394_v27 = vld [vmem:[%s33417_s0 + $0xf48] sm:$0xff]   ;;  %24938 = vst [vmem:[%s33418_s1 + $0xb48] sm:$0xff] %v26393_v26  ;;  %v26403_v36 = vld [vmem:[%s33417_s0 + $0xf58] sm:$0xff]   ;;  %24974 = vst [vmem:[%s33418_s1 + $0xb58] sm:$0xff] %v26402_v35 }
 0x213   :  { %v26395_v28 = vld [vmem:[%s33417_s0 + $0x348] sm:$0xff]   ;;  %24942 = vst [vmem:[%s33418_s1 + $0x1748] sm:$0xff] %v26394_v27  ;;  %v26404_v37 = vld [vmem:[%s33417_s0 + $0x358] sm:$0xff]   ;;  %24978 = vst [vmem:[%s33418_s1 + $0x1758] sm:$0xff] %v26403_v36 }
 0x214   :  { %24946 = vst [vmem:[%s33418_s1 + $0x2348] sm:$0xff] %v26395_v28  ;;  %v26405_v38 = vld [vmem:[%s33417_s0 + $0x2368] sm:$0xff]   ;;  %24982 = vst [vmem:[%s33418_s1 + $0x2358] sm:$0xff] %v26404_v37  ;;  %v26414_v47 = vld [vmem:[%s33417_s0 + $0x2378] sm:$0xff]  }
 0x215   :  { %v26406_v39 = vld [vmem:[%s33417_s0 + $0x1768] sm:$0xff]   ;;  %24986 = vst [vmem:[%s33418_s1 + $0x368] sm:$0xff] %v26405_v38  ;;  %v26415_v48 = vld [vmem:[%s33417_s0 + $0x1778] sm:$0xff]   ;;  %25022 = vst [vmem:[%s33418_s1 + $0x378] sm:$0xff] %v26414_v47 }
 0x216   :  { %v26407_v40 = vld [vmem:[%s33417_s0 + $0xb68] sm:$0xff]   ;;  %24990 = vst [vmem:[%s33418_s1 + $0xf68] sm:$0xff] %v26406_v39  ;;  %v26416_v49 = vld [vmem:[%s33417_s0 + $0xb78] sm:$0xff]   ;;  %25026 = vst [vmem:[%s33418_s1 + $0xf78] sm:$0xff] %v26415_v48 }
 0x217   :  { %v26408_v41 = vld [vmem:[%s33417_s0 + $0x1f68] sm:$0xff]   ;;  %24994 = vst [vmem:[%s33418_s1 + $0x1b68] sm:$0xff] %v26407_v40  ;;  %v26417_v50 = vld [vmem:[%s33417_s0 + $0x1f78] sm:$0xff]   ;;  %25030 = vst [vmem:[%s33418_s1 + $0x1b78] sm:$0xff] %v26416_v49 }
 0x218   :  { %v26409_v42 = vld [vmem:[%s33417_s0 + $0x1368] sm:$0xff]   ;;  %24998 = vst [vmem:[%s33418_s1 + $0x768] sm:$0xff] %v26408_v41  ;;  %v26418_v51 = vld [vmem:[%s33417_s0 + $0x1378] sm:$0xff]   ;;  %25034 = vst [vmem:[%s33418_s1 + $0x778] sm:$0xff] %v26417_v50 }
 0x219   :  { %v26410_v43 = vld [vmem:[%s33417_s0 + $0x768] sm:$0xff]   ;;  %25002 = vst [vmem:[%s33418_s1 + $0x1368] sm:$0xff] %v26409_v42  ;;  %v26419_v52 = vld [vmem:[%s33417_s0 + $0x778] sm:$0xff]   ;;  %25038 = vst [vmem:[%s33418_s1 + $0x1378] sm:$0xff] %v26418_v51 }
 0x21a   :  { %v26411_v44 = vld [vmem:[%s33417_s0 + $0x1b68] sm:$0xff]   ;;  %25006 = vst [vmem:[%s33418_s1 + $0x1f68] sm:$0xff] %v26410_v43  ;;  %v26420_v53 = vld [vmem:[%s33417_s0 + $0x1b78] sm:$0xff]   ;;  %25042 = vst [vmem:[%s33418_s1 + $0x1f78] sm:$0xff] %v26419_v52 }
 0x21b   :  { %v26412_v45 = vld [vmem:[%s33417_s0 + $0xf68] sm:$0xff]   ;;  %25010 = vst [vmem:[%s33418_s1 + $0xb68] sm:$0xff] %v26411_v44  ;;  %v26421_v54 = vld [vmem:[%s33417_s0 + $0xf78] sm:$0xff]   ;;  %25046 = vst [vmem:[%s33418_s1 + $0xb78] sm:$0xff] %v26420_v53 }
 0x21c   :  { %v26413_v46 = vld [vmem:[%s33417_s0 + $0x368] sm:$0xff]   ;;  %25014 = vst [vmem:[%s33418_s1 + $0x1768] sm:$0xff] %v26412_v45  ;;  %v26422_v55 = vld [vmem:[%s33417_s0 + $0x378] sm:$0xff]   ;;  %25050 = vst [vmem:[%s33418_s1 + $0x1778] sm:$0xff] %v26421_v54 }
 0x21d   :  { %25018 = vst [vmem:[%s33418_s1 + $0x2368] sm:$0xff] %v26413_v46  ;;  %v26423_v56 = vld [vmem:[%s33417_s0 + $0x2388] sm:$0xff]   ;;  %25054 = vst [vmem:[%s33418_s1 + $0x2378] sm:$0xff] %v26422_v55  ;;  %v26432_v1 = vld [vmem:[%s33417_s0 + $0x2398] sm:$0xff]  }
 0x21e   :  { %v26424_v57 = vld [vmem:[%s33417_s0 + $0x1788] sm:$0xff]   ;;  %25058 = vst [vmem:[%s33418_s1 + $0x388] sm:$0xff] %v26423_v56  ;;  %v26433_v2 = vld [vmem:[%s33417_s0 + $0x1798] sm:$0xff]   ;;  %25094 = vst [vmem:[%s33418_s1 + $0x398] sm:$0xff] %v26432_v1 }
 0x21f   :  { %v26425_v58 = vld [vmem:[%s33417_s0 + $0xb88] sm:$0xff]   ;;  %25062 = vst [vmem:[%s33418_s1 + $0xf88] sm:$0xff] %v26424_v57  ;;  %v26434_v3 = vld [vmem:[%s33417_s0 + $0xb98] sm:$0xff]   ;;  %25098 = vst [vmem:[%s33418_s1 + $0xf98] sm:$0xff] %v26433_v2 }
 0x220   :  { %v26426_v59 = vld [vmem:[%s33417_s0 + $0x1f88] sm:$0xff]   ;;  %25066 = vst [vmem:[%s33418_s1 + $0x1b88] sm:$0xff] %v26425_v58  ;;  %v26435_v4 = vld [vmem:[%s33417_s0 + $0x1f98] sm:$0xff]   ;;  %25102 = vst [vmem:[%s33418_s1 + $0x1b98] sm:$0xff] %v26434_v3 }
 0x221   :  { %v26427_v60 = vld [vmem:[%s33417_s0 + $0x1388] sm:$0xff]   ;;  %25070 = vst [vmem:[%s33418_s1 + $0x788] sm:$0xff] %v26426_v59  ;;  %v26436_v5 = vld [vmem:[%s33417_s0 + $0x1398] sm:$0xff]   ;;  %25106 = vst [vmem:[%s33418_s1 + $0x798] sm:$0xff] %v26435_v4 }
 0x222   :  { %v26428_v61 = vld [vmem:[%s33417_s0 + $0x788] sm:$0xff]   ;;  %25074 = vst [vmem:[%s33418_s1 + $0x1388] sm:$0xff] %v26427_v60  ;;  %v26437_v6 = vld [vmem:[%s33417_s0 + $0x798] sm:$0xff]   ;;  %25110 = vst [vmem:[%s33418_s1 + $0x1398] sm:$0xff] %v26436_v5 }
 0x223   :  { %v26429_v62 = vld [vmem:[%s33417_s0 + $0x1b88] sm:$0xff]   ;;  %25078 = vst [vmem:[%s33418_s1 + $0x1f88] sm:$0xff] %v26428_v61  ;;  %v26438_v7 = vld [vmem:[%s33417_s0 + $0x1b98] sm:$0xff]   ;;  %25114 = vst [vmem:[%s33418_s1 + $0x1f98] sm:$0xff] %v26437_v6 }
 0x224   :  { %v26430_v63 = vld [vmem:[%s33417_s0 + $0xf88] sm:$0xff]   ;;  %25082 = vst [vmem:[%s33418_s1 + $0xb88] sm:$0xff] %v26429_v62  ;;  %v26439_v8 = vld [vmem:[%s33417_s0 + $0xf98] sm:$0xff]   ;;  %25118 = vst [vmem:[%s33418_s1 + $0xb98] sm:$0xff] %v26438_v7 }
 0x225   :  { %v26431_v0 = vld [vmem:[%s33417_s0 + $0x388] sm:$0xff]   ;;  %25086 = vst [vmem:[%s33418_s1 + $0x1788] sm:$0xff] %v26430_v63  ;;  %v26440_v9 = vld [vmem:[%s33417_s0 + $0x398] sm:$0xff]   ;;  %25122 = vst [vmem:[%s33418_s1 + $0x1798] sm:$0xff] %v26439_v8 }
 0x226   :  { %25090 = vst [vmem:[%s33418_s1 + $0x2388] sm:$0xff] %v26431_v0  ;;  %v26441_v10 = vld [vmem:[%s33417_s0 + $0x23a8] sm:$0xff]   ;;  %25126 = vst [vmem:[%s33418_s1 + $0x2398] sm:$0xff] %v26440_v9  ;;  %v26450_v19 = vld [vmem:[%s33417_s0 + $0x23b8] sm:$0xff]  }
 0x227   :  { %v26442_v11 = vld [vmem:[%s33417_s0 + $0x17a8] sm:$0xff]   ;;  %25130 = vst [vmem:[%s33418_s1 + $0x3a8] sm:$0xff] %v26441_v10  ;;  %v26451_v20 = vld [vmem:[%s33417_s0 + $0x17b8] sm:$0xff]   ;;  %25166 = vst [vmem:[%s33418_s1 + $0x3b8] sm:$0xff] %v26450_v19 }
 0x228   :  { %v26443_v12 = vld [vmem:[%s33417_s0 + $0xba8] sm:$0xff]   ;;  %25134 = vst [vmem:[%s33418_s1 + $0xfa8] sm:$0xff] %v26442_v11  ;;  %v26452_v21 = vld [vmem:[%s33417_s0 + $0xbb8] sm:$0xff]   ;;  %25170 = vst [vmem:[%s33418_s1 + $0xfb8] sm:$0xff] %v26451_v20 }
 0x229   :  { %v26444_v13 = vld [vmem:[%s33417_s0 + $0x1fa8] sm:$0xff]   ;;  %25138 = vst [vmem:[%s33418_s1 + $0x1ba8] sm:$0xff] %v26443_v12  ;;  %v26453_v22 = vld [vmem:[%s33417_s0 + $0x1fb8] sm:$0xff]   ;;  %25174 = vst [vmem:[%s33418_s1 + $0x1bb8] sm:$0xff] %v26452_v21 }
 0x22a   :  { %v26445_v14 = vld [vmem:[%s33417_s0 + $0x13a8] sm:$0xff]   ;;  %25142 = vst [vmem:[%s33418_s1 + $0x7a8] sm:$0xff] %v26444_v13  ;;  %v26454_v23 = vld [vmem:[%s33417_s0 + $0x13b8] sm:$0xff]   ;;  %25178 = vst [vmem:[%s33418_s1 + $0x7b8] sm:$0xff] %v26453_v22 }
 0x22b   :  { %v26446_v15 = vld [vmem:[%s33417_s0 + $0x7a8] sm:$0xff]   ;;  %25146 = vst [vmem:[%s33418_s1 + $0x13a8] sm:$0xff] %v26445_v14  ;;  %v26455_v24 = vld [vmem:[%s33417_s0 + $0x7b8] sm:$0xff]   ;;  %25182 = vst [vmem:[%s33418_s1 + $0x13b8] sm:$0xff] %v26454_v23 }
 0x22c   :  { %v26447_v16 = vld [vmem:[%s33417_s0 + $0x1ba8] sm:$0xff]   ;;  %25150 = vst [vmem:[%s33418_s1 + $0x1fa8] sm:$0xff] %v26446_v15  ;;  %v26456_v25 = vld [vmem:[%s33417_s0 + $0x1bb8] sm:$0xff]   ;;  %25186 = vst [vmem:[%s33418_s1 + $0x1fb8] sm:$0xff] %v26455_v24 }
 0x22d   :  { %v26448_v17 = vld [vmem:[%s33417_s0 + $0xfa8] sm:$0xff]   ;;  %25154 = vst [vmem:[%s33418_s1 + $0xba8] sm:$0xff] %v26447_v16  ;;  %v26457_v26 = vld [vmem:[%s33417_s0 + $0xfb8] sm:$0xff]   ;;  %25190 = vst [vmem:[%s33418_s1 + $0xbb8] sm:$0xff] %v26456_v25 }
 0x22e   :  { %v26449_v18 = vld [vmem:[%s33417_s0 + $0x3a8] sm:$0xff]   ;;  %25158 = vst [vmem:[%s33418_s1 + $0x17a8] sm:$0xff] %v26448_v17  ;;  %v26458_v27 = vld [vmem:[%s33417_s0 + $0x3b8] sm:$0xff]   ;;  %25194 = vst [vmem:[%s33418_s1 + $0x17b8] sm:$0xff] %v26457_v26 }
 0x22f   :  { %25162 = vst [vmem:[%s33418_s1 + $0x23a8] sm:$0xff] %v26449_v18  ;;  %v26459_v28 = vld [vmem:[%s33417_s0 + $0x23c8] sm:$0xff]   ;;  %25198 = vst [vmem:[%s33418_s1 + $0x23b8] sm:$0xff] %v26458_v27  ;;  %v26468_v37 = vld [vmem:[%s33417_s0 + $0x23d8] sm:$0xff]  }
 0x230   :  { %v26460_v29 = vld [vmem:[%s33417_s0 + $0x17c8] sm:$0xff]   ;;  %25202 = vst [vmem:[%s33418_s1 + $0x3c8] sm:$0xff] %v26459_v28  ;;  %v26469_v38 = vld [vmem:[%s33417_s0 + $0x17d8] sm:$0xff]   ;;  %25238 = vst [vmem:[%s33418_s1 + $0x3d8] sm:$0xff] %v26468_v37 }
 0x231   :  { %v26461_v30 = vld [vmem:[%s33417_s0 + $0xbc8] sm:$0xff]   ;;  %25206 = vst [vmem:[%s33418_s1 + $0xfc8] sm:$0xff] %v26460_v29  ;;  %v26470_v39 = vld [vmem:[%s33417_s0 + $0xbd8] sm:$0xff]   ;;  %25242 = vst [vmem:[%s33418_s1 + $0xfd8] sm:$0xff] %v26469_v38 }
 0x232   :  { %v26462_v31 = vld [vmem:[%s33417_s0 + $0x1fc8] sm:$0xff]   ;;  %25210 = vst [vmem:[%s33418_s1 + $0x1bc8] sm:$0xff] %v26461_v30  ;;  %v26471_v40 = vld [vmem:[%s33417_s0 + $0x1fd8] sm:$0xff]   ;;  %25246 = vst [vmem:[%s33418_s1 + $0x1bd8] sm:$0xff] %v26470_v39 }
 0x233   :  { %v26463_v32 = vld [vmem:[%s33417_s0 + $0x13c8] sm:$0xff]   ;;  %25214 = vst [vmem:[%s33418_s1 + $0x7c8] sm:$0xff] %v26462_v31  ;;  %v26472_v41 = vld [vmem:[%s33417_s0 + $0x13d8] sm:$0xff]   ;;  %25250 = vst [vmem:[%s33418_s1 + $0x7d8] sm:$0xff] %v26471_v40 }
 0x234   :  { %v26464_v33 = vld [vmem:[%s33417_s0 + $0x7c8] sm:$0xff]   ;;  %25218 = vst [vmem:[%s33418_s1 + $0x13c8] sm:$0xff] %v26463_v32  ;;  %v26473_v42 = vld [vmem:[%s33417_s0 + $0x7d8] sm:$0xff]   ;;  %25254 = vst [vmem:[%s33418_s1 + $0x13d8] sm:$0xff] %v26472_v41 }
 0x235   :  { %v26465_v34 = vld [vmem:[%s33417_s0 + $0x1bc8] sm:$0xff]   ;;  %25222 = vst [vmem:[%s33418_s1 + $0x1fc8] sm:$0xff] %v26464_v33  ;;  %v26474_v43 = vld [vmem:[%s33417_s0 + $0x1bd8] sm:$0xff]   ;;  %25258 = vst [vmem:[%s33418_s1 + $0x1fd8] sm:$0xff] %v26473_v42 }
 0x236   :  { %v26466_v35 = vld [vmem:[%s33417_s0 + $0xfc8] sm:$0xff]   ;;  %25226 = vst [vmem:[%s33418_s1 + $0xbc8] sm:$0xff] %v26465_v34  ;;  %v26475_v44 = vld [vmem:[%s33417_s0 + $0xfd8] sm:$0xff]   ;;  %25262 = vst [vmem:[%s33418_s1 + $0xbd8] sm:$0xff] %v26474_v43 }
 0x237   :  { %v26467_v36 = vld [vmem:[%s33417_s0 + $0x3c8] sm:$0xff]   ;;  %25230 = vst [vmem:[%s33418_s1 + $0x17c8] sm:$0xff] %v26466_v35  ;;  %v26476_v45 = vld [vmem:[%s33417_s0 + $0x3d8] sm:$0xff]   ;;  %25266 = vst [vmem:[%s33418_s1 + $0x17d8] sm:$0xff] %v26475_v44 }
 0x238   :  { %25234 = vst [vmem:[%s33418_s1 + $0x23c8] sm:$0xff] %v26467_v36  ;;  %v26477_v46 = vld [vmem:[%s33417_s0 + $0x23e8] sm:$0xff]   ;;  %25270 = vst [vmem:[%s33418_s1 + $0x23d8] sm:$0xff] %v26476_v45  ;;  %v26486_v55 = vld [vmem:[%s33417_s0 + $0x23f8] sm:$0xff]  }
 0x239   :  { %v26478_v47 = vld [vmem:[%s33417_s0 + $0x17e8] sm:$0xff]   ;;  %25274 = vst [vmem:[%s33418_s1 + $0x3e8] sm:$0xff] %v26477_v46  ;;  %v26487_v56 = vld [vmem:[%s33417_s0 + $0x17f8] sm:$0xff]   ;;  %25310 = vst [vmem:[%s33418_s1 + $0x3f8] sm:$0xff] %v26486_v55 }
 0x23a   :  { %v26479_v48 = vld [vmem:[%s33417_s0 + $0xbe8] sm:$0xff]   ;;  %25278 = vst [vmem:[%s33418_s1 + $0xfe8] sm:$0xff] %v26478_v47  ;;  %v26488_v57 = vld [vmem:[%s33417_s0 + $0xbf8] sm:$0xff]   ;;  %25314 = vst [vmem:[%s33418_s1 + $0xff8] sm:$0xff] %v26487_v56 }
 0x23b   :  { %v26480_v49 = vld [vmem:[%s33417_s0 + $0x1fe8] sm:$0xff]   ;;  %25282 = vst [vmem:[%s33418_s1 + $0x1be8] sm:$0xff] %v26479_v48  ;;  %v26489_v58 = vld [vmem:[%s33417_s0 + $0x1ff8] sm:$0xff]   ;;  %25318 = vst [vmem:[%s33418_s1 + $0x1bf8] sm:$0xff] %v26488_v57 }
 0x23c   :  { %v26481_v50 = vld [vmem:[%s33417_s0 + $0x13e8] sm:$0xff]   ;;  %25286 = vst [vmem:[%s33418_s1 + $0x7e8] sm:$0xff] %v26480_v49  ;;  %v26490_v59 = vld [vmem:[%s33417_s0 + $0x13f8] sm:$0xff]   ;;  %25322 = vst [vmem:[%s33418_s1 + $0x7f8] sm:$0xff] %v26489_v58 }
 0x23d   :  { %v26482_v51 = vld [vmem:[%s33417_s0 + $0x7e8] sm:$0xff]   ;;  %25290 = vst [vmem:[%s33418_s1 + $0x13e8] sm:$0xff] %v26481_v50  ;;  %v26491_v60 = vld [vmem:[%s33417_s0 + $0x7f8] sm:$0xff]   ;;  %25326 = vst [vmem:[%s33418_s1 + $0x13f8] sm:$0xff] %v26490_v59 }
 0x23e   :  { %v26483_v52 = vld [vmem:[%s33417_s0 + $0x1be8] sm:$0xff]   ;;  %25294 = vst [vmem:[%s33418_s1 + $0x1fe8] sm:$0xff] %v26482_v51  ;;  %v26492_v61 = vld [vmem:[%s33417_s0 + $0x1bf8] sm:$0xff]   ;;  %25330 = vst [vmem:[%s33418_s1 + $0x1ff8] sm:$0xff] %v26491_v60 }
 0x23f   :  { %v26484_v53 = vld [vmem:[%s33417_s0 + $0xfe8] sm:$0xff]   ;;  %25298 = vst [vmem:[%s33418_s1 + $0xbe8] sm:$0xff] %v26483_v52  ;;  %v26493_v62 = vld [vmem:[%s33417_s0 + $0xff8] sm:$0xff]   ;;  %25334 = vst [vmem:[%s33418_s1 + $0xbf8] sm:$0xff] %v26492_v61 }
 0x240   :  { %v26485_v54 = vld [vmem:[%s33417_s0 + $0x3e8] sm:$0xff]   ;;  %25302 = vst [vmem:[%s33418_s1 + $0x17e8] sm:$0xff] %v26484_v53  ;;  %v26494_v63 = vld [vmem:[%s33417_s0 + $0x3f8] sm:$0xff]   ;;  %25338 = vst [vmem:[%s33418_s1 + $0x17f8] sm:$0xff] %v26493_v62 }
 0x241   :  { %25306 = vst [vmem:[%s33418_s1 + $0x23e8] sm:$0xff] %v26485_v54  ;;  %25342 = vst [vmem:[%s33418_s1 + $0x23f8] sm:$0xff] %v26494_v63 }

// kernel: dual_stage_forward.1
= control target key start
LH: loop header
LB: loop body
LE: loop exit
PB: predicated region body
PF: predicated region fallthrough
CT: control target
= control target key end

     0   :  { %vm4353_vm0 = vmmov 0   ;;  %s7104_s2 = inlined_call_operand.vmem [shape: f32[2048,128], index: 2, kind: input, shape index: {}]   ;;  %s7105_s0 = inlined_call_operand.vmem [shape: f32[8,2048], index: 0, kind: input, shape index: {}]   ;;  %s7106_s6 = inlined_call_operand.vmem [shape: f32[8,4224], index: 6, kind: output, shape index: {0}]   ;;  %s7107_s4 = inlined_call_operand.vmem [shape: f32[4224,128], index: 4, kind: input, shape index: {}]   ;;  %s7108_s1 = inlined_call_operand.vmem [shape: f32[8,2048], index: 1, kind: input, shape index: {}]   ;;  %s7109_s3 = inlined_call_operand.vmem [shape: f32[1,128], index: 3, kind: input, shape index: {}]   ;;  %s7110_s5 = inlined_call_operand.vmem [shape: f32[1,128], index: 5, kind: input, shape index: {}]   ;;  %s7111_s7 = inlined_call_operand.vmem [shape: f32[8,128], index: 7, kind: output, shape index: {1}]  }
   0x1   :  { %v73_v0 = vld [vmem:[%s7104_s2 + $0x80] sm:$0xff]  ;;  %v74_v1 = vld [vmem:[%s7104_s2 + $0x88] sm:$0xff]  ;;  %v75_v11 = vld [vmem:[%s7104_s2 + $0x90] sm:$0xff] }
   0x2   :  { %v105_v2 = vld [vmem:[%s7104_s2 + $0x180] sm:$0xff]  ;;  %v3543_v3 = vpack.c.bf16 %v74_v1, %v73_v0  ;;  %v106_v4 = vld [vmem:[%s7104_s2 + $0x188] sm:$0xff]  ;;  %v76_v13 = vld [vmem:[%s7104_s2 + $0x98] sm:$0xff] }
   0x3   :  { %v57_v5 = vld [vmem:[%s7104_s2] sm:$0xff]  ;;  %v58_v6 = vld [vmem:[%s7104_s2 + $0x8] sm:$0xff]  ;;  %v3575_v7 = vpack.c.bf16 %v106_v4, %v105_v2  ;;  %v107_v14 = vld [vmem:[%s7104_s2 + $0x190] sm:$0xff]  ;;  %v3547_v16 = vpack.c.bf16 %v76_v13, %v75_v11 }
   0x4   :  { %v3545_v8 = vpack.c.bf16 %v58_v6, %v57_v5  ;;  %v89_v9 = vld [vmem:[%s7104_s2 + $0x100] sm:$0xff]  ;;  %v90_v10 = vld [vmem:[%s7104_s2 + $0x108] sm:$0xff]  ;;  %3544 = vmatprep.subr.bf16.mxu0 %v3543_v3  ;;  %v108_v15 = vld [vmem:[%s7104_s2 + $0x198] sm:$0xff] }
   0x5   :  { %v3577_v12 = vpack.c.bf16 %v90_v10, %v89_v9  ;;  %3576 = vmatprep.subr.bf16.mxu1 %v3575_v7  ;;  %v3579_v17 = vpack.c.bf16 %v108_v15, %v107_v14  ;;  %v59_v18 = vld [vmem:[%s7104_s2 + $0x10] sm:$0xff]  ;;  %v60_v19 = vld [vmem:[%s7104_s2 + $0x18] sm:$0xff]  ;;  %v77_v23 = vld [vmem:[%s7104_s2 + $0xa0] sm:$0xff] }
   0x6   :  { %3546 = vmatpush3.bf16.msra.mxu0 %v3545_v8  ;;  %v91_v20 = vld [vmem:[%s7104_s2 + $0x110] sm:$0xff]  ;;  %v3549_v21 = vpack.c.bf16 %v60_v19, %v59_v18  ;;  %v92_v22 = vld [vmem:[%s7104_s2 + $0x118] sm:$0xff]  ;;  %v78_v24 = vld [vmem:[%s7104_s2 + $0xa8] sm:$0xff] }
   0x7   :  { %3578 = vmatpush3.bf16.msra.mxu1 %v3577_v12  ;;  %3548 = vmatprep.subr.bf16.mxu0 %v3547_v16  ;;  %v3581_v25 = vpack.c.bf16 %v92_v22, %v91_v20  ;;  %v3551_v26 = vpack.c.bf16 %v78_v24, %v77_v23  ;;  %v109_v27 = vld [vmem:[%s7104_s2 + $0x1a0] sm:$0xff]  ;;  %v110_v28 = vld [vmem:[%s7104_s2 + $0x1a8] sm:$0xff]  ;;  %v79_v35 = vld [vmem:[%s7104_s2 + $0xb0] sm:$0xff] }
   0x8   :  { %3580 = vmatprep.subr.bf16.mxu1 %v3579_v17  ;;  %v61_v29 = vld [vmem:[%s7104_s2 + $0x20] sm:$0xff]  ;;  %v3583_v30 = vpack.c.bf16 %v110_v28, %v109_v27  ;;  %v62_v31 = vld [vmem:[%s7104_s2 + $0x28] sm:$0xff]  ;;  %v80_v36 = vld [vmem:[%s7104_s2 + $0xb8] sm:$0xff] }
   0x9   :  { %v93_v32 = vld [vmem:[%s7104_s2 + $0x120] sm:$0xff]  ;;  %v94_v33 = vld [vmem:[%s7104_s2 + $0x128] sm:$0xff]  ;;  %v3553_v34 = vpack.c.bf16 %v62_v31, %v61_v29  ;;  %v111_v37 = vld [vmem:[%s7104_s2 + $0x1b0] sm:$0xff]  ;;  %v3555_v39 = vpack.c.bf16 %v80_v36, %v79_v35 }
   0xa   :  { %3550 = vmatpush3.bf16.msra.mxu0 %v3549_v21  ;;  %v3585_v38 = vpack.c.bf16 %v94_v33, %v93_v32  ;;  %v112_v40 = vld [vmem:[%s7104_s2 + $0x1b8] sm:$0xff]  ;;  %v63_v41 = vld [vmem:[%s7104_s2 + $0x30] sm:$0xff]  ;;  %v81_v46 = vld [vmem:[%s7104_s2 + $0xc0] sm:$0xff] }
   0xb   :  { %3582 = vmatpush3.bf16.msra.mxu1 %v3581_v25  ;;  %3552 = vmatprep.subr.bf16.mxu0 %v3551_v26  ;;  %v64_v42 = vld [vmem:[%s7104_s2 + $0x38] sm:$0xff]  ;;  %v3587_v43 = vpack.c.bf16 %v112_v40, %v111_v37  ;;  %v95_v44 = vld [vmem:[%s7104_s2 + $0x130] sm:$0xff]  ;;  %v82_v47 = vld [vmem:[%s7104_s2 + $0xc8] sm:$0xff] }
   0xc   :  { %3584 = vmatprep.subr.bf16.mxu1 %v3583_v30  ;;  %v96_v45 = vld [vmem:[%s7104_s2 + $0x138] sm:$0xff]  ;;  %v113_v48 = vld [vmem:[%s7104_s2 + $0x1c0] sm:$0xff]  ;;  %v114_v49 = vld [vmem:[%s7104_s2 + $0x1c8] sm:$0xff]  ;;  %v3557_v50 = vpack.c.bf16 %v64_v42, %v63_v41  ;;  %v3559_v52 = vpack.c.bf16 %v82_v47, %v81_v46 }
   0xd   :  { %v3589_v51 = vpack.c.bf16 %v96_v45, %v95_v44  ;;  %v65_v53 = vld [vmem:[%s7104_s2 + $0x40] sm:$0xff]  ;;  %v66_v54 = vld [vmem:[%s7104_s2 + $0x48] sm:$0xff]  ;;  %v3591_v56 = vpack.c.bf16 %v114_v49, %v113_v48  ;;  %v83_v58 = vld [vmem:[%s7104_s2 + $0xd0] sm:$0xff] }
   0xe   :  { %3554 = vmatpush3.bf16.msra.mxu0 %v3553_v34  ;;  %v97_v55 = vld [vmem:[%s7104_s2 + $0x140] sm:$0xff]  ;;  %v98_v57 = vld [vmem:[%s7104_s2 + $0x148] sm:$0xff]  ;;  %v84_v59 = vld [vmem:[%s7104_s2 + $0xd8] sm:$0xff]  ;;  %v3561_v62 = vpack.c.bf16 %v66_v54, %v65_v53 }
   0xf   :  { %3586 = vmatpush3.bf16.msra.mxu1 %v3585_v38  ;;  %3556 = vmatprep.subr.bf16.mxu0 %v3555_v39  ;;  %v115_v60 = vld [vmem:[%s7104_s2 + $0x1d0] sm:$0xff]  ;;  %v116_v61 = vld [vmem:[%s7104_s2 + $0x1d8] sm:$0xff]  ;;  %v3593_v63 = vpack.c.bf16 %v98_v57, %v97_v55  ;;  %v3563_v0 = vpack.c.bf16 %v84_v59, %v83_v58  ;;  %v85_v6 = vld [vmem:[%s7104_s2 + $0xe0] sm:$0xff] }
  0x10   :  { %3588 = vmatprep.subr.bf16.mxu1 %v3587_v43  ;;  %v67_v1 = vld [vmem:[%s7104_s2 + $0x50] sm:$0xff]  ;;  %v68_v2 = vld [vmem:[%s7104_s2 + $0x58] sm:$0xff]  ;;  %v3595_v4 = vpack.c.bf16 %v116_v61, %v115_v60  ;;  %v86_v7 = vld [vmem:[%s7104_s2 + $0xe8] sm:$0xff] }
  0x11   :  { %v99_v3 = vld [vmem:[%s7104_s2 + $0x150] sm:$0xff]  ;;  %v100_v5 = vld [vmem:[%s7104_s2 + $0x158] sm:$0xff]  ;;  %v117_v8 = vld [vmem:[%s7104_s2 + $0x1e0] sm:$0xff]  ;;  %v3565_v10 = vpack.c.bf16 %v68_v2, %v67_v1  ;;  %v3567_v15 = vpack.c.bf16 %v86_v7, %v85_v6 }
  0x12   :  { %3558 = vmatpush3.bf16.msra.mxu0 %v3557_v50  ;;  %v118_v9 = vld [vmem:[%s7104_s2 + $0x1e8] sm:$0xff]  ;;  %v69_v11 = vld [vmem:[%s7104_s2 + $0x60] sm:$0xff]  ;;  %v3597_v14 = vpack.c.bf16 %v100_v5, %v99_v3  ;;  %v87_v20 = vld [vmem:[%s7104_s2 + $0xf0] sm:$0xff] }
  0x13   :  { %3590 = vmatpush3.bf16.msra.mxu1 %v3589_v51  ;;  %3560 = vmatprep.subr.bf16.mxu0 %v3559_v52  ;;  %v70_v12 = vld [vmem:[%s7104_s2 + $0x68] sm:$0xff]  ;;  %v101_v13 = vld [vmem:[%s7104_s2 + $0x160] sm:$0xff]  ;;  %v3599_v19 = vpack.c.bf16 %v118_v9, %v117_v8  ;;  %v88_v21 = vld [vmem:[%s7104_s2 + $0xf8] sm:$0xff] }
  0x14   :  { %3592 = vmatprep.subr.bf16.mxu1 %v3591_v56  ;;  %v102_v16 = vld [vmem:[%s7104_s2 + $0x168] sm:$0xff]  ;;  %v25_v18 = vld [vmem:[%s7105_s0] sm:$0xff]  ;;  %v4588_v22 = vld [vmem:[%s7105_s0 + $0x18] sm:$0xff]  ;;  %v3569_v26 = vpack.c.bf16 %v70_v12, %v69_v11  ;;  %v3571_v28 = vpack.c.bf16 %v88_v21, %v87_v20 }
  0x15   :  { %v4566_v17 = vld [vmem:[%s7105_s0 + $0x8] sm:$0xff]  ;;  %896 = vst [vmem:[%s7106_s6 + $0x80] sm:$0xff] %v25_v18  ;;  %v119_v23 = vld [vmem:[%s7104_s2 + $0x1f0] sm:$0xff]  ;;  %v120_v24 = vld [vmem:[%s7104_s2 + $0x1f8] sm:$0xff]  ;;  %454 = vmatprep.mubr.f32.mxu1 %v4588_v22  ;;  %v3601_v27 = vpack.c.bf16 %v102_v16, %v101_v13 }
  0x16   :  { %3562 = vmatpush3.bf16.msra.mxu0 %v3561_v62  ;;  %384 = vmatprep.mubr.f32.mxu0 %v4566_v17  ;;  %897 = vst [vmem:[%s7106_s6 + $0x88] sm:$0xff] %v4566_v17  ;;  %899 = vst [vmem:[%s7106_s6 + $0x98] sm:$0xff] %v4588_v22  ;;  %v27_v25 = vld [vmem:[%s7105_s0 + $0x10] sm:$0xff]  ;;  %v72_v30 = vld [vmem:[%s7104_s2 + $0x78] sm:$0xff]  ;;  %v3603_v32 = vpack.c.bf16 %v120_v24, %v119_v23 }
  0x17   :  { %3594 = vmatpush3.bf16.msra.mxu1 %v3593_v63  ;;  %3564 = vmatprep.subr.bf16.mxu0 %v3563_v0  ;;  %898 = vst [vmem:[%s7106_s6 + $0x90] sm:$0xff] %v27_v25  ;;  %v71_v29 = vld [vmem:[%s7104_s2 + $0x70] sm:$0xff]  ;;  %v104_v33 = vld [vmem:[%s7104_s2 + $0x178] sm:$0xff]  ;;  %v137_v34 = vld [vmem:[%s7104_s2 + $0x280] sm:$0xff] }
  0x18   :  { %3596 = vmatprep.subr.bf16.mxu1 %v3595_v4  ;;  %v103_v31 = vld [vmem:[%s7104_s2 + $0x170] sm:$0xff]  ;;  %v138_v35 = vld [vmem:[%s7104_s2 + $0x288] sm:$0xff]  ;;  %v169_v36 = vld [vmem:[%s7104_s2 + $0x380] sm:$0xff]  ;;  %v3573_v38 = vpack.c.bf16 %v72_v30, %v71_v29 }
  0x19   :  { %v170_v37 = vld [vmem:[%s7104_s2 + $0x388] sm:$0xff]  ;;  %v3605_v39 = vpack.c.bf16 %v104_v33, %v103_v31  ;;  %v3607_v40 = vpack.c.bf16 %v138_v35, %v137_v34  ;;  %v121_v41 = vld [vmem:[%s7104_s2 + $0x200] sm:$0xff]  ;;  %v139_v46 = vld [vmem:[%s7104_s2 + $0x290] sm:$0xff] }
  0x1a   :  { %3566 = vmatpush3.bf16.msra.mxu0 %v3565_v10  ;;  %v122_v42 = vld [vmem:[%s7104_s2 + $0x208] sm:$0xff]  ;;  %v153_v43 = vld [vmem:[%s7104_s2 + $0x300] sm:$0xff]  ;;  %v3639_v44 = vpack.c.bf16 %v170_v37, %v169_v36  ;;  %v140_v47 = vld [vmem:[%s7104_s2 + $0x298] sm:$0xff] }
  0x1b   :  { %3598 = vmatpush3.bf16.msra.mxu1 %v3597_v14  ;;  %3568 = vmatprep.subr.bf16.mxu0 %v3567_v15  ;;  %v154_v45 = vld [vmem:[%s7104_s2 + $0x308] sm:$0xff]  ;;  %v171_v48 = vld [vmem:[%s7104_s2 + $0x390] sm:$0xff]  ;;  %v172_v49 = vld [vmem:[%s7104_s2 + $0x398] sm:$0xff]  ;;  %v3609_v50 = vpack.c.bf16 %v122_v42, %v121_v41  ;;  %v3611_v52 = vpack.c.bf16 %v140_v47, %v139_v46 }
  0x1c   :  { %3600 = vmatprep.subr.bf16.mxu1 %v3599_v19  ;;  %v3641_v51 = vpack.c.bf16 %v154_v45, %v153_v43  ;;  %v123_v53 = vld [vmem:[%s7104_s2 + $0x210] sm:$0xff]  ;;  %v124_v54 = vld [vmem:[%s7104_s2 + $0x218] sm:$0xff]  ;;  %v3643_v56 = vpack.c.bf16 %v172_v49, %v171_v48  ;;  %v141_v58 = vld [vmem:[%s7104_s2 + $0x2a0] sm:$0xff] }
  0x1d   :  { %v155_v55 = vld [vmem:[%s7104_s2 + $0x310] sm:$0xff]  ;;  %v156_v57 = vld [vmem:[%s7104_s2 + $0x318] sm:$0xff]  ;;  %v142_v59 = vld [vmem:[%s7104_s2 + $0x2a8] sm:$0xff]  ;;  %v3613_v62 = vpack.c.bf16 %v124_v54, %v123_v53 }
  0x1e   :  { %3570 = vmatpush3.bf16.msra.mxu0 %v3569_v26  ;;  %v173_v60 = vld [vmem:[%s7104_s2 + $0x3a0] sm:$0xff]  ;;  %v174_v61 = vld [vmem:[%s7104_s2 + $0x3a8] sm:$0xff]  ;;  %v3645_v63 = vpack.c.bf16 %v156_v57, %v155_v55  ;;  %v3615_v0 = vpack.c.bf16 %v142_v59, %v141_v58  ;;  %v143_v6 = vld [vmem:[%s7104_s2 + $0x2b0] sm:$0xff] }
  0x1f   :  { %3602 = vmatpush3.bf16.msra.mxu1 %v3601_v27  ;;  %3572 = vmatprep.subr.bf16.mxu0 %v3571_v28  ;;  %v125_v1 = vld [vmem:[%s7104_s2 + $0x220] sm:$0xff]  ;;  %v126_v2 = vld [vmem:[%s7104_s2 + $0x228] sm:$0xff]  ;;  %v3647_v4 = vpack.c.bf16 %v174_v61, %v173_v60  ;;  %v144_v7 = vld [vmem:[%s7104_s2 + $0x2b8] sm:$0xff] }
  0x20   :  { %3604 = vmatprep.subr.bf16.mxu1 %v3603_v32  ;;  %v157_v3 = vld [vmem:[%s7104_s2 + $0x320] sm:$0xff]  ;;  %v158_v5 = vld [vmem:[%s7104_s2 + $0x328] sm:$0xff]  ;;  %v175_v8 = vld [vmem:[%s7104_s2 + $0x3b0] sm:$0xff]  ;;  %v3617_v10 = vpack.c.bf16 %v126_v2, %v125_v1  ;;  %v3619_v12 = vpack.c.bf16 %v144_v7, %v143_v6 }
  0x21   :  { %v176_v9 = vld [vmem:[%s7104_s2 + $0x3b8] sm:$0xff]  ;;  %v3649_v11 = vpack.c.bf16 %v158_v5, %v157_v3  ;;  %v127_v13 = vld [vmem:[%s7104_s2 + $0x230] sm:$0xff]  ;;  %v145_v19 = vld [vmem:[%s7104_s2 + $0x2c0] sm:$0xff] }
  0x22   :  { %3574 = vmatpush3.bf16.msra.mxu0 %v3573_v38  ;;  %v128_v14 = vld [vmem:[%s7104_s2 + $0x238] sm:$0xff]  ;;  %v159_v15 = vld [vmem:[%s7104_s2 + $0x330] sm:$0xff]  ;;  %v3651_v16 = vpack.c.bf16 %v176_v9, %v175_v8  ;;  %v146_v20 = vld [vmem:[%s7104_s2 + $0x2c8] sm:$0xff] }
  0x23   :  { %3606 = vmatpush3.bf16.msra.mxu1 %v3605_v39  ;;  %3608 = vmatprep.subr.bf16.mxu0 %v3607_v40  ;;  %v177_v21 = vld [vmem:[%s7104_s2 + $0x3c0] sm:$0xff]  ;;  %v178_v23 = vld [vmem:[%s7104_s2 + $0x3c8] sm:$0xff]  ;;  %v32_v28 = vld [vmem:[%s7105_s0 + $0x38] sm:$0xff]  ;;  %v3623_v30 = vpack.c.bf16 %v146_v20, %v145_v19 }
  0x24   :  { %3640 = vmatprep.subr.bf16.mxu1 %v3639_v44  ;;  %v129_v24 = vld [vmem:[%s7104_s2 + $0x240] sm:$0xff]  ;;  %v30_v26 = vld [vmem:[%s7105_s0 + $0x28] sm:$0xff]  ;;  %903 = vst [vmem:[%s7106_s6 + $0xb8] sm:$0xff] %v32_v28  ;;  %v3655_v34 = vpack.c.bf16 %v178_v23, %v177_v21  ;;  %v147_v35 = vld [vmem:[%s7104_s2 + $0x2d0] sm:$0xff] }
  0x25   :  { %385 = vmatmul.mubr.f32.vlgmr.msra.gmra.mrb[0].mxu0 %v25_v18  ;;  %v160_v18 = vld [vmem:[%s7104_s2 + $0x338] sm:$0xff]  ;;  %v4736_v27 = vld [vmem:[%s7105_s0 + $0x20] sm:$0xff]  ;;  %v130_v31 = vld [vmem:[%s7104_s2 + $0x248] sm:$0xff]  ;;  %901 = vst [vmem:[%s7106_s6 + $0xa8] sm:$0xff] %v30_v26 }
  0x26   :  { %455 = vmatmul.mubr.f32.vlgmr.msra.gmra.mrb[0].mxu1 %v27_v25  ;;  %3610 = vmatpush3.bf16.msra.mxu0 %v3609_v50  ;;  %v3621_v25 = vpack.c.bf16 %v128_v14, %v127_v13  ;;  %v3653_v29 = vpack.c.bf16 %v160_v18, %v159_v15  ;;  %v161_v32 = vld [vmem:[%s7104_s2 + $0x340] sm:$0xff]  ;;  %v162_v33 = vld [vmem:[%s7104_s2 + $0x348] sm:$0xff]  ;;  %900 = vst [vmem:[%s7106_s6 + $0xa0] sm:$0xff] %v4736_v27  ;;  %v148_v36 = vld [vmem:[%s7104_s2 + $0x2d8] sm:$0xff] }
  0x27   :  { %3642 = vmatpush3.bf16.msra.mxu1 %v3641_v51  ;;  %3612 = vmatprep.subr.bf16.mxu0 %v3611_v52  ;;  %v4769_v37 = vld [vmem:[%s7105_s0 + $0x30] sm:$0xff]  ;;  %v180_v39 = vld [vmem:[%s7104_s2 + $0x3d8] sm:$0xff]  ;;  %v3625_v40 = vpack.c.bf16 %v130_v31, %v129_v24  ;;  %v3657_v41 = vpack.c.bf16 %v162_v33, %v161_v32  ;;  %v3627_v42 = vpack.c.bf16 %v148_v36, %v147_v35  ;;  %v149_v48 = vld [vmem:[%s7104_s2 + $0x2e0] sm:$0xff] }
  0x28   :  { %3644 = vmatprep.subr.bf16.mxu1 %v3643_v56  ;;  %524 = vmatprep.mubr.f32.mxu0 %v30_v26  ;;  %v179_v38 = vld [vmem:[%s7104_s2 + $0x3d0] sm:$0xff]  ;;  %902 = vst [vmem:[%s7106_s6 + $0xb0] sm:$0xff] %v4769_v37  ;;  %v132_v44 = vld [vmem:[%s7104_s2 + $0x258] sm:$0xff]  ;;  %v150_v49 = vld [vmem:[%s7104_s2 + $0x2e8] sm:$0xff] }
  0x29   :  { %594 = vmatprep.mubr.f32.mxu1 %v32_v28  ;;  %v131_v43 = vld [vmem:[%s7104_s2 + $0x250] sm:$0xff]  ;;  %v3659_v46 = vpack.c.bf16 %v180_v39, %v179_v38  ;;  %v164_v47 = vld [vmem:[%s7104_s2 + $0x358] sm:$0xff]  ;;  %v181_v50 = vld [vmem:[%s7104_s2 + $0x3e0] sm:$0xff]  ;;  %v3631_v54 = vpack.c.bf16 %v150_v49, %v149_v48 }
  0x2a   :  { %3614 = vmatpush3.bf16.msra.mxu0 %v3613_v62  ;;  %v163_v45 = vld [vmem:[%s7104_s2 + $0x350] sm:$0xff]  ;;  %v182_v51 = vld [vmem:[%s7104_s2 + $0x3e8] sm:$0xff]  ;;  %v3629_v52 = vpack.c.bf16 %v132_v44, %v131_v43  ;;  %v133_v55 = vld [vmem:[%s7104_s2 + $0x260] sm:$0xff] }
  0x2b   :  { %3646 = vmatpush3.bf16.msra.mxu1 %v3645_v63  ;;  %3616 = vmatprep.subr.bf16.mxu0 %v3615_v0  ;;  %v3661_v53 = vpack.c.bf16 %v164_v47, %v163_v45  ;;  %v134_v56 = vld [vmem:[%s7104_s2 + $0x268] sm:$0xff]  ;;  %v165_v57 = vld [vmem:[%s7104_s2 + $0x360] sm:$0xff]  ;;  %v3663_v58 = vpack.c.bf16 %v182_v51, %v181_v50  ;;  %v151_v60 = vld [vmem:[%s7104_s2 + $0x2f0] sm:$0xff] }
  0x2c   :  { %3648 = vmatprep.subr.bf16.mxu1 %v3647_v4  ;;  %v166_v59 = vld [vmem:[%s7104_s2 + $0x368] sm:$0xff]  ;;  %v152_v61 = vld [vmem:[%s7104_s2 + $0x2f8] sm:$0xff]  ;;  %v183_v62 = vld [vmem:[%s7104_s2 + $0x3f0] sm:$0xff]  ;;  %v3633_v0 = vpack.c.bf16 %v134_v56, %v133_v55 }
  0x2d   :  { %v184_v63 = vld [vmem:[%s7104_s2 + $0x3f8] sm:$0xff]  ;;  %v3665_v1 = vpack.c.bf16 %v166_v59, %v165_v57  ;;  %v3635_v2 = vpack.c.bf16 %v152_v61, %v151_v60  ;;  %v135_v3 = vld [vmem:[%s7104_s2 + $0x270] sm:$0xff]  ;;  %v201_v8 = vld [vmem:[%s7104_s2 + $0x480] sm:$0xff] }
  0x2e   :  { %3618 = vmatpush3.bf16.msra.mxu0 %v3617_v10  ;;  %v136_v4 = vld [vmem:[%s7104_s2 + $0x278] sm:$0xff]  ;;  %v167_v5 = vld [vmem:[%s7104_s2 + $0x370] sm:$0xff]  ;;  %v3667_v6 = vpack.c.bf16 %v184_v63, %v183_v62  ;;  %v202_v9 = vld [vmem:[%s7104_s2 + $0x488] sm:$0xff] }
  0x2f   :  { %3650 = vmatpush3.bf16.msra.mxu1 %v3649_v11  ;;  %3620 = vmatprep.subr.bf16.mxu0 %v3619_v12  ;;  %v168_v7 = vld [vmem:[%s7104_s2 + $0x378] sm:$0xff]  ;;  %v233_v10 = vld [vmem:[%s7104_s2 + $0x580] sm:$0xff]  ;;  %v234_v11 = vld [vmem:[%s7104_s2 + $0x588] sm:$0xff]  ;;  %v3637_v12 = vpack.c.bf16 %v136_v4, %v135_v3  ;;  %v3671_v14 = vpack.c.bf16 %v202_v9, %v201_v8 }
  0x30   :  { %3652 = vmatprep.subr.bf16.mxu1 %v3651_v16  ;;  %v3669_v13 = vpack.c.bf16 %v168_v7, %v167_v5  ;;  %v185_v15 = vld [vmem:[%s7104_s2 + $0x400] sm:$0xff]  ;;  %v186_v16 = vld [vmem:[%s7104_s2 + $0x408] sm:$0xff]  ;;  %v3703_v19 = vpack.c.bf16 %v234_v11, %v233_v10  ;;  %v203_v21 = vld [vmem:[%s7104_s2 + $0x490] sm:$0xff] }
  0x31   :  { %v217_v18 = vld [vmem:[%s7104_s2 + $0x500] sm:$0xff]  ;;  %v218_v20 = vld [vmem:[%s7104_s2 + $0x508] sm:$0xff]  ;;  %v204_v23 = vld [vmem:[%s7104_s2 + $0x498] sm:$0xff]  ;;  %v3673_v26 = vpack.c.bf16 %v186_v16, %v185_v15 }
  0x32   :  { %3622 = vmatpush3.bf16.msra.mxu0 %v3621_v25  ;;  %v235_v24 = vld [vmem:[%s7104_s2 + $0x590] sm:$0xff]  ;;  %v236_v25 = vld [vmem:[%s7104_s2 + $0x598] sm:$0xff]  ;;  %v3675_v31 = vpack.c.bf16 %v204_v23, %v203_v21  ;;  %v206_v36 = vld [vmem:[%s7104_s2 + $0x4a8] sm:$0xff] }
  0x33   :  { %3654 = vmatpush3.bf16.msra.mxu1 %v3653_v29  ;;  %3624 = vmatprep.subr.bf16.mxu0 %v3623_v30  ;;  %v187_v28 = vld [vmem:[%s7104_s2 + $0x410] sm:$0xff]  ;;  %v188_v29 = vld [vmem:[%s7104_s2 + $0x418] sm:$0xff]  ;;  %v3705_v30 = vpack.c.bf16 %v218_v20, %v217_v18  ;;  %v3707_v35 = vpack.c.bf16 %v236_v25, %v235_v24  ;;  %v237_v38 = vld [vmem:[%s7104_s2 + $0x5a0] sm:$0xff] }
  0x34   :  { %3656 = vmatprep.subr.bf16.mxu1 %v3655_v34  ;;  %v219_v32 = vld [vmem:[%s7104_s2 + $0x510] sm:$0xff]  ;;  %v220_v33 = vld [vmem:[%s7104_s2 + $0x518] sm:$0xff]  ;;  %v205_v34 = vld [vmem:[%s7104_s2 + $0x4a0] sm:$0xff] }
  0x35   :  { %v34_v39 = vld [vmem:[%s7105_s0 + $0x48] sm:$0xff]  ;;  %v189_v43 = vld [vmem:[%s7104_s2 + $0x420] sm:$0xff]  ;;  %v3709_v44 = vpack.c.bf16 %v220_v33, %v219_v32  ;;  %v3679_v45 = vpack.c.bf16 %v206_v36, %v205_v34  ;;  %v4936_v47 = vld [vmem:[%s7105_s0 + $0x50] sm:$0xff] }
  0x36   :  { %3626 = vmatpush3.bf16.msra.mxu0 %v3625_v40  ;;  %v238_v40 = vld [vmem:[%s7104_s2 + $0x5a8] sm:$0xff]  ;;  %905 = vst [vmem:[%s7106_s6 + $0xc8] sm:$0xff] %v34_v39  ;;  %v207_v50 = vld [vmem:[%s7104_s2 + $0x4b0] sm:$0xff]  ;;  %v208_v51 = vld [vmem:[%s7104_s2 + $0x4b8] sm:$0xff] }
  0x37   :  { %3658 = vmatpush3.bf16.msra.mxu1 %v3657_v41  ;;  %3628 = vmatprep.subr.bf16.mxu0 %v3627_v42  ;;  %v4911_v41 = vld [vmem:[%s7105_s0 + $0x40] sm:$0xff]  ;;  %v36_v42 = vld [vmem:[%s7105_s0 + $0x58] sm:$0xff]  ;;  %v3711_v48 = vpack.c.bf16 %v238_v40, %v237_v38  ;;  %v222_v49 = vld [vmem:[%s7104_s2 + $0x528] sm:$0xff]  ;;  %906 = vst [vmem:[%s7106_s6 + $0xd0] sm:$0xff] %v4936_v47  ;;  %v3683_v56 = vpack.c.bf16 %v208_v51, %v207_v50 }
  0x38   :  { %3660 = vmatprep.subr.bf16.mxu1 %v3659_v46  ;;  %904 = vst [vmem:[%s7106_s6 + $0xc0] sm:$0xff] %v4911_v41  ;;  %907 = vst [vmem:[%s7106_s6 + $0xd8] sm:$0xff] %v36_v42  ;;  %v221_v46 = vld [vmem:[%s7104_s2 + $0x520] sm:$0xff]  ;;  %v191_v57 = vld [vmem:[%s7104_s2 + $0x430] sm:$0xff] }
  0x39   :  { %v3713_v55 = vpack.c.bf16 %v222_v49, %v221_v46  ;;  %v223_v59 = vld [vmem:[%s7104_s2 + $0x530] sm:$0xff]  ;;  %v224_v61 = vld [vmem:[%s7104_s2 + $0x538] sm:$0xff]  ;;  %v209_v62 = vld [vmem:[%s7104_s2 + $0x4c0] sm:$0xff] }
  0x3a   :  { %3630 = vmatpush3.bf16.msra.mxu0 %v3629_v52  ;;  %v239_v52 = vld [vmem:[%s7104_s2 + $0x5b0] sm:$0xff]  ;;  %v210_v63 = vld [vmem:[%s7104_s2 + $0x4c8] sm:$0xff]  ;;  %v3717_v3 = vpack.c.bf16 %v224_v61, %v223_v59  ;;  %v193_v5 = vld [vmem:[%s7104_s2 + $0x440] sm:$0xff] }
  0x3b   :  { %3662 = vmatpush3.bf16.msra.mxu1 %v3661_v53  ;;  %3632 = vmatprep.subr.bf16.mxu0 %v3631_v54  ;;  %v240_v53 = vld [vmem:[%s7104_s2 + $0x5b8] sm:$0xff]  ;;  %v3687_v4 = vpack.c.bf16 %v210_v63, %v209_v62  ;;  %v225_v7 = vld [vmem:[%s7104_s2 + $0x540] sm:$0xff]  ;;  %v226_v9 = vld [vmem:[%s7104_s2 + $0x548] sm:$0xff] }
  0x3c   :  { %3664 = vmatprep.subr.bf16.mxu1 %v3663_v58  ;;  %v192_v58 = vld [vmem:[%s7104_s2 + $0x438] sm:$0xff]  ;;  %v3715_v60 = vpack.c.bf16 %v240_v53, %v239_v52  ;;  %v211_v10 = vld [vmem:[%s7104_s2 + $0x4d0] sm:$0xff]  ;;  %v3721_v15 = vpack.c.bf16 %v226_v9, %v225_v7  ;;  %v213_v24 = vld [vmem:[%s7104_s2 + $0x4e0] sm:$0xff] }
  0x3d   :  { %v212_v11 = vld [vmem:[%s7104_s2 + $0x4d8] sm:$0xff]  ;;  %v195_v18 = vld [vmem:[%s7104_s2 + $0x450] sm:$0xff]  ;;  %v214_v25 = vld [vmem:[%s7104_s2 + $0x4e8] sm:$0xff] }
  0x3e   :  { %3634 = vmatpush3.bf16.msra.mxu0 %v3633_v0  ;;  %v241_v0 = vld [vmem:[%s7104_s2 + $0x5c0] sm:$0xff]  ;;  %v3691_v16 = vpack.c.bf16 %v212_v11, %v211_v10  ;;  %v227_v20 = vld [vmem:[%s7104_s2 + $0x550] sm:$0xff]  ;;  %v228_v23 = vld [vmem:[%s7104_s2 + $0x558] sm:$0xff] }
  0x3f   :  { %3666 = vmatpush3.bf16.msra.mxu1 %v3665_v1  ;;  %3636 = vmatprep.subr.bf16.mxu0 %v3635_v2  ;;  %v242_v1 = vld [vmem:[%s7104_s2 + $0x5c8] sm:$0xff]  ;;  %v3685_v2 = vpack.c.bf16 %v192_v58, %v191_v57  ;;  %v197_v32 = vld [vmem:[%s7104_s2 + $0x460] sm:$0xff]  ;;  %v215_v38 = vld [vmem:[%s7104_s2 + $0x4f0] sm:$0xff] }
  0x40   :  { %3668 = vmatprep.subr.bf16.mxu1 %v3667_v6  ;;  %v194_v6 = vld [vmem:[%s7104_s2 + $0x448] sm:$0xff]  ;;  %v3719_v8 = vpack.c.bf16 %v242_v1, %v241_v0  ;;  %v229_v34 = vld [vmem:[%s7104_s2 + $0x560] sm:$0xff]  ;;  %v247_v40 = vld [vmem:[%s7104_s2 + $0x5f0] sm:$0xff] }
  0x41   :  { %v198_v33 = vld [vmem:[%s7104_s2 + $0x468] sm:$0xff]  ;;  %v5071_v50 = vld [vmem:[%s7105_s0 + $0x60] sm:$0xff]  ;;  %v5101_v57 = vld [vmem:[%s7105_s0 + $0x70] sm:$0xff] }
  0x42   :  { %3638 = vmatpush3.bf16.msra.mxu0 %v3637_v12  ;;  %v243_v12 = vld [vmem:[%s7104_s2 + $0x5d0] sm:$0xff]  ;;  %v230_v36 = vld [vmem:[%s7104_s2 + $0x568] sm:$0xff]  ;;  %v265_v52 = vld [vmem:[%s7104_s2 + $0x680] sm:$0xff]  ;;  %908 = vst [vmem:[%s7106_s6 + $0xe0] sm:$0xff] %v5071_v50 }
  0x43   :  { %3670 = vmatpush3.bf16.msra.mxu1 %v3669_v13  ;;  %3672 = vmatprep.subr.bf16.mxu0 %v3671_v14  ;;  %v244_v13 = vld [vmem:[%s7104_s2 + $0x5d8] sm:$0xff]  ;;  %v3689_v14 = vpack.c.bf16 %v194_v6, %v193_v5  ;;  %v38_v49 = vld [vmem:[%s7105_s0 + $0x68] sm:$0xff]  ;;  %910 = vst [vmem:[%s7106_s6 + $0xf0] sm:$0xff] %v5101_v57  ;;  %v249_v61 = vld [vmem:[%s7104_s2 + $0x600] sm:$0xff] }
  0x44   :  { %3704 = vmatprep.subr.bf16.mxu1 %v3703_v19  ;;  %v196_v19 = vld [vmem:[%s7104_s2 + $0x458] sm:$0xff]  ;;  %v3723_v21 = vpack.c.bf16 %v244_v13, %v243_v12  ;;  %v266_v53 = vld [vmem:[%s7104_s2 + $0x688] sm:$0xff]  ;;  %909 = vst [vmem:[%s7106_s6 + $0xe8] sm:$0xff] %v38_v49  ;;  %v281_v63 = vld [vmem:[%s7104_s2 + $0x700] sm:$0xff] }
  0x45   :  { %525 = vmatmul.mubr.f32.vlgmr.msra.gmra.mrb[2].mxu0 %v4736_v27  ;;  %v3677_v27 = vpack.c.bf16 %v188_v29, %v187_v28  ;;  %v246_v28 = vld [vmem:[%s7104_s2 + $0x5e8] sm:$0xff]  ;;  %v3693_v29 = vpack.c.bf16 %v196_v19, %v195_v18  ;;  %v300_v5 = vld [vmem:[%s7104_s2 + $0x798] sm:$0xff]  ;;  %v251_v9 = vld [vmem:[%s7104_s2 + $0x610] sm:$0xff] }
  0x46   :  { %595 = vmatmul.mubr.f32.vlgmr.msra.gmra.mrb[2].mxu1 %v4769_v37  ;;  %3674 = vmatpush3.bf16.msra.mxu0 %v3673_v26  ;;  %v190_v37 = vld [vmem:[%s7104_s2 + $0x428] sm:$0xff]  ;;  %v245_v26 = vld [vmem:[%s7104_s2 + $0x5e0] sm:$0xff]  ;;  %v252_v10 = vld [vmem:[%s7104_s2 + $0x618] sm:$0xff] }
  0x47   :  { %3706 = vmatpush3.bf16.msra.mxu1 %v3705_v30  ;;  %3676 = vmatprep.subr.bf16.mxu0 %v3675_v31  ;;  %v3681_v54 = vpack.c.bf16 %v190_v37, %v189_v43  ;;  %v3725_v30 = vpack.c.bf16 %v228_v23, %v227_v20  ;;  %v3695_v31 = vpack.c.bf16 %v214_v25, %v213_v24  ;;  %v199_v43 = vld [vmem:[%s7104_s2 + $0x470] sm:$0xff]  ;;  %v250_v62 = vld [vmem:[%s7104_s2 + $0x608] sm:$0xff]  ;;  %v284_v13 = vld [vmem:[%s7104_s2 + $0x718] sm:$0xff] }
  0x48   :  { %3708 = vmatprep.subr.bf16.mxu1 %v3707_v35  ;;  %664 = vmatprep.mubr.f32.mxu0 %v34_v39  ;;  %v3727_v35 = vpack.c.bf16 %v246_v28, %v245_v26  ;;  %v216_v39 = vld [vmem:[%s7104_s2 + $0x4f8] sm:$0xff]  ;;  %v3729_v37 = vpack.c.bf16 %v230_v36, %v229_v34  ;;  %v282_v1 = vld [vmem:[%s7104_s2 + $0x708] sm:$0xff]  ;;  %v3737_v6 = vpack.c.bf16 %v250_v62, %v249_v61  ;;  %v283_v11 = vld [vmem:[%s7104_s2 + $0x710] sm:$0xff] }
  0x49   :  { %734 = vmatprep.mubr.f32.mxu1 %v36_v42  ;;  %v248_v42 = vld [vmem:[%s7104_s2 + $0x5f8] sm:$0xff]  ;;  %v3699_v46 = vpack.c.bf16 %v216_v39, %v215_v38  ;;  %v3769_v7 = vpack.c.bf16 %v282_v1, %v281_v63  ;;  %v302_v18 = vld [vmem:[%s7104_s2 + $0x7a8] sm:$0xff]  ;;  %v3741_v19 = vpack.c.bf16 %v252_v10, %v251_v9  ;;  %v3773_v20 = vpack.c.bf16 %v284_v13, %v283_v11  ;;  %v285_v24 = vld [vmem:[%s7104_s2 + $0x720] sm:$0xff] }
  0x4a   :  { %3678 = vmatpush3.bf16.msra.mxu0 %v3677_v27  ;;  %v3697_v27 = vpack.c.bf16 %v198_v33, %v197_v32  ;;  %v3731_v51 = vpack.c.bf16 %v248_v42, %v247_v40  ;;  %v254_v23 = vld [vmem:[%s7104_s2 + $0x628] sm:$0xff]  ;;  %v271_v26 = vld [vmem:[%s7104_s2 + $0x6b0] sm:$0xff]  ;;  %v272_v28 = vld [vmem:[%s7104_s2 + $0x6b8] sm:$0xff] }
  0x4b   :  { %3710 = vmatpush3.bf16.msra.mxu1 %v3709_v44  ;;  %3680 = vmatprep.subr.bf16.mxu0 %v3679_v45  ;;  %v200_v44 = vld [vmem:[%s7104_s2 + $0x478] sm:$0xff]  ;;  %v231_v45 = vld [vmem:[%s7104_s2 + $0x570] sm:$0xff]  ;;  %v286_v25 = vld [vmem:[%s7104_s2 + $0x728] sm:$0xff]  ;;  %v3747_v33 = vpack.c.bf16 %v272_v28, %v271_v26 }
  0x4c   :  { %3712 = vmatprep.subr.bf16.mxu1 %v3711_v48  ;;  %v232_v48 = vld [vmem:[%s7104_s2 + $0x578] sm:$0xff]  ;;  %v3701_v58 = vpack.c.bf16 %v200_v44, %v199_v43  ;;  %v3777_v32 = vpack.c.bf16 %v286_v25, %v285_v24  ;;  %v255_v34 = vld [vmem:[%s7104_s2 + $0x630] sm:$0xff]  ;;  %v273_v40 = vld [vmem:[%s7104_s2 + $0x6c0] sm:$0xff] }
  0x4d   :  { %v3733_v59 = vpack.c.bf16 %v232_v48, %v231_v45  ;;  %v287_v36 = vld [vmem:[%s7104_s2 + $0x730] sm:$0xff]  ;;  %v288_v39 = vld [vmem:[%s7104_s2 + $0x738] sm:$0xff]  ;;  %v274_v42 = vld [vmem:[%s7104_s2 + $0x6c8] sm:$0xff] }
  0x4e   :  { %3682 = vmatpush3.bf16.msra.mxu0 %v3681_v54  ;;  %v40_v54 = vld [vmem:[%s7105_s0 + $0x78] sm:$0xff]  ;;  %v306_v43 = vld [vmem:[%s7104_s2 + $0x7c8] sm:$0xff]  ;;  %v3781_v45 = vpack.c.bf16 %v288_v39, %v287_v36  ;;  %v259_v61 = vld [vmem:[%s7104_s2 + $0x650] sm:$0xff] }
  0x4f   :  { %3714 = vmatpush3.bf16.msra.mxu1 %v3713_v55  ;;  %3684 = vmatprep.subr.bf16.mxu0 %v3683_v56  ;;  %v297_v55 = vld [vmem:[%s7104_s2 + $0x780] sm:$0xff]  ;;  %v298_v56 = vld [vmem:[%s7104_s2 + $0x788] sm:$0xff]  ;;  %911 = vst [vmem:[%s7106_s6 + $0xf8] sm:$0xff] %v40_v54  ;;  %v260_v62 = vld [vmem:[%s7104_s2 + $0x658] sm:$0xff] }
  0x50   :  { %3716 = vmatprep.subr.bf16.mxu1 %v3715_v60  ;;  %v3735_v60 = vpack.c.bf16 %v266_v53, %v265_v52  ;;  %v3767_v0 = vpack.c.bf16 %v298_v56, %v297_v55  ;;  %v258_v48 = vld [vmem:[%s7104_s2 + $0x648] sm:$0xff]  ;;  %v275_v53 = vld [vmem:[%s7104_s2 + $0x6d0] sm:$0xff]  ;;  %v308_v56 = vld [vmem:[%s7104_s2 + $0x7d8] sm:$0xff] }
  0x51   :  { %v290_v52 = vld [vmem:[%s7104_s2 + $0x748] sm:$0xff]  ;;  %v307_v55 = vld [vmem:[%s7104_s2 + $0x7d0] sm:$0xff]  ;;  %v292_v1 = vld [vmem:[%s7104_s2 + $0x758] sm:$0xff] }
  0x52   :  { %3686 = vmatpush3.bf16.msra.mxu0 %v3685_v2  ;;  %v267_v2 = vld [vmem:[%s7104_s2 + $0x690] sm:$0xff]  ;;  %v261_v9 = vld [vmem:[%s7104_s2 + $0x660] sm:$0xff]  ;;  %v262_v10 = vld [vmem:[%s7104_s2 + $0x668] sm:$0xff] }
  0x53   :  { %3718 = vmatpush3.bf16.msra.mxu1 %v3717_v3  ;;  %3688 = vmatprep.subr.bf16.mxu0 %v3687_v4  ;;  %v268_v3 = vld [vmem:[%s7104_s2 + $0x698] sm:$0xff]  ;;  %v299_v4 = vld [vmem:[%s7104_s2 + $0x790] sm:$0xff]  ;;  %v293_v11 = vld [vmem:[%s7104_s2 + $0x760] sm:$0xff] }
  0x54   :  { %3720 = vmatprep.subr.bf16.mxu1 %v3719_v8  ;;  %v3739_v8 = vpack.c.bf16 %v268_v3, %v267_v2  ;;  %v3771_v12 = vpack.c.bf16 %v300_v5, %v299_v4  ;;  %v291_v63 = vld [vmem:[%s7104_s2 + $0x750] sm:$0xff]  ;;  %v277_v2 = vld [vmem:[%s7104_s2 + $0x6e0] sm:$0xff]  ;;  %v278_v3 = vld [vmem:[%s7104_s2 + $0x6e8] sm:$0xff] }
  0x55   :  { %v309_v4 = vld [vmem:[%s7104_s2 + $0x7e0] sm:$0xff]  ;;  %v310_v5 = vld [vmem:[%s7104_s2 + $0x7e8] sm:$0xff]  ;;  %v295_v24 = vld [vmem:[%s7104_s2 + $0x770] sm:$0xff] }
  0x56   :  { %3690 = vmatpush3.bf16.msra.mxu0 %v3689_v14  ;;  %v269_v14 = vld [vmem:[%s7104_s2 + $0x6a0] sm:$0xff]  ;;  %v294_v13 = vld [vmem:[%s7104_s2 + $0x768] sm:$0xff]  ;;  %v296_v25 = vld [vmem:[%s7104_s2 + $0x778] sm:$0xff] }
  0x57   :  { %3722 = vmatpush3.bf16.msra.mxu1 %v3721_v15  ;;  %3692 = vmatprep.subr.bf16.mxu0 %v3691_v16  ;;  %v270_v15 = vld [vmem:[%s7104_s2 + $0x6a8] sm:$0xff]  ;;  %v301_v16 = vld [vmem:[%s7104_s2 + $0x7a0] sm:$0xff] }
  0x58   :  { %3724 = vmatprep.subr.bf16.mxu1 %v3723_v21  ;;  %v3743_v21 = vpack.c.bf16 %v270_v15, %v269_v14  ;;  %v279_v14 = vld [vmem:[%s7104_s2 + $0x6f0] sm:$0xff]  ;;  %v280_v15 = vld [vmem:[%s7104_s2 + $0x6f8] sm:$0xff]  ;;  %v1185_v26 = vld [vmem:[%s7107_s4 + $0x880] sm:$0xff] }
  0x59   :  { %v1186_v28 = vld [vmem:[%s7107_s4 + $0x888] sm:$0xff]  ;;  %v1201_v36 = vld [vmem:[%s7107_s4 + $0x900] sm:$0xff] }
  0x5a   :  { %3694 = vmatpush3.bf16.msra.mxu0 %v3693_v29  ;;  %v303_v29 = vld [vmem:[%s7104_s2 + $0x7b0] sm:$0xff]  ;;  %v1202_v39 = vld [vmem:[%s7107_s4 + $0x908] sm:$0xff] }
  0x5b   :  { %3726 = vmatpush3.bf16.msra.mxu1 %v3725_v30  ;;  %3696 = vmatprep.subr.bf16.mxu0 %v3695_v31  ;;  %v304_v30 = vld [vmem:[%s7104_s2 + $0x7b8] sm:$0xff] }
  0x5c   :  { %3728 = vmatprep.subr.bf16.mxu1 %v3727_v35  ;;  %v256_v35 = vld [vmem:[%s7104_s2 + $0x638] sm:$0xff]  ;;  %v3779_v38 = vpack.c.bf16 %v304_v30, %v303_v29  ;;  %v1217_v29 = vld [vmem:[%s7107_s4 + $0x980] sm:$0xff]  ;;  %v1218_v30 = vld [vmem:[%s7107_s4 + $0x988] sm:$0xff] }
  0x5d   :  { %v3749_v44 = vpack.c.bf16 %v256_v35, %v255_v34  ;;  %v1169_v34 = vld [vmem:[%s7107_s4 + $0x800] sm:$0xff]  ;;  %v1170_v35 = vld [vmem:[%s7107_s4 + $0x808] sm:$0xff] }
  0x5e   :  { %3698 = vmatpush3.bf16.msra.mxu0 %v3697_v27  ;;  %v305_v27 = vld [vmem:[%s7104_s2 + $0x7c0] sm:$0xff] }
  0x5f   :  { %3730 = vmatpush3.bf16.msra.mxu1 %v3729_v37  ;;  %3700 = vmatprep.subr.bf16.mxu0 %v3699_v46  ;;  %v3751_v37 = vpack.c.bf16 %v274_v42, %v273_v40  ;;  %v257_v46 = vld [vmem:[%s7104_s2 + $0x640] sm:$0xff]  ;;  %v1187_v40 = vld [vmem:[%s7107_s4 + $0x890] sm:$0xff]  ;;  %v1188_v42 = vld [vmem:[%s7107_s4 + $0x898] sm:$0xff] }
  0x60   :  { %3732 = vmatprep.subr.bf16.mxu1 %v3731_v51  ;;  %v3783_v51 = vpack.c.bf16 %v306_v43, %v305_v27  ;;  %v1219_v27 = vld [vmem:[%s7107_s4 + $0x990] sm:$0xff]  ;;  %v1220_v43 = vld [vmem:[%s7107_s4 + $0x998] sm:$0xff] }
  0x62   :  { %3702 = vmatpush3.bf16.msra.mxu0 %v3701_v58  ;;  %v3753_v58 = vpack.c.bf16 %v258_v48, %v257_v46  ;;  %v1171_v46 = vld [vmem:[%s7107_s4 + $0x810] sm:$0xff]  ;;  %v1172_v48 = vld [vmem:[%s7107_s4 + $0x818] sm:$0xff] }
  0x63   :  { %3734 = vmatpush3.bf16.msra.mxu1 %v3733_v59  ;;  %3736 = vmatprep.subr.bf16.mxu0 %v3735_v60 }
  0x64   :  { %3768 = vmatprep.subr.bf16.mxu1 %v3767_v0  ;;  %v3787_v0 = vpack.c.bf16 %v308_v56, %v307_v55  ;;  %v1221_v55 = vld [vmem:[%s7107_s4 + $0x9a0] sm:$0xff]  ;;  %v1222_v56 = vld [vmem:[%s7107_s4 + $0x9a8] sm:$0xff] }
  0x65   :  { %665 = vmatmul.mubr.f32.vlgmr.msra.gmra.mrb[4].mxu0 %v4911_v41  ;;  %v253_v41 = vld [vmem:[%s7104_s2 + $0x620] sm:$0xff] }
  0x66   :  { %735 = vmatmul.mubr.f32.vlgmr.msra.gmra.mrb[4].mxu1 %v4936_v47  ;;  %3738 = vmatpush3.bf16.msra.mxu0 %v3737_v6  ;;  %v3775_v47 = vpack.c.bf16 %v302_v18, %v301_v16  ;;  %v3745_v31 = vpack.c.bf16 %v254_v23, %v253_v41  ;;  %v3757_v6 = vpack.c.bf16 %v260_v62, %v259_v61  ;;  %v311_v16 = vld [vmem:[%s7104_s2 + $0x7f0] sm:$0xff]  ;;  %v312_v18 = vld [vmem:[%s7104_s2 + $0x7f8] sm:$0xff]  ;;  %v1174_v61 = vld [vmem:[%s7107_s4 + $0x828] sm:$0xff] }
  0x67   :  { %3770 = vmatpush3.bf16.msra.mxu1 %v3769_v7  ;;  %3740 = vmatprep.subr.bf16.mxu0 %v3739_v8  ;;  %v3789_v7 = vpack.c.bf16 %v292_v1, %v291_v63  ;;  %v3759_v8 = vpack.c.bf16 %v278_v3, %v277_v2  ;;  %v263_v41 = vld [vmem:[%s7104_s2 + $0x670] sm:$0xff]  ;;  %v264_v23 = vld [vmem:[%s7104_s2 + $0x678] sm:$0xff]  ;;  %v1205_v62 = vld [vmem:[%s7107_s4 + $0x920] sm:$0xff] }
  0x68   :  { %3772 = vmatprep.subr.bf16.mxu1 %v3771_v12  ;;  %804 = vmatprep.mubr.f32.mxu0 %v38_v49  ;;  %v289_v49 = vld [vmem:[%s7104_s2 + $0x740] sm:$0xff]  ;;  %v3791_v12 = vpack.c.bf16 %v310_v5, %v309_v4  ;;  %v1206_v63 = vld [vmem:[%s7107_s4 + $0x928] sm:$0xff]  ;;  %v1192_v1 = vld [vmem:[%s7107_s4 + $0x8b8] sm:$0xff] }
  0x69   :  { %874 = vmatprep.mubr.f32.mxu1 %v40_v54  ;;  %v276_v54 = vld [vmem:[%s7104_s2 + $0x6d8] sm:$0xff]  ;;  %v3785_v59 = vpack.c.bf16 %v290_v52, %v289_v49  ;;  %v1203_v49 = vld [vmem:[%s7107_s4 + $0x910] sm:$0xff]  ;;  %v3841_v5 = vpack.c.bf16 %v1206_v63, %v1205_v62  ;;  %v1250_v62 = vld [vmem:[%s7107_s4 + $0xa88] sm:$0xff] }
  0x6a   :  { %3742 = vmatpush3.bf16.msra.mxu0 %v3741_v19  ;;  %v3755_v60 = vpack.c.bf16 %v276_v54, %v275_v53  ;;  %v3761_v19 = vpack.c.bf16 %v262_v10, %v261_v9  ;;  %v1204_v52 = vld [vmem:[%s7107_s4 + $0x918] sm:$0xff]  ;;  %v1189_v53 = vld [vmem:[%s7107_s4 + $0x8a0] sm:$0xff]  ;;  %v1190_v54 = vld [vmem:[%s7107_s4 + $0x8a8] sm:$0xff] }
  0x6b   :  { %3774 = vmatpush3.bf16.msra.mxu1 %v3773_v20  ;;  %3744 = vmatprep.subr.bf16.mxu0 %v3743_v21  ;;  %v3793_v20 = vpack.c.bf16 %v294_v13, %v293_v11  ;;  %v3763_v21 = vpack.c.bf16 %v280_v15, %v279_v14  ;;  %v1223_v2 = vld [vmem:[%s7107_s4 + $0x9b0] sm:$0xff]  ;;  %v1224_v3 = vld [vmem:[%s7107_s4 + $0x9b8] sm:$0xff]  ;;  %v1193_v10 = vld [vmem:[%s7107_s4 + $0x8c0] sm:$0xff] }
  0x6c   :  { %3776 = vmatprep.subr.bf16.mxu1 %v3775_v47  ;;  %v3795_v47 = vpack.c.bf16 %v312_v18, %v311_v16  ;;  %v1208_v9 = vld [vmem:[%s7107_s4 + $0x938] sm:$0xff]  ;;  %v1194_v11 = vld [vmem:[%s7107_s4 + $0x8c8] sm:$0xff]  ;;  %v1177_v18 = vld [vmem:[%s7107_s4 + $0x840] sm:$0xff] }
  0x6d   :  { %v1226_v13 = vld [vmem:[%s7107_s4 + $0x9c8] sm:$0xff]  ;;  %v3815_v16 = vpack.c.bf16 %v1194_v11, %v1193_v10 }
  0x6e   :  { %3746 = vmatpush3.bf16.msra.mxu0 %v3745_v31  ;;  %v3765_v31 = vpack.c.bf16 %v264_v23, %v263_v41  ;;  %v1210_v41 = vld [vmem:[%s7107_s4 + $0x948] sm:$0xff]  ;;  %v1195_v23 = vld [vmem:[%s7107_s4 + $0x8d0] sm:$0xff] }
  0x6f   :  { %3778 = vmatpush3.bf16.msra.mxu1 %v3777_v32  ;;  %3748 = vmatprep.subr.bf16.mxu0 %v3747_v33  ;;  %v3797_v32 = vpack.c.bf16 %v296_v25, %v295_v24  ;;  %v3799_v33 = vpack.c.bf16 %v1186_v28, %v1185_v26  ;;  %v1196_v24 = vld [vmem:[%s7107_s4 + $0x8d8] sm:$0xff]  ;;  %v1282_v63 = vld [vmem:[%s7107_s4 + $0xb88] sm:$0xff] }
  0x70   :  { %3780 = vmatprep.subr.bf16.mxu1 %v3779_v38  ;;  %v3831_v38 = vpack.c.bf16 %v1218_v30, %v1217_v29  ;;  %v1228_v25 = vld [vmem:[%s7107_s4 + $0x9d8] sm:$0xff]  ;;  %v3819_v29 = vpack.c.bf16 %v1196_v24, %v1195_v23  ;;  %v1179_v30 = vld [vmem:[%s7107_s4 + $0x850] sm:$0xff]  ;;  %v1286_v23 = vld [vmem:[%s7107_s4 + $0xba8] sm:$0xff] }
  0x71   :  { %v4339_v24 = vld [vmem:[%s7106_s6 + $0x90] sm:$0xff] }
  0x72   :  { %3750 = vmatpush3.bf16.msra.mxu0 %v3749_v44  ;;  %v3801_v44 = vpack.c.bf16 %v1170_v35, %v1169_v34  ;;  %v1212_v34 = vld [vmem:[%s7107_s4 + $0x958] sm:$0xff]  ;;  %v1197_v35 = vld [vmem:[%s7107_s4 + $0x8e0] sm:$0xff] }
  0x73   :  { %3782 = vmatpush3.bf16.msra.mxu1 %v3781_v45  ;;  %3752 = vmatprep.subr.bf16.mxu0 %v3751_v37  ;;  %v3833_v45 = vpack.c.bf16 %v1202_v39, %v1201_v36  ;;  %v3803_v37 = vpack.c.bf16 %v1188_v42, %v1187_v40  ;;  %v1198_v36 = vld [vmem:[%s7107_s4 + $0x8e8] sm:$0xff] }
  0x74   :  { %3784 = vmatprep.subr.bf16.mxu1 %v3783_v51  ;;  %v3835_v51 = vpack.c.bf16 %v1220_v43, %v1219_v27  ;;  %v1230_v39 = vld [vmem:[%s7107_s4 + $0x9e8] sm:$0xff]  ;;  %v3823_v27 = vpack.c.bf16 %v1198_v36, %v1197_v35  ;;  %v1181_v43 = vld [vmem:[%s7107_s4 + $0x860] sm:$0xff]  ;;  %v1287_v36 = vld [vmem:[%s7107_s4 + $0xbb0] sm:$0xff] }
  0x75   :  { %v4340_v35 = vld [vmem:[%s7106_s6 + $0xa8] sm:$0xff] }
  0x76   :  { %3754 = vmatpush3.bf16.msra.mxu0 %v3753_v58  ;;  %v3805_v58 = vpack.c.bf16 %v1172_v48, %v1171_v46  ;;  %v1214_v46 = vld [vmem:[%s7107_s4 + $0x968] sm:$0xff]  ;;  %v1199_v48 = vld [vmem:[%s7107_s4 + $0x8f0] sm:$0xff] }
  0x77   :  { %3786 = vmatpush3.bf16.msra.mxu1 %v3785_v59  ;;  %3756 = vmatprep.subr.bf16.mxu0 %v3755_v60  ;;  %v3837_v59 = vpack.c.bf16 %v1204_v52, %v1203_v49  ;;  %v3807_v60 = vpack.c.bf16 %v1190_v54, %v1189_v53  ;;  %v1200_v49 = vld [vmem:[%s7107_s4 + $0x8f8] sm:$0xff] }
  0x78   :  { %3788 = vmatprep.subr.bf16.mxu1 %v3787_v0  ;;  %v1191_v0 = vld [vmem:[%s7107_s4 + $0x8b0] sm:$0xff]  ;;  %v1232_v52 = vld [vmem:[%s7107_s4 + $0x9f8] sm:$0xff] }
  0x7a   :  { %3758 = vmatpush3.bf16.msra.mxu0 %v3757_v6  ;;  %v3811_v6 = vpack.c.bf16 %v1192_v1, %v1191_v0 }
  0x7b   :  { %3790 = vmatpush3.bf16.msra.mxu1 %v3789_v7  ;;  %3760 = vmatprep.subr.bf16.mxu0 %v3759_v8  ;;  %v1176_v7 = vld [vmem:[%s7107_s4 + $0x838] sm:$0xff]  ;;  %v1207_v8 = vld [vmem:[%s7107_s4 + $0x930] sm:$0xff] }
  0x7c   :  { %3792 = vmatprep.subr.bf16.mxu1 %v3791_v12  ;;  %v1225_v12 = vld [vmem:[%s7107_s4 + $0x9c0] sm:$0xff]  ;;  %v3845_v15 = vpack.c.bf16 %v1208_v9, %v1207_v8  ;;  %v1252_v8 = vld [vmem:[%s7107_s4 + $0xa98] sm:$0xff] }
  0x7d   :  { %v1284_v9 = vld [vmem:[%s7107_s4 + $0xb98] sm:$0xff] }
  0x7e   :  { %3762 = vmatpush3.bf16.msra.mxu0 %v3761_v19  ;;  %v1178_v19 = vld [vmem:[%s7107_s4 + $0x848] sm:$0xff] }
  0x7f   :  { %3794 = vmatpush3.bf16.msra.mxu1 %v3793_v20  ;;  %3764 = vmatprep.subr.bf16.mxu0 %v3763_v21  ;;  %v1209_v20 = vld [vmem:[%s7107_s4 + $0x940] sm:$0xff]  ;;  %v3847_v21 = vpack.c.bf16 %v1226_v13, %v1225_v12  ;;  %v3817_v26 = vpack.c.bf16 %v1178_v19, %v1177_v18  ;;  %v1235_v13 = vld [vmem:[%s7107_s4 + $0xa10] sm:$0xff]  ;;  %v1268_v18 = vld [vmem:[%s7107_s4 + $0xb18] sm:$0xff] }
  0x80   :  { %3796 = vmatprep.subr.bf16.mxu1 %v3795_v47  ;;  %v1227_v47 = vld [vmem:[%s7107_s4 + $0x9d0] sm:$0xff]  ;;  %v3849_v28 = vpack.c.bf16 %v1210_v41, %v1209_v20  ;;  %v1253_v19 = vld [vmem:[%s7107_s4 + $0xaa0] sm:$0xff]  ;;  %v1254_v20 = vld [vmem:[%s7107_s4 + $0xaa8] sm:$0xff] }
  0x81   :  { %v1285_v41 = vld [vmem:[%s7107_s4 + $0xba0] sm:$0xff] }
  0x82   :  { %3766 = vmatpush3.bf16.msra.mxu0 %v3765_v31  ;;  %v1180_v31 = vld [vmem:[%s7107_s4 + $0x858] sm:$0xff] }
  0x83   :  { %3798 = vmatpush3.bf16.msra.mxu1 %v3797_v32  ;;  %3800 = vmatprep.subr.bf16.mxu0 %v3799_v33  ;;  %v1211_v32 = vld [vmem:[%s7107_s4 + $0x950] sm:$0xff]  ;;  %v3851_v33 = vpack.c.bf16 %v1228_v25, %v1227_v47  ;;  %v3821_v40 = vpack.c.bf16 %v1180_v31, %v1179_v30  ;;  %v1269_v30 = vld [vmem:[%s7107_s4 + $0xb20] sm:$0xff]  ;;  %v3903_v31 = vpack.c.bf16 %v1286_v23, %v1285_v41  ;;  %v1296_v41 = vld [vmem:[%s7107_s4 + $0xbf8] sm:$0xff] }
  0x84   :  { %3832 = vmatprep.subr.bf16.mxu1 %v3831_v38  ;;  %v1229_v38 = vld [vmem:[%s7107_s4 + $0x9e0] sm:$0xff]  ;;  %v3853_v42 = vpack.c.bf16 %v1212_v34, %v1211_v32  ;;  %v1270_v32 = vld [vmem:[%s7107_s4 + $0xb28] sm:$0xff]  ;;  %v1256_v34 = vld [vmem:[%s7107_s4 + $0xab8] sm:$0xff] }
  0x85   :  { %805 = vmatmul.mubr.f32.vlgmr.msra.gmra.mrb[6].mxu0 %v5071_v50  ;;  %v1173_v50 = vld [vmem:[%s7107_s4 + $0x820] sm:$0xff] }
  0x86   :  { %875 = vmatmul.mubr.f32.vlgmr.msra.gmra.mrb[6].mxu1 %v5101_v57  ;;  %3802 = vmatpush3.bf16.msra.mxu0 %v3801_v44  ;;  %v3839_v57 = vpack.c.bf16 %v1222_v56, %v1221_v55  ;;  %v3809_v4 = vpack.c.bf16 %v1174_v61, %v1173_v50  ;;  %v1182_v44 = vld [vmem:[%s7107_s4 + $0x868] sm:$0xff]  ;;  %v3827_v55 = vpack.c.bf16 %v1200_v49, %v1199_v48  ;;  %v1183_v56 = vld [vmem:[%s7107_s4 + $0x870] sm:$0xff]  ;;  %v1216_v50 = vld [vmem:[%s7107_s4 + $0x978] sm:$0xff] }
  0x87   :  { %3834 = vmatpush3.bf16.msra.mxu1 %v3833_v45  ;;  %3804 = vmatprep.subr.bf16.mxu0 %v3803_v37  ;;  %v1213_v45 = vld [vmem:[%s7107_s4 + $0x960] sm:$0xff]  ;;  %v3855_v37 = vpack.c.bf16 %v1230_v39, %v1229_v38  ;;  %v3825_v53 = vpack.c.bf16 %v1182_v44, %v1181_v43  ;;  %v1288_v38 = vld [vmem:[%s7107_s4 + $0xbb8] sm:$0xff]  ;;  %v1239_v43 = vld [vmem:[%s7107_s4 + $0xa30] sm:$0xff] }
  0x88   :  { %3836 = vmatprep.subr.bf16.mxu1 %v3835_v51  ;;  %1489 = vmatprep.mubr.f32.mxu0 %v4566_v17  ;;  %v1175_v17 = vld [vmem:[%s7107_s4 + $0x830] sm:$0xff]  ;;  %v3857_v54 = vpack.c.bf16 %v1214_v46, %v1213_v45  ;;  %v1249_v61 = vld [vmem:[%s7107_s4 + $0xa80] sm:$0xff]  ;;  %v4341_v39 = vld [vmem:[%s7106_s6 + $0xb8] sm:$0xff] }
  0x89   :  { %1559 = vmatprep.mubr.f32.mxu1 %v4588_v22  ;;  %v3843_v22 = vpack.c.bf16 %v1224_v3, %v1223_v2  ;;  %v3813_v14 = vpack.c.bf16 %v1176_v7, %v1175_v17  ;;  %v1231_v51 = vld [vmem:[%s7107_s4 + $0x9f0] sm:$0xff]  ;;  %v3863_v2 = vpack.c.bf16 %v1250_v62, %v1249_v61  ;;  %v1233_v3 = vld [vmem:[%s7107_s4 + $0xa00] sm:$0xff]  ;;  %v1266_v17 = vld [vmem:[%s7107_s4 + $0xb08] sm:$0xff] }
  0x8a   :  { %3806 = vmatpush3.bf16.msra.mxu0 %v3805_v58  ;;  %v1184_v58 = vld [vmem:[%s7107_s4 + $0x878] sm:$0xff]  ;;  %v1251_v7 = vld [vmem:[%s7107_s4 + $0xa90] sm:$0xff]  ;;  %v1257_v48 = vld [vmem:[%s7107_s4 + $0xac0] sm:$0xff] }
  0x8b   :  { %3838 = vmatpush3.bf16.msra.mxu1 %v3837_v59  ;;  %3808 = vmatprep.subr.bf16.mxu0 %v3807_v60  ;;  %v1215_v59 = vld [vmem:[%s7107_s4 + $0x970] sm:$0xff]  ;;  %v3859_v60 = vpack.c.bf16 %v1232_v52, %v1231_v51  ;;  %v3829_v0 = vpack.c.bf16 %v1184_v58, %v1183_v56  ;;  %v3867_v12 = vpack.c.bf16 %v1252_v8, %v1251_v7  ;;  %v1240_v44 = vld [vmem:[%s7107_s4 + $0xa38] sm:$0xff]  ;;  %v1258_v49 = vld [vmem:[%s7107_s4 + $0xac8] sm:$0xff] }
  0x8c   :  { %3840 = vmatprep.subr.bf16.mxu1 %v3839_v57  ;;  %v1281_v57 = vld [vmem:[%s7107_s4 + $0xb80] sm:$0xff]  ;;  %v3861_v1 = vpack.c.bf16 %v1216_v50, %v1215_v59  ;;  %v1271_v45 = vld [vmem:[%s7107_s4 + $0xb30] sm:$0xff]  ;;  %v1272_v46 = vld [vmem:[%s7107_s4 + $0xb38] sm:$0xff] }
  0x8d   :  { %v1289_v51 = vld [vmem:[%s7107_s4 + $0xbc0] sm:$0xff]  ;;  %v1290_v52 = vld [vmem:[%s7107_s4 + $0xbc8] sm:$0xff]  ;;  %v1259_v61 = vld [vmem:[%s7107_s4 + $0xad0] sm:$0xff] }
  0x8e   :  { %3810 = vmatpush3.bf16.msra.mxu0 %v3809_v4  ;;  %v1234_v4 = vld [vmem:[%s7107_s4 + $0xa08] sm:$0xff]  ;;  %v1241_v56 = vld [vmem:[%s7107_s4 + $0xa40] sm:$0xff]  ;;  %v1260_v62 = vld [vmem:[%s7107_s4 + $0xad8] sm:$0xff] }
  0x8f   :  { %3842 = vmatpush3.bf16.msra.mxu1 %v3841_v5  ;;  %3812 = vmatprep.subr.bf16.mxu0 %v3811_v6  ;;  %v1265_v5 = vld [vmem:[%s7107_s4 + $0xb00] sm:$0xff]  ;;  %v3895_v6 = vpack.c.bf16 %v1282_v63, %v1281_v57  ;;  %v3865_v10 = vpack.c.bf16 %v1234_v4, %v1233_v3  ;;  %v1242_v58 = vld [vmem:[%s7107_s4 + $0xa48] sm:$0xff]  ;;  %v1291_v57 = vld [vmem:[%s7107_s4 + $0xbd0] sm:$0xff] }
  0x90   :  { %3844 = vmatprep.subr.bf16.mxu1 %v3843_v22  ;;  %v1283_v22 = vld [vmem:[%s7107_s4 + $0xb90] sm:$0xff]  ;;  %v3897_v11 = vpack.c.bf16 %v1266_v17, %v1265_v5  ;;  %v1273_v59 = vld [vmem:[%s7107_s4 + $0xb40] sm:$0xff]  ;;  %v1274_v50 = vld [vmem:[%s7107_s4 + $0xb48] sm:$0xff] }
  0x91   :  { %v1292_v63 = vld [vmem:[%s7107_s4 + $0xbd8] sm:$0xff]  ;;  %v1243_v3 = vld [vmem:[%s7107_s4 + $0xa50] sm:$0xff]  ;;  %v1261_v7 = vld [vmem:[%s7107_s4 + $0xae0] sm:$0xff] }
  0x92   :  { %3814 = vmatpush3.bf16.msra.mxu0 %v3813_v14  ;;  %v1236_v14 = vld [vmem:[%s7107_s4 + $0xa18] sm:$0xff]  ;;  %v1275_v5 = vld [vmem:[%s7107_s4 + $0xb50] sm:$0xff]  ;;  %v1262_v8 = vld [vmem:[%s7107_s4 + $0xae8] sm:$0xff] }
  0x93   :  { %3846 = vmatpush3.bf16.msra.mxu1 %v3845_v15  ;;  %3816 = vmatprep.subr.bf16.mxu0 %v3815_v16  ;;  %v1267_v15 = vld [vmem:[%s7107_s4 + $0xb10] sm:$0xff]  ;;  %v3899_v16 = vpack.c.bf16 %v1284_v9, %v1283_v22  ;;  %v3869_v47 = vpack.c.bf16 %v1236_v14, %v1235_v13  ;;  %v1244_v4 = vld [vmem:[%s7107_s4 + $0xa58] sm:$0xff]  ;;  %v1293_v22 = vld [vmem:[%s7107_s4 + $0xbe0] sm:$0xff] }
  0x94   :  { %3848 = vmatprep.subr.bf16.mxu1 %v3847_v21  ;;  %v4338_v21 = vld [vmem:[%s7106_s6 + $0x80] sm:$0xff]  ;;  %v3901_v25 = vpack.c.bf16 %v1268_v18, %v1267_v15  ;;  %v1276_v17 = vld [vmem:[%s7107_s4 + $0xb58] sm:$0xff]  ;;  %v1294_v9 = vld [vmem:[%s7107_s4 + $0xbe8] sm:$0xff] }
  0x95   :  { %v1245_v13 = vld [vmem:[%s7107_s4 + $0xa60] sm:$0xff]  ;;  %v1246_v14 = vld [vmem:[%s7107_s4 + $0xa68] sm:$0xff] }
  0x96   :  { %3818 = vmatpush3.bf16.msra.mxu0 %v3817_v26  ;;  %v3871_v26 = vpack.c.bf16 %v1254_v20, %v1253_v19  ;;  %v1277_v15 = vld [vmem:[%s7107_s4 + $0xb60] sm:$0xff]  ;;  %v1278_v18 = vld [vmem:[%s7107_s4 + $0xb68] sm:$0xff]  ;;  %v1263_v19 = vld [vmem:[%s7107_s4 + $0xaf0] sm:$0xff]  ;;  %v3889_v23 = vpack.c.bf16 %v1246_v14, %v1245_v13 }
  0x97   :  { %3850 = vmatpush3.bf16.msra.mxu1 %v3849_v28  ;;  %3820 = vmatprep.subr.bf16.mxu0 %v3819_v29  ;;  %v1237_v28 = vld [vmem:[%s7107_s4 + $0xa20] sm:$0xff]  ;;  %v1238_v29 = vld [vmem:[%s7107_s4 + $0xa28] sm:$0xff]  ;;  %v1264_v20 = vld [vmem:[%s7107_s4 + $0xaf8] sm:$0xff] }
  0x98   :  { %3852 = vmatprep.subr.bf16.mxu1 %v3851_v33  ;;  %v1255_v33 = vld [vmem:[%s7107_s4 + $0xab0] sm:$0xff] }
  0x99   :  { %v5815_v14 = vld [vmem:[%s7108_s1 + $0x10] sm:$0xff] }
  0x9a   :  { %3822 = vmatpush3.bf16.msra.mxu0 %v3821_v40  ;;  %v3873_v40 = vpack.c.bf16 %v1238_v29, %v1237_v28  ;;  %v1279_v28 = vld [vmem:[%s7107_s4 + $0xb70] sm:$0xff]  ;;  %882 = vst [vmem:[%s7106_s6 + $0x10] sm:$0xff] %v5815_v14 }
  0x9b   :  { %3854 = vmatpush3.bf16.msra.mxu1 %v3853_v42  ;;  %3824 = vmatprep.subr.bf16.mxu0 %v3823_v27  ;;  %v3905_v42 = vpack.c.bf16 %v1270_v32, %v1269_v30  ;;  %v3875_v27 = vpack.c.bf16 %v1256_v34, %v1255_v33  ;;  %v1280_v30 = vld [vmem:[%s7107_s4 + $0xb78] sm:$0xff]  ;;  %v1314_v32 = vld [vmem:[%s7107_s4 + $0xc88] sm:$0xff]  ;;  %v1345_v33 = vld [vmem:[%s7107_s4 + $0xd80] sm:$0xff] }
  0x9c   :  { %3856 = vmatprep.subr.bf16.mxu1 %v3855_v37  ;;  %v3907_v37 = vpack.c.bf16 %v1288_v38, %v1287_v36  ;;  %v1346_v34 = vld [vmem:[%s7107_s4 + $0xd88] sm:$0xff]  ;;  %v3925_v36 = vpack.c.bf16 %v1280_v30, %v1279_v28  ;;  %v1305_v30 = vld [vmem:[%s7107_s4 + $0xc40] sm:$0xff] }
  0x9e   :  { %3826 = vmatpush3.bf16.msra.mxu0 %v3825_v53  ;;  %v3877_v53 = vpack.c.bf16 %v1240_v44, %v1239_v43  ;;  %v1330_v43 = vld [vmem:[%s7107_s4 + $0xd08] sm:$0xff]  ;;  %v1315_v44 = vld [vmem:[%s7107_s4 + $0xc90] sm:$0xff] }
  0x9f   :  { %3858 = vmatpush3.bf16.msra.mxu1 %v3857_v54  ;;  %3828 = vmatprep.subr.bf16.mxu0 %v3827_v55  ;;  %v3909_v54 = vpack.c.bf16 %v1272_v46, %v1271_v45  ;;  %v3879_v55 = vpack.c.bf16 %v1258_v49, %v1257_v48  ;;  %v1316_v45 = vld [vmem:[%s7107_s4 + $0xc98] sm:$0xff] }
  0xa0   :  { %3860 = vmatprep.subr.bf16.mxu1 %v3859_v60  ;;  %v3911_v60 = vpack.c.bf16 %v1290_v52, %v1289_v51  ;;  %v1348_v46 = vld [vmem:[%s7107_s4 + $0xd98] sm:$0xff]  ;;  %v3931_v51 = vpack.c.bf16 %v1316_v45, %v1315_v44  ;;  %v1299_v52 = vld [vmem:[%s7107_s4 + $0xc10] sm:$0xff] }
  0xa1   :  { %v1308_v44 = vld [vmem:[%s7107_s4 + $0xc58] sm:$0xff]  ;;  %v1339_v45 = vld [vmem:[%s7107_s4 + $0xd50] sm:$0xff] }
  0xa2   :  { %3830 = vmatpush3.bf16.msra.mxu0 %v3829_v0  ;;  %v3881_v0 = vpack.c.bf16 %v1242_v58, %v1241_v56  ;;  %v1332_v56 = vld [vmem:[%s7107_s4 + $0xd18] sm:$0xff]  ;;  %v1317_v58 = vld [vmem:[%s7107_s4 + $0xca0] sm:$0xff] }
  0xa3   :  { %3862 = vmatpush3.bf16.msra.mxu1 %v3861_v1  ;;  %3864 = vmatprep.subr.bf16.mxu0 %v3863_v2  ;;  %v3913_v1 = vpack.c.bf16 %v1274_v50, %v1273_v59  ;;  %v3883_v2 = vpack.c.bf16 %v1260_v62, %v1259_v61  ;;  %v1318_v59 = vld [vmem:[%s7107_s4 + $0xca8] sm:$0xff]  ;;  %v1349_v50 = vld [vmem:[%s7107_s4 + $0xda0] sm:$0xff]  ;;  %v4343_v62 = vld [vmem:[%s7106_s6 + $0xb0] sm:$0xff] }
  0xa4   :  { %3896 = vmatprep.subr.bf16.mxu1 %v3895_v6  ;;  %v3915_v6 = vpack.c.bf16 %v1292_v63, %v1291_v57  ;;  %v1350_v61 = vld [vmem:[%s7107_s4 + $0xda8] sm:$0xff]  ;;  %v1301_v63 = vld [vmem:[%s7107_s4 + $0xc20] sm:$0xff] }
  0xa5   :  { %1490 = vmatmul.mubr.f32.vlgmr.msra.gmra.mrb[8].mxu0 %v4338_v21  ;;  %v1295_v21 = vld [vmem:[%s7107_s4 + $0xbf0] sm:$0xff] }
  0xa6   :  { %1560 = vmatmul.mubr.f32.vlgmr.msra.gmra.mrb[8].mxu1 %v4339_v24  ;;  %3866 = vmatpush3.bf16.msra.mxu0 %v3865_v10  ;;  %v3885_v10 = vpack.c.bf16 %v1244_v4, %v1243_v3  ;;  %v3921_v24 = vpack.c.bf16 %v1278_v18, %v1277_v15  ;;  %v3923_v29 = vpack.c.bf16 %v1296_v41, %v1295_v21  ;;  %v1333_v3 = vld [vmem:[%s7107_s4 + $0xd20] sm:$0xff]  ;;  %v1334_v4 = vld [vmem:[%s7107_s4 + $0xd28] sm:$0xff]  ;;  %v1303_v18 = vld [vmem:[%s7107_s4 + $0xc30] sm:$0xff] }
  0xa7   :  { %3898 = vmatpush3.bf16.msra.mxu1 %v3897_v11  ;;  %3868 = vmatprep.subr.bf16.mxu0 %v3867_v12  ;;  %v3917_v11 = vpack.c.bf16 %v1276_v17, %v1275_v5  ;;  %v3887_v12 = vpack.c.bf16 %v1262_v8, %v1261_v7  ;;  %v5770_v5 = vld [vmem:[%s7108_s1 + $0x8] sm:$0xff]  ;;  %v1319_v17 = vld [vmem:[%s7107_s4 + $0xcb0] sm:$0xff]  ;;  %v1320_v7 = vld [vmem:[%s7107_s4 + $0xcb8] sm:$0xff]  ;;  %v3969_v15 = vpack.c.bf16 %v1334_v4, %v1333_v3 }
  0xa8   :  { %3900 = vmatprep.subr.bf16.mxu1 %v3899_v16  ;;  %1629 = vmatprep.mubr.f32.mxu0 %v4340_v35  ;;  %v3919_v16 = vpack.c.bf16 %v1294_v9, %v1293_v22  ;;  %v4344_v8 = vld [vmem:[%s7106_s6 + $0xc8] sm:$0xff]  ;;  %881 = vst [vmem:[%s7106_s6 + $0x8] sm:$0xff] %v5770_v5  ;;  %v5788_v22 = vld [vmem:[%s7108_s1] sm:$0xff]  ;;  %v1351_v9 = vld [vmem:[%s7107_s4 + $0xdb0] sm:$0xff] }
  0xa9   :  { %1699 = vmatprep.mubr.f32.mxu1 %v4341_v39  ;;  %v1297_v39 = vld [vmem:[%s7107_s4 + $0xc00] sm:$0xff]  ;;  %880 = vst [vmem:[%s7106_s6] sm:$0xff] %v5788_v22  ;;  %v1336_v41 = vld [vmem:[%s7107_s4 + $0xd38] sm:$0xff]  ;;  %v1311_v3 = vld [vmem:[%s7107_s4 + $0xc70] sm:$0xff] }
  0xaa   :  { %3870 = vmatpush3.bf16.msra.mxu0 %v3869_v47  ;;  %v3891_v47 = vpack.c.bf16 %v1264_v20, %v1263_v19  ;;  %v1304_v19 = vld [vmem:[%s7107_s4 + $0xc38] sm:$0xff]  ;;  %v1335_v20 = vld [vmem:[%s7107_s4 + $0xd30] sm:$0xff] }
  0xab   :  { %3902 = vmatpush3.bf16.msra.mxu1 %v3901_v25  ;;  %3872 = vmatprep.subr.bf16.mxu0 %v3871_v26  ;;  %v1247_v25 = vld [vmem:[%s7107_s4 + $0xa70] sm:$0xff]  ;;  %v1248_v26 = vld [vmem:[%s7107_s4 + $0xa78] sm:$0xff]  ;;  %v3973_v28 = vpack.c.bf16 %v1336_v41, %v1335_v20  ;;  %v1393_v41 = vld [vmem:[%s7107_s4 + $0xf00] sm:$0xff] }
  0xac   :  { %3904 = vmatprep.subr.bf16.mxu1 %v3903_v31  ;;  %v1313_v31 = vld [vmem:[%s7107_s4 + $0xc80] sm:$0xff]  ;;  %v3893_v35 = vpack.c.bf16 %v1248_v26, %v1247_v25  ;;  %v1354_v25 = vld [vmem:[%s7107_s4 + $0xdc8] sm:$0xff]  ;;  %v3941_v26 = vpack.c.bf16 %v1304_v19, %v1303_v18  ;;  %v1312_v4 = vld [vmem:[%s7107_s4 + $0xc78] sm:$0xff] }
  0xad   :  { %v3927_v38 = vpack.c.bf16 %v1314_v32, %v1313_v31  ;;  %v1306_v31 = vld [vmem:[%s7107_s4 + $0xc48] sm:$0xff]  ;;  %v1337_v32 = vld [vmem:[%s7107_s4 + $0xd40] sm:$0xff] }
  0xae   :  { %3874 = vmatpush3.bf16.msra.mxu0 %v3873_v40  ;;  %v1298_v40 = vld [vmem:[%s7107_s4 + $0xc08] sm:$0xff]  ;;  %v5959_v19 = vld [vmem:[%s7108_s1 + $0x20] sm:$0xff] }
  0xaf   :  { %3906 = vmatpush3.bf16.msra.mxu1 %v3905_v42  ;;  %3876 = vmatprep.subr.bf16.mxu0 %v3875_v27  ;;  %v1329_v42 = vld [vmem:[%s7107_s4 + $0xd00] sm:$0xff]  ;;  %v3959_v27 = vpack.c.bf16 %v1346_v34, %v1345_v33  ;;  %v3929_v48 = vpack.c.bf16 %v1298_v40, %v1297_v39  ;;  %v1338_v34 = vld [vmem:[%s7107_s4 + $0xd48] sm:$0xff]  ;;  %v1356_v39 = vld [vmem:[%s7107_s4 + $0xdd8] sm:$0xff]  ;;  %v3945_v40 = vpack.c.bf16 %v1306_v31, %v1305_v30 }
  0xb0   :  { %3908 = vmatprep.subr.bf16.mxu1 %v3907_v37  ;;  %v1347_v37 = vld [vmem:[%s7107_s4 + $0xd90] sm:$0xff]  ;;  %v3961_v49 = vpack.c.bf16 %v1330_v43, %v1329_v42  ;;  %v3977_v42 = vpack.c.bf16 %v1338_v34, %v1337_v32  ;;  %v1362_v18 = vld [vmem:[%s7107_s4 + $0xe08] sm:$0xff]  ;;  %884 = vst [vmem:[%s7106_s6 + $0x20] sm:$0xff] %v5959_v19  ;;  %v1412_v30 = vld [vmem:[%s7107_s4 + $0xf98] sm:$0xff] }
  0xb1   :  { %v1307_v43 = vld [vmem:[%s7107_s4 + $0xc50] sm:$0xff] }
  0xb2   :  { %3878 = vmatpush3.bf16.msra.mxu0 %v3877_v53  ;;  %v1300_v53 = vld [vmem:[%s7107_s4 + $0xc18] sm:$0xff]  ;;  %v1363_v34 = vld [vmem:[%s7107_s4 + $0xe10] sm:$0xff] }
  0xb3   :  { %3910 = vmatpush3.bf16.msra.mxu1 %v3909_v54  ;;  %3880 = vmatprep.subr.bf16.mxu0 %v3879_v55  ;;  %v1331_v54 = vld [vmem:[%s7107_s4 + $0xd10] sm:$0xff]  ;;  %v3963_v55 = vpack.c.bf16 %v1348_v46, %v1347_v37  ;;  %v3933_v57 = vpack.c.bf16 %v1300_v53, %v1299_v52  ;;  %v1340_v46 = vld [vmem:[%s7107_s4 + $0xd58] sm:$0xff]  ;;  %v1358_v52 = vld [vmem:[%s7107_s4 + $0xde8] sm:$0xff]  ;;  %v3949_v53 = vpack.c.bf16 %v1308_v44, %v1307_v43 }
  0xb4   :  { %3912 = vmatprep.subr.bf16.mxu1 %v3911_v60  ;;  %v4342_v60 = vld [vmem:[%s7106_s6 + $0xa0] sm:$0xff]  ;;  %v1414_v44 = vld [vmem:[%s7107_s4 + $0xfa8] sm:$0xff] }
  0xb5   :  { %v1413_v43 = vld [vmem:[%s7107_s4 + $0xfa0] sm:$0xff] }
  0xb6   :  { %3882 = vmatpush3.bf16.msra.mxu0 %v3881_v0  ;;  %v1302_v0 = vld [vmem:[%s7107_s4 + $0xc28] sm:$0xff] }
  0xb7   :  { %3914 = vmatpush3.bf16.msra.mxu1 %v3913_v1  ;;  %3884 = vmatprep.subr.bf16.mxu0 %v3883_v2  ;;  %v3965_v1 = vpack.c.bf16 %v1332_v56, %v1331_v54  ;;  %v3935_v2 = vpack.c.bf16 %v1318_v59, %v1317_v58  ;;  %v3937_v13 = vpack.c.bf16 %v1302_v0, %v1301_v63  ;;  %v1309_v56 = vld [vmem:[%s7107_s4 + $0xc60] sm:$0xff]  ;;  %v1310_v58 = vld [vmem:[%s7107_s4 + $0xc68] sm:$0xff]  ;;  %v1360_v63 = vld [vmem:[%s7107_s4 + $0xdf8] sm:$0xff] }
  0xb8   :  { %3916 = vmatprep.subr.bf16.mxu1 %v3915_v6  ;;  %v3967_v6 = vpack.c.bf16 %v1350_v61, %v1349_v50  ;;  %v3981_v54 = vpack.c.bf16 %v1340_v46, %v1339_v45  ;;  %v1341_v59 = vld [vmem:[%s7107_s4 + $0xd60] sm:$0xff]  ;;  %v1342_v50 = vld [vmem:[%s7107_s4 + $0xd68] sm:$0xff]  ;;  %v1327_v61 = vld [vmem:[%s7107_s4 + $0xcf0] sm:$0xff]  ;;  %v3953_v0 = vpack.c.bf16 %v1310_v58, %v1309_v56 }
  0xb9   :  { %v4347_v45 = vld [vmem:[%s7106_s6 + $0xd0] sm:$0xff]  ;;  %v1384_v56 = vld [vmem:[%s7107_s4 + $0xeb8] sm:$0xff]  ;;  %v4348_v58 = vld [vmem:[%s7106_s6 + $0xe8] sm:$0xff] }
  0xba   :  { %3886 = vmatpush3.bf16.msra.mxu0 %v3885_v10  ;;  %v1352_v10 = vld [vmem:[%s7107_s4 + $0xdb8] sm:$0xff] }
  0xbb   :  { %3918 = vmatpush3.bf16.msra.mxu1 %v3917_v11  ;;  %3888 = vmatprep.subr.bf16.mxu0 %v3887_v12  ;;  %v4345_v11 = vld [vmem:[%s7106_s6 + $0xd8] sm:$0xff]  ;;  %v3971_v21 = vpack.c.bf16 %v1352_v10, %v1351_v9  ;;  %v1378_v9 = vld [vmem:[%s7107_s4 + $0xe88] sm:$0xff]  ;;  %v1409_v10 = vld [vmem:[%s7107_s4 + $0xf80] sm:$0xff] }
  0xbc   :  { %3920 = vmatprep.subr.bf16.mxu1 %v3919_v16  ;;  %v5806_v12 = vld [vmem:[%s7108_s1 + $0x18] sm:$0xff]  ;;  %v3939_v16 = vpack.c.bf16 %v1320_v7, %v1319_v17 }
  0xbd   :  { %883 = vst [vmem:[%s7106_s6 + $0x18] sm:$0xff] %v5806_v12  ;;  %v1344_v7 = vld [vmem:[%s7107_s4 + $0xd78] sm:$0xff] }
  0xbe   :  { %3890 = vmatpush3.bf16.msra.mxu0 %v3889_v23  ;;  %v1321_v23 = vld [vmem:[%s7107_s4 + $0xcc0] sm:$0xff] }
  0xbf   :  { %3922 = vmatpush3.bf16.msra.mxu1 %v3921_v24  ;;  %3892 = vmatprep.subr.bf16.mxu0 %v3891_v47  ;;  %v1322_v24 = vld [vmem:[%s7107_s4 + $0xcc8] sm:$0xff]  ;;  %v1353_v47 = vld [vmem:[%s7107_s4 + $0xdc0] sm:$0xff] }
  0xc0   :  { %3924 = vmatprep.subr.bf16.mxu1 %v3923_v29  ;;  %v3943_v29 = vpack.c.bf16 %v1322_v24, %v1321_v23  ;;  %v3975_v33 = vpack.c.bf16 %v1354_v25, %v1353_v47  ;;  %v1394_v23 = vld [vmem:[%s7107_s4 + $0xf08] sm:$0xff]  ;;  %v5974_v24 = vld [vmem:[%s7108_s1 + $0x38] sm:$0xff]  ;;  %v1379_v25 = vld [vmem:[%s7107_s4 + $0xe90] sm:$0xff] }
  0xc1   :  { %887 = vst [vmem:[%s7106_s6 + $0x38] sm:$0xff] %v5974_v24  ;;  %v4025_v32 = vpack.c.bf16 %v1394_v23, %v1393_v41  ;;  %v1388_v41 = vld [vmem:[%s7107_s4 + $0xed8] sm:$0xff]  ;;  %v1419_v23 = vld [vmem:[%s7107_s4 + $0xfd0] sm:$0xff] }
  0xc2   :  { %3894 = vmatpush3.bf16.msra.mxu0 %v3893_v35  ;;  %v1323_v35 = vld [vmem:[%s7107_s4 + $0xcd0] sm:$0xff] }
  0xc3   :  { %3926 = vmatpush3.bf16.msra.mxu1 %v3925_v36  ;;  %3928 = vmatprep.subr.bf16.mxu0 %v3927_v38  ;;  %v1324_v36 = vld [vmem:[%s7107_s4 + $0xcd8] sm:$0xff]  ;;  %v1355_v38 = vld [vmem:[%s7107_s4 + $0xdd0] sm:$0xff] }
  0xc4   :  { %3960 = vmatprep.subr.bf16.mxu1 %v3959_v27  ;;  %v3947_v27 = vpack.c.bf16 %v1324_v36, %v1323_v35  ;;  %v3979_v37 = vpack.c.bf16 %v1356_v39, %v1355_v38  ;;  %v1364_v35 = vld [vmem:[%s7107_s4 + $0xe18] sm:$0xff]  ;;  %v1395_v36 = vld [vmem:[%s7107_s4 + $0xf10] sm:$0xff] }
  0xc5   :  { %1630 = vmatmul.mubr.f32.vlgmr.msra.gmra.mrb[10].mxu0 %v4342_v60  ;;  %v1396_v39 = vld [vmem:[%s7107_s4 + $0xf18] sm:$0xff] }
  0xc6   :  { %3930 = vmatpush3.bf16.msra.mxu0 %v3929_v48  ;;  %1700 = vmatmul.mubr.f32.vlgmr.msra.gmra.mrb[10].mxu1 %v4343_v62  ;;  %v1325_v48 = vld [vmem:[%s7107_s4 + $0xce0] sm:$0xff]  ;;  %v1328_v62 = vld [vmem:[%s7107_s4 + $0xcf8] sm:$0xff]  ;;  %v4029_v46 = vpack.c.bf16 %v1396_v39, %v1395_v36  ;;  %v1390_v36 = vld [vmem:[%s7107_s4 + $0xee8] sm:$0xff] }
  0xc7   :  { %3962 = vmatpush3.bf16.msra.mxu1 %v3961_v49  ;;  %3932 = vmatprep.subr.bf16.mxu0 %v3931_v51  ;;  %v1326_v49 = vld [vmem:[%s7107_s4 + $0xce8] sm:$0xff]  ;;  %v1357_v51 = vld [vmem:[%s7107_s4 + $0xde0] sm:$0xff] }
  0xc8   :  { %3964 = vmatprep.subr.bf16.mxu1 %v3963_v55  ;;  %1769 = vmatprep.mubr.f32.mxu0 %v4344_v8  ;;  %v3951_v55 = vpack.c.bf16 %v1326_v49, %v1325_v48  ;;  %v3983_v60 = vpack.c.bf16 %v1358_v52, %v1357_v51  ;;  %v1377_v8 = vld [vmem:[%s7107_s4 + $0xe80] sm:$0xff]  ;;  %v1366_v51 = vld [vmem:[%s7107_s4 + $0xe28] sm:$0xff] }
  0xc9   :  { %1839 = vmatprep.mubr.f32.mxu1 %v4345_v11  ;;  %v1410_v11 = vld [vmem:[%s7107_s4 + $0xf88] sm:$0xff]  ;;  %v1365_v49 = vld [vmem:[%s7107_s4 + $0xe20] sm:$0xff] }
  0xca   :  { %3934 = vmatpush3.bf16.msra.mxu0 %v3933_v57  ;;  %v1359_v57 = vld [vmem:[%s7107_s4 + $0xdf0] sm:$0xff]  ;;  %v4023_v47 = vpack.c.bf16 %v1410_v11, %v1409_v10  ;;  %v1397_v52 = vld [vmem:[%s7107_s4 + $0xf20] sm:$0xff] }
  0xcb   :  { %3966 = vmatpush3.bf16.msra.mxu1 %v3965_v1  ;;  %3936 = vmatprep.subr.bf16.mxu0 %v3935_v2  ;;  %v3985_v1 = vpack.c.bf16 %v1342_v50, %v1341_v59  ;;  %v3955_v2 = vpack.c.bf16 %v1328_v62, %v1327_v61  ;;  %v3987_v17 = vpack.c.bf16 %v1360_v63, %v1359_v57  ;;  %v1415_v59 = vld [vmem:[%s7107_s4 + $0xfb0] sm:$0xff]  ;;  %v4349_v50 = vld [vmem:[%s7106_s6 + $0xf8] sm:$0xff]  ;;  %v1369_v11 = vld [vmem:[%s7107_s4 + $0xe40] sm:$0xff] }
  0xcc   :  { %3968 = vmatprep.subr.bf16.mxu1 %v3967_v6  ;;  %v1343_v6 = vld [vmem:[%s7107_s4 + $0xd70] sm:$0xff]  ;;  %v4001_v61 = vpack.c.bf16 %v1366_v51, %v1365_v49  ;;  %v1421_v39 = vld [vmem:[%s7107_s4 + $0xfe0] sm:$0xff] }
  0xcd   :  { %v3989_v20 = vpack.c.bf16 %v1344_v7, %v1343_v6  ;;  %v1367_v63 = vld [vmem:[%s7107_s4 + $0xe30] sm:$0xff]  ;;  %v1386_v6 = vld [vmem:[%s7107_s4 + $0xec8] sm:$0xff] }
  0xce   :  { %3938 = vmatpush3.bf16.msra.mxu0 %v3937_v13  ;;  %v5944_v13 = vld [vmem:[%s7108_s1 + $0x28] sm:$0xff]  ;;  %v6172_v49 = vld [vmem:[%s7108_s1 + $0x50] sm:$0xff] }
  0xcf   :  { %3970 = vmatpush3.bf16.msra.mxu1 %v3969_v15  ;;  %3940 = vmatprep.subr.bf16.mxu0 %v3939_v16  ;;  %v3957_v15 = vpack.c.bf16 %v1312_v4, %v1311_v3  ;;  %v1361_v16 = vld [vmem:[%s7107_s4 + $0xe00] sm:$0xff]  ;;  %885 = vst [vmem:[%s7106_s6 + $0x28] sm:$0xff] %v5944_v13  ;;  %v1400_v3 = vld [vmem:[%s7107_s4 + $0xf38] sm:$0xff]  ;;  %v1418_v7 = vld [vmem:[%s7107_s4 + $0xfc8] sm:$0xff] }
  0xd0   :  { %3972 = vmatprep.subr.bf16.mxu1 %v3971_v21  ;;  %v3991_v21 = vpack.c.bf16 %v1378_v9, %v1377_v8  ;;  %v3993_v31 = vpack.c.bf16 %v1362_v18, %v1361_v16  ;;  %v1385_v4 = vld [vmem:[%s7107_s4 + $0xec0] sm:$0xff]  ;;  %890 = vst [vmem:[%s7106_s6 + $0x50] sm:$0xff] %v6172_v49 }
  0xd1   :  { %v4007_v10 = vpack.c.bf16 %v1386_v6, %v1385_v4  ;;  %v1401_v16 = vld [vmem:[%s7107_s4 + $0xf40] sm:$0xff]  ;;  %v1407_v4 = vld [vmem:[%s7107_s4 + $0xf70] sm:$0xff] }
  0xd2   :  { %3942 = vmatpush3.bf16.msra.mxu0 %v3941_v26  ;;  %v1380_v26 = vld [vmem:[%s7107_s4 + $0xe98] sm:$0xff] }
  0xd3   :  { %3974 = vmatpush3.bf16.msra.mxu1 %v3973_v28  ;;  %3944 = vmatprep.subr.bf16.mxu0 %v3943_v29  ;;  %v5989_v28 = vld [vmem:[%s7108_s1 + $0x30] sm:$0xff] }
  0xd4   :  { %3976 = vmatprep.subr.bf16.mxu1 %v3975_v33  ;;  %v1411_v29 = vld [vmem:[%s7107_s4 + $0xf90] sm:$0xff]  ;;  %886 = vst [vmem:[%s7106_s6 + $0x30] sm:$0xff] %v5989_v28  ;;  %v3995_v33 = vpack.c.bf16 %v1380_v26, %v1379_v25 }
  0xd5   :  { %v4027_v38 = vpack.c.bf16 %v1412_v30, %v1411_v29  ;;  %v1371_v26 = vld [vmem:[%s7107_s4 + $0xe50] sm:$0xff] }
  0xd6   :  { %3946 = vmatpush3.bf16.msra.mxu0 %v3945_v40  ;;  %v1381_v40 = vld [vmem:[%s7107_s4 + $0xea0] sm:$0xff] }
  0xd7   :  { %3978 = vmatpush3.bf16.msra.mxu1 %v3977_v42  ;;  %3948 = vmatprep.subr.bf16.mxu0 %v3947_v27  ;;  %v1382_v42 = vld [vmem:[%s7107_s4 + $0xea8] sm:$0xff]  ;;  %v4346_v27 = vld [vmem:[%s7106_s6 + $0xc0] sm:$0xff] }
  0xd8   :  { %3980 = vmatprep.subr.bf16.mxu1 %v3979_v37  ;;  %v3997_v37 = vpack.c.bf16 %v1364_v35, %v1363_v34  ;;  %v3999_v48 = vpack.c.bf16 %v1382_v42, %v1381_v40  ;;  %v1389_v35 = vld [vmem:[%s7107_s4 + $0xee0] sm:$0xff]  ;;  %v1422_v40 = vld [vmem:[%s7107_s4 + $0xfe8] sm:$0xff] }
  0xd9   :  { %v6145_v42 = vld [vmem:[%s7108_s1 + $0x40] sm:$0xff] }
  0xda   :  { %3950 = vmatpush3.bf16.msra.mxu0 %v3949_v53  ;;  %v4031_v53 = vpack.c.bf16 %v1414_v44, %v1413_v43  ;;  %v1373_v43 = vld [vmem:[%s7107_s4 + $0xe60] sm:$0xff]  ;;  %888 = vst [vmem:[%s7106_s6 + $0x40] sm:$0xff] %v6145_v42  ;;  %v6157_v44 = vld [vmem:[%s7108_s1 + $0x58] sm:$0xff] }
  0xdb   :  { %3982 = vmatpush3.bf16.msra.mxu1 %v3981_v54  ;;  %3952 = vmatprep.subr.bf16.mxu0 %v3951_v55  ;;  %v1398_v54 = vld [vmem:[%s7107_s4 + $0xf28] sm:$0xff]  ;;  %v1383_v55 = vld [vmem:[%s7107_s4 + $0xeb0] sm:$0xff]  ;;  %891 = vst [vmem:[%s7106_s6 + $0x58] sm:$0xff] %v6157_v44 }
  0xdc   :  { %3984 = vmatprep.subr.bf16.mxu1 %v3983_v60  ;;  %v1416_v60 = vld [vmem:[%s7107_s4 + $0xfb8] sm:$0xff]  ;;  %v4033_v62 = vpack.c.bf16 %v1398_v54, %v1397_v52  ;;  %v4003_v57 = vpack.c.bf16 %v1384_v56, %v1383_v55  ;;  %v4047_v52 = vpack.c.bf16 %v1422_v40, %v1421_v39  ;;  %v1391_v54 = vld [vmem:[%s7107_s4 + $0xef0] sm:$0xff]  ;;  %v2649_v56 = vld [vmem:[%s7109_s3] ss:$0 sm:$0xff] }
  0xdd   :  { %v1392_v55 = vld [vmem:[%s7107_s4 + $0xef8] sm:$0xff]  ;;  %v947_v39 = vld [vmem:[%s7107_s4 + $0x110] sm:$0xff] }
  0xde   :  { %3954 = vmatpush3.bf16.msra.mxu0 %v3953_v0  ;;  %v1368_v0 = vld [vmem:[%s7107_s4 + $0xe38] sm:$0xff] }
  0xdf   :  { %3986 = vmatpush3.bf16.msra.mxu1 %v3985_v1  ;;  %3956 = vmatprep.subr.bf16.mxu0 %v3955_v2  ;;  %v1399_v1 = vld [vmem:[%s7107_s4 + $0xf30] sm:$0xff]  ;;  %v4035_v2 = vpack.c.bf16 %v1416_v60, %v1415_v59  ;;  %v4005_v8 = vpack.c.bf16 %v1368_v0, %v1367_v63 }
  0xe0   :  { %3988 = vmatprep.subr.bf16.mxu1 %v3987_v17  ;;  %v1417_v17 = vld [vmem:[%s7107_s4 + $0xfc0] sm:$0xff]  ;;  %v4037_v9 = vpack.c.bf16 %v1400_v3, %v1399_v1  ;;  %v1423_v60 = vld [vmem:[%s7107_s4 + $0xff0] sm:$0xff]  ;;  %v4019_v1 = vpack.c.bf16 %v1392_v55, %v1391_v54  ;;  %v1376_v3 = vld [vmem:[%s7107_s4 + $0xe78] sm:$0xff] }
  0xe1   :  { %v4039_v18 = vpack.c.bf16 %v1418_v7, %v1417_v17  ;;  %v1408_v7 = vld [vmem:[%s7107_s4 + $0xf78] sm:$0xff]  ;;  %v917_v55 = vld [vmem:[%s7107_s4 + $0x20] sm:$0xff] }
  0xe2   :  { %3958 = vmatpush3.bf16.msra.mxu0 %v3957_v15  ;;  %v1370_v15 = vld [vmem:[%s7107_s4 + $0xe48] sm:$0xff] }
  0xe3   :  { %3990 = vmatpush3.bf16.msra.mxu1 %v3989_v20  ;;  %3992 = vmatprep.subr.bf16.mxu0 %v3991_v21  ;;  %v1402_v20 = vld [vmem:[%s7107_s4 + $0xf48] sm:$0xff]  ;;  %v1387_v21 = vld [vmem:[%s7107_s4 + $0xed0] sm:$0xff]  ;;  %v4009_v25 = vpack.c.bf16 %v1370_v15, %v1369_v11 }
  0xe4   :  { %4024 = vmatprep.subr.bf16.mxu1 %v4023_v47  ;;  %v1420_v47 = vld [vmem:[%s7107_s4 + $0xfd8] sm:$0xff]  ;;  %v4041_v29 = vpack.c.bf16 %v1402_v20, %v1401_v16  ;;  %v4011_v30 = vpack.c.bf16 %v1388_v41, %v1387_v21  ;;  %v962_v11 = vld [vmem:[%s7107_s4 + $0x188] sm:$0xff]  ;;  %v913_v21 = vld [vmem:[%s7107_s4] sm:$0xff] }
  0xe5   :  { %1770 = vmatmul.mubr.f32.vlgmr.msra.gmra.mrb[12].mxu0 %v4346_v27  ;;  %v4043_v34 = vpack.c.bf16 %v1420_v47, %v1419_v23  ;;  %v914_v41 = vld [vmem:[%s7107_s4 + $0x8] sm:$0xff]  ;;  %v945_v23 = vld [vmem:[%s7107_s4 + $0x100] sm:$0xff] }
  0xe6   :  { %3994 = vmatpush3.bf16.msra.mxu0 %v3993_v31  ;;  %1840 = vmatmul.mubr.f32.vlgmr.msra.gmra.mrb[12].mxu1 %v4347_v45  ;;  %v1372_v31 = vld [vmem:[%s7107_s4 + $0xe58] sm:$0xff] }
  0xe7   :  { %4026 = vmatpush3.bf16.msra.mxu1 %v4025_v32  ;;  %3996 = vmatprep.subr.bf16.mxu0 %v3995_v33  ;;  %v1403_v32 = vld [vmem:[%s7107_s4 + $0xf50] sm:$0xff]  ;;  %v1404_v33 = vld [vmem:[%s7107_s4 + $0xf58] sm:$0xff]  ;;  %v4013_v27 = vpack.c.bf16 %v1372_v31, %v1371_v26 }
  0xe8   :  { %4028 = vmatprep.subr.bf16.mxu1 %v4027_v38  ;;  %1909 = vmatprep.mubr.f32.mxu0 %v4348_v58  ;;  %v6130_v38 = vld [vmem:[%s7108_s1 + $0x48] sm:$0xff]  ;;  %v4045_v45 = vpack.c.bf16 %v1404_v33, %v1403_v32  ;;  %v931_v26 = vld [vmem:[%s7107_s4 + $0x90] sm:$0xff]  ;;  %v964_v31 = vld [vmem:[%s7107_s4 + $0x198] sm:$0xff]  ;;  %v4057_v32 = vpack.c.bf16 %v914_v41, %v913_v21 }
  0xe9   :  { %1979 = vmatprep.mubr.f32.mxu1 %v4349_v50  ;;  %889 = vst [vmem:[%s7106_s6 + $0x48] sm:$0xff] %v6130_v38  ;;  %v1424_v50 = vld [vmem:[%s7107_s4 + $0xff8] sm:$0xff]  ;;  %v921_v41 = vld [vmem:[%s7107_s4 + $0x40] sm:$0xff] }
  0xea   :  { %3998 = vmatpush3.bf16.msra.mxu0 %v3997_v37  ;;  %v4015_v37 = vpack.c.bf16 %v1390_v36, %v1389_v35  ;;  %v4051_v17 = vpack.c.bf16 %v1424_v50, %v1423_v60  ;;  %v915_v35 = vld [vmem:[%s7107_s4 + $0x10] sm:$0xff]  ;;  %v916_v36 = vld [vmem:[%s7107_s4 + $0x18] sm:$0xff]  ;;  %v950_v60 = vld [vmem:[%s7107_s4 + $0x128] sm:$0xff] }
  0xeb   :  { %4030 = vmatpush3.bf16.msra.mxu1 %v4029_v46  ;;  %4000 = vmatprep.subr.bf16.mxu0 %v3999_v48  ;;  %v1374_v46 = vld [vmem:[%s7107_s4 + $0xe68] sm:$0xff]  ;;  %v1405_v48 = vld [vmem:[%s7107_s4 + $0xf60] sm:$0xff]  ;;  %v935_v50 = vld [vmem:[%s7107_s4 + $0xb0] sm:$0xff] }
  0xec   :  { %4032 = vmatprep.subr.bf16.mxu1 %v4031_v53  ;;  %v1406_v53 = vld [vmem:[%s7107_s4 + $0xf68] sm:$0xff] }
  0xed   :  { %v4049_v0 = vpack.c.bf16 %v1406_v53, %v1405_v48  ;;  %v966_v48 = vld [vmem:[%s7107_s4 + $0x1a8] sm:$0xff] }
  0xee   :  { %4002 = vmatpush3.bf16.msra.mxu0 %v4001_v61 }
  0xef   :  { %4034 = vmatpush3.bf16.msra.mxu1 %v4033_v62  ;;  %4004 = vmatprep.subr.bf16.mxu0 %v4003_v57  ;;  %v4017_v57 = vpack.c.bf16 %v1374_v46, %v1373_v43  ;;  %v933_v43 = vld [vmem:[%s7107_s4 + $0xa0] sm:$0xff] }
  0xf0   :  { %4036 = vmatprep.subr.bf16.mxu1 %v4035_v2  ;;  %v1375_v2 = vld [vmem:[%s7107_s4 + $0xe70] sm:$0xff]  ;;  %v965_v46 = vld [vmem:[%s7107_s4 + $0x1a0] sm:$0xff] }
  0xf1   :  { %v4021_v16 = vpack.c.bf16 %v1376_v3, %v1375_v2 }
  0xf2   :  { %4006 = vmatpush3.bf16.msra.mxu0 %v4005_v8  ;;  %v929_v8 = vld [vmem:[%s7107_s4 + $0x80] sm:$0xff] }
  0xf3   :  { %4038 = vmatpush3.bf16.msra.mxu1 %v4037_v9  ;;  %4008 = vmatprep.subr.bf16.mxu0 %v4007_v10  ;;  %v930_v9 = vld [vmem:[%s7107_s4 + $0x88] sm:$0xff]  ;;  %v961_v10 = vld [vmem:[%s7107_s4 + $0x180] sm:$0xff] }
  0xf4   :  { %4040 = vmatprep.subr.bf16.mxu1 %v4039_v18  ;;  %v4053_v18 = vpack.c.bf16 %v1408_v7, %v1407_v4  ;;  %v4055_v20 = vpack.c.bf16 %v930_v9, %v929_v8  ;;  %v4087_v47 = vpack.c.bf16 %v962_v11, %v961_v10  ;;  %v937_v4 = vld [vmem:[%s7107_s4 + $0xc0] sm:$0xff]  ;;  %v938_v7 = vld [vmem:[%s7107_s4 + $0xc8] sm:$0xff]  ;;  %v6337_v9 = vld [vmem:[%s7108_s1 + $0x78] sm:$0xff] }
  0xf5   :  { %v6332_v8 = vld [vmem:[%s7108_s1 + $0x60] sm:$0xff]  ;;  %v970_v11 = vld [vmem:[%s7107_s4 + $0x1c8] sm:$0xff]  ;;  %895 = vst [vmem:[%s7106_s6 + $0x78] sm:$0xff] %v6337_v9  ;;  %v4071_v21 = vpack.c.bf16 %v938_v7, %v937_v4  ;;  %v928_v7 = vld [vmem:[%s7107_s4 + $0x78] sm:$0xff] }
  0xf6   :  { %4010 = vmatpush3.bf16.msra.mxu0 %v4009_v25  ;;  %v946_v25 = vld [vmem:[%s7107_s4 + $0x108] sm:$0xff]  ;;  %v969_v10 = vld [vmem:[%s7107_s4 + $0x1c0] sm:$0xff]  ;;  %892 = vst [vmem:[%s7106_s6 + $0x60] sm:$0xff] %v6332_v8 }
  0xf7   :  { %4042 = vmatpush3.bf16.msra.mxu1 %v4041_v29  ;;  %4012 = vmatprep.subr.bf16.mxu0 %v4011_v30  ;;  %v932_v29 = vld [vmem:[%s7107_s4 + $0x98] sm:$0xff]  ;;  %v963_v30 = vld [vmem:[%s7107_s4 + $0x190] sm:$0xff]  ;;  %v4089_v33 = vpack.c.bf16 %v946_v25, %v945_v23  ;;  %v922_v23 = vld [vmem:[%s7107_s4 + $0x48] sm:$0xff]  ;;  %v4103_v25 = vpack.c.bf16 %v970_v11, %v969_v10 }
  0xf8   :  { %v2683_v51 = vpop.f32.mrb[0].mxu0  ;;  %4044 = vmatprep.subr.bf16.mxu1 %v4043_v34  ;;  %v4059_v34 = vpack.c.bf16 %v932_v29, %v931_v26  ;;  %v4091_v40 = vpack.c.bf16 %v964_v31, %v963_v30  ;;  %v954_v26 = vld [vmem:[%s7107_s4 + $0x148] sm:$0xff]  ;;  %v939_v29 = vld [vmem:[%s7107_s4 + $0xd0] sm:$0xff]  ;;  %v940_v30 = vld [vmem:[%s7107_s4 + $0xd8] sm:$0xff] }
  0xf9   :  { %v2684_v58 = vpop.f32.mrb[1].mxu0  ;;  %v2718_v59 = vpop.f32.mrb[0].mxu1  ;;  %v971_v31 = vld [vmem:[%s7107_s4 + $0x1d0] sm:$0xff] }
  0xfa   :  { %v2685_v61 = vadd.f32 %v2684_v58, %v2683_v51  ;;  %4014 = vmatpush3.bf16.msra.mxu0 %v4013_v27  ;;  %v2719_v62 = vpop.f32.mrb[1].mxu1  ;;  %v948_v27 = vld [vmem:[%s7107_s4 + $0x118] sm:$0xff]  ;;  %v4351_v51 = vld [vmem:[%s7106_s6 + $0xf0] sm:$0xff]  ;;  %v949_v58 = vld [vmem:[%s7107_s4 + $0x120] sm:$0xff] }
  0xfb   :  { %v2720_v63 = vadd.f32 %v2719_v62, %v2718_v59  ;;  %4046 = vmatpush3.bf16.msra.mxu1 %v4045_v45  ;;  %4016 = vmatprep.subr.bf16.mxu0 %v4015_v37  ;;  %v934_v45 = vld [vmem:[%s7107_s4 + $0xa8] sm:$0xff]  ;;  %v4350_v37 = vld [vmem:[%s7106_s6 + $0xe0] sm:$0xff]  ;;  %v4093_v53 = vpack.c.bf16 %v948_v27, %v947_v39  ;;  %v4095_v59 = vpack.c.bf16 %v966_v48, %v965_v46  ;;  %v967_v62 = vld [vmem:[%s7107_s4 + $0x1b0] sm:$0xff] }
  0xfc   :  { %v387_v6 = vadd.f32 %v2685_v61, %v2649_v56  ;;  %4048 = vmatprep.subr.bf16.mxu1 %v4047_v52  ;;  %v4061_v52 = vpack.c.bf16 %v916_v36, %v915_v35  ;;  %v4063_v54 = vpack.c.bf16 %v934_v45, %v933_v43  ;;  %v918_v56 = vld [vmem:[%s7107_s4 + $0x28] sm:$0xff]  ;;  %v936_v61 = vld [vmem:[%s7107_s4 + $0xb8] sm:$0xff]  ;;  %v4097_v2 = vpack.c.bf16 %v950_v60, %v949_v58  ;;  %v923_v36 = vld [vmem:[%s7107_s4 + $0x50] sm:$0xff] }
  0xfd   :  { %v4067_v3 = vpack.c.bf16 %v936_v61, %v935_v50  ;;  %v4075_v35 = vpack.c.bf16 %v940_v30, %v939_v29  ;;  %v924_v39 = vld [vmem:[%s7107_s4 + $0x58] sm:$0xff]  ;;  %v941_v45 = vld [vmem:[%s7107_s4 + $0xe0] sm:$0xff]  ;;  %v974_v48 = vld [vmem:[%s7107_s4 + $0x1e8] sm:$0xff] }
  0xfe   :  { %v6220_v15 = vadd.f32 %v2720_v63, %v387_v6  ;;  %4018 = vmatpush3.bf16.msra.mxu0 %v4017_v57  ;;  %v968_v57 = vld [vmem:[%s7107_s4 + $0x1b8] sm:$0xff]  ;;  %v4065_v63 = vpack.c.bf16 %v918_v56, %v917_v55  ;;  %v6320_v6 = vld [vmem:[%s7108_s1 + $0x68] sm:$0xff]  ;;  %v973_v46 = vld [vmem:[%s7107_s4 + $0x1e0] sm:$0xff] }
  0xff   :  { %4050 = vmatpush3.bf16.msra.mxu1 %v4049_v0  ;;  %4020 = vmatprep.subr.bf16.mxu0 %v4019_v1  ;;  %v919_v0 = vld [vmem:[%s7107_s4 + $0x30] sm:$0xff]  ;;  %893 = vst [vmem:[%s7106_s6 + $0x68] sm:$0xff] %v6320_v6  ;;  %v956_v43 = vld [vmem:[%s7107_s4 + $0x158] sm:$0xff]  ;;  %v926_v55 = vld [vmem:[%s7107_s4 + $0x68] sm:$0xff] }
 0x100   :  { %4052 = vmatprep.subr.bf16.mxu1 %v4051_v17  ;;  %v951_v1 = vld [vmem:[%s7107_s4 + $0x130] sm:$0xff]  ;;  %v4099_v17 = vpack.c.bf16 %v968_v57, %v967_v62  ;;  %v957_v56 = vld [vmem:[%s7107_s4 + $0x160] sm:$0xff]  ;;  %v958_v60 = vld [vmem:[%s7107_s4 + $0x168] sm:$0xff] }
 0x101   :  { %v943_v50 = vld [vmem:[%s7107_s4 + $0xf0] sm:$0xff]  ;;  %v944_v61 = vld [vmem:[%s7107_s4 + $0xf8] sm:$0xff]  ;;  %v977_v30 = vld [vmem:[%s7107_s4 + $0x200] sm:$0xff] }
 0x102   :  { %4022 = vmatpush3.bf16.msra.mxu0 %v4021_v16  ;;  %v6356_v16 = vld [vmem:[%s7108_s1 + $0x70] sm:$0xff]  ;;  %v4083_v4 = vpack.c.bf16 %v944_v61, %v943_v50  ;;  %v982_v50 = vld [vmem:[%s7107_s4 + $0x228] sm:$0xff]  ;;  %v1013_v61 = vld [vmem:[%s7107_s4 + $0x320] sm:$0xff] }
 0x103   :  { %4054 = vmatpush3.bf16.msra.mxu1 %v4053_v18  ;;  %4056 = vmatprep.subr.bf16.mxu0 %v4055_v20  ;;  %894 = vst [vmem:[%s7106_s6 + $0x70] sm:$0xff] %v6356_v16  ;;  %v959_v10 = vld [vmem:[%s7107_s4 + $0x170] sm:$0xff] }
 0x104   :  { %4088 = vmatprep.subr.bf16.mxu1 %v4087_v47  ;;  %v953_v47 = vld [vmem:[%s7107_s4 + $0x140] sm:$0xff] }
 0x105   :  { %1910 = vmatmul.mubr.f32.vlgmr.msra.gmra.mrb[14].mxu0 %v4350_v37  ;;  %v942_v37 = vld [vmem:[%s7107_s4 + $0xe8] sm:$0xff] }
 0x106   :  { %4058 = vmatpush3.bf16.msra.mxu0 %v4057_v32  ;;  %1980 = vmatmul.mubr.f32.vlgmr.msra.gmra.mrb[14].mxu1 %v4351_v51  ;;  %v972_v32 = vld [vmem:[%s7107_s4 + $0x1d8] sm:$0xff]  ;;  %v4077_v51 = vpack.c.bf16 %v924_v39, %v923_v36  ;;  %v1027_v39 = vld [vmem:[%s7107_s4 + $0x390] sm:$0xff] }
 0x107   :  { %4090 = vmatpush3.bf16.msra.mxu1 %v4089_v33  ;;  %4060 = vmatprep.subr.bf16.mxu0 %v4059_v34  ;;  %v4073_v33 = vpack.c.bf16 %v922_v23, %v921_v41  ;;  %v4105_v34 = vpack.c.bf16 %v954_v26, %v953_v47  ;;  %v4107_v27 = vpack.c.bf16 %v972_v32, %v971_v31  ;;  %v994_v41 = vld [vmem:[%s7107_s4 + $0x288] sm:$0xff]  ;;  %v1025_v23 = vld [vmem:[%s7107_s4 + $0x380] sm:$0xff]  ;;  %v996_v36 = vld [vmem:[%s7107_s4 + $0x298] sm:$0xff] }
 0x108   :  { %4092 = vmatprep.subr.bf16.mxu1 %v4091_v40  ;;  %2049 = vmatprep.mubr.f32.mxu0 %v5770_v5  ;;  %v920_v5 = vld [vmem:[%s7107_s4 + $0x38] sm:$0xff]  ;;  %v955_v40 = vld [vmem:[%s7107_s4 + $0x150] sm:$0xff]  ;;  %v978_v31 = vld [vmem:[%s7107_s4 + $0x208] sm:$0xff] }
 0x109   :  { %2119 = vmatprep.mubr.f32.mxu1 %v5806_v12  ;;  %v952_v12 = vld [vmem:[%s7107_s4 + $0x138] sm:$0xff]  ;;  %v4069_v18 = vpack.c.bf16 %v920_v5, %v919_v0  ;;  %v1009_v32 = vld [vmem:[%s7107_s4 + $0x300] sm:$0xff] }
 0x10a   :  { %4062 = vmatpush3.bf16.msra.mxu0 %v4061_v52  ;;  %v4101_v20 = vpack.c.bf16 %v952_v12, %v951_v1  ;;  %v4109_v52 = vpack.c.bf16 %v956_v43, %v955_v40  ;;  %v976_v0 = vld [vmem:[%s7107_s4 + $0x1f8] sm:$0xff]  ;;  %v4113_v12 = vpack.c.bf16 %v958_v60, %v957_v56  ;;  %v1030_v56 = vld [vmem:[%s7107_s4 + $0x3a8] sm:$0xff] }
 0x10b   :  { %4094 = vmatpush3.bf16.msra.mxu1 %v4093_v53  ;;  %4064 = vmatprep.subr.bf16.mxu0 %v4063_v54  ;;  %v4079_v53 = vpack.c.bf16 %v942_v37, %v941_v45  ;;  %v925_v54 = vld [vmem:[%s7107_s4 + $0x60] sm:$0xff]  ;;  %v1028_v40 = vld [vmem:[%s7107_s4 + $0x398] sm:$0xff]  ;;  %v979_v37 = vld [vmem:[%s7107_s4 + $0x210] sm:$0xff] }
 0x10c   :  { %4096 = vmatprep.subr.bf16.mxu1 %v4095_v59  ;;  %v4111_v59 = vpack.c.bf16 %v974_v48, %v973_v46  ;;  %v980_v46 = vld [vmem:[%s7107_s4 + $0x218] sm:$0xff]  ;;  %v1011_v48 = vld [vmem:[%s7107_s4 + $0x310] sm:$0xff] }
 0x10e   :  { %4066 = vmatpush3.bf16.msra.mxu0 %v4065_v63  ;;  %v975_v63 = vld [vmem:[%s7107_s4 + $0x1f0] sm:$0xff] }
 0x10f   :  { %4098 = vmatpush3.bf16.msra.mxu1 %v4097_v2  ;;  %4068 = vmatprep.subr.bf16.mxu0 %v4067_v3  ;;  %v4081_v2 = vpack.c.bf16 %v926_v55, %v925_v54  ;;  %v998_v54 = vld [vmem:[%s7107_s4 + $0x2a8] sm:$0xff]  ;;  %v1029_v55 = vld [vmem:[%s7107_s4 + $0x3a0] sm:$0xff] }
 0x110   :  { %4100 = vmatprep.subr.bf16.mxu1 %v4099_v17  ;;  %v927_v17 = vld [vmem:[%s7107_s4 + $0x70] sm:$0xff] }
 0x112   :  { %4070 = vmatpush3.bf16.msra.mxu0 %v4069_v18  ;;  %v4115_v18 = vpack.c.bf16 %v976_v0, %v975_v63  ;;  %v1000_v63 = vld [vmem:[%s7107_s4 + $0x2b8] sm:$0xff]  ;;  %v1031_v0 = vld [vmem:[%s7107_s4 + $0x3b0] sm:$0xff] }
 0x113   :  { %4102 = vmatpush3.bf16.msra.mxu1 %v4101_v20  ;;  %4072 = vmatprep.subr.bf16.mxu0 %v4071_v21  ;;  %v960_v20 = vld [vmem:[%s7107_s4 + $0x178] sm:$0xff]  ;;  %v993_v21 = vld [vmem:[%s7107_s4 + $0x280] sm:$0xff] }
 0x114   :  { %4104 = vmatprep.subr.bf16.mxu1 %v4103_v25  ;;  %v4085_v25 = vpack.c.bf16 %v928_v7, %v927_v17  ;;  %v4117_v26 = vpack.c.bf16 %v960_v20, %v959_v10  ;;  %v4119_v29 = vpack.c.bf16 %v994_v41, %v993_v21  ;;  %v1016_v17 = vld [vmem:[%s7107_s4 + $0x338] sm:$0xff]  ;;  %v1001_v7 = vld [vmem:[%s7107_s4 + $0x2c0] sm:$0xff]  ;;  %v1002_v10 = vld [vmem:[%s7107_s4 + $0x2c8] sm:$0xff] }
 0x115   :  { %v4135_v41 = vpack.c.bf16 %v1002_v10, %v1001_v7  ;;  %v1024_v10 = vld [vmem:[%s7107_s4 + $0x378] sm:$0xff] }
 0x116   :  { %4074 = vmatpush3.bf16.msra.mxu0 %v4073_v33 }
 0x117   :  { %4106 = vmatpush3.bf16.msra.mxu1 %v4105_v34  ;;  %4076 = vmatprep.subr.bf16.mxu0 %v4075_v35  ;;  %v1010_v34 = vld [vmem:[%s7107_s4 + $0x308] sm:$0xff]  ;;  %v995_v35 = vld [vmem:[%s7107_s4 + $0x290] sm:$0xff] }
 0x118   :  { %v2753_v58 = vpop.f32.mrb[2].mxu0  ;;  %4108 = vmatprep.subr.bf16.mxu1 %v4107_v27  ;;  %v4121_v27 = vpack.c.bf16 %v978_v31, %v977_v30  ;;  %v4153_v43 = vpack.c.bf16 %v1010_v34, %v1009_v32  ;;  %v4123_v45 = vpack.c.bf16 %v996_v36, %v995_v35  ;;  %v1003_v30 = vld [vmem:[%s7107_s4 + $0x2d0] sm:$0xff]  ;;  %v1004_v31 = vld [vmem:[%s7107_s4 + $0x2d8] sm:$0xff] }
 0x119   :  { %v2754_v62 = vpop.f32.mrb[3].mxu0  ;;  %v2788_v57 = vpop.f32.mrb[2].mxu1  ;;  %v1035_v32 = vld [vmem:[%s7107_s4 + $0x3d0] sm:$0xff]  ;;  %v4139_v36 = vpack.c.bf16 %v1004_v31, %v1003_v30  ;;  %v1074_v31 = vld [vmem:[%s7107_s4 + $0x508] sm:$0xff] }
 0x11a   :  { %v2755_v5 = vadd.f32 %v2754_v62, %v2753_v58  ;;  %4078 = vmatpush3.bf16.msra.mxu0 %v4077_v51  ;;  %v2789_v1 = vpop.f32.mrb[3].mxu1  ;;  %v4155_v51 = vpack.c.bf16 %v1028_v40, %v1027_v39  ;;  %v4125_v58 = vpack.c.bf16 %v980_v46, %v979_v37  ;;  %v4159_v62 = vpack.c.bf16 %v1030_v56, %v1029_v55  ;;  %v987_v39 = vld [vmem:[%s7107_s4 + $0x250] sm:$0xff]  ;;  %v988_v40 = vld [vmem:[%s7107_s4 + $0x258] sm:$0xff]  ;;  %v1005_v37 = vld [vmem:[%s7107_s4 + $0x2e0] sm:$0xff] }
 0x11b   :  { %v2790_v3 = vadd.f32 %v2789_v1, %v2788_v57  ;;  %4110 = vmatpush3.bf16.msra.mxu1 %v4109_v52  ;;  %4080 = vmatprep.subr.bf16.mxu0 %v4079_v53  ;;  %v1012_v52 = vld [vmem:[%s7107_s4 + $0x318] sm:$0xff]  ;;  %v997_v53 = vld [vmem:[%s7107_s4 + $0x2a0] sm:$0xff]  ;;  %v999_v57 = vld [vmem:[%s7107_s4 + $0x2b0] sm:$0xff] }
 0x11c   :  { %v527_v11 = vadd.f32 %v2755_v5, %v6220_v15  ;;  %4112 = vmatprep.subr.bf16.mxu1 %v4111_v59  ;;  %v1026_v15 = vld [vmem:[%s7107_s4 + $0x388] sm:$0xff]  ;;  %v4157_v59 = vpack.c.bf16 %v1012_v52, %v1011_v48  ;;  %v4127_v60 = vpack.c.bf16 %v998_v54, %v997_v53  ;;  %v1032_v5 = vld [vmem:[%s7107_s4 + $0x3b8] sm:$0xff]  ;;  %v1037_v48 = vld [vmem:[%s7107_s4 + $0x3e0] sm:$0xff]  ;;  %v4141_v52 = vpack.c.bf16 %v988_v40, %v987_v39 }
 0x11d   :  { %v4151_v33 = vpack.c.bf16 %v1026_v15, %v1025_v23  ;;  %v985_v23 = vld [vmem:[%s7107_s4 + $0x240] sm:$0xff]  ;;  %v986_v15 = vld [vmem:[%s7107_s4 + $0x248] sm:$0xff] }
 0x11e   :  { %v6459_v47 = vadd.f32 %v2790_v3, %v527_v11  ;;  %4082 = vmatpush3.bf16.msra.mxu0 %v4081_v2  ;;  %v4131_v3 = vpack.c.bf16 %v1000_v63, %v999_v57  ;;  %v1033_v11 = vld [vmem:[%s7107_s4 + $0x3c0] sm:$0xff]  ;;  %v4137_v34 = vpack.c.bf16 %v986_v15, %v985_v23  ;;  %v1006_v46 = vld [vmem:[%s7107_s4 + $0x2e8] sm:$0xff]  ;;  %v1039_v57 = vld [vmem:[%s7107_s4 + $0x3f0] sm:$0xff] }
 0x11f   :  { %4114 = vmatpush3.bf16.msra.mxu1 %v4113_v12  ;;  %4084 = vmatprep.subr.bf16.mxu0 %v4083_v4  ;;  %v984_v12 = vld [vmem:[%s7107_s4 + $0x238] sm:$0xff]  ;;  %v1015_v4 = vld [vmem:[%s7107_s4 + $0x330] sm:$0xff]  ;;  %v4143_v54 = vpack.c.bf16 %v1006_v46, %v1005_v37  ;;  %v989_v55 = vld [vmem:[%s7107_s4 + $0x260] sm:$0xff] }
 0x120   :  { %4116 = vmatprep.subr.bf16.mxu1 %v4115_v18  ;;  %v1034_v18 = vld [vmem:[%s7107_s4 + $0x3c8] sm:$0xff]  ;;  %v4165_v21 = vpack.c.bf16 %v1016_v17, %v1015_v4  ;;  %v1040_v63 = vld [vmem:[%s7107_s4 + $0x3f8] sm:$0xff] }
 0x121   :  { %v990_v56 = vld [vmem:[%s7107_s4 + $0x268] sm:$0xff]  ;;  %v992_v4 = vld [vmem:[%s7107_s4 + $0x278] sm:$0xff]  ;;  %v4179_v7 = vpack.c.bf16 %v1040_v63, %v1039_v57 }
 0x122   :  { %4086 = vmatpush3.bf16.msra.mxu0 %v4085_v25  ;;  %v1017_v25 = vld [vmem:[%s7107_s4 + $0x340] sm:$0xff]  ;;  %v1076_v46 = vld [vmem:[%s7107_s4 + $0x518] sm:$0xff] }
 0x123   :  { %4118 = vmatpush3.bf16.msra.mxu1 %v4117_v26  ;;  %4120 = vmatprep.subr.bf16.mxu0 %v4119_v29  ;;  %v4167_v26 = vpack.c.bf16 %v1034_v18, %v1033_v11  ;;  %v1018_v29 = vld [vmem:[%s7107_s4 + $0x348] sm:$0xff]  ;;  %v1057_v11 = vld [vmem:[%s7107_s4 + $0x480] sm:$0xff] }
 0x124   :  { %4152 = vmatprep.subr.bf16.mxu1 %v4151_v33  ;;  %v1036_v33 = vld [vmem:[%s7107_s4 + $0x3d8] sm:$0xff]  ;;  %v4169_v35 = vpack.c.bf16 %v1018_v29, %v1017_v25  ;;  %v1058_v18 = vld [vmem:[%s7107_s4 + $0x488] sm:$0xff]  ;;  %v1041_v25 = vld [vmem:[%s7107_s4 + $0x400] sm:$0xff] }
 0x125   :  { %2050 = vmatmul.mubr.f32.vlgmr.msra.gmra.mrb[16].mxu0 %v5788_v22  ;;  %v981_v22 = vld [vmem:[%s7107_s4 + $0x220] sm:$0xff]  ;;  %v4183_v15 = vpack.c.bf16 %v1058_v18, %v1057_v11 }
 0x126   :  { %4122 = vmatpush3.bf16.msra.mxu0 %v4121_v27  ;;  %2120 = vmatmul.mubr.f32.vlgmr.msra.gmra.mrb[16].mxu1 %v5815_v14  ;;  %v1014_v14 = vld [vmem:[%s7107_s4 + $0x328] sm:$0xff]  ;;  %v4129_v1 = vpack.c.bf16 %v982_v50, %v981_v22  ;;  %v1019_v27 = vld [vmem:[%s7107_s4 + $0x350] sm:$0xff]  ;;  %v1073_v29 = vld [vmem:[%s7107_s4 + $0x500] sm:$0xff] }
 0x127   :  { %4154 = vmatpush3.bf16.msra.mxu1 %v4153_v43  ;;  %4124 = vmatprep.subr.bf16.mxu0 %v4123_v45  ;;  %v4161_v2 = vpack.c.bf16 %v1014_v14, %v1013_v61  ;;  %v4171_v43 = vpack.c.bf16 %v1036_v33, %v1035_v32  ;;  %v1020_v45 = vld [vmem:[%s7107_s4 + $0x358] sm:$0xff]  ;;  %v1022_v22 = vld [vmem:[%s7107_s4 + $0x368] sm:$0xff]  ;;  %v1007_v50 = vld [vmem:[%s7107_s4 + $0x2f0] sm:$0xff]  ;;  %v4217_v39 = vpack.c.bf16 %v1074_v31, %v1073_v29 }
 0x128   :  { %4156 = vmatprep.subr.bf16.mxu1 %v4155_v51  ;;  %2189 = vmatprep.mubr.f32.mxu0 %v5944_v13  ;;  %v983_v13 = vld [vmem:[%s7107_s4 + $0x230] sm:$0xff]  ;;  %v1038_v51 = vld [vmem:[%s7107_s4 + $0x3e8] sm:$0xff]  ;;  %v4173_v53 = vpack.c.bf16 %v1020_v45, %v1019_v27  ;;  %v1008_v61 = vld [vmem:[%s7107_s4 + $0x2f8] sm:$0xff] }
 0x129   :  { %2259 = vmatprep.mubr.f32.mxu1 %v5974_v24  ;;  %v4163_v24 = vpack.c.bf16 %v1032_v5, %v1031_v0  ;;  %v4133_v20 = vpack.c.bf16 %v984_v12, %v983_v13  ;;  %v4147_v13 = vpack.c.bf16 %v1008_v61, %v1007_v50  ;;  %v991_v12 = vld [vmem:[%s7107_s4 + $0x270] sm:$0xff]  ;;  %v1060_v33 = vld [vmem:[%s7107_s4 + $0x498] sm:$0xff]  ;;  %v1081_v11 = vld [vmem:[%s7107_s4 + $0x540] sm:$0xff] }
 0x12a   :  { %4126 = vmatpush3.bf16.msra.mxu0 %v4125_v58  ;;  %v1021_v58 = vld [vmem:[%s7107_s4 + $0x360] sm:$0xff]  ;;  %v1059_v32 = vld [vmem:[%s7107_s4 + $0x490] sm:$0xff]  ;;  %v1064_v50 = vld [vmem:[%s7107_s4 + $0x4b8] sm:$0xff] }
 0x12b   :  { %4158 = vmatpush3.bf16.msra.mxu1 %v4157_v59  ;;  %4128 = vmatprep.subr.bf16.mxu0 %v4127_v60  ;;  %v4175_v60 = vpack.c.bf16 %v1038_v51, %v1037_v48  ;;  %v4187_v40 = vpack.c.bf16 %v1060_v33, %v1059_v32  ;;  %v1043_v27 = vld [vmem:[%s7107_s4 + $0x410] sm:$0xff]  ;;  %v1061_v48 = vld [vmem:[%s7107_s4 + $0x4a0] sm:$0xff]  ;;  %v1062_v51 = vld [vmem:[%s7107_s4 + $0x4a8] sm:$0xff] }
 0x12c   :  { %4160 = vmatprep.subr.bf16.mxu1 %v4159_v62  ;;  %v1075_v45 = vld [vmem:[%s7107_s4 + $0x510] sm:$0xff]  ;;  %v1052_v31 = vld [vmem:[%s7107_s4 + $0x458] sm:$0xff] }
 0x12d   :  { %v1095_v61 = vld [vmem:[%s7107_s4 + $0x5b0] sm:$0xff] }
 0x12e   :  { %4130 = vmatpush3.bf16.msra.mxu0 %v4129_v1  ;;  %v4145_v1 = vpack.c.bf16 %v990_v56, %v989_v55  ;;  %v4221_v55 = vpack.c.bf16 %v1076_v46, %v1075_v45  ;;  %v4191_v56 = vpack.c.bf16 %v1062_v51, %v1061_v48  ;;  %v1083_v32 = vld [vmem:[%s7107_s4 + $0x550] sm:$0xff]  ;;  %v1054_v46 = vld [vmem:[%s7107_s4 + $0x468] sm:$0xff]  ;;  %v1085_v48 = vld [vmem:[%s7107_s4 + $0x560] sm:$0xff] }
 0x12f   :  { %4162 = vmatpush3.bf16.msra.mxu1 %v4161_v2  ;;  %4132 = vmatprep.subr.bf16.mxu0 %v4131_v3  ;;  %v4177_v3 = vpack.c.bf16 %v1022_v22, %v1021_v58  ;;  %v1046_v58 = vld [vmem:[%s7107_s4 + $0x428] sm:$0xff]  ;;  %v1063_v22 = vld [vmem:[%s7107_s4 + $0x4b0] sm:$0xff] }
 0x130   :  { %4164 = vmatprep.subr.bf16.mxu1 %v4163_v24  ;;  %v1023_v24 = vld [vmem:[%s7107_s4 + $0x370] sm:$0xff]  ;;  %v4195_v63 = vpack.c.bf16 %v1064_v50, %v1063_v22 }
 0x131   :  { %v4181_v23 = vpack.c.bf16 %v1024_v10, %v1023_v24  ;;  %v1050_v10 = vld [vmem:[%s7107_s4 + $0x448] sm:$0xff] }
 0x132   :  { %4134 = vmatpush3.bf16.msra.mxu0 %v4133_v20  ;;  %v1089_v20 = vld [vmem:[%s7107_s4 + $0x580] sm:$0xff] }
 0x133   :  { %4166 = vmatpush3.bf16.msra.mxu1 %v4165_v21  ;;  %4136 = vmatprep.subr.bf16.mxu0 %v4135_v41  ;;  %v4149_v41 = vpack.c.bf16 %v992_v4, %v991_v12  ;;  %v1098_v12 = vld [vmem:[%s7107_s4 + $0x5c8] sm:$0xff] }
 0x134   :  { %4168 = vmatprep.subr.bf16.mxu1 %v4167_v26  ;;  %v1042_v26 = vld [vmem:[%s7107_s4 + $0x408] sm:$0xff] }
 0x136   :  { %4138 = vmatpush3.bf16.msra.mxu0 %v4137_v34  ;;  %v1091_v34 = vld [vmem:[%s7107_s4 + $0x590] sm:$0xff] }
 0x137   :  { %4170 = vmatpush3.bf16.msra.mxu1 %v4169_v35  ;;  %4140 = vmatprep.subr.bf16.mxu0 %v4139_v36  ;;  %v1092_v35 = vld [vmem:[%s7107_s4 + $0x598] sm:$0xff]  ;;  %v4185_v36 = vpack.c.bf16 %v1042_v26, %v1041_v25 }
 0x138   :  { %v2823_v59 = vpop.f32.mrb[4].mxu0  ;;  %4172 = vmatprep.subr.bf16.mxu1 %v4171_v43  ;;  %v1044_v43 = vld [vmem:[%s7107_s4 + $0x418] sm:$0xff]  ;;  %v4219_v37 = vpack.c.bf16 %v1092_v35, %v1091_v34  ;;  %v1069_v35 = vld [vmem:[%s7107_s4 + $0x4e0] sm:$0xff] }
 0x139   :  { %v2824_v62 = vpop.f32.mrb[5].mxu0  ;;  %v2858_v14 = vpop.f32.mrb[4].mxu1  ;;  %v1084_v34 = vld [vmem:[%s7107_s4 + $0x558] sm:$0xff] }
 0x13a   :  { %v2825_v0 = vadd.f32 %v2824_v62, %v2823_v59  ;;  %4142 = vmatpush3.bf16.msra.mxu0 %v4141_v52  ;;  %v2859_v5 = vpop.f32.mrb[5].mxu1  ;;  %v1093_v52 = vld [vmem:[%s7107_s4 + $0x5a0] sm:$0xff]  ;;  %v1096_v62 = vld [vmem:[%s7107_s4 + $0x5b8] sm:$0xff] }
 0x13b   :  { %v2860_v2 = vadd.f32 %v2859_v5, %v2858_v14  ;;  %4174 = vmatpush3.bf16.msra.mxu1 %v4173_v53  ;;  %4144 = vmatprep.subr.bf16.mxu0 %v4143_v54  ;;  %v1094_v53 = vld [vmem:[%s7107_s4 + $0x5a8] sm:$0xff]  ;;  %v4189_v54 = vpack.c.bf16 %v1044_v43, %v1043_v27  ;;  %v1077_v59 = vld [vmem:[%s7107_s4 + $0x520] sm:$0xff]  ;;  %v1079_v5 = vld [vmem:[%s7107_s4 + $0x530] sm:$0xff]  ;;  %v4237_v43 = vpack.c.bf16 %v1084_v34, %v1083_v32 }
 0x13c   :  { %v667_v17 = vadd.f32 %v2825_v0, %v6459_v47  ;;  %4176 = vmatprep.subr.bf16.mxu1 %v4175_v60  ;;  %v1090_v47 = vld [vmem:[%s7107_s4 + $0x588] sm:$0xff]  ;;  %v4223_v60 = vpack.c.bf16 %v1094_v53, %v1093_v52  ;;  %v1048_v0 = vld [vmem:[%s7107_s4 + $0x438] sm:$0xff] }
 0x13d   :  { %v4215_v30 = vpack.c.bf16 %v1090_v47, %v1089_v20  ;;  %v1082_v20 = vld [vmem:[%s7107_s4 + $0x548] sm:$0xff]  ;;  %v1067_v47 = vld [vmem:[%s7107_s4 + $0x4d0] sm:$0xff]  ;;  %v1140_v32 = vld [vmem:[%s7107_s4 + $0x718] sm:$0xff] }
 0x13e   :  { %v6658_v21 = vadd.f32 %v2860_v2, %v667_v17  ;;  %4146 = vmatpush3.bf16.msra.mxu0 %v4145_v1  ;;  %v1080_v1 = vld [vmem:[%s7107_s4 + $0x538] sm:$0xff]  ;;  %v1065_v2 = vld [vmem:[%s7107_s4 + $0x4c0] sm:$0xff]  ;;  %v4233_v26 = vpack.c.bf16 %v1082_v20, %v1081_v11  ;;  %v1086_v53 = vld [vmem:[%s7107_s4 + $0x568] sm:$0xff] }
 0x13f   :  { %4178 = vmatpush3.bf16.msra.mxu1 %v4177_v3  ;;  %4148 = vmatprep.subr.bf16.mxu0 %v4147_v13  ;;  %v1066_v3 = vld [vmem:[%s7107_s4 + $0x4c8] sm:$0xff]  ;;  %v1097_v13 = vld [vmem:[%s7107_s4 + $0x5c0] sm:$0xff]  ;;  %v4229_v24 = vpack.c.bf16 %v1080_v1, %v1079_v5  ;;  %v1088_v5 = vld [vmem:[%s7107_s4 + $0x578] sm:$0xff] }
 0x140   :  { %4180 = vmatprep.subr.bf16.mxu1 %v4179_v7  ;;  %v4199_v17 = vpack.c.bf16 %v1066_v3, %v1065_v2  ;;  %v1049_v7 = vld [vmem:[%s7107_s4 + $0x440] sm:$0xff]  ;;  %v4231_v18 = vpack.c.bf16 %v1098_v12, %v1097_v13  ;;  %v1122_v1 = vld [vmem:[%s7107_s4 + $0x688] sm:$0xff]  ;;  %v1124_v20 = vld [vmem:[%s7107_s4 + $0x698] sm:$0xff] }
 0x141   :  { %v4201_v25 = vpack.c.bf16 %v1050_v10, %v1049_v7  ;;  %v1153_v2 = vld [vmem:[%s7107_s4 + $0x780] sm:$0xff]  ;;  %v1138_v11 = vld [vmem:[%s7107_s4 + $0x708] sm:$0xff] }
 0x142   :  { %4150 = vmatpush3.bf16.msra.mxu0 %v4149_v41  ;;  %v1068_v41 = vld [vmem:[%s7107_s4 + $0x4d8] sm:$0xff]  ;;  %v1137_v7 = vld [vmem:[%s7107_s4 + $0x700] sm:$0xff]  ;;  %v1126_v34 = vld [vmem:[%s7107_s4 + $0x6a8] sm:$0xff] }
 0x143   :  { %4182 = vmatpush3.bf16.msra.mxu1 %v4181_v23  ;;  %4184 = vmatprep.subr.bf16.mxu0 %v4183_v15  ;;  %v1099_v23 = vld [vmem:[%s7107_s4 + $0x5d0] sm:$0xff]  ;;  %v1100_v15 = vld [vmem:[%s7107_s4 + $0x5d8] sm:$0xff]  ;;  %v4203_v29 = vpack.c.bf16 %v1068_v41, %v1067_v47 }
 0x144   :  { %4216 = vmatprep.subr.bf16.mxu1 %v4215_v30  ;;  %v1051_v30 = vld [vmem:[%s7107_s4 + $0x450] sm:$0xff]  ;;  %v4235_v33 = vpack.c.bf16 %v1100_v15, %v1099_v23  ;;  %v1156_v41 = vld [vmem:[%s7107_s4 + $0x798] sm:$0xff]  ;;  %v4281_v15 = vpack.c.bf16 %v1138_v11, %v1137_v7  ;;  %v1133_v11 = vld [vmem:[%s7107_s4 + $0x6e0] sm:$0xff] }
 0x145   :  { %2190 = vmatmul.mubr.f32.vlgmr.msra.gmra.mrb[18].mxu0 %v5959_v19  ;;  %v1045_v19 = vld [vmem:[%s7107_s4 + $0x420] sm:$0xff]  ;;  %v4205_v27 = vpack.c.bf16 %v1052_v31, %v1051_v30  ;;  %v1155_v47 = vld [vmem:[%s7107_s4 + $0x790] sm:$0xff] }
 0x146   :  { %4186 = vmatpush3.bf16.msra.mxu0 %v4185_v36  ;;  %2260 = vmatmul.mubr.f32.vlgmr.msra.gmra.mrb[18].mxu1 %v5989_v28  ;;  %v1078_v28 = vld [vmem:[%s7107_s4 + $0x528] sm:$0xff]  ;;  %v4193_v14 = vpack.c.bf16 %v1046_v58, %v1045_v19  ;;  %v1103_v58 = vld [vmem:[%s7107_s4 + $0x5f0] sm:$0xff]  ;;  %v4283_v31 = vpack.c.bf16 %v1156_v41, %v1155_v47 }
 0x147   :  { %4218 = vmatpush3.bf16.msra.mxu1 %v4217_v39  ;;  %4188 = vmatprep.subr.bf16.mxu0 %v4187_v40  ;;  %v4225_v57 = vpack.c.bf16 %v1078_v28, %v1077_v59  ;;  %v1070_v36 = vld [vmem:[%s7107_s4 + $0x4e8] sm:$0xff]  ;;  %v1101_v39 = vld [vmem:[%s7107_s4 + $0x5e0] sm:$0xff]  ;;  %v1104_v59 = vld [vmem:[%s7107_s4 + $0x5f8] sm:$0xff] }
 0x148   :  { %4220 = vmatprep.subr.bf16.mxu1 %v4219_v37  ;;  %2329 = vmatprep.mubr.f32.mxu0 %v6130_v38  ;;  %v1047_v38 = vld [vmem:[%s7107_s4 + $0x430] sm:$0xff]  ;;  %v1102_v40 = vld [vmem:[%s7107_s4 + $0x5e8] sm:$0xff]  ;;  %v4207_v45 = vpack.c.bf16 %v1070_v36, %v1069_v35  ;;  %v1053_v37 = vld [vmem:[%s7107_s4 + $0x460] sm:$0xff] }
 0x149   :  { %2399 = vmatprep.mubr.f32.mxu1 %v6157_v44  ;;  %v4227_v44 = vpack.c.bf16 %v1096_v62, %v1095_v61  ;;  %v4197_v4 = vpack.c.bf16 %v1048_v0, %v1047_v38  ;;  %v4239_v52 = vpack.c.bf16 %v1102_v40, %v1101_v39  ;;  %v4209_v22 = vpack.c.bf16 %v1054_v46, %v1053_v37  ;;  %v1139_v30 = vld [vmem:[%s7107_s4 + $0x710] sm:$0xff]  ;;  %v1157_v35 = vld [vmem:[%s7107_s4 + $0x7a0] sm:$0xff]  ;;  %v1158_v36 = vld [vmem:[%s7107_s4 + $0x7a8] sm:$0xff] }
 0x14a   :  { %4190 = vmatpush3.bf16.msra.mxu0 %v4189_v54  ;;  %v1071_v54 = vld [vmem:[%s7107_s4 + $0x4f0] sm:$0xff]  ;;  %v4241_v61 = vpack.c.bf16 %v1086_v53, %v1085_v48  ;;  %v4243_v0 = vpack.c.bf16 %v1104_v59, %v1103_v58  ;;  %v4285_v40 = vpack.c.bf16 %v1140_v32, %v1139_v30  ;;  %v4287_v37 = vpack.c.bf16 %v1158_v36, %v1157_v35  ;;  %v1128_v48 = vld [vmem:[%s7107_s4 + $0x6b8] sm:$0xff]  ;;  %v1129_v59 = vld [vmem:[%s7107_s4 + $0x6c0] sm:$0xff] }
 0x14b   :  { %4222 = vmatpush3.bf16.msra.mxu1 %v4221_v55  ;;  %4192 = vmatprep.subr.bf16.mxu0 %v4191_v56  ;;  %v1072_v55 = vld [vmem:[%s7107_s4 + $0x4f8] sm:$0xff]  ;;  %v1127_v46 = vld [vmem:[%s7107_s4 + $0x6b0] sm:$0xff]  ;;  %v1166_v47 = vld [vmem:[%s7107_s4 + $0x7e8] sm:$0xff] }
 0x14c   :  { %4224 = vmatprep.subr.bf16.mxu1 %v4223_v60  ;;  %v4211_v62 = vpack.c.bf16 %v1072_v55, %v1071_v54  ;;  %v4259_v55 = vpack.c.bf16 %v1128_v48, %v1127_v46  ;;  %v1144_v58 = vld [vmem:[%s7107_s4 + $0x738] sm:$0xff]  ;;  %v1150_v32 = vld [vmem:[%s7107_s4 + $0x768] sm:$0xff]  ;;  %v1119_v46 = vld [vmem:[%s7107_s4 + $0x670] sm:$0xff] }
 0x14d   :  { %v1120_v48 = vld [vmem:[%s7107_s4 + $0x678] sm:$0xff] }
 0x14e   :  { %4194 = vmatpush3.bf16.msra.mxu0 %v4193_v14  ;;  %v1055_v14 = vld [vmem:[%s7107_s4 + $0x470] sm:$0xff] }
 0x14f   :  { %4226 = vmatpush3.bf16.msra.mxu1 %v4225_v57  ;;  %4196 = vmatprep.subr.bf16.mxu0 %v4195_v63  ;;  %v1056_v57 = vld [vmem:[%s7107_s4 + $0x478] sm:$0xff]  ;;  %v1087_v63 = vld [vmem:[%s7107_s4 + $0x570] sm:$0xff] }
 0x150   :  { %4228 = vmatprep.subr.bf16.mxu1 %v4227_v44  ;;  %v1121_v44 = vld [vmem:[%s7107_s4 + $0x680] sm:$0xff]  ;;  %v4213_v13 = vpack.c.bf16 %v1056_v57, %v1055_v14  ;;  %v4245_v12 = vpack.c.bf16 %v1088_v5, %v1087_v63  ;;  %v1114_v57 = vld [vmem:[%s7107_s4 + $0x648] sm:$0xff]  ;;  %v1131_v5 = vld [vmem:[%s7107_s4 + $0x6d0] sm:$0xff] }
 0x151   :  { %v1113_v14 = vld [vmem:[%s7107_s4 + $0x640] sm:$0xff] }
 0x152   :  { %4198 = vmatpush3.bf16.msra.mxu0 %v4197_v4  ;;  %v4247_v4 = vpack.c.bf16 %v1122_v1, %v1121_v44  ;;  %v1145_v63 = vld [vmem:[%s7107_s4 + $0x740] sm:$0xff]  ;;  %v1132_v44 = vld [vmem:[%s7107_s4 + $0x6d8] sm:$0xff]  ;;  %v1163_v1 = vld [vmem:[%s7107_s4 + $0x7d0] sm:$0xff] }
 0x153   :  { %4230 = vmatpush3.bf16.msra.mxu1 %v4229_v24  ;;  %4200 = vmatprep.subr.bf16.mxu0 %v4199_v17  ;;  %v1105_v24 = vld [vmem:[%s7107_s4 + $0x600] sm:$0xff]  ;;  %v1106_v17 = vld [vmem:[%s7107_s4 + $0x608] sm:$0xff] }
 0x154   :  { %4232 = vmatprep.subr.bf16.mxu1 %v4231_v18  ;;  %v1123_v18 = vld [vmem:[%s7107_s4 + $0x690] sm:$0xff]  ;;  %v4249_v23 = vpack.c.bf16 %v1106_v17, %v1105_v24  ;;  %v1116_v24 = vld [vmem:[%s7107_s4 + $0x658] sm:$0xff] }
 0x155   :  { %v1147_v17 = vld [vmem:[%s7107_s4 + $0x750] sm:$0xff] }
 0x156   :  { %4202 = vmatpush3.bf16.msra.mxu0 %v4201_v25  ;;  %v4251_v25 = vpack.c.bf16 %v1124_v20, %v1123_v18  ;;  %v1134_v18 = vld [vmem:[%s7107_s4 + $0x6e8] sm:$0xff]  ;;  %v1165_v20 = vld [vmem:[%s7107_s4 + $0x7e0] sm:$0xff] }
 0x157   :  { %4234 = vmatpush3.bf16.msra.mxu1 %v4233_v26  ;;  %4204 = vmatprep.subr.bf16.mxu0 %v4203_v29  ;;  %v1107_v26 = vld [vmem:[%s7107_s4 + $0x610] sm:$0xff]  ;;  %v1108_v29 = vld [vmem:[%s7107_s4 + $0x618] sm:$0xff] }
 0x158   :  { %v2893_v51 = vpop.f32.mrb[6].mxu0  ;;  %4236 = vmatprep.subr.bf16.mxu1 %v4235_v33  ;;  %v1125_v33 = vld [vmem:[%s7107_s4 + $0x6a0] sm:$0xff]  ;;  %v4253_v39 = vpack.c.bf16 %v1108_v29, %v1107_v26  ;;  %v1118_v26 = vld [vmem:[%s7107_s4 + $0x668] sm:$0xff] }
 0x159   :  { %v2894_v56 = vpop.f32.mrb[7].mxu0  ;;  %v2928_v19 = vpop.f32.mrb[6].mxu1  ;;  %v1149_v29 = vld [vmem:[%s7107_s4 + $0x760] sm:$0xff] }
 0x15a   :  { %v2895_v60 = vadd.f32 %v2894_v56, %v2893_v51  ;;  %4206 = vmatpush3.bf16.msra.mxu0 %v4205_v27  ;;  %v2929_v28 = vpop.f32.mrb[7].mxu1  ;;  %v4255_v27 = vpack.c.bf16 %v1126_v34, %v1125_v33  ;;  %v1159_v51 = vld [vmem:[%s7107_s4 + $0x7b0] sm:$0xff]  ;;  %v1112_v56 = vld [vmem:[%s7107_s4 + $0x638] sm:$0xff] }
 0x15b   :  { %v2930_v50 = vadd.f32 %v2929_v28, %v2928_v19  ;;  %4238 = vmatpush3.bf16.msra.mxu1 %v4237_v43  ;;  %4208 = vmatprep.subr.bf16.mxu0 %v4207_v45  ;;  %v1110_v43 = vld [vmem:[%s7107_s4 + $0x628] sm:$0xff]  ;;  %v1141_v45 = vld [vmem:[%s7107_s4 + $0x720] sm:$0xff]  ;;  %v1143_v19 = vld [vmem:[%s7107_s4 + $0x730] sm:$0xff] }
 0x15c   :  { %v807_v38 = vadd.f32 %v2895_v60, %v6658_v21  ;;  %4240 = vmatprep.subr.bf16.mxu1 %v4239_v52  ;;  %v1154_v21 = vld [vmem:[%s7107_s4 + $0x788] sm:$0xff]  ;;  %v1160_v52 = vld [vmem:[%s7107_s4 + $0x7b8] sm:$0xff]  ;;  %v1161_v28 = vld [vmem:[%s7107_s4 + $0x7c0] sm:$0xff] }
 0x15d   :  { %v4279_v10 = vpack.c.bf16 %v1154_v21, %v1153_v2  ;;  %v1130_v60 = vld [vmem:[%s7107_s4 + $0x6c8] sm:$0xff]  ;;  %v1164_v2 = vld [vmem:[%s7107_s4 + $0x7d8] sm:$0xff]  ;;  %v4265_v21 = vpack.c.bf16 %v1114_v57, %v1113_v14  ;;  %v1135_v33 = vld [vmem:[%s7107_s4 + $0x6f0] sm:$0xff] }
 0x15e   :  { %v6857_v3 = vadd.f32 %v2930_v50, %v807_v38  ;;  %4210 = vmatpush3.bf16.msra.mxu0 %v4209_v22  ;;  %v1162_v22 = vld [vmem:[%s7107_s4 + $0x7c8] sm:$0xff]  ;;  %v4299_v7 = vpack.c.bf16 %v1164_v2, %v1163_v1  ;;  %v1136_v34 = vld [vmem:[%s7107_s4 + $0x6f8] sm:$0xff]  ;;  %v2553_v57 = vld [vmem:[%s7107_s4 + $0x1040] sm:$0xff] }
 0x15f   :  { %4242 = vmatpush3.bf16.msra.mxu1 %v4241_v61  ;;  %4212 = vmatprep.subr.bf16.mxu0 %v4211_v62  ;;  %v4293_v61 = vpack.c.bf16 %v1144_v58, %v1143_v19  ;;  %v4263_v62 = vpack.c.bf16 %v1130_v60, %v1129_v59  ;;  %v4295_v38 = vpack.c.bf16 %v1162_v22, %v1161_v28  ;;  %v2546_v19 = vld [vmem:[%s7107_s4 + $0x1008] sm:$0xff]  ;;  %v4352_v58 = vmov 0.0|0.0   ;;  %v2547_v59 = vld [vmem:[%s7107_s4 + $0x1010] sm:$0xff]  ;;  %v2548_v60 = vld [vmem:[%s7107_s4 + $0x1018] sm:$0xff] }
 0x160   :  { %912 = vst [vmem:[%s7106_s6 + $0x100] sm:$0xff] %v6857_v3  ;;  %4244 = vmatprep.subr.bf16.mxu1 %v4243_v0  ;;  %v1146_v0 = vld [vmem:[%s7107_s4 + $0x748] sm:$0xff]  ;;  %v4315_v28 = vpack.c.bf16 %v2548_v60, %v2547_v59  ;;  %v2549_v22 = vld [vmem:[%s7107_s4 + $0x1020] sm:$0xff] }
 0x161   :  { %v2557_v1 = vld [vmem:[%s7107_s4 + $0x1060] sm:$0xff]  ;;  %v2558_v2 = vld [vmem:[%s7107_s4 + $0x1068] sm:$0xff] }
 0x162   :  { %4214 = vmatpush3.bf16.msra.mxu0 %v4213_v13  ;;  %v4297_v13 = vpack.c.bf16 %v1146_v0, %v1145_v63  ;;  %v2554_v63 = vld [vmem:[%s7107_s4 + $0x1048] sm:$0xff]  ;;  %v2555_v0 = vld [vmem:[%s7107_s4 + $0x1050] sm:$0xff] }
 0x163   :  { %4246 = vmatpush3.bf16.msra.mxu1 %v4245_v12  ;;  %4248 = vmatprep.subr.bf16.mxu0 %v4247_v4  ;;  %v4267_v12 = vpack.c.bf16 %v1132_v44, %v1131_v5  ;;  %v1115_v4 = vld [vmem:[%s7107_s4 + $0x650] sm:$0xff]  ;;  %v2556_v5 = vld [vmem:[%s7107_s4 + $0x1058] sm:$0xff] }
 0x164   :  { %4280 = vmatprep.subr.bf16.mxu1 %v4279_v10  ;;  %v1148_v10 = vld [vmem:[%s7107_s4 + $0x758] sm:$0xff]  ;;  %v4269_v41 = vpack.c.bf16 %v1116_v24, %v1115_v4  ;;  %v4327_v44 = vpack.c.bf16 %v2556_v5, %v2555_v0 }
 0x165   :  { %2330 = vmatmul.mubr.f32.vlgmr.msra.gmra.mrb[20].mxu0 %v6145_v42  ;;  %v1109_v42 = vld [vmem:[%s7107_s4 + $0x620] sm:$0xff] }
 0x166   :  { %4250 = vmatpush3.bf16.msra.mxu0 %v4249_v23  ;;  %2400 = vmatmul.mubr.f32.vlgmr.msra.gmra.mrb[20].mxu1 %v6172_v49  ;;  %v1142_v49 = vld [vmem:[%s7107_s4 + $0x728] sm:$0xff]  ;;  %v4257_v53 = vpack.c.bf16 %v1110_v43, %v1109_v42  ;;  %v4301_v23 = vpack.c.bf16 %v1148_v10, %v1147_v17  ;;  %v4330_v17 = vpack.c.bf16 %v2558_v2, %v2557_v1  ;;  %v2559_v10 = vld [vmem:[%s7107_s4 + $0x1070] sm:$0xff] }
 0x167   :  { %4282 = vmatpush3.bf16.msra.mxu1 %v4281_v15  ;;  %4252 = vmatprep.subr.bf16.mxu0 %v4251_v25  ;;  %v4289_v54 = vpack.c.bf16 %v1142_v49, %v1141_v45  ;;  %v4271_v15 = vpack.c.bf16 %v1134_v18, %v1133_v11  ;;  %v1117_v25 = vld [vmem:[%s7107_s4 + $0x660] sm:$0xff]  ;;  %v4275_v49 = vpack.c.bf16 %v1136_v34, %v1135_v33  ;;  %v2560_v11 = vld [vmem:[%s7107_s4 + $0x1078] sm:$0xff] }
 0x168   :  { %4284 = vmatprep.subr.bf16.mxu1 %v4283_v31  ;;  %2469 = vmatprep.mubr.f32.mxu0 %v6320_v6  ;;  %v1111_v6 = vld [vmem:[%s7107_s4 + $0x630] sm:$0xff]  ;;  %v4303_v31 = vpack.c.bf16 %v1166_v47, %v1165_v20  ;;  %v4273_v43 = vpack.c.bf16 %v1118_v26, %v1117_v25  ;;  %v4333_v47 = vpack.c.bf16 %v2560_v11, %v2559_v10 }
 0x169   :  { %2539 = vmatprep.mubr.f32.mxu1 %v6337_v9  ;;  %v4291_v9 = vpack.c.bf16 %v1160_v52, %v1159_v51  ;;  %v4261_v50 = vpack.c.bf16 %v1112_v56, %v1111_v6  ;;  %v1151_v52 = vld [vmem:[%s7107_s4 + $0x770] sm:$0xff]  ;;  %v2545_v56 = vld [vmem:[%s7107_s4 + $0x1000] sm:$0xff] }
 0x16a   :  { %4254 = vmatpush3.bf16.msra.mxu0 %v4253_v39  ;;  %v1167_v39 = vld [vmem:[%s7107_s4 + $0x7f0] sm:$0xff] }
 0x16b   :  { %4286 = vmatpush3.bf16.msra.mxu1 %v4285_v40  ;;  %4256 = vmatprep.subr.bf16.mxu0 %v4255_v27  ;;  %v1168_v40 = vld [vmem:[%s7107_s4 + $0x7f8] sm:$0xff] }
 0x16c   :  { %4288 = vmatprep.subr.bf16.mxu1 %v4287_v37  ;;  %v4305_v37 = vpack.c.bf16 %v1150_v32, %v1149_v29  ;;  %v4307_v51 = vpack.c.bf16 %v1168_v40, %v1167_v39 }
 0x16e   :  { %4258 = vmatpush3.bf16.msra.mxu0 %v4257_v53  ;;  %v1152_v53 = vld [vmem:[%s7107_s4 + $0x778] sm:$0xff] }
 0x16f   :  { %4290 = vmatpush3.bf16.msra.mxu1 %v4289_v54  ;;  %4260 = vmatprep.subr.bf16.mxu0 %v4259_v55  ;;  %v4277_v55 = vpack.c.bf16 %v1120_v48, %v1119_v46  ;;  %v4309_v6 = vpack.c.bf16 %v1152_v53, %v1151_v52 }
 0x170   :  { %4292 = vmatprep.subr.bf16.mxu1 %v4291_v9  ;;  %v4312_v9 = vpack.c.bf16 %v2546_v19, %v2545_v56 }
 0x172   :  { %4262 = vmatpush3.bf16.msra.mxu0 %v4261_v50  ;;  %v2550_v50 = vld [vmem:[%s7107_s4 + $0x1028] sm:$0xff] }
 0x173   :  { %4294 = vmatpush3.bf16.msra.mxu1 %v4293_v61  ;;  %4264 = vmatprep.subr.bf16.mxu0 %v4263_v62  ;;  %v4354_v61 = vmov 0.0   ;;  %v4318_v62 = vpack.c.bf16 %v2550_v50, %v2549_v22 }
 0x174   :  { %4296 = vmatprep.subr.bf16.mxu1 %v4295_v38  ;;  %v4324_v38 = vpack.c.bf16 %v2554_v63, %v2553_v57 }
 0x176   :  { %4266 = vmatpush3.bf16.msra.mxu0 %v4265_v21 }
 0x177   :  { %4298 = vmatpush3.bf16.msra.mxu1 %v4297_v13  ;;  %4268 = vmatprep.subr.bf16.mxu0 %v4267_v12 }
 0x178   :  { %v2963_v30 = vpop.f32.mrb[8].mxu0  ;;  %4300 = vmatprep.subr.bf16.mxu1 %v4299_v7 }
 0x179   :  { %v2998_v35 = vpop.f32.mrb[8].mxu1  ;;  %v2964_v36 = vpop.f32.mrb[9].mxu0 }
 0x17a   :  { %v2965_v27 = vadd.f32 %v2964_v36, %v2963_v30  ;;  %v2999_v42 = vpop.f32.mrb[9].mxu1  ;;  %4270 = vmatpush3.bf16.msra.mxu0 %v4269_v41 }
 0x17b   :  { %v3000_v45 = vadd.f32 %v2999_v42, %v2998_v35  ;;  %4302 = vmatpush3.bf16.msra.mxu1 %v4301_v23  ;;  %4272 = vmatprep.subr.bf16.mxu0 %v4271_v15 }
 0x17c   :  { %4304 = vmatprep.subr.bf16.mxu1 %v4303_v31 }
 0x17d   :  { %v1562_v54 = vadd.f32 %v3000_v45, %v2965_v27 }
 0x17e   :  { %4274 = vmatpush3.bf16.msra.mxu0 %v4273_v43 }
 0x17f   :  { %4306 = vmatpush3.bf16.msra.mxu1 %v4305_v37  ;;  %4276 = vmatprep.subr.bf16.mxu0 %v4275_v49 }
 0x180   :  { %4308 = vmatprep.subr.bf16.mxu1 %v4307_v51 }
 0x182   :  { %4278 = vmatpush3.bf16.msra.mxu0 %v4277_v55 }
 0x183   :  { %4310 = vmatpush3.bf16.msra.mxu1 %v4309_v6  ;;  %4311 = vmatprep.subr.bf16.mxu0 %v4352_v58 }
 0x185   :  { %2470 = vmatmul.mubr.f32.vlgmr.msra.gmra.mrb[22].mxu0 %v6332_v8  ;;  %v2551_v8 = vld [vmem:[%s7107_s4 + $0x1030] sm:$0xff] }
 0x186   :  { %4313 = vmatpush3.bf16.msra.mxu0 %v4312_v9  ;;  %2540 = vmatmul.mubr.f32.vlgmr.msra.gmra.mrb[22].mxu1 %v6356_v16  ;;  %v2552_v16 = vld [vmem:[%s7107_s4 + $0x1038] sm:$0xff] }
 0x187   :  { %4314 = vmatprep.subr.bf16.mxu0 %v4352_v58  ;;  %3540 = vmatprep.mubr.msk.f32.mxu0 %vm4353_vm0, %v4354_v61  ;;  %v4321_v14 = vpack.c.bf16 %v2552_v16, %v2551_v8 }
 0x18a   :  { %4316 = vmatpush3.bf16.msra.mxu0 %v4315_v28 }
 0x18b   :  { %4317 = vmatprep.subr.bf16.mxu0 %v4352_v58 }
 0x18e   :  { %4319 = vmatpush3.bf16.msra.mxu0 %v4318_v62 }
 0x18f   :  { %4320 = vmatprep.subr.bf16.mxu0 %v4352_v58 }
 0x192   :  { %4322 = vmatpush3.bf16.msra.mxu0 %v4321_v14 }
 0x193   :  { %4323 = vmatprep.subr.bf16.mxu0 %v4352_v58 }
 0x196   :  { %4325 = vmatpush3.bf16.msra.mxu0 %v4324_v38 }
 0x197   :  { %4326 = vmatprep.subr.bf16.mxu0 %v4352_v58 }
 0x198   :  { %v3033_v21 = vpop.f32.mrb[10].mxu0 }
 0x199   :  { %v3034_v13 = vpop.f32.mrb[11].mxu0  ;;  %v3068_v12 = vpop.f32.mrb[10].mxu1 }
 0x19a   :  { %v3035_v4 = vadd.f32 %v3034_v13, %v3033_v21  ;;  %4328 = vmatpush3.bf16.msra.mxu0 %v4327_v44  ;;  %v3069_v24 = vpop.f32.mrb[11].mxu1  ;;  %v2650_v44 = vld [vmem:[%s7110_s5] ss:$0 sm:$0xff] }
 0x19b   :  { %v3070_v7 = vadd.f32 %v3069_v24, %v3068_v12  ;;  %4329 = vmatprep.subr.bf16.mxu0 %v4352_v58 }
 0x19c   :  { %v1632_v18 = vadd.f32 %v3035_v4, %v1562_v54 }
 0x19e   :  { %v1702_v20 = vadd.f32 %v3070_v7, %v1632_v18  ;;  %4331 = vmatpush3.bf16.msra.mxu0 %v4330_v17 }
 0x19f   :  { %4332 = vmatprep.subr.bf16.mxu0 %v4352_v58 }
 0x1a2   :  { %4334 = vmatpush3.bf16.msra.mxu0 %v4333_v47 }
 0x1a5   :  { %3541 = vmatmul.mubr.f32.vlgmr.msra.gmra.mrb[24].mxu0 %v6857_v3 }
 0x1b8   :  { %v3103_v41 = vpop.f32.mrb[12].mxu0 }
 0x1b9   :  { %v3104_v23 = vpop.f32.mrb[13].mxu0  ;;  %v3138_v15 = vpop.f32.mrb[12].mxu1 }
 0x1ba   :  { %v3105_v25 = vadd.f32 %v3104_v23, %v3103_v41  ;;  %v3139_v26 = vpop.f32.mrb[13].mxu1 }
 0x1bb   :  { %v3140_v29 = vadd.f32 %v3139_v26, %v3138_v15 }
 0x1bc   :  { %v1772_v30 = vadd.f32 %v3105_v25, %v1702_v20 }
 0x1be   :  { %v1842_v31 = vadd.f32 %v3140_v29, %v1772_v30 }
 0x1d8   :  { %v3173_v32 = vpop.f32.mrb[14].mxu0 }
 0x1d9   :  { %v3174_v33 = vpop.f32.mrb[15].mxu0  ;;  %v3208_v34 = vpop.f32.mrb[14].mxu1 }
 0x1da   :  { %v3175_v35 = vadd.f32 %v3174_v33, %v3173_v32  ;;  %v3209_v36 = vpop.f32.mrb[15].mxu1 }
 0x1db   :  { %v3210_v39 = vadd.f32 %v3209_v36, %v3208_v34 }
 0x1dc   :  { %v1912_v40 = vadd.f32 %v3175_v35, %v1842_v31 }
 0x1de   :  { %v1982_v27 = vadd.f32 %v3210_v39, %v1912_v40 }
 0x1f8   :  { %v3243_v42 = vpop.f32.mrb[16].mxu0 }
 0x1f9   :  { %v3244_v43 = vpop.f32.mrb[17].mxu0  ;;  %v3278_v45 = vpop.f32.mrb[16].mxu1 }
 0x1fa   :  { %v3245_v3 = vadd.f32 %v3244_v43, %v3243_v42  ;;  %v3279_v37 = vpop.f32.mrb[17].mxu1 }
 0x1fb   :  { %v3280_v49 = vadd.f32 %v3279_v37, %v3278_v45 }
 0x1fc   :  { %v2052_v46 = vadd.f32 %v3245_v3, %v1982_v27 }
 0x1fe   :  { %v2122_v48 = vadd.f32 %v3280_v49, %v2052_v46 }
 0x218   :  { %v3313_v51 = vpop.f32.mrb[18].mxu0 }
 0x219   :  { %v3314_v52 = vpop.f32.mrb[19].mxu0  ;;  %v3348_v53 = vpop.f32.mrb[18].mxu1 }
 0x21a   :  { %v3315_v54 = vadd.f32 %v3314_v52, %v3313_v51  ;;  %v3349_v55 = vpop.f32.mrb[19].mxu1 }
 0x21b   :  { %v3350_v6 = vadd.f32 %v3349_v55, %v3348_v53 }
 0x21c   :  { %v2192_v56 = vadd.f32 %v3315_v54, %v2122_v48 }
 0x21e   :  { %v2262_v19 = vadd.f32 %v3350_v6, %v2192_v56 }
 0x238   :  { %v3383_v9 = vpop.f32.mrb[20].mxu0 }
 0x239   :  { %v3384_v58 = vpop.f32.mrb[21].mxu0  ;;  %v3418_v59 = vpop.f32.mrb[20].mxu1 }
 0x23a   :  { %v3385_v60 = vadd.f32 %v3384_v58, %v3383_v9  ;;  %v3419_v28 = vpop.f32.mrb[21].mxu1 }
 0x23b   :  { %v3420_v22 = vadd.f32 %v3419_v28, %v3418_v59 }
 0x23c   :  { %v2332_v50 = vadd.f32 %v3385_v60, %v2262_v19 }
 0x23e   :  { %v2402_v61 = vadd.f32 %v3420_v22, %v2332_v50 }
 0x258   :  { %v3453_v62 = vpop.f32.mrb[22].mxu0 }
 0x259   :  { %v3454_v8 = vpop.f32.mrb[23].mxu0  ;;  %v3488_v16 = vpop.f32.mrb[22].mxu1 }
 0x25a   :  { %v3455_v14 = vadd.f32 %v3454_v8, %v3453_v62  ;;  %v3489_v57 = vpop.f32.mrb[23].mxu1 }
 0x25b   :  { %v3490_v63 = vadd.f32 %v3489_v57, %v3488_v16 }
 0x25c   :  { %v2472_v38 = vadd.f32 %v3455_v14, %v2402_v61 }
 0x25e   :  { %v2542_v0 = vadd.f32 %v3490_v63, %v2472_v38 }
 0x278   :  { %v2627_v5 = vpop.f32.mrb[24].mxu0 }
 0x279   :  { %v2631_v1 = vadd.f32 %v2627_v5, %v2542_v0  ;;  %v3542_v2 = vpop.f32.mrb[25].mxu0 }
 0x27b   :  { %v2639_v21 = vadd.f32 %v2650_v44, %v2631_v1 }
 0x27d   :  { %2640 = vst [vmem:[%s7111_s7] sm:$0xff] %v2639_v21 }

</bundles_post_ra>
